<compile_context>
chip_gen: v5e
topology: v5e:2x2
jax: 0.10.0
libtpu: 0.0.40
codegen_flags: <defaults>
</compile_context>

<pallas_src>
import numpy as np
import jax
import jax.numpy as jnp
from jax.experimental import pallas as pl
from jax.experimental.pallas import tpu as pltpu

# ---- module config (mirrors `args`) -------------------------------------------------
N_AGENTS = 4
N_ENTITIES = 8
ENTITY_DIM = 16          # args.entity_shape
HYPERNET_EMBED = 32      # args.hypernet_embed
MIX_EMBED = 32           # args.mixing_embed_dim
N_HEADS = 4              # args.attn_n_heads
HEAD_DIM = HYPERNET_EMBED // N_HEADS

NA, NE, ED = N_AGENTS, N_ENTITIES, ENTITY_DIM
H, NH, HD, MIX = HYPERNET_EMBED, N_HEADS, HEAD_DIM, MIX_EMBED
NBIG = HD * NA * NH * NE          # 1024 : (d, a, h, e) q*k product layout
NV = NE * NH * H                  # 1024 : (e, h, j) out-projected V layout
NLOG = NA * NH * NE               # 128  : (a, h, e) logits layout
NOUT = NA * H                     # 128  : (a, j)   x2 / output layout


# ---- lane-layout helpers: single source of truth for every packed constant -----------
def _lane_q(a, h, d):      return a * H + h * HD + d                   # 128-wide
def _lane_k(e, h, d):      return e * H + h * HD + d                   # 256-wide
def _lane_big(d, a, h, e): return ((d * NA + a) * NH + h) * NE + e     # 1024-wide
def _lane_v(e, h, j):      return (e * NH + h) * H + j                 # 1024-wide
def _lane_logit(a, h, e):  return (a * NH + h) * NE + e                # 128-wide
def _lane_x2(a, j):        return a * H + j                            # 128-wide


def _hypernet_kernel(ent_ref, emask_ref, w1bd_ref, wbig_ref, w2bd_ref,
                     sel_ref, pg_ref, ew_ref, sr_ref, bias_ref, out_ref):
    f32 = jnp.float32
    BT = emask_ref.shape[0]

    def mm(a, b):   # MXU dot; operands take the packed weight's dtype (f32 or bf16)
        return jnp.dot(a.astype(b.dtype), b, preferred_element_type=f32)

    b1w = bias_ref[:, 0:NE * H]                      # (1, 256)
    boutw = bias_ref[:, NE * H:NE * H + NOUT]        # (1, 128)
    b2w = bias_ref[:, NE * H + NOUT:]                # (1, 128)

    # ---- masks (exact 0/1 f32 arithmetic) --------------------------------------------
    ent_keep = 1.0 - emask_ref[...]                                     # (BT, NE)
    aexp = jnp.dot(ent_keep, sel_ref[:, 0:NLOG], preferred_element_type=f32)       # agent keep
    eexp = jnp.dot(ent_keep, sel_ref[:, NLOG:2 * NLOG], preferred_element_type=f32)  # entity keep
    keep = jnp.dot(ent_keep, sel_ref[:, 2 * NLOG:], preferred_element_type=f32)    # output keep
    attn_bias = (aexp * eexp - 1.0) * 1e30            # 0 where attend allowed, -1e30 where masked

    # ---- fc1 (block-diag over entities) + relu : (BT,128)@(128,256) -------------------
    x1 = jnp.maximum(mm(ent_ref[...], w1bd_ref[...]) + b1w, 0.0)        # (BT, 256)

    # ---- fused projection [Qbig | Kbig | Vproj] = x1 @ wbig : (BT,256)@(256,3072) -----
    proj = mm(x1, wbig_ref[...])
    qbig = proj[:, 0:NBIG]                   # lane = d*128 + a*32 + h*8 + e  (scale folded in)
    kbig = proj[:, NBIG:2 * NBIG]            # lane = d*128 + a*32 + h*8 + e
    vproj = proj[:, 2 * NBIG:]               # lane = e*128 + h*32 + j  (out-projection folded in)

    # ---- all-head logits in one (BT,128) slab: accumulate 128-lane d-slices -----------
    prod = qbig * kbig
    logits = prod[:, 0:NLOG]
    for d in range(1, HD):
        logits = logits + prod[:, d * NLOG:(d + 1) * NLOG]
    logits = logits + attn_bias                                          # (BT, 128)

    # ---- segmented softmax over aligned 8-lane (entity) groups, all f32 ---------------
    m = logits
    for i in range(3):     # XOR-partner permutations (4, 2, 1) -> per-group max in every lane
        m = jnp.maximum(m, jnp.dot(m, pg_ref[:, i * NLOG:(i + 1) * NLOG],
                                   preferred_element_type=f32))
    p = jnp.exp(logits - m)
    s = jnp.dot(p, pg_ref[:, 3 * NLOG:], preferred_element_type=f32)     # group sum, broadcast
    w = p * pl.reciprocal(s, approx=False)
    # NOTE: fully-masked groups give uniform weights here (PyTorch gives NaN -> 0); those
    # agents are zeroed by `keep` both before and after fc2, so the output is identical.

    # ---- attention-weighted sum of the (already out-projected) V, lane-dense ----------
    x2 = jnp.zeros((BT, NOUT), f32)
    for a in range(NA):
        wexp = mm(w, ew_ref[:, a * NV:(a + 1) * NV])                     # (BT, 1024)
        x2 = x2 + mm(wexp * vproj, sr_ref[:, a * NOUT:(a + 1) * NOUT])   # (BT, 128)

    # ---- lane-dense tail: bout, post-mask, fc2 (block-diag), final mask ----------------
    x2 = (x2 + boutw) * keep
    x3 = mm(x2, w2bd_ref[...]) + b2w
    out_ref[...] = x3 * keep


def prepare_hypernet_params(params, mm_dtype=jnp.bfloat16):
    """Fold / pack the module weights into the kernel's lane-dense constants.

    Pure JAX + numpy glue -- call once and cache across forward calls (review item:
    hoist the per-call weight prep).  `mm_dtype` is the MXU-operand dtype for the big
    matmuls (bf16 on v6e/v7x, f32 when exactness is required); mask / softmax selectors
    and biases always stay f32.
    """
    f32 = jnp.float32
    w1T = params["w1"].T.astype(f32)            # (ED, H)
    winT = params["win"].T.astype(f32)          # (H, 3H)
    woutT = params["wout"].T.astype(f32)        # (H, H)
    w2T = params["w2"].T.astype(f32)            # (H, MIX)
    scale = 1.0 / np.sqrt(np.float32(HD))

    # fc1 as a block-diagonal (NE*ED, NE*H) matmul on the (B, NE*ED) lane-dense input slab
    w1bd = jnp.kron(jnp.eye(NE, dtype=f32), w1T)

    # per-head slice of the out-projection packed so v_e @ wv_big == out-projected V
    headmask = np.zeros((H, NH), np.float32)
    for h in range(NH):
        headmask[h * HD:(h + 1) * HD, h] = 1.0
    wout_big = (woutT[:, None, :] * jnp.asarray(headmask)[:, :, None]).reshape(H, NH * H)
    wv_big = winT[:, 2 * H:3 * H] @ wout_big                     # (32, 128): cols h*32+j

    wq_s = scale * winT[:, 0:H]                                  # (32, 32): cols h*8+d, scaled
    wk = winT[:, H:2 * H]                                        # (32, 32): cols h*8+d

    # expansion selectors: q_flat/k_flat columns -> the (d,a,h,e) elementwise-product layout
    eq = np.zeros((NA * H, NBIG), np.float32)
    ek = np.zeros((NE * H, NBIG), np.float32)
    for a in range(NA):
        for h in range(NH):
            for d in range(HD):
                for e in range(NE):
                    c = _lane_big(d, a, h, e)
                    eq[_lane_q(a, h, d), c] = 1.0
                    ek[_lane_k(e, h, d), c] = 1.0

    wq_big = jnp.kron(jnp.asarray(np.eye(NE, NA, dtype=np.float32)), wq_s) @ jnp.asarray(eq)
    wk_big = jnp.kron(jnp.eye(NE, dtype=f32), wk) @ jnp.asarray(ek)
    wv_cols = jnp.kron(jnp.eye(NE, dtype=f32), wv_big)           # (256, 1024): _lane_v(e,h,j)
    wbig = jnp.concatenate([wq_big, wk_big, wv_cols], axis=1)    # (256, 3072)

    # fc2 as a block-diagonal (NA*H, NA*MIX) matmul on the agent-major wide layout
    w2bd = jnp.kron(jnp.eye(NA, dtype=f32), w2T)                 # (128, 128)

    # packed biases: [b1 tiled over entities | bout tiled over agents | b2 tiled over agents]
    bias = jnp.concatenate([jnp.tile(params["b1"].astype(f32), NE),
                            jnp.tile(params["bout"].astype(f32), NA),
                            jnp.tile(params["b2"].astype(f32), NA)]).reshape(1, -1)   # (1, 512)

    # data-independent 0/1 selectors (kept f32 so mask / softmax math stays exact)
    sel = np.zeros((NE, 3 * NLOG), np.float32)
    for a in range(NA):
        for h in range(NH):
            for e in range(NE):
                sel[a, _lane_logit(a, h, e)] = 1.0               # agent-keep -> logit lanes
                sel[e, NLOG + _lane_logit(a, h, e)] = 1.0        # entity-keep -> logit lanes
    for a in range(NA):
        for j in range(H):
            sel[a, 2 * NLOG + _lane_x2(a, j)] = 1.0              # agent-keep -> output lanes

    pg = np.zeros((NLOG, 4 * NLOG), np.float32)
    for i, k in enumerate((4, 2, 1)):                            # XOR-partner permutations
        for r in range(NLOG):
            pg[r, i * NLOG + (r ^ k)] = 1.0
    for r in range(NLOG):                                        # 8-lane group-sum matrix
        g = (r // NE) * NE
        pg[r, 3 * NLOG + g:3 * NLOG + g + NE] = 1.0

    ew = np.zeros((NLOG, NA * NV), np.float32)                   # softmax-weight expansion
    sr = np.zeros((NV, NA * NOUT), np.float32)                   # (h,e) contraction / placement
    for a in range(NA):
        for h in range(NH):
            for e in range(NE):
                for j in range(H):
                    ew[_lane_logit(a, h, e), a * NV + _lane_v(e, h, j)] = 1.0
                    sr[_lane_v(e, h, j), a * NOUT + _lane_x2(a, j)] = 1.0

    cast = lambda x: jnp.asarray(x, mm_dtype)
    return dict(w1bd=cast(w1bd), wbig=cast(wbig), w2bd=cast(w2bd),
                ew=cast(ew), sr=cast(sr),
                sel=jnp.asarray(sel), pg=jnp.asarray(pg), bias=bias)


def attention_icm_hypernet(entities, entity_mask, prep, mode="matrix", block_b=256):
    """Forward pass.  `prep` comes from prepare_hypernet_params (cache it across calls)."""
    assert H == MIX, "shared post/final keep mask assumes hypernet_embed == mixing_embed_dim"
    B = entities.shape[0]

    # batch tile: large enough to amortize the ~0.35us per-grid-step overhead, multiple of 8
    bb = max(8, min(block_b, -(-B // 8) * 8))
    bb = (bb // 8) * 8
    nblk = -(-B // bb)
    if nblk > 1 and nblk % 2 == 1:
        nblk += 1                       # even grid so v7x's two TensorCores stay balanced
    Bp = nblk * bb

    ents = entities.reshape(B, NE * ED).astype(jnp.float32)      # lane-dense (B, 128) input
    emask = entity_mask.astype(jnp.float32)
    if Bp != B:
        ents = jnp.pad(ents, ((0, Bp - B), (0, 0)))
        emask = jnp.pad(emask, ((0, Bp - B), (0, 0)), constant_values=1.0)  # pad rows masked

    const_spec = lambda arr: pl.BlockSpec(arr.shape, lambda i: (0, 0))
    out_wide = pl.pallas_call(
        _hypernet_kernel,
        out_shape=jax.ShapeDtypeStruct((Bp, NOUT), jnp.float32),
        grid_spec=pltpu.PrefetchScalarGridSpec(
            num_scalar_prefetch=0,
            grid=(nblk,),
            in_specs=[
                pl.BlockSpec((bb, NE * ED), lambda i: (i, 0)),
                pl.BlockSpec((bb, NE), lambda i: (i, 0)),
                const_spec(prep["w1bd"]), const_spec(prep["wbig"]), const_spec(prep["w2bd"]),
                const_spec(prep["sel"]), const_spec(prep["pg"]),
                const_spec(prep["ew"]), const_spec(prep["sr"]), const_spec(prep["bias"]),
            ],
            out_specs=pl.BlockSpec((bb, NOUT), lambda i: (i, 0)),
        ),
        compiler_params=pltpu.CompilerParams(
            dimension_semantics=("parallel",),
            vmem_limit_bytes=48 * 1024 * 1024),
    )(ents, emask, prep["w1bd"], prep["wbig"], prep["w2bd"],
      prep["sel"], prep["pg"], prep["ew"], prep["sr"], prep["bias"])

    out = out_wide[:B].reshape(B, NA, MIX)
    if mode == "vector":
        return out.mean(axis=1)
    if mode == "alt_vector":
        return out.mean(axis=2)
    if mode == "scalar":
        return out.mean(axis=(1, 2))
    return out  # 'matrix'


# ---- pure-JAX reference (mirrors the PyTorch forward exactly) -------------------------
def reference(entities, entity_mask, params):
    B = entities.shape[0]
    x1 = jax.nn.relu(entities @ params["w1"].T + params["b1"])
    agent_mask = entity_mask[:, :NA]
    attn_mask = 1.0 - jnp.einsum("ba,be->bae", 1.0 - agent_mask, 1.0 - entity_mask)
    qkv = x1 @ params["win"].T
    q, k, v = jnp.split(qkv, 3, axis=-1)
    q = q[:, :NA]
    qh = q.reshape(B, NA, NH, HD)
    kh = k.reshape(B, NE, NH, HD)
    vh = v.reshape(B, NE, NH, HD)
    logits = jnp.einsum("bqhd,bkhd->bhqk", qh, kh) / jnp.sqrt(jnp.float32(HD))
    masked = jnp.where(attn_mask[:, None] > 0.5, -jnp.inf, logits)
    w = jax.nn.softmax(masked, axis=-1)
    w = jnp.nan_to_num(w, nan=0.0)          # fully-masked rows -> 0, like masked_fill
    attn = jnp.einsum("bhqk,bkhd->bqhd", w, vh).reshape(B, NA, H)
    x2 = attn @ params["wout"].T + params["bout"]
    x2 = jnp.where(agent_mask[..., None] > 0.5, 0.0, x2)
    x3 = x2 @ params["w2"].T + params["b2"]
    x3 = jnp.where(agent_mask[..., None] > 0.5, 0.0, x3)
    return x3


if __name__ == "__main__":
    B = 70                                   # not a tile multiple -> exercises padding paths
    key = jax.random.PRNGKey(0)
    ks = jax.random.split(key, 9)

    params = {
        "w1":   0.1 * jax.random.normal(ks[0], (H, ED), jnp.float32),
        "b1":   0.1 * jax.random.normal(ks[1], (H,), jnp.float32),
        "win":  0.1 * jax.random.normal(ks[2], (3 * H, H), jnp.float32),
        "wout": 0.1 * jax.random.normal(ks[3], (H, H), jnp.float32),
        "bout": 0.1 * jax.random.normal(ks[4], (H,), jnp.float32),
        "w2":   0.1 * jax.random.normal(ks[5], (MIX, H), jnp.float32),
        "b2":   0.1 * jax.random.normal(ks[6], (MIX,), jnp.float32),
    }

    entities = jax.random.normal(ks[7], (B, NE, ED), jnp.float32)
    # 1 == masked entity; random masks exercise masked agents / masked entities paths
    entity_mask = (jax.random.uniform(ks[8], (B, NE)) < 0.3).astype(jnp.float32)

    ref = reference(entities, entity_mask, params)

    # exact-f32 path with a small tile -> multi-step grid + padded tail + even-grid logic
    prep32 = prepare_hypernet_params(params, mm_dtype=jnp.float32)
    out32 = jax.block_until_ready(
        attention_icm_hypernet(entities, entity_mask, prep32, mode="matrix", block_b=32))
    assert out32.shape == (B, NA, MIX)
    err32 = jnp.max(jnp.abs(out32 - ref))
    assert jnp.allclose(out32, ref, atol=1e-4, rtol=1e-4), f"f32 max abs diff {err32}"

    # bf16 MXU-operand path (v6e/v7x fast path), default large tile; softmax math stays f32
    prep16 = prepare_hypernet_params(params, mm_dtype=jnp.bfloat16)
    out16 = jax.block_until_ready(
        attention_icm_hypernet(entities, entity_mask, prep16, mode="matrix"))
    err16 = jnp.max(jnp.abs(out16 - ref))
    assert jnp.allclose(out16, ref, atol=3e-2, rtol=3e-2), f"bf16 max abs diff {err16}"

    print("KERNEL_OK")
</pallas_src>

<mosaic_0001>
module attributes {stable_mosaic.version = 11 : i64} {
  func.func @_hypernet_kernel(%arg0: i32, %arg1: memref<32x128xf32, #tpu.memory_space<vmem>>, %arg2: memref<32x8xf32, #tpu.memory_space<vmem>>, %arg3: memref<128x256xf32, #tpu.memory_space<vmem>>, %arg4: memref<256x3072xf32, #tpu.memory_space<vmem>>, %arg5: memref<128x128xf32, #tpu.memory_space<vmem>>, %arg6: memref<8x384xf32, #tpu.memory_space<vmem>>, %arg7: memref<128x512xf32, #tpu.memory_space<vmem>>, %arg8: memref<128x4096xf32, #tpu.memory_space<vmem>>, %arg9: memref<1024x512xf32, #tpu.memory_space<vmem>>, %arg10: memref<1x512xf32, #tpu.memory_space<vmem>>, %arg11: memref<32x128xf32, #tpu.memory_space<vmem>>) attributes {dimension_semantics = [#tpu.dimension_semantics<parallel>], iteration_bounds = array<i64: 4>, scalar_prefetch = 0 : i64, scratch_operands = 0 : i64, tpu.core_type = #tpu.core_type<tc>, window_params = [{transform_indices = @transform_0, window_bounds = array<i64: 32, 128>}, {transform_indices = @transform_1, window_bounds = array<i64: 32, 8>}, {pipeline_mode = #tpu.pipeline_mode<synchronous>, transform_indices = @transform_2, window_bounds = array<i64: 128, 256>}, {pipeline_mode = #tpu.pipeline_mode<synchronous>, transform_indices = @transform_3, window_bounds = array<i64: 256, 3072>}, {pipeline_mode = #tpu.pipeline_mode<synchronous>, transform_indices = @transform_4, window_bounds = array<i64: 128, 128>}, {pipeline_mode = #tpu.pipeline_mode<synchronous>, transform_indices = @transform_5, window_bounds = array<i64: 8, 384>}, {pipeline_mode = #tpu.pipeline_mode<synchronous>, transform_indices = @transform_6, window_bounds = array<i64: 128, 512>}, {pipeline_mode = #tpu.pipeline_mode<synchronous>, transform_indices = @transform_7, window_bounds = array<i64: 128, 4096>}, {pipeline_mode = #tpu.pipeline_mode<synchronous>, transform_indices = @transform_8, window_bounds = array<i64: 1024, 512>}, {pipeline_mode = #tpu.pipeline_mode<synchronous>, transform_indices = @transform_9, window_bounds = array<i64: 1, 512>}, {transform_indices = @transform_10, window_bounds = array<i64: 32, 128>}]} {
    %c0 = arith.constant 0 : index
    %c0_0 = arith.constant 0 : index
    %0 = vector.load %arg10[%c0, %c0_0] : memref<1x512xf32, #tpu.memory_space<vmem>>, vector<1x256xf32>
    %c0_1 = arith.constant 0 : index
    %c256 = arith.constant 256 : index
    %1 = vector.load %arg10[%c0_1, %c256] : memref<1x512xf32, #tpu.memory_space<vmem>>, vector<1x128xf32>
    %c0_2 = arith.constant 0 : index
    %c384 = arith.constant 384 : index
    %2 = vector.load %arg10[%c0_2, %c384] : memref<1x512xf32, #tpu.memory_space<vmem>>, vector<1x128xf32>
    %c0_3 = arith.constant 0 : index
    %c0_4 = arith.constant 0 : index
    %3 = vector.load %arg2[%c0_3, %c0_4] : memref<32x8xf32, #tpu.memory_space<vmem>>, vector<32x8xf32>
    %cst = arith.constant 1.000000e+00 : f32
    %4 = vector.broadcast %cst : f32 to vector<32x8xf32>
    %5 = arith.subf %4, %3 : vector<32x8xf32>
    %c0_5 = arith.constant 0 : index
    %c0_6 = arith.constant 0 : index
    %6 = vector.load %arg6[%c0_5, %c0_6] : memref<8x384xf32, #tpu.memory_space<vmem>>, vector<8x128xf32>
    %cst_7 = arith.constant dense<0.000000e+00> : vector<32x128xf32>
    %7 = tpu.matmul %5, %6, %cst_7 {dimension_numbers = #tpu.dot_dimension_numbers<[1], [0], [0], [1], [0, 0, 1, 1], [], []>} : vector<32x8xf32>, vector<8x128xf32>, vector<32x128xf32> -> vector<32x128xf32>
    %c0_8 = arith.constant 0 : index
    %c128 = arith.constant 128 : index
    %8 = vector.load %arg6[%c0_8, %c128] : memref<8x384xf32, #tpu.memory_space<vmem>>, vector<8x128xf32>
    %cst_9 = arith.constant dense<0.000000e+00> : vector<32x128xf32>
    %9 = tpu.matmul %5, %8, %cst_9 {dimension_numbers = #tpu.dot_dimension_numbers<[1], [0], [0], [1], [0, 0, 1, 1], [], []>} : vector<32x8xf32>, vector<8x128xf32>, vector<32x128xf32> -> vector<32x128xf32>
    %c0_10 = arith.constant 0 : index
    %c256_11 = arith.constant 256 : index
    %10 = vector.load %arg6[%c0_10, %c256_11] : memref<8x384xf32, #tpu.memory_space<vmem>>, vector<8x128xf32>
    %cst_12 = arith.constant dense<0.000000e+00> : vector<32x128xf32>
    %11 = tpu.matmul %5, %10, %cst_12 {dimension_numbers = #tpu.dot_dimension_numbers<[1], [0], [0], [1], [0, 0, 1, 1], [], []>} : vector<32x8xf32>, vector<8x128xf32>, vector<32x128xf32> -> vector<32x128xf32>
    %12 = arith.mulf %7, %9 : vector<32x128xf32>
    %cst_13 = arith.constant 1.000000e+00 : f32
    %13 = vector.broadcast %cst_13 : f32 to vector<32x128xf32>
    %14 = arith.subf %12, %13 : vector<32x128xf32>
    %cst_14 = arith.constant 1.000000e+30 : f32
    %15 = vector.broadcast %cst_14 : f32 to vector<32x128xf32>
    %16 = arith.mulf %14, %15 : vector<32x128xf32>
    %c0_15 = arith.constant 0 : index
    %c0_16 = arith.constant 0 : index
    %17 = vector.load %arg1[%c0_15, %c0_16] : memref<32x128xf32, #tpu.memory_space<vmem>>, vector<32x128xf32>
    %c0_17 = arith.constant 0 : index
    %c0_18 = arith.constant 0 : index
    %18 = vector.load %arg3[%c0_17, %c0_18] : memref<128x256xf32, #tpu.memory_space<vmem>>, vector<128x256xf32>
    %cst_19 = arith.constant dense<0.000000e+00> : vector<32x256xf32>
    %19 = tpu.matmul %17, %18, %cst_19 {dimension_numbers = #tpu.dot_dimension_numbers<[1], [0], [0], [1], [0, 0, 1, 1], [], []>} : vector<32x128xf32>, vector<128x256xf32>, vector<32x256xf32> -> vector<32x256xf32>
    %20 = vector.broadcast %0 : vector<1x256xf32> to vector<32x256xf32>
    %21 = arith.addf %19, %20 : vector<32x256xf32>
    %cst_20 = arith.constant 0.000000e+00 : f32
    %22 = vector.broadcast %cst_20 : f32 to vector<32x256xf32>
    %23 = arith.maximumf %21, %22 : vector<32x256xf32>
    %c0_21 = arith.constant 0 : index
    %c0_22 = arith.constant 0 : index
    %24 = vector.load %arg4[%c0_21, %c0_22] : memref<256x3072xf32, #tpu.memory_space<vmem>>, vector<256x3072xf32>
    %cst_23 = arith.constant dense<0.000000e+00> : vector<32x3072xf32>
    %25 = tpu.matmul %23, %24, %cst_23 {dimension_numbers = #tpu.dot_dimension_numbers<[1], [0], [0], [1], [0, 0, 1, 1], [], []>} : vector<32x256xf32>, vector<256x3072xf32>, vector<32x3072xf32> -> vector<32x3072xf32>
    %26 = vector.extract_strided_slice %25 {offsets = [0, 0], sizes = [32, 1024], strides = [1, 1]} : vector<32x3072xf32> to vector<32x1024xf32>
    %27 = vector.extract_strided_slice %25 {offsets = [0, 1024], sizes = [32, 1024], strides = [1, 1]} : vector<32x3072xf32> to vector<32x1024xf32>
    %28 = vector.extract_strided_slice %25 {offsets = [0, 2048], sizes = [32, 1024], strides = [1, 1]} : vector<32x3072xf32> to vector<32x1024xf32>
    %29 = arith.mulf %26, %27 : vector<32x1024xf32>
    %30 = vector.extract_strided_slice %29 {offsets = [0, 0], sizes = [32, 128], strides = [1, 1]} : vector<32x1024xf32> to vector<32x128xf32>
    %31 = vector.extract_strided_slice %29 {offsets = [0, 128], sizes = [32, 128], strides = [1, 1]} : vector<32x1024xf32> to vector<32x128xf32>
    %32 = arith.addf %30, %31 : vector<32x128xf32>
    %33 = vector.extract_strided_slice %29 {offsets = [0, 256], sizes = [32, 128], strides = [1, 1]} : vector<32x1024xf32> to vector<32x128xf32>
    %34 = arith.addf %32, %33 : vector<32x128xf32>
    %35 = vector.extract_strided_slice %29 {offsets = [0, 384], sizes = [32, 128], strides = [1, 1]} : vector<32x1024xf32> to vector<32x128xf32>
    %36 = arith.addf %34, %35 : vector<32x128xf32>
    %37 = vector.extract_strided_slice %29 {offsets = [0, 512], sizes = [32, 128], strides = [1, 1]} : vector<32x1024xf32> to vector<32x128xf32>
    %38 = arith.addf %36, %37 : vector<32x128xf32>
    %39 = vector.extract_strided_slice %29 {offsets = [0, 640], sizes = [32, 128], strides = [1, 1]} : vector<32x1024xf32> to vector<32x128xf32>
    %40 = arith.addf %38, %39 : vector<32x128xf32>
    %41 = vector.extract_strided_slice %29 {offsets = [0, 768], sizes = [32, 128], strides = [1, 1]} : vector<32x1024xf32> to vector<32x128xf32>
    %42 = arith.addf %40, %41 : vector<32x128xf32>
    %43 = vector.extract_strided_slice %29 {offsets = [0, 896], sizes = [32, 128], strides = [1, 1]} : vector<32x1024xf32> to vector<32x128xf32>
    %44 = arith.addf %42, %43 : vector<32x128xf32>
    %45 = arith.addf %44, %16 : vector<32x128xf32>
    %c0_24 = arith.constant 0 : index
    %c0_25 = arith.constant 0 : index
    %46 = vector.load %arg7[%c0_24, %c0_25] : memref<128x512xf32, #tpu.memory_space<vmem>>, vector<128x128xf32>
    %cst_26 = arith.constant dense<0.000000e+00> : vector<32x128xf32>
    %47 = tpu.matmul %45, %46, %cst_26 {dimension_numbers = #tpu.dot_dimension_numbers<[1], [0], [0], [1], [0, 0, 1, 1], [], []>} : vector<32x128xf32>, vector<128x128xf32>, vector<32x128xf32> -> vector<32x128xf32>
    %48 = arith.maximumf %45, %47 : vector<32x128xf32>
    %c0_27 = arith.constant 0 : index
    %c128_28 = arith.constant 128 : index
    %49 = vector.load %arg7[%c0_27, %c128_28] : memref<128x512xf32, #tpu.memory_space<vmem>>, vector<128x128xf32>
    %cst_29 = arith.constant dense<0.000000e+00> : vector<32x128xf32>
    %50 = tpu.matmul %48, %49, %cst_29 {dimension_numbers = #tpu.dot_dimension_numbers<[1], [0], [0], [1], [0, 0, 1, 1], [], []>} : vector<32x128xf32>, vector<128x128xf32>, vector<32x128xf32> -> vector<32x128xf32>
    %51 = arith.maximumf %48, %50 : vector<32x128xf32>
    %c0_30 = arith.constant 0 : index
    %c256_31 = arith.constant 256 : index
    %52 = vector.load %arg7[%c0_30, %c256_31] : memref<128x512xf32, #tpu.memory_space<vmem>>, vector<128x128xf32>
    %cst_32 = arith.constant dense<0.000000e+00> : vector<32x128xf32>
    %53 = tpu.matmul %51, %52, %cst_32 {dimension_numbers = #tpu.dot_dimension_numbers<[1], [0], [0], [1], [0, 0, 1, 1], [], []>} : vector<32x128xf32>, vector<128x128xf32>, vector<32x128xf32> -> vector<32x128xf32>
    %54 = arith.maximumf %51, %53 : vector<32x128xf32>
    %55 = arith.subf %45, %54 : vector<32x128xf32>
    %56 = math.exp %55 : vector<32x128xf32>
    %c0_33 = arith.constant 0 : index
    %c384_34 = arith.constant 384 : index
    %57 = vector.load %arg7[%c0_33, %c384_34] : memref<128x512xf32, #tpu.memory_space<vmem>>, vector<128x128xf32>
    %cst_35 = arith.constant dense<0.000000e+00> : vector<32x128xf32>
    %58 = tpu.matmul %56, %57, %cst_35 {dimension_numbers = #tpu.dot_dimension_numbers<[1], [0], [0], [1], [0, 0, 1, 1], [], []>} : vector<32x128xf32>, vector<128x128xf32>, vector<32x128xf32> -> vector<32x128xf32>
    %59 = tpu.reciprocal %58 : vector<32x128xf32> -> vector<32x128xf32>
    %60 = arith.mulf %56, %59 : vector<32x128xf32>
    %cst_36 = arith.constant 0.000000e+00 : f32
    %61 = vector.broadcast %cst_36 : f32 to vector<32x128xf32>
    %c0_37 = arith.constant 0 : index
    %c0_38 = arith.constant 0 : index
    %62 = vector.load %arg8[%c0_37, %c0_38] : memref<128x4096xf32, #tpu.memory_space<vmem>>, vector<128x1024xf32>
    %cst_39 = arith.constant dense<0.000000e+00> : vector<32x1024xf32>
    %63 = tpu.matmul %60, %62, %cst_39 {dimension_numbers = #tpu.dot_dimension_numbers<[1], [0], [0], [1], [0, 0, 1, 1], [], []>} : vector<32x128xf32>, vector<128x1024xf32>, vector<32x1024xf32> -> vector<32x1024xf32>
    %64 = arith.mulf %63, %28 : vector<32x1024xf32>
    %c0_40 = arith.constant 0 : index
    %c0_41 = arith.constant 0 : index
    %65 = vector.load %arg9[%c0_40, %c0_41] : memref<1024x512xf32, #tpu.memory_space<vmem>>, vector<1024x128xf32>
    %cst_42 = arith.constant dense<0.000000e+00> : vector<32x128xf32>
    %66 = tpu.matmul %64, %65, %cst_42 {dimension_numbers = #tpu.dot_dimension_numbers<[1], [0], [0], [1], [0, 0, 1, 1], [], []>} : vector<32x1024xf32>, vector<1024x128xf32>, vector<32x128xf32> -> vector<32x128xf32>
    %67 = arith.addf %61, %66 : vector<32x128xf32>
    %c0_43 = arith.constant 0 : index
    %c1024 = arith.constant 1024 : index
    %68 = vector.load %arg8[%c0_43, %c1024] : memref<128x4096xf32, #tpu.memory_space<vmem>>, vector<128x1024xf32>
    %cst_44 = arith.constant dense<0.000000e+00> : vector<32x1024xf32>
    %69 = tpu.matmul %60, %68, %cst_44 {dimension_numbers = #tpu.dot_dimension_numbers<[1], [0], [0], [1], [0, 0, 1, 1], [], []>} : vector<32x128xf32>, vector<128x1024xf32>, vector<32x1024xf32> -> vector<32x1024xf32>
    %70 = arith.mulf %69, %28 : vector<32x1024xf32>
    %c0_45 = arith.constant 0 : index
    %c128_46 = arith.constant 128 : index
    %71 = vector.load %arg9[%c0_45, %c128_46] : memref<1024x512xf32, #tpu.memory_space<vmem>>, vector<1024x128xf32>
    %cst_47 = arith.constant dense<0.000000e+00> : vector<32x128xf32>
    %72 = tpu.matmul %70, %71, %cst_47 {dimension_numbers = #tpu.dot_dimension_numbers<[1], [0], [0], [1], [0, 0, 1, 1], [], []>} : vector<32x1024xf32>, vector<1024x128xf32>, vector<32x128xf32> -> vector<32x128xf32>
    %73 = arith.addf %67, %72 : vector<32x128xf32>
    %c0_48 = arith.constant 0 : index
    %c2048 = arith.constant 2048 : index
    %74 = vector.load %arg8[%c0_48, %c2048] : memref<128x4096xf32, #tpu.memory_space<vmem>>, vector<128x1024xf32>
    %cst_49 = arith.constant dense<0.000000e+00> : vector<32x1024xf32>
    %75 = tpu.matmul %60, %74, %cst_49 {dimension_numbers = #tpu.dot_dimension_numbers<[1], [0], [0], [1], [0, 0, 1, 1], [], []>} : vector<32x128xf32>, vector<128x1024xf32>, vector<32x1024xf32> -> vector<32x1024xf32>
    %76 = arith.mulf %75, %28 : vector<32x1024xf32>
    %c0_50 = arith.constant 0 : index
    %c256_51 = arith.constant 256 : index
    %77 = vector.load %arg9[%c0_50, %c256_51] : memref<1024x512xf32, #tpu.memory_space<vmem>>, vector<1024x128xf32>
    %cst_52 = arith.constant dense<0.000000e+00> : vector<32x128xf32>
    %78 = tpu.matmul %76, %77, %cst_52 {dimension_numbers = #tpu.dot_dimension_numbers<[1], [0], [0], [1], [0, 0, 1, 1], [], []>} : vector<32x1024xf32>, vector<1024x128xf32>, vector<32x128xf32> -> vector<32x128xf32>
    %79 = arith.addf %73, %78 : vector<32x128xf32>
    %c0_53 = arith.constant 0 : index
    %c3072 = arith.constant 3072 : index
    %80 = vector.load %arg8[%c0_53, %c3072] : memref<128x4096xf32, #tpu.memory_space<vmem>>, vector<128x1024xf32>
    %cst_54 = arith.constant dense<0.000000e+00> : vector<32x1024xf32>
    %81 = tpu.matmul %60, %80, %cst_54 {dimension_numbers = #tpu.dot_dimension_numbers<[1], [0], [0], [1], [0, 0, 1, 1], [], []>} : vector<32x128xf32>, vector<128x1024xf32>, vector<32x1024xf32> -> vector<32x1024xf32>
    %82 = arith.mulf %81, %28 : vector<32x1024xf32>
    %c0_55 = arith.constant 0 : index
    %c384_56 = arith.constant 384 : index
    %83 = vector.load %arg9[%c0_55, %c384_56] : memref<1024x512xf32, #tpu.memory_space<vmem>>, vector<1024x128xf32>
    %cst_57 = arith.constant dense<0.000000e+00> : vector<32x128xf32>
    %84 = tpu.matmul %82, %83, %cst_57 {dimension_numbers = #tpu.dot_dimension_numbers<[1], [0], [0], [1], [0, 0, 1, 1], [], []>} : vector<32x1024xf32>, vector<1024x128xf32>, vector<32x128xf32> -> vector<32x128xf32>
    %85 = arith.addf %79, %84 : vector<32x128xf32>
    %86 = vector.broadcast %1 : vector<1x128xf32> to vector<32x128xf32>
    %87 = arith.addf %85, %86 : vector<32x128xf32>
    %88 = arith.mulf %87, %11 : vector<32x128xf32>
    %c0_58 = arith.constant 0 : index
    %c0_59 = arith.constant 0 : index
    %89 = vector.load %arg5[%c0_58, %c0_59] : memref<128x128xf32, #tpu.memory_space<vmem>>, vector<128x128xf32>
    %cst_60 = arith.constant dense<0.000000e+00> : vector<32x128xf32>
    %90 = tpu.matmul %88, %89, %cst_60 {dimension_numbers = #tpu.dot_dimension_numbers<[1], [0], [0], [1], [0, 0, 1, 1], [], []>} : vector<32x128xf32>, vector<128x128xf32>, vector<32x128xf32> -> vector<32x128xf32>
    %91 = vector.broadcast %2 : vector<1x128xf32> to vector<32x128xf32>
    %92 = arith.addf %90, %91 : vector<32x128xf32>
    %93 = arith.mulf %92, %11 : vector<32x128xf32>
    %c0_61 = arith.constant 0 : index
    %c0_62 = arith.constant 0 : index
    %94 = vector.load %arg11[%c0_61, %c0_62] : memref<32x128xf32, #tpu.memory_space<vmem>>, vector<32x128xf32>
    tpu.vector_store %arg11[%c0_61, %c0_62], %93 {strides = array<i32>} : memref<32x128xf32, #tpu.memory_space<vmem>>, vector<32x128xf32>,
    return
  }
  func.func @transform_0(%arg0: i32) -> (i32, i32) {
    %c0_i32 = arith.constant 0 : i32
    %c0_i32_0 = arith.constant 0 : i32
    return %arg0, %c0_i32 : i32, i32
  }
  func.func @transform_1(%arg0: i32) -> (i32, i32) {
    %c0_i32 = arith.constant 0 : i32
    %c0_i32_0 = arith.constant 0 : i32
    return %arg0, %c0_i32 : i32, i32
  }
  func.func @transform_2(%arg0: i32) -> (i32, i32) {
    %c0_i32 = arith.constant 0 : i32
    %c0_i32_0 = arith.constant 0 : i32
    %c0_i32_1 = arith.constant 0 : i32
    return %c0_i32, %c0_i32_0 : i32, i32
  }
  func.func @transform_3(%arg0: i32) -> (i32, i32) {
    %c0_i32 = arith.constant 0 : i32
    %c0_i32_0 = arith.constant 0 : i32
    %c0_i32_1 = arith.constant 0 : i32
    return %c0_i32, %c0_i32_0 : i32, i32
  }
  func.func @transform_4(%arg0: i32) -> (i32, i32) {
    %c0_i32 = arith.constant 0 : i32
    %c0_i32_0 = arith.constant 0 : i32
    %c0_i32_1 = arith.constant 0 : i32
    return %c0_i32, %c0_i32_0 : i32, i32
  }
  func.func @transform_5(%arg0: i32) -> (i32, i32) {
    %c0_i32 = arith.constant 0 : i32
    %c0_i32_0 = arith.constant 0 : i32
    %c0_i32_1 = arith.constant 0 : i32
    return %c0_i32, %c0_i32_0 : i32, i32
  }
  func.func @transform_6(%arg0: i32) -> (i32, i32) {
    %c0_i32 = arith.constant 0 : i32
    %c0_i32_0 = arith.constant 0 : i32
    %c0_i32_1 = arith.constant 0 : i32
    return %c0_i32, %c0_i32_0 : i32, i32
  }
  func.func @transform_7(%arg0: i32) -> (i32, i32) {
    %c0_i32 = arith.constant 0 : i32
    %c0_i32_0 = arith.constant 0 : i32
    %c0_i32_1 = arith.constant 0 : i32
    return %c0_i32, %c0_i32_0 : i32, i32
  }
  func.func @transform_8(%arg0: i32) -> (i32, i32) {
    %c0_i32 = arith.constant 0 : i32
    %c0_i32_0 = arith.constant 0 : i32
    %c0_i32_1 = arith.constant 0 : i32
    return %c0_i32, %c0_i32_0 : i32, i32
  }
  func.func @transform_9(%arg0: i32) -> (i32, i32) {
    %c0_i32 = arith.constant 0 : i32
    %c0_i32_0 = arith.constant 0 : i32
    %c0_i32_1 = arith.constant 0 : i32
    return %c0_i32, %c0_i32_0 : i32, i32
  }
  func.func @transform_10(%arg0: i32) -> (i32, i32) {
    %c0_i32 = arith.constant 0 : i32
    %c0_i32_0 = arith.constant 0 : i32
    return %arg0, %c0_i32 : i32, i32
  }
}

</mosaic_0001>

<bundles_post_ra>
// kernel: tpu_custom_call.1
= control target key start
LH: loop header
LB: loop body
LE: loop exit
PB: predicated region body
PF: predicated region fallthrough
CT: control target
= control target key end

     0   :  { %s9084_s0 = inlined_call_operand.hbm [shape: f32[128,128], index: 0, kind: input, shape index: {}]   ;;  %s9085_s1 = inlined_call_operand.vmem [shape: f32[128,8], index: 1, kind: input, shape index: {}]   ;;  %s9086_s2 = inlined_call_operand.hbm [shape: f32[128,256], index: 2, kind: input, shape index: {}]   ;;  %s9087_s3 = inlined_call_operand.hbm [shape: f32[256,3072], index: 3, kind: input, shape index: {}]   ;;  %s9088_s4 = inlined_call_operand.hbm [shape: f32[128,128], index: 4, kind: input, shape index: {}]   ;;  %s9089_s5 = inlined_call_operand.hbm [shape: f32[8,384], index: 5, kind: input, shape index: {}]   ;;  %s9090_s6 = inlined_call_operand.hbm [shape: f32[128,512], index: 6, kind: input, shape index: {}]   ;;  %s9091_s7 = inlined_call_operand.hbm [shape: f32[128,4096], index: 7, kind: input, shape index: {}]   ;;  %s9092_s8 = inlined_call_operand.hbm [shape: f32[1024,512], index: 8, kind: input, shape index: {}]   ;;  %s9093_s9 = inlined_call_operand.hbm [shape: f32[1,512], index: 9, kind: input, shape index: {}]   ;;  %s9094_s10 = inlined_call_operand.hbm [shape: f32[128,128], index: 10, kind: output, shape index: {}]  }
   0x1   :  { %9115 = sst [smem:[#allocation107_spill]] %s9086_s2 }
   0x2   :  { %9116 = sst [smem:[#allocation108_spill]] %s9087_s3 }
   0x3   :  { %9117 = sst [smem:[#allocation109_spill]] %s9088_s4 }
   0x4   :  { %9118 = sst [smem:[#allocation110_spill]] %s9089_s5 }
   0x5   :  { %15 = vsyncpa [#allocation3], 0 }
   0x6   :  { %17 = vsyncpa [#allocation3 + $0x1], 0 }
   0x7   :  { %18 = vsyncpa [#allocation6], 0 }
   0x8   :  { %19 = vsyncpa [#allocation9], 0 }
   0x9   :  { %20 = vsyncpa [#allocation12], 0 }
   0xa   :  { %21 = vsyncpa [#allocation15], 0 }
   0xb   :  { %22 = vsyncpa [#allocation4], 0 }
   0xc   :  { %24 = vsyncpa [#allocation4 + $0x1], 0  ;;  %s7163_s13 = smov 0   ;;  %s7165_s14 = smov 0  }
   0xd   :  { %s7167_s15 = smov 0   ;;  %s7169_s16 = smov 0  }
   0xe LB: > { %s9119_s2 = sld [smem:[#allocation107_spill]]  ;;  %s7187_s20 = sadd.s32 4294967295, %s7087_s16   ;;  %s7087_s16 = sphi %s7169_s16, %s9533_s16   ;;  %s7083_s15 = sphi %s7167_s15, %s9532_s15   ;;  %s7079_s14 = sphi %s7165_s14, %s9531_s14   ;;  %s7075_s13 = sphi %s7163_s13, %s9530_s13  }
   0xf   : > { %p6514_p0 = scmp.ge.s32.totalorder %s7087_s16, 1  ;;  %p51_p1 = scmp.eq.s32.totalorder %s7187_s20, 0 }
  0x10   : > { %p281_p2 = scmp.lt.s32.totalorder %s7087_s16, 5  ;;  %s7089_s22 = smov [#allocation5]  }
  0x11   : > { %s294_s23 = sshll.u32 %s7089_s22, 4  ;;  %s9121_s4 = sld [smem:[#allocation109_spill]]  ;;  %s295_s23 = int_to_ptr.vmem [resolvable:$true] %s294_s23 }
  0x12   : > { %p7192_p3 = pnand %p6514_p0, %p281_p2  ;;  %s7090_s28 = smov [#allocation8]  }
  0x13   : > { %s322_s29 = sshll.u32 %s7090_s28, 4  ;;  %s9097_s30 = smov 256   ;;  %s323_s29 = int_to_ptr.vmem [resolvable:$true] %s322_s29 }
  0x14   : > { %s292_s19 = sshll.u32 %s9119_s2, 4  ;;  %p6615_p4 = pneg %p7192_p3  ;;  %s293_s19 = int_to_ptr.hbm [resolvable:$true] %s292_s19 }
  0x15   : > { %s7092_s11 = smov 16   ;;  %s9095_s12 = smov 128  }
  0x16   : > { %p7203_p5 = pnand %p6615_p4, %p51_p1  ;;  %s9096_s17 = smov 8  }
  0x17   : > { %s320_s26 = sshll.u32 %s9121_s4, 4  ;;  %s346_s24 = sshll.u32 %s9090_s6, 4  ;;  %s321_s26 = int_to_ptr.hbm [resolvable:$true] %s320_s26  ;;  %s347_s24 = int_to_ptr.hbm [resolvable:$true] %s346_s24 }
  0x18   : > { %6618 = dma.hbm_to_vmem [thread:$0]  (!%p7203_p5), %s293_s19, 4096, %s295_s23, [#allocation6], %s9097_s30, %s9097_s30, %s7092_s11  }
  0x19   : > { %6624 = dma.hbm_to_vmem [thread:$0]  (!%p7203_p5), %s321_s26, 2048, %s323_s29, [#allocation9], %s9095_s12, %s9095_s12, %s9096_s17  }
  0x1a   : > { %s7095_s25 = smov [#allocation11]   ;;  %s374_s19 = sshll.u32 %s9092_s8, 4  ;;  %s375_s19 = int_to_ptr.hbm [resolvable:$true] %s374_s19 }
  0x1b   : > { %s348_s28 = sshll.u32 %s7095_s25, 4  ;;  %s7096_s23 = smov 512   ;;  %s349_s28 = int_to_ptr.vmem [resolvable:$true] %s348_s28 }
  0x1c   : > { %s7097_s11 = smov 32   ;;  %s7098_s26 = smov [#allocation14]  }
  0x1d   : > { %6630 = dma.hbm_to_vmem [thread:$0]  (!%p7203_p5), %s347_s24, 8192, %s349_s28, [#allocation12], %s7096_s23, %s7096_s23, %s7097_s11  }
  0x1e   : > { %s376_s29 = sshll.u32 %s7098_s26, 4  ;;  %s9123_s3 = sld [smem:[#allocation108_spill]]  ;;  %s377_s29 = int_to_ptr.vmem [resolvable:$true] %s376_s29 }
  0x1f   : > { %6636 = dma.hbm_to_vmem [thread:$0]  (!%p7203_p5), %s375_s19, 65536, %s377_s29, [#allocation15], %s7096_s23, %s7096_s23, %s7097_s11  }
  0x20   : > { %s7099_s25 = smov [#allocation7]   ;;  %s9124_s5 = sld [smem:[#allocation110_spill]] }
  0x21   : > { %s308_s2 = sshll.u32 %s7099_s25, 4  ;;  %s7100_s24 = smov 3072   ;;  %s309_s2 = int_to_ptr.vmem [resolvable:$true] %s308_s2 }
  0x22   : > { %s7101_s28 = smov 192   ;;  %s7102_s12 = smov [#allocation10]  }
  0x23   : > { %s337_s26 = sshll.u32 %s7102_s12, 4  ;;  %s360_s19 = sshll.u32 %s9091_s7, 4  ;;  %s338_s26 = int_to_ptr.vmem [resolvable:$true] %s337_s26  ;;  %s361_s19 = int_to_ptr.hbm [resolvable:$true] %s360_s19 }
  0x24   : > { %s306_s22 = sshll.u32 %s9123_s3, 4  ;;  %s7103_s17 = smov [#allocation13]   ;;  %s307_s22 = int_to_ptr.hbm [resolvable:$true] %s306_s22 }
  0x25   : > { %6621 = dma.hbm_to_vmem [thread:$0]  (!%p7203_p5), %s307_s22, 98304, %s309_s2, [#allocation6], %s7100_s24, %s7100_s24, %s7101_s28  }
  0x26   : > { %s335_s30 = sshll.u32 %s9124_s5, 4  ;;  %s362_s23 = sshll.u32 %s7103_s17, 4  ;;  %s336_s30 = int_to_ptr.hbm [resolvable:$true] %s335_s30  ;;  %s363_s23 = int_to_ptr.vmem [resolvable:$true] %s362_s23 }
  0x27   : > { %6627 = dma.hbm_to_vmem [thread:$0]  (!%p7203_p5), %s336_s30, 384, %s338_s26, [#allocation9]  }
  0x28   : > { %s389_s22 = sshll.u32 %s9093_s9, 4  ;;  %s7104_s3 = smov 4096   ;;  %s390_s22 = int_to_ptr.hbm [resolvable:$true] %s389_s22 }
  0x29   : > { %s9125_s25 = smov 256   ;;  %s7105_s30 = smov [#allocation16]  }
  0x2a   : > { %6633 = dma.hbm_to_vmem [thread:$0]  (!%p7203_p5), %s361_s19, 65536, %s363_s23, [#allocation12], %s7104_s3, %s7104_s3, %s9125_s25  }
  0x2b   : > { %s391_s2 = sshll.u32 %s7105_s30, 4  ;;  %s6513_s4 = sadd.s32 4294967294, %s7087_s16   ;;  %s392_s2 = int_to_ptr.vmem [resolvable:$true] %s391_s2 }
  0x2c   : > { %6639 = dma.hbm_to_vmem [thread:$0]  (!%p7203_p5), %s390_s22, 64, %s392_s2, [#allocation15]  }
  0x2d   : > { %s7249_s24 = sadd.s32 1, %s7087_s16   ;;  %s37_s28 = sadd.s32 1, %s7083_s15 }
  0x2e   : > { %s34_s12 = ssub.s32 %s7087_s16, %s7249_s24  ;;  %p44_p6 = scmp.ne.s32.totalorder %s7083_s15, %s7079_s14 }
  0x2f   : > { %p35_p7 = scmp.eq.s32.totalorder %s34_s12, 0  ;;  %p45_p8 = scmp.eq.s32.totalorder %s7087_s16, 0 }
  0x30   : > { %p50_p9 = scmp.ne.s32.totalorder %s7079_s14, %s7075_s13  ;;  %p268_p10 = scmp.eq.s32.totalorder %s7187_s20, 3 }
  0x31   : > { %s7261_s26 = scalar_select %p35_p7, %s7083_s15, %s37_s28  }
  0x32   : > { %p7265_p11 = por %p51_p1, %p50_p9  ;;  %p7269_p12 = por %p268_p10, %p44_p6 }
  0x33   : > { %p274_p13 = scmp.eq.s32.totalorder %s6513_s4, 3  ;;  %p46_p0 = por %p45_p8, %p44_p6 }
  0x34   : > { %s402_s19 = sand.u32 1, %s7083_s15   ;;  %p6656_p4 = scmp.lt.s32.totalorder %s7087_s16, 4 }
  0x35   : > { %p7274_p2 = por %p274_p13, %p50_p9  ;;  %s6524_s23 = sshll.u32 %s402_s19, 5 }
  0x36   : > { %s6561_s11 = sshll.u32 %s7087_s16, 5  ;;  %s406_s30 = scalar_lea.vmem [#allocation2], %s6524_s23 }
  0x37   : > { %s411_s3 = scalar_lea.hbm %s9084_s0, %s6561_s11  ;;  %s414_s2 = sshll.u32 %s406_s30, 4  ;;  %s415_s2 = int_to_ptr.vmem [resolvable:$true] %s414_s2 }
  0x38   : > { %s412_s25 = sshll.u32 %s411_s3, 4  ;;  %p7283_p5 = pnand %p6656_p4, %p46_p0  ;;  %s413_s25 = int_to_ptr.hbm [resolvable:$true] %s412_s25 }
  0x39   : > { %s403_s28 = scalar_lea.sflag [#allocation3], %s402_s19  ;;  %s6975_s12 = sshra.s32 %s413_s25, 4  ;;  %s6976_s12 = int_to_ptr.hbm [resolvable:$true] %s6975_s12 }
  0x3a   : > { %s6977_s5 = scalar_lea.hbm %s6976_s12, 32  ;;  %p6979_p7 = pneg %p7283_p5 }
  0x3b   : > { %p6978_p6 = scmp.ne.s32.totalorder %s6976_s12, %s6977_s5  ;;  %s6982_s23 = scalar_lea.hbm %s9084_s0, 128 }
  0x3c   : > { %p6983_p10 = scmp.lt.s32.totalorder %s6976_s12, %s9084_s0  ;;  %p6984_p13 = scmp.lt.s32.totalorder %s6982_s23, %s6977_s5 }
  0x3d   : > { %p6980_p8 = pnand %p6979_p7, %p6978_p6 }
  0x3e   : > { %p6985_p0 = por %p6984_p13, %p6983_p10 }
  0x3f   : > { %p6981_p9 = pneg %p6980_p8 }
  0x41   : > { %p6986_p4 = pnand %p6985_p0, %p6981_p9 }
  0x43   : > { %6989 = shalt.err (!%p6986_p4)
}
  0x44   : > { %s9130_s19 = smov 8   ;;  %s9131_s30 = smov 128  }
  0x45   : > { %6643 = dma.hbm_to_vmem [thread:$0]  (!%p7283_p5), %s413_s25, 512, %s415_s2, %s403_s28, %s9131_s30, %s9131_s30, %s9130_s19  }
  0x46   : > { %435 = sbr.rel (%p7192_p3) target bundleno = 2365 (0x93d), region = 60 }
  0x4b   : > { %s7303_s11 = sand.u32 1, %s7079_s14  }
  0x4c   : > { %s6528_s5 = sshll.u32 %s7303_s11, 5  ;;  %s438_s12 = scalar_lea.sflag [#allocation3], %s7303_s11 }
  0x4d   : > { %s7309_s29 = scalar_lea.vmem [#allocation2], %s6528_s5 }
  0x4e   : > { %7050 = dma.done.wait (%p7265_p11), %s438_s12, 512  }
  0x4f   : > { %7052 = vsyncadd (%p7265_p11), %s438_s12, 4294966784 }
  0x50   : > { %7054 = dma.done.wait (%p51_p1), [#allocation6], 102400  }
  0x51   : > { %7056 = vsyncadd (%p51_p1), [#allocation6], 4294864896 }
  0x52   : > { %7058 = dma.done.wait (%p51_p1), [#allocation9], 2432  }
  0x53   : > { %7060 = vsyncadd (%p51_p1), [#allocation9], 4294964864 }
  0x54   : > { %7062 = dma.done.wait (%p51_p1), [#allocation12], 73728  }
  0x55   : > { %7064 = vsyncadd (%p51_p1), [#allocation12], 4294893568 }
  0x56   : > { %7066 = dma.done.wait (%p51_p1), [#allocation15], 65600  }
  0x57   : > { %7068 = vsyncadd (%p51_p1), [#allocation15], 4294901696  ;;  %s6538_s21 = sshll.u32 %s7187_s20, 2  ;;  %v692_v0 = vld [vmem:[#allocation5 + $0xf0] sm:$0xff]  ;;  %v543_v1 = vld [vmem:[#allocation10] sm:$0xff]  ;;  %vm544_vm0 = vcmask 64512  }
  0x58   : > { %p526_p3 = scmp.lt.s32.totalorder %s6538_s21, 15  ;;  %699 = vmatpush.msra.mxu3 %v692_v0  ;;  %572 = vmatpush.msra.mxu0 %v543_v1  ;;  %v690_v4 = vld [vmem:[#allocation5 + $0xe0] sm:$0xff]  ;;  %v693_v5 = vld [vmem:[#allocation5 + $0xf8] sm:$0xff]  ;;  %v688_v6 = vld [vmem:[#allocation5 + $0xd0] sm:$0xff]  ;;  %s523_s28 = scalar_lea.vmem [#allocation17], %s6528_s5 }
  0x59   : > { %v691_v7 = vld [vmem:[#allocation5 + $0xe8] sm:$0xff]  ;;  %v689_v8 = vld [vmem:[#allocation5 + $0xd8] sm:$0xff]  ;;  %v686_v9 = vld [vmem:[#allocation5 + $0xc0] sm:$0xff]  ;;  %s6562_s23 = sshll.u32 %s7187_s20, 5  ;;  %s6349_s30 = sshll.u32 %s523_s28, 4  ;;  %s6350_s30 = int_to_ptr.vmem [resolvable:$true] %s6349_s30 }
  0x5a   : > { %s9535_s21 = smov (!%p526_p3, %s6538_s21), 15  ;;  %728 = vmatpush.msrb.mxu0 %v693_v5  ;;  %700 = vmatpush.msra.mxu3 %v690_v4  ;;  %v687_v11 = vld [vmem:[#allocation5 + $0xc8] sm:$0xff]  ;;  %v684_v12 = vld [vmem:[#allocation5 + $0xb0] sm:$0xff]  ;;  %v685_v14 = vld [vmem:[#allocation5 + $0xb8] sm:$0xff]  ;;  %s6348_s19 = scalar_lea.hbm %s9094_s10, %s6562_s23 }
  0x5b   : > { %s6539_s27 = sshll.u32 %s9535_s21, 3  ;;  %v682_v15 = vld [vmem:[#allocation5 + $0xa0] sm:$0xff]  ;;  %v586_v16 = vld [vmem:[#allocation10 + $0x8] sm:$0xff]  ;;  %v680_v18 = vld [vmem:[#allocation5 + $0x90] sm:$0xff]  ;;  %s6351_s5 = sshll.u32 %s6348_s19, 4  ;;  %s6352_s5 = int_to_ptr.hbm [resolvable:$true] %s6351_s5 }
  0x5c   : > { %s7335_s4 = scalar_lea.vmem %s9085_s1, %s6539_s27  ;;  %729 = vmatpush.msrb.mxu0 %v691_v7  ;;  %701 = vmatpush.msra.mxu3 %v688_v6  ;;  %v683_v17 = vld [vmem:[#allocation5 + $0xa8] sm:$0xff]  ;;  %v681_v19 = vld [vmem:[#allocation5 + $0x98] sm:$0xff]  ;;  %v678_v20 = vld [vmem:[#allocation5 + $0x80] sm:$0xff]  ;;  %s6337_s12 = scalar_lea.sflag [#allocation4], %s7303_s11 }
  0x5d   : > { %v535_v2 = vld [vmem:[%s7335_s4] sm:$0xff]  ;;  %v536_v10 = vld [vmem:[%s7335_s4 + $0x8] sm:$0xff]  ;;  %602 = vmatpush.msra.mxu1 %v586_v16  ;;  %v537_v21 = vld [vmem:[%s7335_s4 + $0x10] sm:$0xff]  ;;  %s7025_s25 = scalar_lea.hbm %s9094_s10, 128 }
  0x5e   : > { %v7338_v3 = vsub.f32 1.0, %v535_v2  ;;  %730 = vmatpush.msrb.mxu0 %v689_v8  ;;  %702 = vmatpush.msra.mxu3 %v686_v9  ;;  %v7343_v13 = vsub.f32 1.0, %v536_v10  ;;  %v679_v22 = vld [vmem:[#allocation5 + $0x88] sm:$0xff]  ;;  %v676_v23 = vld [vmem:[#allocation5 + $0x70] sm:$0xff]  ;;  %v7350_v24 = vsub.f32 1.0, %v537_v21  ;;  %v677_v25 = vld [vmem:[#allocation5 + $0x78] sm:$0xff] }
  0x5f   : > { %v674_v26 = vld [vmem:[#allocation5 + $0x60] sm:$0xff]  ;;  %v675_v27 = vld [vmem:[#allocation5 + $0x68] sm:$0xff]  ;;  %v672_v28 = vld [vmem:[#allocation5 + $0x50] sm:$0xff] }
  0x60   : > { %6540 = vmatmul.msk.f32.vlgmr.msra.gmra.mxu0 %vm544_vm0, %v7338_v3  ;;  %703 = vmatpush.msra.mxu3 %v684_v12  ;;  %v673_v29 = vld [vmem:[#allocation5 + $0x58] sm:$0xff]  ;;  %v670_v30 = vld [vmem:[#allocation5 + $0x40] sm:$0xff]  ;;  %v671_v32 = vld [vmem:[#allocation5 + $0x48] sm:$0xff] }
  0x61   : > { %731 = vmatpush.msrb.mxu0 %v687_v11  ;;  %6544 = vmatmul.msk.f32.vlgmr.msra.gmra.mxu1 %vm544_vm0, %v7338_v3  ;;  %v538_v31 = vld [vmem:[%s7335_s4 + $0x18] sm:$0xff]  ;;  %v668_v33 = vld [vmem:[#allocation5 + $0x30] sm:$0xff]  ;;  %v666_v36 = vld [vmem:[#allocation5 + $0x20] sm:$0xff] }
  0x62   : > { %704 = vmatpush.msra.mxu3 %v682_v15  ;;  %v7357_v34 = vsub.f32 1.0, %v538_v31  ;;  %v669_v35 = vld [vmem:[#allocation5 + $0x38] sm:$0xff]  ;;  %v667_v37 = vld [vmem:[#allocation5 + $0x28] sm:$0xff]  ;;  %v664_v38 = vld [vmem:[#allocation5 + $0x10] sm:$0xff] }
  0x63   : > { %732 = vmatpush.msrb.mxu0 %v685_v14  ;;  %v665_v39 = vld [vmem:[#allocation5 + $0x18] sm:$0xff]  ;;  %v662_v40 = vld [vmem:[#allocation5] sm:$0xff]  ;;  %v663_v42 = vld [vmem:[#allocation5 + $0x8] sm:$0xff] }
  0x64   : > { %705 = vmatpush.msra.mxu3 %v680_v18  ;;  %v658_v41 = vld [vmem:[%s7309_s29] sm:$0xff]  ;;  %v659_v43 = vld [vmem:[%s7309_s29 + $0x8] sm:$0xff]  ;;  %v660_v44 = vld [vmem:[%s7309_s29 + $0x10] sm:$0xff] }
  0x65   : > { %733 = vmatpush.msrb.mxu0 %v683_v17  ;;  %v661_v45 = vld [vmem:[%s7309_s29 + $0x18] sm:$0xff]  ;;  %v616_v46 = vld [vmem:[#allocation10 + $0x10] sm:$0xff]  ;;  %v1509_v47 = vld [vmem:[#allocation7 + $0x1740] sm:$0xff]  ;;  %s7019_s29 = sshra.s32 %s6352_s5, 4  ;;  %s7020_s29 = int_to_ptr.hbm [resolvable:$true] %s7019_s29 }
  0x66   : > { %706 = vmatpush.msra.mxu3 %v678_v20  ;;  %v1510_v48 = vld [vmem:[#allocation7 + $0x1748] sm:$0xff]  ;;  %632 = vmatpush.msra.mxu2 %v616_v46  ;;  %v1485_v49 = vld [vmem:[#allocation7 + $0x1680] sm:$0xff]  ;;  %v1511_v46 = vld [vmem:[#allocation7 + $0x1750] sm:$0xff]  ;;  %s7021_s20 = scalar_lea.hbm %s7020_s29, 32  ;;  %p7026_p6 = scmp.lt.s32.totalorder %s7020_s29, %s9094_s10 }
  0x67   : > { %734 = vmatpush.msrb.mxu0 %v681_v19  ;;  %6548 = vmatmul.msk.f32.vlgmr.msra.gmra.mxu2 %vm544_vm0, %v7338_v3  ;;  %v1486_v50 = vld [vmem:[#allocation7 + $0x1688] sm:$0xff]  ;;  %v1125_v51 = vld [vmem:[#allocation7 + $0xb40] sm:$0xff]  ;;  %p7022_p1 = scmp.ne.s32.totalorder %s7020_s29, %s7021_s20  ;;  %p7027_p7 = scmp.lt.s32.totalorder %s7025_s25, %s7021_s20 }
  0x68   : > { %6541 = vmatmul.msk.f32.gmra.mxu0 %vm544_vm0, %v7343_v13  ;;  %707 = vmatpush.msra.mxu3 %v676_v23  ;;  %v1126_v52 = vld [vmem:[#allocation7 + $0xb48] sm:$0xff]  ;;  %v1101_v53 = vld [vmem:[#allocation7 + $0xa80] sm:$0xff] }
  0x69   : > { %735 = vmatpush.msrb.mxu0 %v679_v22  ;;  %6545 = vmatmul.msk.f32.gmra.mxu1 %vm544_vm0, %v7343_v13  ;;  %v1461_v54 = vld [vmem:[#allocation7 + $0x15c0] sm:$0xff]  ;;  %v1462_v55 = vld [vmem:[#allocation7 + $0x15c8] sm:$0xff]  ;;  %p7023_p11 = pnand %p7022_p1, %p7269_p12  ;;  %p7028_p8 = por %p7027_p7, %p7026_p6 }
  0x6a   : > { %708 = vmatpush.msra.mxu3 %v674_v26  ;;  %1562 = vmatpush.msrb.mxu2 %v1509_v47  ;;  %v1102_v56 = vld [vmem:[#allocation7 + $0xa88] sm:$0xff]  ;;  %v1077_v57 = vld [vmem:[#allocation7 + $0x9c0] sm:$0xff]  ;;  %v1512_v47 = vld [vmem:[#allocation7 + $0x1758] sm:$0xff] }
  0x6b   : > { %736 = vmatpush.msrb.mxu0 %v677_v25  ;;  %1533 = vmatpush.msrb.mxu1 %v1125_v51  ;;  %v1437_v58 = vld [vmem:[#allocation7 + $0x1500] sm:$0xff]  ;;  %v1438_v59 = vld [vmem:[#allocation7 + $0x1508] sm:$0xff]  ;;  %v1488_v51 = vld [vmem:[#allocation7 + $0x1698] sm:$0xff]  ;;  %p7024_p5 = pneg %p7023_p11 }
  0x6c   : > { %709 = vmatpush.msra.mxu3 %v672_v28  ;;  %1563 = vmatpush.msrb.mxu2 %v1485_v49  ;;  %v1078_v60 = vld [vmem:[#allocation7 + $0x9c8] sm:$0xff]  ;;  %v1413_v61 = vld [vmem:[#allocation7 + $0x1440] sm:$0xff] }
  0x6d   : > { %737 = vmatpush.msrb.mxu0 %v675_v27  ;;  %1534 = vmatpush.msrb.mxu1 %v1101_v53  ;;  %v1053_v62 = vld [vmem:[#allocation7 + $0x900] sm:$0xff]  ;;  %v1414_v63 = vld [vmem:[#allocation7 + $0x1448] sm:$0xff]  ;;  %v1127_v53 = vld [vmem:[#allocation7 + $0xb50] sm:$0xff]  ;;  %p7029_p9 = pnand %p7028_p8, %p7024_p5 }
  0x6e   : > { %710 = vmatpush.msra.mxu3 %v670_v30  ;;  %1564 = vmatpush.msrb.mxu2 %v1461_v54  ;;  %v1054_v0 = vld [vmem:[#allocation7 + $0x908] sm:$0xff]  ;;  %v1389_v1 = vld [vmem:[#allocation7 + $0x1380] sm:$0xff]  ;;  %v1128_v54 = vld [vmem:[#allocation7 + $0xb58] sm:$0xff] }
  0x6f   : > { %738 = vmatpush.msrb.mxu0 %v673_v29  ;;  %1535 = vmatpush.msrb.mxu1 %v1077_v57  ;;  %v1390_v2 = vld [vmem:[#allocation7 + $0x1388] sm:$0xff]  ;;  %v1029_v3 = vld [vmem:[#allocation7 + $0x840] sm:$0xff]  ;;  %v1103_v57 = vld [vmem:[#allocation7 + $0xa90] sm:$0xff] }
  0x70   : > { %6542 = vmatmul.msk.f32.gmra.mxu0 %vm544_vm0, %v7350_v24  ;;  %711 = vmatpush.msra.mxu3 %v668_v33  ;;  %v1030_v4 = vld [vmem:[#allocation7 + $0x848] sm:$0xff]  ;;  %v1005_v5 = vld [vmem:[#allocation7 + $0x780] sm:$0xff] }
  0x71   : > { %739 = vmatpush.msrb.mxu0 %v671_v32  ;;  %6546 = vmatmul.msk.f32.gmra.mxu1 %vm544_vm0, %v7350_v24  ;;  %v1365_v6 = vld [vmem:[#allocation7 + $0x12c0] sm:$0xff]  ;;  %v1366_v7 = vld [vmem:[#allocation7 + $0x12c8] sm:$0xff] }
  0x72   : > { %712 = vmatpush.msra.mxu3 %v666_v36  ;;  %1565 = vmatpush.msrb.mxu2 %v1437_v58  ;;  %v1006_v8 = vld [vmem:[#allocation7 + $0x788] sm:$0xff]  ;;  %v981_v9 = vld [vmem:[#allocation7 + $0x6c0] sm:$0xff]  ;;  %v1104_v58 = vld [vmem:[#allocation7 + $0xa98] sm:$0xff] }
  0x73   : > { %740 = vmatpush.msrb.mxu0 %v669_v35  ;;  %6549 = vmatmul.msk.f32.gmra.mxu2 %vm544_vm0, %v7343_v13  ;;  %v1341_v10 = vld [vmem:[#allocation7 + $0x1200] sm:$0xff]  ;;  %v1342_v11 = vld [vmem:[#allocation7 + $0x1208] sm:$0xff] }
  0x74   : > { %713 = vmatpush.msra.mxu3 %v664_v38  ;;  %1566 = vmatpush.msrb.mxu2 %v1413_v61  ;;  %v982_v12 = vld [vmem:[#allocation7 + $0x6c8] sm:$0xff]  ;;  %v957_v13 = vld [vmem:[#allocation7 + $0x600] sm:$0xff]  ;;  %v1079_v61 = vld [vmem:[#allocation7 + $0x9d0] sm:$0xff] }
  0x75   : > { %741 = vmatpush.msrb.mxu0 %v667_v37  ;;  %1536 = vmatpush.msrb.mxu1 %v1053_v62  ;;  %v1317_v14 = vld [vmem:[#allocation7 + $0x1140] sm:$0xff]  ;;  %v1318_v15 = vld [vmem:[#allocation7 + $0x1148] sm:$0xff]  ;;  %v1080_v62 = vld [vmem:[#allocation7 + $0x9d8] sm:$0xff] }
  0x76   : > { %714 = vmatpush.msra.mxu3 %v662_v40  ;;  %1567 = vmatpush.msrb.mxu2 %v1389_v1  ;;  %v958_v16 = vld [vmem:[#allocation7 + $0x608] sm:$0xff]  ;;  %v1293_v17 = vld [vmem:[#allocation7 + $0x1080] sm:$0xff]  ;;  %v1055_v1 = vld [vmem:[#allocation7 + $0x910] sm:$0xff] }
  0x77   : > { %742 = vmatpush.msrb.mxu0 %v665_v39  ;;  %715 = vmatmul.f32.vlgmr.msra.gmra.mxu3 %v658_v41  ;;  %v1294_v18 = vld [vmem:[#allocation7 + $0x1088] sm:$0xff]  ;;  %v933_v19 = vld [vmem:[#allocation7 + $0x540] sm:$0xff] }
  0x78   : > { %6543 = vmatmul.msk.f32.gmra.mxu0 %vm544_vm0, %v7357_v34  ;;  %1591 = vmatpush.msrb.mxu3 %v1126_v52  ;;  %v934_v20 = vld [vmem:[#allocation7 + $0x548] sm:$0xff]  ;;  %v909_v21 = vld [vmem:[#allocation7 + $0x480] sm:$0xff] }
  0x79   : > { %743 = vmatpush.msrb.mxu0 %v663_v42  ;;  %6547 = vmatmul.msk.f32.gmra.mxu1 %vm544_vm0, %v7357_v34  ;;  %v1269_v22 = vld [vmem:[#allocation7 + $0xfc0] sm:$0xff]  ;;  %v1270_v23 = vld [vmem:[#allocation7 + $0xfc8] sm:$0xff] }
  0x7a   : > { %1592 = vmatpush.msrb.mxu3 %v1102_v56  ;;  %1537 = vmatpush.msrb.mxu1 %v1029_v3  ;;  %v910_v25 = vld [vmem:[#allocation7 + $0x488] sm:$0xff]  ;;  %v885_v26 = vld [vmem:[#allocation7 + $0x3c0] sm:$0xff]  ;;  %v1464_v56 = vld [vmem:[#allocation7 + $0x15d8] sm:$0xff] }
  0x7b   : > { %1620 = vmatpush.msra.mxu0 %v1510_v48  ;;  %1568 = vmatpush.msrb.mxu2 %v1365_v6  ;;  %v1245_v27 = vld [vmem:[#allocation7 + $0xf00] sm:$0xff]  ;;  %v886_v28 = vld [vmem:[#allocation7 + $0x3c8] sm:$0xff]  ;;  %v1391_v3 = vld [vmem:[#allocation7 + $0x1390] sm:$0xff] }
  0x7c   : > { %1593 = vmatpush.msrb.mxu3 %v1078_v60  ;;  %1538 = vmatpush.msrb.mxu1 %v1005_v5  ;;  %v861_v29 = vld [vmem:[#allocation7 + $0x300] sm:$0xff]  ;;  %v1222_v31 = vld [vmem:[#allocation7 + $0xe48] sm:$0xff]  ;;  %v1440_v60 = vld [vmem:[#allocation7 + $0x1518] sm:$0xff] }
  0x7d   : > { %1621 = vmatpush.msra.mxu0 %v1486_v50  ;;  %1569 = vmatpush.msrb.mxu2 %v1341_v10  ;;  %v1221_v30 = vld [vmem:[#allocation7 + $0xe40] sm:$0xff]  ;;  %v862_v32 = vld [vmem:[#allocation7 + $0x308] sm:$0xff]  ;;  %v1487_v50 = vld [vmem:[#allocation7 + $0x1690] sm:$0xff] }
  0x7e   : > { %1594 = vmatpush.msrb.mxu3 %v1054_v0  ;;  %1539 = vmatpush.msrb.mxu1 %v981_v9  ;;  %v1197_v33 = vld [vmem:[#allocation7 + $0xd80] sm:$0xff]  ;;  %v1198_v35 = vld [vmem:[#allocation7 + $0xd88] sm:$0xff]  ;;  %v1416_v0 = vld [vmem:[#allocation7 + $0x1458] sm:$0xff] }
  0x7f   : > { %718 = vmatmul.f32.gmra.mxu3 %v659_v43  ;;  %1622 = vmatpush.msra.mxu0 %v1462_v55  ;;  %v837_v37 = vld [vmem:[#allocation7 + $0x240] sm:$0xff]  ;;  %v838_v38 = vld [vmem:[#allocation7 + $0x248] sm:$0xff]  ;;  %v1463_v55 = vld [vmem:[#allocation7 + $0x15d0] sm:$0xff] }
  0x80   : > { %744 = vmatmul.f32.vlgmr.msrb.gmra.mxu0 %v658_v41  ;;  %1595 = vmatpush.msrb.mxu3 %v1030_v4  ;;  %v1173_v39 = vld [vmem:[#allocation7 + $0xcc0] sm:$0xff]  ;;  %v1174_v40 = vld [vmem:[#allocation7 + $0xcc8] sm:$0xff]  ;;  %v1392_v4 = vld [vmem:[#allocation7 + $0x1398] sm:$0xff] }
  0x81   : > { %1623 = vmatpush.msra.mxu0 %v1438_v59  ;;  %6550 = vmatmul.msk.f32.gmra.mxu2 %vm544_vm0, %v7350_v24  ;;  %v1246_v24 = vld [vmem:[#allocation7 + $0xf08] sm:$0xff]  ;;  %v813_v41 = vld [vmem:[#allocation7 + $0x180] sm:$0xff]  ;;  %v1439_v59 = vld [vmem:[#allocation7 + $0x1510] sm:$0xff] }
  0x82   : > { %1596 = vmatpush.msrb.mxu3 %v1006_v8  ;;  %1540 = vmatpush.msrb.mxu1 %v957_v13  ;;  %v814_v42 = vld [vmem:[#allocation7 + $0x188] sm:$0xff]  ;;  %v765_v48 = vld [vmem:[#allocation7] sm:$0xff]  ;;  %v1031_v6 = vld [vmem:[#allocation7 + $0x850] sm:$0xff] }
  0x83   : > { %1624 = vmatpush.msra.mxu0 %v1414_v63  ;;  %1570 = vmatpush.msrb.mxu2 %v1317_v14  ;;  %v766_v49 = vld [vmem:[#allocation7 + $0x8] sm:$0xff]  ;;  %v1415_v63 = vld [vmem:[#allocation7 + $0x1450] sm:$0xff]  ;;  %v1368_v9 = vld [vmem:[#allocation7 + $0x12d8] sm:$0xff] }
  0x84   : > { %1597 = vmatpush.msrb.mxu3 %v982_v12  ;;  %1541 = vmatpush.msrb.mxu1 %v933_v19  ;;  %v1367_v8 = vld [vmem:[#allocation7 + $0x12d0] sm:$0xff]  ;;  %v1344_v13 = vld [vmem:[#allocation7 + $0x1218] sm:$0xff] }
  0x85   : > { %1625 = vmatpush.msra.mxu0 %v1390_v2  ;;  %1571 = vmatpush.msrb.mxu2 %v1293_v17  ;;  %v1056_v2 = vld [vmem:[#allocation7 + $0x918] sm:$0xff]  ;;  %v1007_v10 = vld [vmem:[#allocation7 + $0x790] sm:$0xff] }
  0x86   : > { %1598 = vmatpush.msrb.mxu3 %v958_v16  ;;  %1542 = vmatpush.msrb.mxu1 %v909_v21  ;;  %v1343_v12 = vld [vmem:[#allocation7 + $0x1210] sm:$0xff]  ;;  %v1320_v17 = vld [vmem:[#allocation7 + $0x1158] sm:$0xff] }
  0x87   : > { %721 = vmatmul.f32.gmra.mxu3 %v660_v44  ;;  %1626 = vmatpush.msra.mxu0 %v1366_v7  ;;  %v1032_v7 = vld [vmem:[#allocation7 + $0x858] sm:$0xff]  ;;  %v983_v14 = vld [vmem:[#allocation7 + $0x6d0] sm:$0xff] }
  0x88   : > { %747 = vmatmul.f32.gmra.mxu0 %v659_v43  ;;  %1599 = vmatpush.msrb.mxu3 %v934_v20  ;;  %v1150_v43 = vld [vmem:[#allocation7 + $0xc08] sm:$0xff]  ;;  %v1319_v16 = vld [vmem:[#allocation7 + $0x1150] sm:$0xff]  ;;  %v960_v19 = vld [vmem:[#allocation7 + $0x618] sm:$0xff] }
  0x89   : > { %1627 = vmatpush.msra.mxu0 %v1342_v11  ;;  %1572 = vmatpush.msrb.mxu2 %v1269_v22  ;;  %v1008_v11 = vld [vmem:[#allocation7 + $0x798] sm:$0xff]  ;;  %v1295_v20 = vld [vmem:[#allocation7 + $0x1090] sm:$0xff] }
  0x8a   : > { %1600 = vmatpush.msrb.mxu3 %v910_v25  ;;  %1543 = vmatpush.msrb.mxu1 %v885_v26  ;;  %v1296_v21 = vld [vmem:[#allocation7 + $0x1098] sm:$0xff]  ;;  %v1271_v26 = vld [vmem:[#allocation7 + $0xfd0] sm:$0xff] }
  0x8b   : > { %1628 = vmatpush.msra.mxu0 %v1318_v15  ;;  %1573 = vmatpush.msrb.mxu2 %v1245_v27  ;;  %v984_v15 = vld [vmem:[#allocation7 + $0x6d8] sm:$0xff] }
  0x8c   : > { %6551 = vmatmul.msk.f32.gmra.mxu2 %vm544_vm0, %v7357_v34  ;;  %1601 = vmatpush.msrb.mxu3 %v886_v28  ;;  %v1149_v34 = vld [vmem:[#allocation7 + $0xc00] sm:$0xff]  ;;  %v936_v25 = vld [vmem:[#allocation7 + $0x558] sm:$0xff]  ;;  %v911_v28 = vld [vmem:[#allocation7 + $0x490] sm:$0xff] }
  0x8d   : > { %1629 = vmatpush.msra.mxu0 %v1294_v18  ;;  %1544 = vmatpush.msrb.mxu1 %v861_v29  ;;  %v959_v18 = vld [vmem:[#allocation7 + $0x610] sm:$0xff]  ;;  %v1272_v27 = vld [vmem:[#allocation7 + $0xfd8] sm:$0xff] }
  0x8e   : > { %1574 = vmatpush.msrb.mxu2 %v1221_v30  ;;  %1602 = vmatpush.msrb.mxu3 %v862_v32  ;;  %v912_v29 = vld [vmem:[#allocation7 + $0x498] sm:$0xff]  ;;  %v1247_v30 = vld [vmem:[#allocation7 + $0xf10] sm:$0xff] }
  0x8f   : > { %724 = vmatmul.f32.gmra.mxu3 %v661_v45  ;;  %1630 = vmatpush.msra.mxu0 %v1270_v23  ;;  %v935_v23 = vld [vmem:[#allocation7 + $0x550] sm:$0xff] }
  0x90   : > { %750 = vmatmul.f32.gmra.mxu0 %v660_v44  ;;  %1545 = vmatpush.msrb.mxu1 %v837_v37  ;;  %v789_v44 = vld [vmem:[#allocation7 + $0xc0] sm:$0xff]  ;;  %v887_v32 = vld [vmem:[#allocation7 + $0x3d0] sm:$0xff] }
  0x91   : > { %1631 = vmatpush.msra.mxu0 %v1246_v24  ;;  %1575 = vmatpush.msrb.mxu2 %v1197_v33  ;;  %v532_v24 = vld [vmem:[#allocation16] sm:$0x3]  ;;  %v1223_v37 = vld [vmem:[#allocation7 + $0xe50] sm:$0xff] }
  0x92   : > { %1603 = vmatpush.msrb.mxu3 %v838_v38  ;;  %1546 = vmatpush.msrb.mxu1 %v813_v41  ;;  %v888_v33 = vld [vmem:[#allocation7 + $0x3d8] sm:$0xff]  ;;  %v1199_v41 = vld [vmem:[#allocation7 + $0xd90] sm:$0xff] }
  0x93   : > { %1632 = vmatpush.msra.mxu0 %v1222_v31  ;;  %1576 = vmatpush.msrb.mxu2 %v1173_v39  ;;  %v1248_v31 = vld [vmem:[#allocation7 + $0xf18] sm:$0xff]  ;;  %v863_v39 = vld [vmem:[#allocation7 + $0x310] sm:$0xff] }
  0x94   : > { %1604 = vmatpush.msrb.mxu3 %v814_v42  ;;  %1547 = vmatpush.msrb.mxu1 %v789_v44  ;;  %v1224_v38 = vld [vmem:[#allocation7 + $0xe58] sm:$0xff]  ;;  %v839_v44 = vld [vmem:[#allocation7 + $0x250] sm:$0xff] }
  0x95   : > { %1633 = vmatpush.msra.mxu0 %v1198_v35  ;;  %1577 = vmatpush.msrb.mxu2 %v1149_v34  ;;  %v7385_v35 = vperm.slane %v532_v24, 1  ;;  %v1200_v42 = vld [vmem:[#allocation7 + $0xd98] sm:$0xff] }
  0x96   : > { %1548 = vmatpush.msrb.mxu1 %v765_v48  ;;  %v1175_v48 = vld [vmem:[#allocation7 + $0xcd0] sm:$0xff] }
  0x97   : > { %1634 = vmatpush.msra.mxu0 %v1174_v40  ;;  %1678 = vmatpush.msra.mxu2 %v1511_v46  ;;  %v864_v40 = vld [vmem:[#allocation7 + $0x318] sm:$0xff]  ;;  %v815_v46 = vld [vmem:[#allocation7 + $0x190] sm:$0xff] }
  0x98   : > { %753 = vmatmul.f32.gmra.mxu0 %v661_v45  ;;  %v790_v45 = vld [vmem:[#allocation7 + $0xc8] sm:$0xff]  ;;  %1649 = vmatpush.msra.mxu1 %v1127_v53  ;;  %v816_v53 = vld [vmem:[#allocation7 + $0x198] sm:$0xff] }
  0x99   : > { %1635 = vmatpush.msra.mxu0 %v1150_v43  ;;  %1605 = vmatpush.msrb.mxu3 %v790_v45  ;;  %v7387_v43 = vperm.slane %v532_v24, 0  ;;  %v840_v45 = vld [vmem:[#allocation7 + $0x258] sm:$0xff]  ;;  %v1058_v24 = vld [vmem:[#allocation7 + $0x928] sm:$0xff] }
  0x9a   : > { %1679 = vmatpush.msra.mxu2 %v1487_v50  ;;  %1650 = vmatpush.msra.mxu1 %v1103_v57  ;;  %v1152_v57 = vld [vmem:[#allocation7 + $0xc18] sm:$0xff] }
  0x9b   : > { %1736 = vmatpush.msrb.mxu0 %v1512_v47  ;;  %1606 = vmatpush.msrb.mxu3 %v766_v49  ;;  %v1176_v49 = vld [vmem:[#allocation7 + $0xcd8] sm:$0xff] }
  0x9c   : > { %1680 = vmatpush.msra.mxu2 %v1463_v55  ;;  %1651 = vmatpush.msra.mxu1 %v1079_v61  ;;  %v1513_v61 = vld [vmem:[#allocation7 + $0x1760] sm:$0xff] }
  0x9d   : > { %1737 = vmatpush.msrb.mxu0 %v1488_v51  ;;  %1707 = vmatpush.msra.mxu3 %v1128_v54  ;;  %v791_v54 = vld [vmem:[#allocation7 + $0xd0] sm:$0xff] }
  0x9e   : > { %1681 = vmatpush.msra.mxu2 %v1439_v59  ;;  %1652 = vmatpush.msra.mxu1 %v1055_v1  ;;  %v792_v59 = vld [vmem:[#allocation7 + $0xd8] sm:$0xff]  ;;  %v1129_v1 = vld [vmem:[#allocation7 + $0xb60] sm:$0xff] }
  0x9f   : > { %1738 = vmatpush.msrb.mxu0 %v1464_v56  ;;  %1708 = vmatpush.msra.mxu3 %v1104_v58  ;;  %v1151_v56 = vld [vmem:[#allocation7 + $0xc10] sm:$0xff] }
  0xa0   : > { %1682 = vmatpush.msra.mxu2 %v1415_v63  ;;  %1653 = vmatpush.msra.mxu1 %v1031_v6 }
  0xa1   : > { %1739 = vmatpush.msrb.mxu0 %v1440_v60  ;;  %1709 = vmatpush.msra.mxu3 %v1080_v62  ;;  %v767_v60 = vld [vmem:[#allocation7 + $0x10] sm:$0xff]  ;;  %v1514_v62 = vld [vmem:[#allocation7 + $0x1768] sm:$0xff] }
  0xa2   : > { %1683 = vmatpush.msra.mxu2 %v1391_v3  ;;  %1654 = vmatpush.msra.mxu1 %v1007_v10  ;;  %v1489_v3 = vld [vmem:[#allocation7 + $0x16a0] sm:$0xff] }
  0xa3   : > { %1740 = vmatpush.msrb.mxu0 %v1416_v0  ;;  %1710 = vmatpush.msra.mxu3 %v1056_v2  ;;  %v768_v0 = vld [vmem:[#allocation7 + $0x18] sm:$0xff] }
  0xa4   : > { %1684 = vmatpush.msra.mxu2 %v1367_v8  ;;  %1655 = vmatpush.msra.mxu1 %v983_v14  ;;  %v1130_v8 = vld [vmem:[#allocation7 + $0xb68] sm:$0xff] }
  0xa5   : > { %1741 = vmatpush.msrb.mxu0 %v1392_v4  ;;  %1711 = vmatpush.msra.mxu3 %v1032_v7  ;;  %v1490_v4 = vld [vmem:[#allocation7 + $0x16a8] sm:$0xff] }
  0xa6   : > { %1685 = vmatpush.msra.mxu2 %v1343_v12  ;;  %1656 = vmatpush.msra.mxu1 %v959_v18  ;;  %v1466_v12 = vld [vmem:[#allocation7 + $0x15e8] sm:$0xff] }
  0xa7   : > { %1742 = vmatpush.msrb.mxu0 %v1368_v9  ;;  %1712 = vmatpush.msra.mxu3 %v1008_v11  ;;  %v1105_v9 = vld [vmem:[#allocation7 + $0xaa0] sm:$0xff]  ;;  %v1106_v14 = vld [vmem:[#allocation7 + $0xaa8] sm:$0xff] }
  0xa8   : > { %1686 = vmatpush.msra.mxu2 %v1319_v16  ;;  %1657 = vmatpush.msra.mxu1 %v935_v23  ;;  %v1465_v11 = vld [vmem:[#allocation7 + $0x15e0] sm:$0xff] }
  0xa9   : > { %1743 = vmatpush.msrb.mxu0 %v1344_v13  ;;  %1713 = vmatpush.msra.mxu3 %v984_v15  ;;  %v1081_v15 = vld [vmem:[#allocation7 + $0x9e0] sm:$0xff] }
  0xaa   : > { %1687 = vmatpush.msra.mxu2 %v1295_v20  ;;  %1658 = vmatpush.msra.mxu1 %v911_v28  ;;  %v1441_v16 = vld [vmem:[#allocation7 + $0x1520] sm:$0xff] }
  0xab   : > { %1744 = vmatpush.msrb.mxu0 %v1320_v17  ;;  %1714 = vmatpush.msra.mxu3 %v960_v19  ;;  %v1442_v17 = vld [vmem:[#allocation7 + $0x1528] sm:$0xff]  ;;  %v1057_v20 = vld [vmem:[#allocation7 + $0x920] sm:$0xff] }
  0xac   : > { %1688 = vmatpush.msra.mxu2 %v1271_v26  ;;  %1659 = vmatpush.msra.mxu1 %v887_v32  ;;  %v1082_v19 = vld [vmem:[#allocation7 + $0x9e8] sm:$0xff]  ;;  %v1417_v23 = vld [vmem:[#allocation7 + $0x1460] sm:$0xff] }
  0xad   : > { %1745 = vmatpush.msrb.mxu0 %v1296_v21  ;;  %1715 = vmatpush.msra.mxu3 %v936_v25  ;;  %v1418_v25 = vld [vmem:[#allocation7 + $0x1468] sm:$0xff]  ;;  %v1033_v28 = vld [vmem:[#allocation7 + $0x860] sm:$0xff] }
  0xae   : > { %1689 = vmatpush.msra.mxu2 %v1247_v30  ;;  %1660 = vmatpush.msra.mxu1 %v863_v39  ;;  %v1393_v30 = vld [vmem:[#allocation7 + $0x13a0] sm:$0xff]  ;;  %v1370_v39 = vld [vmem:[#allocation7 + $0x12e8] sm:$0xff] }
  0xaf   : > { %1746 = vmatpush.msrb.mxu0 %v1272_v27  ;;  %1716 = vmatpush.msra.mxu3 %v912_v29 }
  0xb0   : > { %1690 = vmatpush.msra.mxu2 %v1223_v37  ;;  %1661 = vmatpush.msra.mxu1 %v839_v44  ;;  %v1009_v37 = vld [vmem:[#allocation7 + $0x7a0] sm:$0xff] }
  0xb1   : > { %1747 = vmatpush.msrb.mxu0 %v1248_v31  ;;  %1717 = vmatpush.msra.mxu3 %v888_v33  ;;  %v1394_v31 = vld [vmem:[#allocation7 + $0x13a8] sm:$0xff]  ;;  %v1345_v44 = vld [vmem:[#allocation7 + $0x1220] sm:$0xff] }
  0xb2   : > { %1691 = vmatpush.msra.mxu2 %v1199_v41  ;;  %1662 = vmatpush.msra.mxu1 %v815_v46  ;;  %v1034_v33 = vld [vmem:[#allocation7 + $0x868] sm:$0xff] }
  0xb3   : > { %1748 = vmatpush.msrb.mxu0 %v1224_v38  ;;  %1718 = vmatpush.msra.mxu3 %v864_v40  ;;  %v1369_v38 = vld [vmem:[#allocation7 + $0x12e0] sm:$0xff]  ;;  %v1010_v41 = vld [vmem:[#allocation7 + $0x7a8] sm:$0xff] }
  0xb4   : > { %1692 = vmatpush.msra.mxu2 %v1175_v48  ;;  %1663 = vmatpush.msra.mxu1 %v791_v54  ;;  %v986_v48 = vld [vmem:[#allocation7 + $0x6e8] sm:$0xff] }
  0xb5   : > { %1749 = vmatpush.msrb.mxu0 %v1200_v42  ;;  %1719 = vmatpush.msra.mxu3 %v840_v45  ;;  %v985_v42 = vld [vmem:[#allocation7 + $0x6e0] sm:$0xff]  ;;  %v1346_v45 = vld [vmem:[#allocation7 + $0x1228] sm:$0xff] }
  0xb6   : > { %1693 = vmatpush.msra.mxu2 %v1151_v56  ;;  %1664 = vmatpush.msra.mxu1 %v767_v60  ;;  %v1322_v54 = vld [vmem:[#allocation7 + $0x1168] sm:$0xff]  ;;  %v937_v56 = vld [vmem:[#allocation7 + $0x560] sm:$0xff] }
  0xb7   : > { %1750 = vmatpush.msrb.mxu0 %v1176_v49  ;;  %1720 = vmatpush.msra.mxu3 %v816_v53  ;;  %v961_v49 = vld [vmem:[#allocation7 + $0x620] sm:$0xff] }
  0xb8   : > { %v1321_v53 = vld [vmem:[#allocation7 + $0x1160] sm:$0xff] }
  0xb9   : > { %1751 = vmatpush.msrb.mxu0 %v1152_v57  ;;  %1721 = vmatpush.msra.mxu3 %v792_v59  ;;  %v1297_v57 = vld [vmem:[#allocation7 + $0x10a0] sm:$0xff]  ;;  %v1298_v59 = vld [vmem:[#allocation7 + $0x10a8] sm:$0xff] }
  0xba   : > { %v913_v60 = vld [vmem:[#allocation7 + $0x4a0] sm:$0xff] }
  0xbb   : > { %1722 = vmatpush.msra.mxu3 %v768_v0  ;;  %v889_v0 = vld [vmem:[#allocation7 + $0x3e0] sm:$0xff] }
  0xdd   : > { %v7377_v36 = vpop.f32.mrf.mxu0 }
  0xe5   : > { %v7379_v52 = vpop.f32.mrf.mxu0 }
  0xed   : > { %v7381_v5 = vpop.f32.mrf.mxu0 }
  0xee   : > { %9132 = vst [vmem:[#allocation24_spill] sm:$0xff] %v7381_v5 }
  0xf5   : > { %v7383_v22 = vpop.f32.mrf.mxu0 }
  0xf6   : > { %9133 = vst [vmem:[#allocation25_spill] sm:$0xff] %v7383_v22  ;;  %v1043_v22 = vld [vmem:[#allocation7 + $0x8b0] sm:$0xff] }
  0xfa   : > { %v716_v51 = vpop.f32.mrf.mxu3 }
  0xfb   : > { %v717_v55 = vadd.f32 %v716_v51, %v7387_v43 }
  0xfd   : > { %v745_v34 = vpop.f32.mrf.mxu0  ;;  %v7395_v58 = vmax.f32 %v717_v55, 0.0  ;;  %v962_v55 = vld [vmem:[#allocation7 + $0x628] sm:$0xff] }
  0xfe   : > { %v746_v47 = vadd.f32 %v745_v34, %v7385_v35 }
  0xff   : > { %1549 = vmatmul.f32.vlgmr.msrb.gmra.mxu1 %v7395_v58  ;;  %1607 = vmatmul.f32.vlgmr.msrb.gmra.mxu3 %v7395_v58 }
 0x100   : > { %v7390_v50 = vmax.f32 %v746_v47, 0.0  ;;  %1765 = vmatpush.msrb.mxu1 %v1129_v1  ;;  %1823 = vmatpush.msrb.mxu3 %v1130_v8  ;;  %v1249_v1 = vld [vmem:[#allocation7 + $0xf20] sm:$0xff]  ;;  %v1226_v8 = vld [vmem:[#allocation7 + $0xe68] sm:$0xff] }
 0x102   : > { %1578 = vmatmul.f32.vlgmr.msrb.gmra.mxu2 %v7390_v50  ;;  %1636 = vmatmul.f32.vlgmr.msra.gmra.mxu0 %v7390_v50  ;;  %v719_v7 = vpop.f32.mrf.mxu3 }
 0x103   : > { %1794 = vmatpush.msrb.mxu2 %v1513_v61  ;;  %1852 = vmatpush.msra.mxu0 %v1514_v62  ;;  %v720_v10 = vadd.f32 %v719_v7, %v7387_v43  ;;  %v1273_v61 = vld [vmem:[#allocation7 + $0xfe0] sm:$0xff]  ;;  %v1274_v62 = vld [vmem:[#allocation7 + $0xfe8] sm:$0xff] }
 0x104   : > { %1766 = vmatpush.msrb.mxu1 %v1105_v9  ;;  %1824 = vmatpush.msrb.mxu3 %v1106_v14  ;;  %v1225_v7 = vld [vmem:[#allocation7 + $0xe60] sm:$0xff]  ;;  %v866_v9 = vld [vmem:[#allocation7 + $0x328] sm:$0xff] }
 0x105   : > { %v748_v63 = vpop.f32.mrf.mxu0  ;;  %1795 = vmatpush.msrb.mxu2 %v1489_v3  ;;  %1853 = vmatpush.msra.mxu0 %v1490_v4  ;;  %v7405_v13 = vmax.f32 %v720_v10, 0.0  ;;  %v890_v3 = vld [vmem:[#allocation7 + $0x3e8] sm:$0xff]  ;;  %v865_v4 = vld [vmem:[#allocation7 + $0x320] sm:$0xff] }
 0x106   : > { %v749_v2 = vadd.f32 %v748_v63, %v7385_v35  ;;  %1767 = vmatpush.msrb.mxu1 %v1081_v15  ;;  %1825 = vmatpush.msrb.mxu3 %v1082_v19  ;;  %v914_v63 = vld [vmem:[#allocation7 + $0x4a8] sm:$0xff]  ;;  %v841_v10 = vld [vmem:[#allocation7 + $0x260] sm:$0xff] }
 0x107   : > { %1796 = vmatpush.msrb.mxu2 %v1465_v11  ;;  %1854 = vmatpush.msra.mxu0 %v1466_v12  ;;  %v1201_v11 = vld [vmem:[#allocation7 + $0xda0] sm:$0xff]  ;;  %v1202_v12 = vld [vmem:[#allocation7 + $0xda8] sm:$0xff] }
 0x108   : > { %v7400_v6 = vmax.f32 %v749_v2, 0.0  ;;  %1552 = vmatmul.f32.gmra.mxu1 %v7405_v13  ;;  %1610 = vmatmul.f32.gmra.mxu3 %v7405_v13  ;;  %v1250_v2 = vld [vmem:[#allocation7 + $0xf28] sm:$0xff]  ;;  %v817_v15 = vld [vmem:[#allocation7 + $0x1a0] sm:$0xff] }
 0x109   : > { %1797 = vmatpush.msrb.mxu2 %v1441_v16  ;;  %1855 = vmatpush.msra.mxu0 %v1442_v17  ;;  %v842_v14 = vld [vmem:[#allocation7 + $0x268] sm:$0xff]  ;;  %v1177_v16 = vld [vmem:[#allocation7 + $0xce0] sm:$0xff] }
 0x10a   : > { %1581 = vmatmul.f32.gmra.mxu2 %v7400_v6  ;;  %1639 = vmatmul.f32.gmra.mxu0 %v7400_v6  ;;  %v722_v27 = vpop.f32.mrf.mxu3  ;;  %v1178_v17 = vld [vmem:[#allocation7 + $0xce8] sm:$0xff]  ;;  %v793_v19 = vld [vmem:[#allocation7 + $0xe0] sm:$0xff] }
 0x10b   : > { %1768 = vmatpush.msrb.mxu1 %v1057_v20  ;;  %v723_v29 = vadd.f32 %v722_v27, %v7387_v43  ;;  %1798 = vmatpush.msrb.mxu2 %v1417_v23  ;;  %v1153_v20 = vld [vmem:[#allocation7 + $0xc20] sm:$0xff]  ;;  %v794_v23 = vld [vmem:[#allocation7 + $0xe8] sm:$0xff]  ;;  %v1515_v27 = vld [vmem:[#allocation7 + $0x1770] sm:$0xff] }
 0x10c   : > { %1856 = vmatpush.msra.mxu0 %v1418_v25  ;;  %1826 = vmatpush.msrb.mxu3 %v1058_v24  ;;  %v769_v25 = vld [vmem:[#allocation7 + $0x20] sm:$0xff]  ;;  %v1516_v24 = vld [vmem:[#allocation7 + $0x1778] sm:$0xff] }
 0x10d   : > { %v751_v18 = vpop.f32.mrf.mxu0  ;;  %v7415_v32 = vmax.f32 %v723_v29, 0.0  ;;  %1769 = vmatpush.msrb.mxu1 %v1033_v28  ;;  %1799 = vmatpush.msrb.mxu2 %v1393_v30  ;;  %v770_v28 = vld [vmem:[#allocation7 + $0x28] sm:$0xff]  ;;  %v1131_v29 = vld [vmem:[#allocation7 + $0xb70] sm:$0xff] }
 0x10e   : > { %v752_v21 = vadd.f32 %v751_v18, %v7385_v35  ;;  %1857 = vmatpush.msra.mxu0 %v1394_v31  ;;  %1827 = vmatpush.msrb.mxu3 %v1034_v33  ;;  %v818_v18 = vld [vmem:[#allocation7 + $0x1a8] sm:$0xff]  ;;  %v1491_v30 = vld [vmem:[#allocation7 + $0x16b0] sm:$0xff]  ;;  %v1492_v31 = vld [vmem:[#allocation7 + $0x16b8] sm:$0xff] }
 0x10f   : > { %9134 = vst [vmem:[#allocation26_spill] sm:$0xff] %v7415_v32  ;;  %1770 = vmatpush.msrb.mxu1 %v1009_v37  ;;  %1800 = vmatpush.msrb.mxu2 %v1369_v38  ;;  %v1132_v33 = vld [vmem:[#allocation7 + $0xb78] sm:$0xff]  ;;  %v1107_v37 = vld [vmem:[#allocation7 + $0xab0] sm:$0xff] }
 0x110   : > { %v7410_v26 = vmax.f32 %v752_v21, 0.0  ;;  %1555 = vmatmul.f32.gmra.mxu1 %v7415_v32  ;;  %1613 = vmatmul.f32.gmra.mxu3 %v7415_v32  ;;  %v1154_v21 = vld [vmem:[#allocation7 + $0xc28] sm:$0xff]  ;;  %v1467_v38 = vld [vmem:[#allocation7 + $0x15f0] sm:$0xff] }
 0x111   : > { %1858 = vmatpush.msra.mxu0 %v1370_v39  ;;  %1828 = vmatpush.msrb.mxu3 %v1010_v41  ;;  %v1468_v39 = vld [vmem:[#allocation7 + $0x15f8] sm:$0xff]  ;;  %v1083_v41 = vld [vmem:[#allocation7 + $0x9f0] sm:$0xff] }
 0x112   : > { %1584 = vmatmul.f32.gmra.mxu2 %v7410_v26  ;;  %1642 = vmatmul.f32.gmra.mxu0 %v7410_v26  ;;  %v725_v47 = vpop.f32.mrf.mxu3 }
 0x113   : > { %1771 = vmatpush.msrb.mxu1 %v985_v42  ;;  %v726_v51 = vadd.f32 %v725_v47, %v7387_v43  ;;  %1801 = vmatpush.msrb.mxu2 %v1345_v44  ;;  %v938_v43 = vld [vmem:[#allocation7 + $0x568] sm:$0xff]  ;;  %v1443_v42 = vld [vmem:[#allocation7 + $0x1530] sm:$0xff]  ;;  %v1084_v44 = vld [vmem:[#allocation7 + $0x9f8] sm:$0xff] }
 0x114   : > { %1859 = vmatpush.msra.mxu0 %v1346_v45  ;;  %1829 = vmatpush.msrb.mxu3 %v986_v48  ;;  %v1059_v45 = vld [vmem:[#allocation7 + $0x930] sm:$0xff]  ;;  %v1420_v48 = vld [vmem:[#allocation7 + $0x1478] sm:$0xff] }
 0x115   : > { %v754_v40 = vpop.f32.mrf.mxu0  ;;  %1772 = vmatpush.msrb.mxu1 %v961_v49  ;;  %1802 = vmatpush.msrb.mxu2 %v1321_v53  ;;  %v1419_v47 = vld [vmem:[#allocation7 + $0x1470] sm:$0xff]  ;;  %v1060_v49 = vld [vmem:[#allocation7 + $0x938] sm:$0xff] }
 0x116   : > { %v755_v34 = vadd.f32 %v754_v40, %v7385_v35  ;;  %v7425_v35 = vmax.f32 %v726_v51, 0.0  ;;  %1860 = vmatpush.msra.mxu0 %v1322_v54  ;;  %1830 = vmatpush.msrb.mxu3 %v962_v55  ;;  %v1108_v40 = vld [vmem:[#allocation7 + $0xab8] sm:$0xff]  ;;  %v1035_v51 = vld [vmem:[#allocation7 + $0x870] sm:$0xff] }
 0x117   : > { %1773 = vmatpush.msrb.mxu1 %v937_v56  ;;  %1803 = vmatpush.msrb.mxu2 %v1297_v57  ;;  %v1395_v53 = vld [vmem:[#allocation7 + $0x13b0] sm:$0xff]  ;;  %v1396_v54 = vld [vmem:[#allocation7 + $0x13b8] sm:$0xff] }
 0x118   : > { %v7420_v46 = vmax.f32 %v755_v34, 0.0  ;;  %9135 = vst [vmem:[#allocation27_spill] sm:$0xff] %v7425_v35  ;;  %1558 = vmatmul.f32.gmra.mxu1 %v7425_v35  ;;  %1616 = vmatmul.f32.gmra.mxu3 %v7425_v35  ;;  %v1444_v34 = vld [vmem:[#allocation7 + $0x1538] sm:$0xff]  ;;  %v1011_v56 = vld [vmem:[#allocation7 + $0x7b0] sm:$0xff] }
 0x119   : > { %1861 = vmatpush.msra.mxu0 %v1298_v59  ;;  %1831 = vmatpush.msrb.mxu3 %v938_v43  ;;  %v1036_v55 = vld [vmem:[#allocation7 + $0x878] sm:$0xff]  ;;  %v1371_v57 = vld [vmem:[#allocation7 + $0x12f0] sm:$0xff] }
 0x11a   : > { %1587 = vmatmul.f32.gmra.mxu2 %v7420_v46  ;;  %1645 = vmatmul.f32.gmra.mxu0 %v7420_v46  ;;  %v1372_v59 = vld [vmem:[#allocation7 + $0x12f8] sm:$0xff] }
 0x11b   : > { %1774 = vmatpush.msrb.mxu1 %v913_v60  ;;  %1804 = vmatpush.msrb.mxu2 %v1273_v61  ;;  %v1012_v43 = vld [vmem:[#allocation7 + $0x7b8] sm:$0xff]  ;;  %v987_v60 = vld [vmem:[#allocation7 + $0x6f0] sm:$0xff] }
 0x11c   : > { %1862 = vmatpush.msra.mxu0 %v1274_v62  ;;  %1832 = vmatpush.msrb.mxu3 %v914_v63  ;;  %v1347_v61 = vld [vmem:[#allocation7 + $0x1230] sm:$0xff]  ;;  %v1348_v62 = vld [vmem:[#allocation7 + $0x1238] sm:$0xff] }
 0x11d   : > { %1775 = vmatpush.msrb.mxu1 %v889_v0  ;;  %1805 = vmatpush.msrb.mxu2 %v1249_v1  ;;  %v988_v63 = vld [vmem:[#allocation7 + $0x6f8] sm:$0xff]  ;;  %v963_v0 = vld [vmem:[#allocation7 + $0x630] sm:$0xff] }
 0x11e   : > { %1863 = vmatpush.msra.mxu0 %v1250_v2  ;;  %1833 = vmatpush.msrb.mxu3 %v890_v3  ;;  %v1323_v1 = vld [vmem:[#allocation7 + $0x1170] sm:$0xff]  ;;  %v1324_v2 = vld [vmem:[#allocation7 + $0x1178] sm:$0xff] }
 0x11f   : > { %1776 = vmatpush.msrb.mxu1 %v865_v4  ;;  %1806 = vmatpush.msrb.mxu2 %v1225_v7  ;;  %v964_v3 = vld [vmem:[#allocation7 + $0x638] sm:$0xff]  ;;  %v939_v4 = vld [vmem:[#allocation7 + $0x570] sm:$0xff] }
 0x120   : > { %1665 = vmatmul.f32.vlgmr.msra.gmra.mxu1 %v7395_v58  ;;  %1723 = vmatmul.f32.vlgmr.msra.gmra.mxu3 %v7395_v58  ;;  %v1299_v7 = vld [vmem:[#allocation7 + $0x10b0] sm:$0xff] }
 0x121   : > { %1864 = vmatpush.msra.mxu0 %v1226_v8  ;;  %1834 = vmatpush.msrb.mxu3 %v866_v9  ;;  %v1300_v8 = vld [vmem:[#allocation7 + $0x10b8] sm:$0xff] }
 0x122   : > { %1694 = vmatmul.f32.vlgmr.msra.gmra.mxu2 %v7390_v50  ;;  %1752 = vmatmul.f32.vlgmr.msrb.gmra.mxu0 %v7390_v50  ;;  %v940_v9 = vld [vmem:[#allocation7 + $0x578] sm:$0xff] }
 0x123   : > { %1777 = vmatpush.msrb.mxu1 %v841_v10  ;;  %1807 = vmatpush.msrb.mxu2 %v1201_v11  ;;  %v915_v10 = vld [vmem:[#allocation7 + $0x4b0] sm:$0xff] }
 0x124   : > { %1865 = vmatpush.msra.mxu0 %v1202_v12  ;;  %1835 = vmatpush.msrb.mxu3 %v842_v14  ;;  %v1275_v11 = vld [vmem:[#allocation7 + $0xff0] sm:$0xff]  ;;  %v1276_v12 = vld [vmem:[#allocation7 + $0xff8] sm:$0xff] }
 0x125   : > { %1778 = vmatpush.msrb.mxu1 %v817_v15  ;;  %1808 = vmatpush.msrb.mxu2 %v1177_v16  ;;  %v916_v14 = vld [vmem:[#allocation7 + $0x4b8] sm:$0xff]  ;;  %v891_v15 = vld [vmem:[#allocation7 + $0x3f0] sm:$0xff] }
 0x126   : > { %1866 = vmatpush.msra.mxu0 %v1178_v17  ;;  %1836 = vmatpush.msrb.mxu3 %v818_v18  ;;  %v1251_v16 = vld [vmem:[#allocation7 + $0xf30] sm:$0xff]  ;;  %v1252_v17 = vld [vmem:[#allocation7 + $0xf38] sm:$0xff] }
 0x127   : > { %1779 = vmatpush.msrb.mxu1 %v793_v19  ;;  %1809 = vmatpush.msrb.mxu2 %v1153_v20  ;;  %v892_v18 = vld [vmem:[#allocation7 + $0x3f8] sm:$0xff]  ;;  %v867_v19 = vld [vmem:[#allocation7 + $0x330] sm:$0xff] }
 0x128   : > { %1668 = vmatmul.f32.gmra.mxu1 %v7405_v13  ;;  %1726 = vmatmul.f32.gmra.mxu3 %v7405_v13  ;;  %v1227_v20 = vld [vmem:[#allocation7 + $0xe70] sm:$0xff] }
 0x129   : > { %1867 = vmatpush.msra.mxu0 %v1154_v21  ;;  %1837 = vmatpush.msrb.mxu3 %v794_v23  ;;  %v1228_v21 = vld [vmem:[#allocation7 + $0xe78] sm:$0xff] }
 0x12a   : > { %1697 = vmatmul.f32.gmra.mxu2 %v7400_v6  ;;  %1755 = vmatmul.f32.gmra.mxu0 %v7400_v6  ;;  %v868_v23 = vld [vmem:[#allocation7 + $0x338] sm:$0xff] }
 0x12b   : > { %1780 = vmatpush.msrb.mxu1 %v769_v25  ;;  %1910 = vmatpush.msra.mxu2 %v1515_v27  ;;  %v843_v25 = vld [vmem:[#allocation7 + $0x270] sm:$0xff] }
 0x12c   : > { %1968 = vmatpush.msrb.mxu0 %v1516_v24  ;;  %1838 = vmatpush.msrb.mxu3 %v770_v28  ;;  %v1203_v27 = vld [vmem:[#allocation7 + $0xdb0] sm:$0xff]  ;;  %v1204_v24 = vld [vmem:[#allocation7 + $0xdb8] sm:$0xff] }
 0x12d   : > { %1881 = vmatpush.msra.mxu1 %v1131_v29  ;;  %1911 = vmatpush.msra.mxu2 %v1491_v30  ;;  %v844_v28 = vld [vmem:[#allocation7 + $0x278] sm:$0xff]  ;;  %v819_v29 = vld [vmem:[#allocation7 + $0x1b0] sm:$0xff] }
 0x12e   : > { %1969 = vmatpush.msrb.mxu0 %v1492_v31  ;;  %1939 = vmatpush.msra.mxu3 %v1132_v33  ;;  %v1179_v30 = vld [vmem:[#allocation7 + $0xcf0] sm:$0xff]  ;;  %v1180_v31 = vld [vmem:[#allocation7 + $0xcf8] sm:$0xff] }
 0x12f   : > { %1882 = vmatpush.msra.mxu1 %v1107_v37  ;;  %1912 = vmatpush.msra.mxu2 %v1467_v38  ;;  %v820_v33 = vld [vmem:[#allocation7 + $0x1b8] sm:$0xff]  ;;  %v795_v37 = vld [vmem:[#allocation7 + $0xf0] sm:$0xff] }
 0x130   : > { %1671 = vmatmul.f32.gmra.mxu1 %v7415_v32  ;;  %1729 = vmatmul.f32.gmra.mxu3 %v7415_v32  ;;  %v1155_v38 = vld [vmem:[#allocation7 + $0xc30] sm:$0xff] }
 0x131   : > { %1970 = vmatpush.msrb.mxu0 %v1468_v39  ;;  %1940 = vmatpush.msra.mxu3 %v1108_v40  ;;  %v1156_v39 = vld [vmem:[#allocation7 + $0xc38] sm:$0xff] }
 0x132   : > { %1700 = vmatmul.f32.gmra.mxu2 %v7410_v26  ;;  %1758 = vmatmul.f32.gmra.mxu0 %v7410_v26  ;;  %v796_v40 = vld [vmem:[#allocation7 + $0xf8] sm:$0xff] }
 0x133   : > { %1883 = vmatpush.msra.mxu1 %v1083_v41  ;;  %1913 = vmatpush.msra.mxu2 %v1443_v42  ;;  %v771_v41 = vld [vmem:[#allocation7 + $0x30] sm:$0xff]  ;;  %v1517_v42 = vld [vmem:[#allocation7 + $0x1780] sm:$0xff] }
 0x134   : > { %1971 = vmatpush.msrb.mxu0 %v1444_v34  ;;  %1941 = vmatpush.msra.mxu3 %v1084_v44  ;;  %v1518_v34 = vld [vmem:[#allocation7 + $0x1788] sm:$0xff]  ;;  %v772_v44 = vld [vmem:[#allocation7 + $0x38] sm:$0xff] }
 0x135   : > { %1884 = vmatpush.msra.mxu1 %v1059_v45  ;;  %1914 = vmatpush.msra.mxu2 %v1419_v47  ;;  %v1133_v45 = vld [vmem:[#allocation7 + $0xb80] sm:$0xff]  ;;  %v7459_v47 = vpop.f32.mrf.mxu1 }
 0x136   : > { %1972 = vmatpush.msrb.mxu0 %v1420_v48  ;;  %1942 = vmatpush.msra.mxu3 %v1060_v49  ;;  %v1493_v48 = vld [vmem:[#allocation7 + $0x16c0] sm:$0xff]  ;;  %v1494_v49 = vld [vmem:[#allocation7 + $0x16c8] sm:$0xff] }
 0x137   : > { %1885 = vmatpush.msra.mxu1 %v1035_v51  ;;  %1915 = vmatpush.msra.mxu2 %v1395_v53  ;;  %v1134_v51 = vld [vmem:[#allocation7 + $0xb88] sm:$0xff]  ;;  %v1109_v53 = vld [vmem:[#allocation7 + $0xac0] sm:$0xff] }
 0x138   : > { %1674 = vmatmul.f32.gmra.mxu1 %v7425_v35  ;;  %1732 = vmatmul.f32.gmra.mxu3 %v7425_v35 }
 0x139   : > { %1973 = vmatpush.msrb.mxu0 %v1396_v54  ;;  %1943 = vmatpush.msra.mxu3 %v1036_v55  ;;  %v1469_v54 = vld [vmem:[#allocation7 + $0x1600] sm:$0xff]  ;;  %v1470_v55 = vld [vmem:[#allocation7 + $0x1608] sm:$0xff] }
 0x13a   : > { %1703 = vmatmul.f32.gmra.mxu2 %v7420_v46  ;;  %1761 = vmatmul.f32.gmra.mxu0 %v7420_v46 }
 0x13b   : > { %1886 = vmatpush.msra.mxu1 %v1011_v56  ;;  %1916 = vmatpush.msra.mxu2 %v1371_v57  ;;  %v1110_v56 = vld [vmem:[#allocation7 + $0xac8] sm:$0xff]  ;;  %v1085_v57 = vld [vmem:[#allocation7 + $0xa00] sm:$0xff] }
 0x13c   : > { %1974 = vmatpush.msrb.mxu0 %v1372_v59  ;;  %1944 = vmatpush.msra.mxu3 %v1012_v43  ;;  %v1445_v59 = vld [vmem:[#allocation7 + $0x1540] sm:$0xff]  ;;  %v1446_v43 = vld [vmem:[#allocation7 + $0x1548] sm:$0xff] }
 0x13d   : > { %1887 = vmatpush.msra.mxu1 %v987_v60  ;;  %1917 = vmatpush.msra.mxu2 %v1347_v61  ;;  %v7465_v60 = vpop.f32.mrf.mxu2  ;;  %v1086_v61 = vld [vmem:[#allocation7 + $0xa08] sm:$0xff] }
 0x13e   : > { %1975 = vmatpush.msrb.mxu0 %v1348_v62  ;;  %1945 = vmatpush.msra.mxu3 %v988_v63  ;;  %9136 = vst [vmem:[#allocation28_spill] sm:$0xff] %v7465_v60  ;;  %v1061_v62 = vld [vmem:[#allocation7 + $0x940] sm:$0xff] }
 0x13f   : > { %1888 = vmatpush.msra.mxu1 %v963_v0  ;;  %1918 = vmatpush.msra.mxu2 %v1323_v1  ;;  %v1421_v63 = vld [vmem:[#allocation7 + $0x1480] sm:$0xff]  ;;  %v1422_v0 = vld [vmem:[#allocation7 + $0x1488] sm:$0xff] }
 0x140   : > { %1781 = vmatmul.f32.vlgmr.msrb.gmra.mxu1 %v7395_v58  ;;  %1839 = vmatmul.f32.vlgmr.msrb.gmra.mxu3 %v7395_v58  ;;  %v1062_v1 = vld [vmem:[#allocation7 + $0x948] sm:$0xff] }
 0x141   : > { %1976 = vmatpush.msrb.mxu0 %v1324_v2  ;;  %1946 = vmatpush.msra.mxu3 %v964_v3  ;;  %v1037_v2 = vld [vmem:[#allocation7 + $0x880] sm:$0xff]  ;;  %v7469_v3 = vpop.f32.mrf.mxu1 }
 0x142   : > { %1810 = vmatmul.f32.vlgmr.msrb.gmra.mxu2 %v7390_v50  ;;  %1868 = vmatmul.f32.vlgmr.msra.gmra.mxu0 %v7390_v50 }
 0x143   : > { %1889 = vmatpush.msra.mxu1 %v939_v4  ;;  %1919 = vmatpush.msra.mxu2 %v1299_v7  ;;  %v1397_v4 = vld [vmem:[#allocation7 + $0x13c0] sm:$0xff]  ;;  %v1398_v7 = vld [vmem:[#allocation7 + $0x13c8] sm:$0xff] }
 0x144   : > { %1977 = vmatpush.msrb.mxu0 %v1300_v8  ;;  %1947 = vmatpush.msra.mxu3 %v940_v9  ;;  %v1038_v8 = vld [vmem:[#allocation7 + $0x888] sm:$0xff]  ;;  %v1013_v9 = vld [vmem:[#allocation7 + $0x7c0] sm:$0xff] }
 0x145   : > { %1890 = vmatpush.msra.mxu1 %v915_v10  ;;  %1920 = vmatpush.msra.mxu2 %v1275_v11  ;;  %v1373_v10 = vld [vmem:[#allocation7 + $0x1300] sm:$0xff]  ;;  %v1374_v11 = vld [vmem:[#allocation7 + $0x1308] sm:$0xff] }
 0x146   : > { %1978 = vmatpush.msrb.mxu0 %v1276_v12  ;;  %1948 = vmatpush.msra.mxu3 %v916_v14  ;;  %v1014_v12 = vld [vmem:[#allocation7 + $0x7c8] sm:$0xff]  ;;  %v989_v14 = vld [vmem:[#allocation7 + $0x700] sm:$0xff] }
 0x147   : > { %1891 = vmatpush.msra.mxu1 %v891_v15  ;;  %1921 = vmatpush.msra.mxu2 %v1251_v16  ;;  %v1349_v15 = vld [vmem:[#allocation7 + $0x1240] sm:$0xff]  ;;  %v1350_v16 = vld [vmem:[#allocation7 + $0x1248] sm:$0xff] }
 0x148   : > { %1784 = vmatmul.f32.gmra.mxu1 %v7405_v13  ;;  %1842 = vmatmul.f32.gmra.mxu3 %v7405_v13 }
 0x149   : > { %1979 = vmatpush.msrb.mxu0 %v1252_v17  ;;  %1949 = vmatpush.msra.mxu3 %v892_v18  ;;  %v7473_v17 = vpop.f32.mrf.mxu2  ;;  %v990_v18 = vld [vmem:[#allocation7 + $0x708] sm:$0xff] }
 0x14a   : > { %1813 = vmatmul.f32.gmra.mxu2 %v7400_v6  ;;  %1871 = vmatmul.f32.gmra.mxu0 %v7400_v6  ;;  %9137 = vst [vmem:[#allocation29_spill] sm:$0xff] %v7473_v17  ;;  %v1091_v17 = vld [vmem:[#allocation7 + $0xa30] sm:$0xff] }
 0x14b   : > { %1892 = vmatpush.msra.mxu1 %v867_v19  ;;  %1922 = vmatpush.msra.mxu2 %v1227_v20  ;;  %v965_v19 = vld [vmem:[#allocation7 + $0x640] sm:$0xff] }
 0x14c   : > { %1980 = vmatpush.msrb.mxu0 %v1228_v21  ;;  %1950 = vmatpush.msra.mxu3 %v868_v23  ;;  %v1325_v20 = vld [vmem:[#allocation7 + $0x1180] sm:$0xff]  ;;  %v1326_v21 = vld [vmem:[#allocation7 + $0x1188] sm:$0xff]  ;;  %v7477_v23 = vpop.f32.mrf.mxu1 }
 0x14d   : > { %1893 = vmatpush.msra.mxu1 %v843_v25  ;;  %1923 = vmatpush.msra.mxu2 %v1203_v27  ;;  %9138 = vst [vmem:[#allocation30_spill] sm:$0xff] %v7477_v23  ;;  %v966_v25 = vld [vmem:[#allocation7 + $0x648] sm:$0xff]  ;;  %v941_v27 = vld [vmem:[#allocation7 + $0x580] sm:$0xff]  ;;  %v1380_v23 = vld [vmem:[#allocation7 + $0x1338] sm:$0xff] }
 0x14e   : > { %1981 = vmatpush.msrb.mxu0 %v1204_v24  ;;  %1951 = vmatpush.msra.mxu3 %v844_v28  ;;  %v1301_v24 = vld [vmem:[#allocation7 + $0x10c0] sm:$0xff]  ;;  %v1302_v28 = vld [vmem:[#allocation7 + $0x10c8] sm:$0xff] }
 0x14f   : > { %1894 = vmatpush.msra.mxu1 %v819_v29  ;;  %1924 = vmatpush.msra.mxu2 %v1179_v30  ;;  %v942_v29 = vld [vmem:[#allocation7 + $0x588] sm:$0xff]  ;;  %v917_v30 = vld [vmem:[#allocation7 + $0x4c0] sm:$0xff] }
 0x150   : > { %1787 = vmatmul.f32.gmra.mxu1 %v7415_v32  ;;  %1845 = vmatmul.f32.gmra.mxu3 %v7415_v32 }
 0x151   : > { %1982 = vmatpush.msrb.mxu0 %v1180_v31  ;;  %1952 = vmatpush.msra.mxu3 %v820_v33  ;;  %v1277_v31 = vld [vmem:[#allocation7 + $0x1000] sm:$0xff]  ;;  %v1278_v33 = vld [vmem:[#allocation7 + $0x1008] sm:$0xff] }
 0x152   : > { %1816 = vmatmul.f32.gmra.mxu2 %v7410_v26  ;;  %1874 = vmatmul.f32.gmra.mxu0 %v7410_v26 }
 0x153   : > { %1895 = vmatpush.msra.mxu1 %v795_v37  ;;  %1925 = vmatpush.msra.mxu2 %v1155_v38  ;;  %v918_v37 = vld [vmem:[#allocation7 + $0x4c8] sm:$0xff]  ;;  %v893_v38 = vld [vmem:[#allocation7 + $0x400] sm:$0xff] }
 0x154   : > { %1983 = vmatpush.msrb.mxu0 %v1156_v39  ;;  %1953 = vmatpush.msra.mxu3 %v796_v40  ;;  %v1253_v39 = vld [vmem:[#allocation7 + $0xf40] sm:$0xff]  ;;  %v1254_v40 = vld [vmem:[#allocation7 + $0xf48] sm:$0xff] }
 0x155   : > { %1896 = vmatpush.msra.mxu1 %v771_v41  ;;  %2026 = vmatpush.msrb.mxu2 %v1517_v42  ;;  %v7483_v41 = vpop.f32.mrf.mxu2  ;;  %v894_v42 = vld [vmem:[#allocation7 + $0x408] sm:$0xff] }
 0x156   : > { %2084 = vmatpush.msra.mxu0 %v1518_v34  ;;  %1954 = vmatpush.msra.mxu3 %v772_v44  ;;  %9139 = vst [vmem:[#allocation31_spill] sm:$0xff] %v7483_v41  ;;  %v869_v34 = vld [vmem:[#allocation7 + $0x340] sm:$0xff] }
 0x157   : > { %1997 = vmatpush.msrb.mxu1 %v1133_v45  ;;  %2027 = vmatpush.msrb.mxu2 %v1493_v48  ;;  %v1229_v44 = vld [vmem:[#allocation7 + $0xe80] sm:$0xff]  ;;  %v1230_v45 = vld [vmem:[#allocation7 + $0xe88] sm:$0xff]  ;;  %v7485_v48 = vpop.f32.mrf.mxu1 }
 0x158   : > { %1790 = vmatmul.f32.gmra.mxu1 %v7425_v35  ;;  %1848 = vmatmul.f32.gmra.mxu3 %v7425_v35  ;;  %9140 = vst [vmem:[#allocation32_spill] sm:$0xff] %v7485_v48  ;;  %v1092_v48 = vld [vmem:[#allocation7 + $0xa38] sm:$0xff] }
 0x159   : > { %2085 = vmatpush.msra.mxu0 %v1494_v49  ;;  %2055 = vmatpush.msrb.mxu3 %v1134_v51  ;;  %v870_v49 = vld [vmem:[#allocation7 + $0x348] sm:$0xff]  ;;  %v845_v51 = vld [vmem:[#allocation7 + $0x280] sm:$0xff] }
 0x15a   : > { %1819 = vmatmul.f32.gmra.mxu2 %v7420_v46  ;;  %1877 = vmatmul.f32.gmra.mxu0 %v7420_v46 }
 0x15b   : > { %1998 = vmatpush.msrb.mxu1 %v1109_v53  ;;  %2028 = vmatpush.msrb.mxu2 %v1469_v54  ;;  %v1205_v53 = vld [vmem:[#allocation7 + $0xdc0] sm:$0xff]  ;;  %v1206_v54 = vld [vmem:[#allocation7 + $0xdc8] sm:$0xff] }
 0x15c   : > { %2086 = vmatpush.msra.mxu0 %v1470_v55  ;;  %2056 = vmatpush.msrb.mxu3 %v1110_v56  ;;  %v846_v55 = vld [vmem:[#allocation7 + $0x288] sm:$0xff]  ;;  %v821_v56 = vld [vmem:[#allocation7 + $0x1c0] sm:$0xff] }
 0x15d   : > { %1999 = vmatpush.msrb.mxu1 %v1085_v57  ;;  %2029 = vmatpush.msrb.mxu2 %v1445_v59  ;;  %v1181_v57 = vld [vmem:[#allocation7 + $0xd00] sm:$0xff]  ;;  %v1182_v59 = vld [vmem:[#allocation7 + $0xd08] sm:$0xff] }
 0x15e   : > { %2087 = vmatpush.msra.mxu0 %v1446_v43  ;;  %2057 = vmatpush.msrb.mxu3 %v1086_v61  ;;  %v822_v43 = vld [vmem:[#allocation7 + $0x1c8] sm:$0xff]  ;;  %v797_v61 = vld [vmem:[#allocation7 + $0x100] sm:$0xff] }
 0x15f   : > { %2000 = vmatpush.msrb.mxu1 %v1061_v62  ;;  %2030 = vmatpush.msrb.mxu2 %v1421_v63  ;;  %v1157_v62 = vld [vmem:[#allocation7 + $0xc40] sm:$0xff]  ;;  %v1158_v63 = vld [vmem:[#allocation7 + $0xc48] sm:$0xff] }
 0x160   : > { %1897 = vmatmul.f32.vlgmr.msra.gmra.mxu1 %v7395_v58  ;;  %1955 = vmatmul.f32.vlgmr.msra.gmra.mxu3 %v7395_v58 }
 0x161   : > { %2088 = vmatpush.msra.mxu0 %v1422_v0  ;;  %2058 = vmatpush.msrb.mxu3 %v1062_v1  ;;  %v7491_v0 = vpop.f32.mrf.mxu2  ;;  %v798_v1 = vld [vmem:[#allocation7 + $0x108] sm:$0xff] }
 0x162   : > { %1926 = vmatmul.f32.vlgmr.msra.gmra.mxu2 %v7390_v50  ;;  %1984 = vmatmul.f32.vlgmr.msrb.gmra.mxu0 %v7390_v50  ;;  %9141 = vst [vmem:[#allocation33_spill] sm:$0xff] %v7491_v0  ;;  %v777_v0 = vld [vmem:[#allocation7 + $0x60] sm:$0xff] }
 0x163   : > { %2001 = vmatpush.msrb.mxu1 %v1037_v2  ;;  %2031 = vmatpush.msrb.mxu2 %v1397_v4  ;;  %v773_v4 = vld [vmem:[#allocation7 + $0x40] sm:$0xff] }
 0x164   : > { %2089 = vmatpush.msra.mxu0 %v1398_v7  ;;  %2059 = vmatpush.msrb.mxu3 %v1038_v8  ;;  %v1519_v7 = vld [vmem:[#allocation7 + $0x1790] sm:$0xff]  ;;  %v1520_v8 = vld [vmem:[#allocation7 + $0x1798] sm:$0xff] }
 0x165   : > { %2002 = vmatpush.msrb.mxu1 %v1013_v9  ;;  %2032 = vmatpush.msrb.mxu2 %v1373_v10  ;;  %v774_v9 = vld [vmem:[#allocation7 + $0x48] sm:$0xff]  ;;  %v1135_v10 = vld [vmem:[#allocation7 + $0xb90] sm:$0xff] }
 0x166   : > { %2090 = vmatpush.msra.mxu0 %v1374_v11  ;;  %2060 = vmatpush.msrb.mxu3 %v1014_v12  ;;  %v1495_v11 = vld [vmem:[#allocation7 + $0x16d0] sm:$0xff]  ;;  %v1496_v12 = vld [vmem:[#allocation7 + $0x16d8] sm:$0xff] }
 0x167   : > { %2003 = vmatpush.msrb.mxu1 %v989_v14  ;;  %2033 = vmatpush.msrb.mxu2 %v1349_v15  ;;  %v1136_v14 = vld [vmem:[#allocation7 + $0xb98] sm:$0xff]  ;;  %v1111_v15 = vld [vmem:[#allocation7 + $0xad0] sm:$0xff] }
 0x168   : > { %1900 = vmatmul.f32.gmra.mxu1 %v7405_v13  ;;  %1958 = vmatmul.f32.gmra.mxu3 %v7405_v13 }
 0x169   : > { %2091 = vmatpush.msra.mxu0 %v1350_v16  ;;  %2061 = vmatpush.msrb.mxu3 %v990_v18  ;;  %v1471_v16 = vld [vmem:[#allocation7 + $0x1610] sm:$0xff]  ;;  %v1472_v18 = vld [vmem:[#allocation7 + $0x1618] sm:$0xff] }
 0x16a   : > { %1929 = vmatmul.f32.gmra.mxu2 %v7400_v6  ;;  %1987 = vmatmul.f32.gmra.mxu0 %v7400_v6 }
 0x16b   : > { %2004 = vmatpush.msrb.mxu1 %v965_v19  ;;  %2034 = vmatpush.msrb.mxu2 %v1325_v20  ;;  %v1112_v19 = vld [vmem:[#allocation7 + $0xad8] sm:$0xff]  ;;  %v1087_v20 = vld [vmem:[#allocation7 + $0xa10] sm:$0xff] }
 0x16c   : > { %2092 = vmatpush.msra.mxu0 %v1326_v21  ;;  %2062 = vmatpush.msrb.mxu3 %v966_v25  ;;  %v1447_v21 = vld [vmem:[#allocation7 + $0x1550] sm:$0xff]  ;;  %v1448_v25 = vld [vmem:[#allocation7 + $0x1558] sm:$0xff] }
 0x16d   : > { %2005 = vmatpush.msrb.mxu1 %v941_v27  ;;  %2035 = vmatpush.msrb.mxu2 %v1301_v24 }
 0x16e   : > { %2093 = vmatpush.msra.mxu0 %v1302_v28  ;;  %2063 = vmatpush.msrb.mxu3 %v942_v29  ;;  %v1088_v28 = vld [vmem:[#allocation7 + $0xa18] sm:$0xff]  ;;  %v1063_v29 = vld [vmem:[#allocation7 + $0x950] sm:$0xff] }
 0x16f   : > { %2006 = vmatpush.msrb.mxu1 %v917_v30  ;;  %2036 = vmatpush.msrb.mxu2 %v1277_v31  ;;  %v1423_v30 = vld [vmem:[#allocation7 + $0x1490] sm:$0xff]  ;;  %v1424_v31 = vld [vmem:[#allocation7 + $0x1498] sm:$0xff] }
 0x170   : > { %1903 = vmatmul.f32.gmra.mxu1 %v7415_v32  ;;  %1961 = vmatmul.f32.gmra.mxu3 %v7415_v32 }
 0x171   : > { %2094 = vmatpush.msra.mxu0 %v1278_v33  ;;  %2064 = vmatpush.msrb.mxu3 %v918_v37  ;;  %v1064_v33 = vld [vmem:[#allocation7 + $0x958] sm:$0xff] }
 0x172   : > { %1932 = vmatmul.f32.gmra.mxu2 %v7410_v26  ;;  %1990 = vmatmul.f32.gmra.mxu0 %v7410_v26 }
 0x173   : > { %2007 = vmatpush.msrb.mxu1 %v893_v38  ;;  %2037 = vmatpush.msrb.mxu2 %v1253_v39  ;;  %v1039_v38 = vld [vmem:[#allocation7 + $0x890] sm:$0xff] }
 0x174   : > { %2095 = vmatpush.msra.mxu0 %v1254_v40  ;;  %2065 = vmatpush.msrb.mxu3 %v894_v42  ;;  %v1399_v39 = vld [vmem:[#allocation7 + $0x13d0] sm:$0xff]  ;;  %v1400_v40 = vld [vmem:[#allocation7 + $0x13d8] sm:$0xff] }
 0x175   : > { %2008 = vmatpush.msrb.mxu1 %v869_v34  ;;  %2038 = vmatpush.msrb.mxu2 %v1229_v44  ;;  %v1040_v34 = vld [vmem:[#allocation7 + $0x898] sm:$0xff]  ;;  %v1015_v44 = vld [vmem:[#allocation7 + $0x7d0] sm:$0xff] }
 0x176   : > { %2096 = vmatpush.msra.mxu0 %v1230_v45  ;;  %2066 = vmatpush.msrb.mxu3 %v870_v49  ;;  %v1375_v45 = vld [vmem:[#allocation7 + $0x1310] sm:$0xff]  ;;  %v1376_v49 = vld [vmem:[#allocation7 + $0x1318] sm:$0xff] }
 0x177   : > { %2009 = vmatpush.msrb.mxu1 %v845_v51  ;;  %2039 = vmatpush.msrb.mxu2 %v1205_v53  ;;  %v1016_v53 = vld [vmem:[#allocation7 + $0x7d8] sm:$0xff] }
 0x178   : > { %1906 = vmatmul.f32.gmra.mxu1 %v7425_v35  ;;  %1964 = vmatmul.f32.gmra.mxu3 %v7425_v35 }
 0x179   : > { %2097 = vmatpush.msra.mxu0 %v1206_v54  ;;  %2067 = vmatpush.msrb.mxu3 %v846_v55  ;;  %v991_v54 = vld [vmem:[#allocation7 + $0x710] sm:$0xff] }
 0x17a   : > { %1935 = vmatmul.f32.gmra.mxu2 %v7420_v46  ;;  %1993 = vmatmul.f32.gmra.mxu0 %v7420_v46  ;;  %v1351_v55 = vld [vmem:[#allocation7 + $0x1250] sm:$0xff] }
 0x17b   : > { %2010 = vmatpush.msrb.mxu1 %v821_v56  ;;  %2040 = vmatpush.msrb.mxu2 %v1181_v57  ;;  %v1352_v56 = vld [vmem:[#allocation7 + $0x1258] sm:$0xff] }
 0x17c   : > { %2098 = vmatpush.msra.mxu0 %v1182_v59  ;;  %2068 = vmatpush.msrb.mxu3 %v822_v43  ;;  %v7493_v2 = vpop.f32.mrf.mxu1  ;;  %v992_v59 = vld [vmem:[#allocation7 + $0x718] sm:$0xff]  ;;  %v967_v43 = vld [vmem:[#allocation7 + $0x650] sm:$0xff] }
 0x17d   : > { %2011 = vmatpush.msrb.mxu1 %v797_v61  ;;  %2041 = vmatpush.msrb.mxu2 %v1157_v62  ;;  %v1327_v61 = vld [vmem:[#allocation7 + $0x1190] sm:$0xff]  ;;  %v1328_v62 = vld [vmem:[#allocation7 + $0x1198] sm:$0xff] }
 0x17e   : > { %2099 = vmatpush.msra.mxu0 %v1158_v63  ;;  %2069 = vmatpush.msrb.mxu3 %v798_v1  ;;  %v968_v63 = vld [vmem:[#allocation7 + $0x658] sm:$0xff] }
 0x17f   : > { %2012 = vmatpush.msrb.mxu1 %v773_v4  ;;  %2142 = vmatpush.msra.mxu2 %v1519_v7  ;;  %v7507_v42 = vpop.f32.mrf.mxu0  ;;  %v943_v4 = vld [vmem:[#allocation7 + $0x590] sm:$0xff] }
 0x180   : > { %2200 = vmatpush.msrb.mxu0 %v1520_v8  ;;  %2070 = vmatpush.msrb.mxu3 %v774_v9  ;;  %v1303_v7 = vld [vmem:[#allocation7 + $0x10d0] sm:$0xff]  ;;  %v1304_v8 = vld [vmem:[#allocation7 + $0x10d8] sm:$0xff] }
 0x181   : > { %2013 = vmatmul.f32.vlgmr.msrb.gmra.mxu1 %v7395_v58  ;;  %2071 = vmatmul.f32.vlgmr.msrb.gmra.mxu3 %v7395_v58 }
 0x182   : > { %2042 = vmatmul.f32.vlgmr.msrb.gmra.mxu2 %v7390_v50  ;;  %2100 = vmatmul.f32.vlgmr.msra.gmra.mxu0 %v7390_v50  ;;  %v7505_v37 = vpop.f32.mrf.mxu3 }
 0x183   : > { %2113 = vmatpush.msra.mxu1 %v1135_v10  ;;  %2143 = vmatpush.msra.mxu2 %v1495_v11  ;;  %v944_v11 = vld [vmem:[#allocation7 + $0x598] sm:$0xff] }
 0x184   : > { %2201 = vmatpush.msrb.mxu0 %v1496_v12  ;;  %2171 = vmatpush.msra.mxu3 %v1136_v14  ;;  %v919_v12 = vld [vmem:[#allocation7 + $0x4d0] sm:$0xff] }
 0x185   : > { %2114 = vmatpush.msra.mxu1 %v1111_v15  ;;  %v7499_v27 = vpop.f32.mrf.mxu1  ;;  %v7501_v24 = vpop.f32.mrf.mxu2  ;;  %2144 = vmatpush.msra.mxu2 %v1471_v16  ;;  %v1279_v14 = vld [vmem:[#allocation7 + $0x1010] sm:$0xff]  ;;  %v1280_v15 = vld [vmem:[#allocation7 + $0x1018] sm:$0xff] }
 0x186   : > { %2202 = vmatpush.msrb.mxu0 %v1472_v18  ;;  %2172 = vmatpush.msra.mxu3 %v1112_v19  ;;  %v920_v16 = vld [vmem:[#allocation7 + $0x4d8] sm:$0xff]  ;;  %v895_v18 = vld [vmem:[#allocation7 + $0x410] sm:$0xff] }
 0x187   : > { %2115 = vmatpush.msra.mxu1 %v1087_v20  ;;  %2145 = vmatpush.msra.mxu2 %v1447_v21  ;;  %v7521_v10 = vpop.f32.mrf.mxu0  ;;  %v1255_v19 = vld [vmem:[#allocation7 + $0xf50] sm:$0xff]  ;;  %v1256_v20 = vld [vmem:[#allocation7 + $0xf58] sm:$0xff] }
 0x188   : > { %2203 = vmatpush.msrb.mxu0 %v1448_v25  ;;  %2173 = vmatpush.msra.mxu3 %v1088_v28  ;;  %v896_v25 = vld [vmem:[#allocation7 + $0x418] sm:$0xff]  ;;  %v871_v28 = vld [vmem:[#allocation7 + $0x350] sm:$0xff] }
 0x189   : > { %2116 = vmatpush.msra.mxu1 %v1063_v29  ;;  %2146 = vmatpush.msra.mxu2 %v1423_v30  ;;  %v1231_v29 = vld [vmem:[#allocation7 + $0xe90] sm:$0xff]  ;;  %v1232_v30 = vld [vmem:[#allocation7 + $0xe98] sm:$0xff] }
 0x18a   : > { %2045 = vmatmul.f32.gmra.mxu2 %v7400_v6  ;;  %2103 = vmatmul.f32.gmra.mxu0 %v7400_v6 }
 0x18b   : > { %2204 = vmatpush.msrb.mxu0 %v1424_v31  ;;  %2174 = vmatpush.msra.mxu3 %v1064_v33  ;;  %v7517_v1 = vpop.f32.mrf.mxu3  ;;  %v872_v31 = vld [vmem:[#allocation7 + $0x358] sm:$0xff] }
 0x18c   : > { %2016 = vmatmul.f32.gmra.mxu1 %v7405_v13  ;;  %2074 = vmatmul.f32.gmra.mxu3 %v7405_v13 }
 0x18d   : > { %2117 = vmatpush.msra.mxu1 %v1039_v38  ;;  %v7511_v51 = vpop.f32.mrf.mxu1  ;;  %2147 = vmatpush.msra.mxu2 %v1399_v39  ;;  %v7513_v57 = vpop.f32.mrf.mxu2  ;;  %v847_v39 = vld [vmem:[#allocation7 + $0x290] sm:$0xff] }
 0x18e   : > { %2205 = vmatpush.msrb.mxu0 %v1400_v40  ;;  %2175 = vmatpush.msra.mxu3 %v1040_v34  ;;  %v1207_v40 = vld [vmem:[#allocation7 + $0xdd0] sm:$0xff]  ;;  %v1208_v34 = vld [vmem:[#allocation7 + $0xdd8] sm:$0xff] }
 0x18f   : > { %2118 = vmatpush.msra.mxu1 %v1015_v44  ;;  %2148 = vmatpush.msra.mxu2 %v1375_v45  ;;  %v7533_v44 = vpop.f32.mrf.mxu0  ;;  %v848_v45 = vld [vmem:[#allocation7 + $0x298] sm:$0xff] }
 0x190   : > { %2206 = vmatpush.msrb.mxu0 %v1376_v49  ;;  %2176 = vmatpush.msra.mxu3 %v1016_v53  ;;  %9143 = vst [vmem:[#allocation35_spill] sm:$0xff] %v7533_v44  ;;  %v823_v49 = vld [vmem:[#allocation7 + $0x1d0] sm:$0xff] }
 0x191   : > { %2119 = vmatpush.msra.mxu1 %v991_v54  ;;  %2149 = vmatpush.msra.mxu2 %v1351_v55  ;;  %v1183_v53 = vld [vmem:[#allocation7 + $0xd10] sm:$0xff]  ;;  %v1184_v54 = vld [vmem:[#allocation7 + $0xd18] sm:$0xff] }
 0x192   : > { %2207 = vmatpush.msrb.mxu0 %v1352_v56  ;;  %2048 = vmatmul.f32.gmra.mxu2 %v7410_v26  ;;  %v824_v55 = vld [vmem:[#allocation7 + $0x1d8] sm:$0xff]  ;;  %v799_v56 = vld [vmem:[#allocation7 + $0x110] sm:$0xff] }
 0x193   : > { %2106 = vmatmul.f32.gmra.mxu0 %v7410_v26  ;;  %2177 = vmatpush.msra.mxu3 %v992_v59  ;;  %v7531_v38 = vpop.f32.mrf.mxu3  ;;  %v1159_v59 = vld [vmem:[#allocation7 + $0xc50] sm:$0xff] }
 0x194   : > { %2120 = vmatpush.msra.mxu1 %v967_v43  ;;  %2150 = vmatpush.msra.mxu2 %v1327_v61  ;;  %v1160_v43 = vld [vmem:[#allocation7 + $0xc58] sm:$0xff] }
 0x195   : > { %2208 = vmatpush.msrb.mxu0 %v1328_v62  ;;  %v7519_v9 = vpop.f32.mrf.mxu1  ;;  %2178 = vmatpush.msra.mxu3 %v968_v63  ;;  %v7525_v21 = vpop.f32.mrf.mxu2  ;;  %v800_v62 = vld [vmem:[#allocation7 + $0x118] sm:$0xff]  ;;  %v775_v63 = vld [vmem:[#allocation7 + $0x50] sm:$0xff] }
 0x196   : > { %9142 = vst [vmem:[#allocation34_spill] sm:$0xff] %v7519_v9  ;;  %2019 = vmatmul.f32.gmra.mxu1 %v7415_v32  ;;  %2077 = vmatmul.f32.gmra.mxu3 %v7415_v32  ;;  %v1236_v9 = vld [vmem:[#allocation7 + $0xeb8] sm:$0xff] }
 0x197   : > { %2121 = vmatpush.msra.mxu1 %v943_v4  ;;  %2151 = vmatpush.msra.mxu2 %v1303_v7  ;;  %v1521_v7 = vld [vmem:[#allocation7 + $0x17a0] sm:$0xff] }
 0x198   : > { %2209 = vmatpush.msrb.mxu0 %v1304_v8  ;;  %2179 = vmatpush.msra.mxu3 %v944_v11  ;;  %v1522_v8 = vld [vmem:[#allocation7 + $0x17a8] sm:$0xff]  ;;  %v776_v11 = vld [vmem:[#allocation7 + $0x58] sm:$0xff] }
 0x199   : > { %2122 = vmatpush.msra.mxu1 %v919_v12  ;;  %2152 = vmatpush.msra.mxu2 %v1279_v14  ;;  %v1137_v14 = vld [vmem:[#allocation7 + $0xba0] sm:$0xff] }
 0x19a   : > { %2210 = vmatpush.msrb.mxu0 %v1280_v15  ;;  %2180 = vmatpush.msra.mxu3 %v920_v16  ;;  %v1497_v15 = vld [vmem:[#allocation7 + $0x16e0] sm:$0xff]  ;;  %v1498_v16 = vld [vmem:[#allocation7 + $0x16e8] sm:$0xff] }
 0x19b   : > { %2123 = vmatpush.msra.mxu1 %v895_v18  ;;  %2153 = vmatpush.msra.mxu2 %v1255_v19  ;;  %v7542_v12 = vpop.f32.mrf.mxu3  ;;  %v7545_v18 = vpop.f32.mrf.mxu0  ;;  %v1138_v19 = vld [vmem:[#allocation7 + $0xba8] sm:$0xff] }
 0x19c   : > { %2211 = vmatpush.msrb.mxu0 %v1256_v20  ;;  %2051 = vmatmul.f32.gmra.mxu2 %v7420_v46  ;;  %9145 = vst [vmem:[#allocation37_spill] sm:$0xff] %v7542_v12  ;;  %v1113_v20 = vld [vmem:[#allocation7 + $0xae0] sm:$0xff] }
 0x19d   : > { %2109 = vmatmul.f32.gmra.mxu0 %v7420_v46  ;;  %v7529_v33 = vpop.f32.mrf.mxu1  ;;  %2181 = vmatpush.msra.mxu3 %v896_v25  ;;  %v7537_v61 = vpop.f32.mrf.mxu2  ;;  %9146 = vst [vmem:[#allocation38_spill] sm:$0xff] %v7545_v18  ;;  %v1473_v25 = vld [vmem:[#allocation7 + $0x1620] sm:$0xff]  ;;  %v1288_v18 = vld [vmem:[#allocation7 + $0x1058] sm:$0xff] }
 0x19e   : > { %2124 = vmatpush.msra.mxu1 %v871_v28  ;;  %2154 = vmatpush.msra.mxu2 %v1231_v29  ;;  %9144 = vst [vmem:[#allocation36_spill] sm:$0xff] %v7537_v61  ;;  %v1474_v28 = vld [vmem:[#allocation7 + $0x1628] sm:$0xff]  ;;  %v875_v61 = vld [vmem:[#allocation7 + $0x370] sm:$0xff] }
 0x19f   : > { %2212 = vmatpush.msrb.mxu0 %v1232_v30  ;;  %2182 = vmatpush.msra.mxu3 %v872_v31  ;;  %v1114_v29 = vld [vmem:[#allocation7 + $0xae8] sm:$0xff]  ;;  %v1089_v30 = vld [vmem:[#allocation7 + $0xa20] sm:$0xff] }
 0x1a0   : > { %2022 = vmatmul.f32.gmra.mxu1 %v7425_v35  ;;  %2080 = vmatmul.f32.gmra.mxu3 %v7425_v35  ;;  %v1449_v31 = vld [vmem:[#allocation7 + $0x1560] sm:$0xff] }
 0x1a1   : > { %2125 = vmatpush.msra.mxu1 %v847_v39  ;;  %2155 = vmatpush.msra.mxu2 %v1207_v40  ;;  %v1450_v39 = vld [vmem:[#allocation7 + $0x1568] sm:$0xff] }
 0x1a2   : > { %2213 = vmatpush.msrb.mxu0 %v1208_v34  ;;  %2183 = vmatpush.msra.mxu3 %v848_v45  ;;  %v1090_v45 = vld [vmem:[#allocation7 + $0xa28] sm:$0xff] }
 0x1a3   : > { %2126 = vmatpush.msra.mxu1 %v823_v49  ;;  %2156 = vmatpush.msra.mxu2 %v1183_v53  ;;  %v1065_v49 = vld [vmem:[#allocation7 + $0x960] sm:$0xff] }
 0x1a4   : > { %2214 = vmatpush.msrb.mxu0 %v1184_v54  ;;  %2184 = vmatpush.msra.mxu3 %v824_v55  ;;  %v1425_v53 = vld [vmem:[#allocation7 + $0x14a0] sm:$0xff]  ;;  %v1426_v54 = vld [vmem:[#allocation7 + $0x14a8] sm:$0xff] }
 0x1a5   : > { %2127 = vmatpush.msra.mxu1 %v799_v56  ;;  %v7539_v4 = vpop.f32.mrf.mxu1  ;;  %2157 = vmatpush.msra.mxu2 %v1159_v59  ;;  %v7551_v34 = vpop.f32.mrf.mxu2  ;;  %v1066_v55 = vld [vmem:[#allocation7 + $0x968] sm:$0xff]  ;;  %v1041_v59 = vld [vmem:[#allocation7 + $0x8a0] sm:$0xff] }
 0x1a6   : > { %2215 = vmatpush.msrb.mxu0 %v1160_v43  ;;  %2158 = vmatmul.f32.vlgmr.msra.gmra.mxu2 %v7390_v50  ;;  %v7555_v56 = vpop.f32.mrf.mxu3  ;;  %v1401_v43 = vld [vmem:[#allocation7 + $0x13e0] sm:$0xff] }
 0x1a7   : > { %2185 = vmatpush.msra.mxu3 %v800_v62  ;;  %2216 = vmatmul.f32.vlgmr.msrb.gmra.mxu0 %v7390_v50  ;;  %v1402_v62 = vld [vmem:[#allocation7 + $0x13e8] sm:$0xff] }
 0x1a8   : > { %2128 = vmatpush.msra.mxu1 %v775_v63  ;;  %2258 = vmatpush.msrb.mxu2 %v1521_v7  ;;  %v7557_v63 = vpop.f32.mrf.mxu0  ;;  %v1042_v7 = vld [vmem:[#allocation7 + $0x8a8] sm:$0xff] }
 0x1a9   : > { %2316 = vmatpush.msra.mxu0 %v1522_v8  ;;  %2186 = vmatpush.msra.mxu3 %v776_v11  ;;  %v1017_v8 = vld [vmem:[#allocation7 + $0x7e0] sm:$0xff] }
 0x1aa   : > { %2129 = vmatmul.f32.vlgmr.msra.gmra.mxu1 %v7395_v58  ;;  %2187 = vmatmul.f32.vlgmr.msra.gmra.mxu3 %v7395_v58  ;;  %v1377_v11 = vld [vmem:[#allocation7 + $0x1320] sm:$0xff] }
 0x1ab   : > { %2229 = vmatpush.msrb.mxu1 %v1137_v14  ;;  %2259 = vmatpush.msrb.mxu2 %v1497_v15  ;;  %v1378_v14 = vld [vmem:[#allocation7 + $0x1328] sm:$0xff] }
 0x1ac   : > { %2317 = vmatpush.msra.mxu0 %v1498_v16  ;;  %2287 = vmatpush.msrb.mxu3 %v1138_v19  ;;  %v1018_v16 = vld [vmem:[#allocation7 + $0x7e8] sm:$0xff]  ;;  %v993_v19 = vld [vmem:[#allocation7 + $0x720] sm:$0xff] }
 0x1ad   : > { %2230 = vmatpush.msrb.mxu1 %v1113_v20  ;;  %v7549_v40 = vpop.f32.mrf.mxu1  ;;  %2260 = vmatpush.msrb.mxu2 %v1473_v25  ;;  %v1353_v20 = vld [vmem:[#allocation7 + $0x1260] sm:$0xff]  ;;  %v1354_v25 = vld [vmem:[#allocation7 + $0x1268] sm:$0xff] }
 0x1ae   : > { %9147 = vst [vmem:[#allocation39_spill] sm:$0xff] %v7549_v40  ;;  %2318 = vmatpush.msra.mxu0 %v1474_v28  ;;  %2288 = vmatpush.msrb.mxu3 %v1114_v29  ;;  %v7563_v28 = vpop.f32.mrf.mxu2  ;;  %v994_v29 = vld [vmem:[#allocation7 + $0x728] sm:$0xff] }
 0x1af   : > { %2231 = vmatpush.msrb.mxu1 %v1089_v30  ;;  %2261 = vmatpush.msrb.mxu2 %v1449_v31  ;;  %v969_v30 = vld [vmem:[#allocation7 + $0x660] sm:$0xff] }
 0x1b0   : > { %2319 = vmatpush.msra.mxu0 %v1450_v39  ;;  %2161 = vmatmul.f32.gmra.mxu2 %v7400_v6  ;;  %v1329_v31 = vld [vmem:[#allocation7 + $0x11a0] sm:$0xff]  ;;  %v1330_v39 = vld [vmem:[#allocation7 + $0x11a8] sm:$0xff] }
 0x1b1   : > { %2219 = vmatmul.f32.gmra.mxu0 %v7400_v6  ;;  %2289 = vmatpush.msrb.mxu3 %v1090_v45  ;;  %v970_v45 = vld [vmem:[#allocation7 + $0x668] sm:$0xff] }
 0x1b2   : > { %2232 = vmatpush.msrb.mxu1 %v1065_v49  ;;  %2262 = vmatpush.msrb.mxu2 %v1425_v53  ;;  %v7567_v49 = vpop.f32.mrf.mxu3  ;;  %v945_v53 = vld [vmem:[#allocation7 + $0x5a0] sm:$0xff] }
 0x1b3   : > { %2320 = vmatpush.msra.mxu0 %v1426_v54  ;;  %2290 = vmatpush.msrb.mxu3 %v1066_v55  ;;  %9149 = vst [vmem:[#allocation41_spill] sm:$0xff] %v7567_v49  ;;  %v1305_v54 = vld [vmem:[#allocation7 + $0x10e0] sm:$0xff]  ;;  %v1306_v55 = vld [vmem:[#allocation7 + $0x10e8] sm:$0xff] }
 0x1b4   : > { %2132 = vmatmul.f32.gmra.mxu1 %v7405_v13  ;;  %2190 = vmatmul.f32.gmra.mxu3 %v7405_v13 }
 0x1b5   : > { %2233 = vmatpush.msrb.mxu1 %v1041_v59  ;;  %v7561_v15 = vpop.f32.mrf.mxu1  ;;  %2263 = vmatpush.msrb.mxu2 %v1401_v43  ;;  %v7571_v43 = vpop.f32.mrf.mxu0 }
 0x1b6   : > { %9148 = vst [vmem:[#allocation40_spill] sm:$0xff] %v7561_v15  ;;  %2321 = vmatpush.msra.mxu0 %v1402_v62  ;;  %2291 = vmatpush.msrb.mxu3 %v1042_v7  ;;  %v946_v62 = vld [vmem:[#allocation7 + $0x5a8] sm:$0xff]  ;;  %v921_v7 = vld [vmem:[#allocation7 + $0x4e0] sm:$0xff] }
 0x1b7   : > { %2234 = vmatpush.msrb.mxu1 %v1017_v8  ;;  %2264 = vmatpush.msrb.mxu2 %v1377_v11  ;;  %9150 = vst [vmem:[#allocation42_spill] sm:$0xff] %v7571_v43  ;;  %v1281_v8 = vld [vmem:[#allocation7 + $0x1020] sm:$0xff]  ;;  %v1282_v11 = vld [vmem:[#allocation7 + $0x1028] sm:$0xff] }
 0x1b8   : > { %2322 = vmatpush.msra.mxu0 %v1378_v14  ;;  %2292 = vmatpush.msrb.mxu3 %v1018_v16  ;;  %v922_v14 = vld [vmem:[#allocation7 + $0x4e8] sm:$0xff]  ;;  %v897_v16 = vld [vmem:[#allocation7 + $0x420] sm:$0xff] }
 0x1b9   : > { %2235 = vmatpush.msrb.mxu1 %v993_v19  ;;  %2265 = vmatpush.msrb.mxu2 %v1353_v20  ;;  %v1257_v19 = vld [vmem:[#allocation7 + $0xf60] sm:$0xff]  ;;  %v1258_v20 = vld [vmem:[#allocation7 + $0xf68] sm:$0xff] }
 0x1ba   : > { %2323 = vmatpush.msra.mxu0 %v1354_v25  ;;  %2164 = vmatmul.f32.gmra.mxu2 %v7410_v26  ;;  %v7575_v25 = vpop.f32.mrf.mxu2 }
 0x1bb   : > { %2222 = vmatmul.f32.gmra.mxu0 %v7410_v26  ;;  %2293 = vmatpush.msrb.mxu3 %v994_v29  ;;  %9151 = vst [vmem:[#allocation43_spill] sm:$0xff] %v7575_v25  ;;  %v898_v29 = vld [vmem:[#allocation7 + $0x428] sm:$0xff]  ;;  %v975_v25 = vld [vmem:[#allocation7 + $0x690] sm:$0xff] }
 0x1bc   : > { %2236 = vmatpush.msrb.mxu1 %v969_v30  ;;  %2266 = vmatpush.msrb.mxu2 %v1329_v31  ;;  %v873_v30 = vld [vmem:[#allocation7 + $0x360] sm:$0xff] }
 0x1bd   : > { %2324 = vmatpush.msra.mxu0 %v1330_v39  ;;  %v7569_v59 = vpop.f32.mrf.mxu1  ;;  %2294 = vmatpush.msrb.mxu3 %v970_v45  ;;  %v1233_v31 = vld [vmem:[#allocation7 + $0xea0] sm:$0xff]  ;;  %v1234_v39 = vld [vmem:[#allocation7 + $0xea8] sm:$0xff] }
 0x1be   : > { %2135 = vmatmul.f32.gmra.mxu1 %v7415_v32  ;;  %2193 = vmatmul.f32.gmra.mxu3 %v7415_v32  ;;  %v874_v45 = vld [vmem:[#allocation7 + $0x368] sm:$0xff] }
 0x1bf   : > { %2237 = vmatpush.msrb.mxu1 %v945_v53  ;;  %2267 = vmatpush.msrb.mxu2 %v1305_v54  ;;  %v7581_v54 = vpop.f32.mrf.mxu3 }
 0x1c0   : > { %2325 = vmatpush.msra.mxu0 %v1306_v55  ;;  %2295 = vmatpush.msrb.mxu3 %v946_v62  ;;  %9153 = vst [vmem:[#allocation45_spill] sm:$0xff] %v7581_v54  ;;  %v849_v55 = vld [vmem:[#allocation7 + $0x2a0] sm:$0xff] }
 0x1c1   : > { %2238 = vmatpush.msrb.mxu1 %v921_v7  ;;  %2268 = vmatpush.msrb.mxu2 %v1281_v8  ;;  %v1209_v62 = vld [vmem:[#allocation7 + $0xde0] sm:$0xff]  ;;  %v1210_v7 = vld [vmem:[#allocation7 + $0xde8] sm:$0xff]  ;;  %v7583_v8 = vpop.f32.mrf.mxu0 }
 0x1c2   : > { %2326 = vmatpush.msra.mxu0 %v1282_v11  ;;  %2296 = vmatpush.msrb.mxu3 %v922_v14  ;;  %9154 = vst [vmem:[#allocation46_spill] sm:$0xff] %v7583_v8  ;;  %v850_v11 = vld [vmem:[#allocation7 + $0x2a8] sm:$0xff]  ;;  %v825_v14 = vld [vmem:[#allocation7 + $0x1e0] sm:$0xff]  ;;  %v1384_v8 = vld [vmem:[#allocation7 + $0x1358] sm:$0xff] }
 0x1c3   : > { %2239 = vmatpush.msrb.mxu1 %v897_v16  ;;  %2269 = vmatpush.msrb.mxu2 %v1257_v19  ;;  %v1185_v16 = vld [vmem:[#allocation7 + $0xd20] sm:$0xff]  ;;  %v1186_v19 = vld [vmem:[#allocation7 + $0xd28] sm:$0xff] }
 0x1c4   : > { %2327 = vmatpush.msra.mxu0 %v1258_v20  ;;  %2167 = vmatmul.f32.gmra.mxu2 %v7420_v46  ;;  %v826_v20 = vld [vmem:[#allocation7 + $0x1e8] sm:$0xff] }
 0x1c5   : > { %2225 = vmatmul.f32.gmra.mxu0 %v7420_v46  ;;  %v7579_v53 = vpop.f32.mrf.mxu1  ;;  %2297 = vmatpush.msrb.mxu3 %v898_v29  ;;  %v801_v29 = vld [vmem:[#allocation7 + $0x120] sm:$0xff] }
 0x1c6   : > { %9152 = vst [vmem:[#allocation44_spill] sm:$0xff] %v7579_v53  ;;  %2240 = vmatpush.msrb.mxu1 %v873_v30  ;;  %2270 = vmatpush.msrb.mxu2 %v1233_v31  ;;  %v1161_v30 = vld [vmem:[#allocation7 + $0xc60] sm:$0xff]  ;;  %v1162_v31 = vld [vmem:[#allocation7 + $0xc68] sm:$0xff]  ;;  %v783_v53 = vld [vmem:[#allocation7 + $0x90] sm:$0xff] }
 0x1c7   : > { %2328 = vmatpush.msra.mxu0 %v1234_v39  ;;  %2298 = vmatpush.msrb.mxu3 %v874_v45  ;;  %v7587_v39 = vpop.f32.mrf.mxu2  ;;  %v802_v45 = vld [vmem:[#allocation7 + $0x128] sm:$0xff] }
 0x1c8   : > { %2138 = vmatmul.f32.gmra.mxu1 %v7425_v35  ;;  %2196 = vmatmul.f32.gmra.mxu3 %v7425_v35  ;;  %9155 = vst [vmem:[#allocation47_spill] sm:$0xff] %v7587_v39  ;;  %v1260_v39 = vld [vmem:[#allocation7 + $0xf78] sm:$0xff] }
 0x1c9   : > { %2241 = vmatpush.msrb.mxu1 %v849_v55  ;;  %2271 = vmatpush.msrb.mxu2 %v1209_v62  ;;  %v1523_v55 = vld [vmem:[#allocation7 + $0x17b0] sm:$0xff]  ;;  %v1524_v62 = vld [vmem:[#allocation7 + $0x17b8] sm:$0xff] }
 0x1ca   : > { %2329 = vmatpush.msra.mxu0 %v1210_v7  ;;  %2299 = vmatpush.msrb.mxu3 %v850_v11  ;;  %v778_v7 = vld [vmem:[#allocation7 + $0x68] sm:$0xff]  ;;  %v7592_v11 = vpop.f32.mrf.mxu3 }
 0x1cb   : > { %2242 = vmatpush.msrb.mxu1 %v825_v14  ;;  %2272 = vmatpush.msrb.mxu2 %v1185_v16  ;;  %9157 = vst [vmem:[#allocation49_spill] sm:$0xff] %v7592_v11  ;;  %v1139_v14 = vld [vmem:[#allocation7 + $0xbb0] sm:$0xff]  ;;  %v1332_v11 = vld [vmem:[#allocation7 + $0x11b8] sm:$0xff] }
 0x1cc   : > { %2330 = vmatpush.msra.mxu0 %v1186_v19  ;;  %2300 = vmatpush.msrb.mxu3 %v826_v20  ;;  %v1499_v16 = vld [vmem:[#allocation7 + $0x16f0] sm:$0xff]  ;;  %v1500_v19 = vld [vmem:[#allocation7 + $0x16f8] sm:$0xff]  ;;  %v7595_v20 = vpop.f32.mrf.mxu0 }
 0x1cd   : > { %2243 = vmatpush.msrb.mxu1 %v801_v29  ;;  %v7589_v41 = vpop.f32.mrf.mxu1  ;;  %2273 = vmatpush.msrb.mxu2 %v1161_v30  ;;  %9158 = vst [vmem:[#allocation50_spill] sm:$0xff] %v7595_v20  ;;  %v1140_v29 = vld [vmem:[#allocation7 + $0xbb8] sm:$0xff]  ;;  %v1115_v30 = vld [vmem:[#allocation7 + $0xaf0] sm:$0xff] }
 0x1ce   : > { %9156 = vst [vmem:[#allocation48_spill] sm:$0xff] %v7589_v41  ;;  %2331 = vmatpush.msra.mxu0 %v1162_v31  ;;  %2274 = vmatmul.f32.vlgmr.msrb.gmra.mxu2 %v7390_v50  ;;  %v1475_v31 = vld [vmem:[#allocation7 + $0x1630] sm:$0xff]  ;;  %v1382_v41 = vld [vmem:[#allocation7 + $0x1348] sm:$0xff] }
 0x1cf   : > { %2301 = vmatpush.msrb.mxu3 %v802_v45  ;;  %2332 = vmatmul.f32.vlgmr.msra.gmra.mxu0 %v7390_v50  ;;  %v1476_v45 = vld [vmem:[#allocation7 + $0x1638] sm:$0xff]  ;;  %v1331_v20 = vld [vmem:[#allocation7 + $0x11b0] sm:$0xff] }
 0x1d0   : > { %2244 = vmatpush.msrb.mxu1 %v777_v0  ;;  %2374 = vmatpush.msra.mxu2 %v1523_v55  ;;  %v1116_v0 = vld [vmem:[#allocation7 + $0xaf8] sm:$0xff]  ;;  %v1451_v55 = vld [vmem:[#allocation7 + $0x1570] sm:$0xff] }
 0x1d1   : > { %2432 = vmatpush.msrb.mxu0 %v1524_v62  ;;  %2302 = vmatpush.msrb.mxu3 %v778_v7  ;;  %v1452_v62 = vld [vmem:[#allocation7 + $0x1578] sm:$0xff]  ;;  %v7601_v7 = vpop.f32.mrf.mxu2 }
 0x1d2   : > { %2245 = vmatmul.f32.vlgmr.msrb.gmra.mxu1 %v7395_v58  ;;  %2303 = vmatmul.f32.vlgmr.msrb.gmra.mxu3 %v7395_v58 }
 0x1d3   : > { %2345 = vmatpush.msra.mxu1 %v1139_v14  ;;  %2375 = vmatpush.msra.mxu2 %v1499_v16  ;;  %v1067_v14 = vld [vmem:[#allocation7 + $0x970] sm:$0xff] }
 0x1d4   : > { %2433 = vmatpush.msrb.mxu0 %v1500_v19  ;;  %2403 = vmatpush.msra.mxu3 %v1140_v29  ;;  %v1427_v16 = vld [vmem:[#allocation7 + $0x14b0] sm:$0xff]  ;;  %v1428_v19 = vld [vmem:[#allocation7 + $0x14b8] sm:$0xff] }
 0x1d5   : > { %2346 = vmatpush.msra.mxu1 %v1115_v30  ;;  %v7599_v60 = vpop.f32.mrf.mxu1  ;;  %2376 = vmatpush.msra.mxu2 %v1475_v31  ;;  %v1068_v29 = vld [vmem:[#allocation7 + $0x978] sm:$0xff]  ;;  %v7605_v30 = vpop.f32.mrf.mxu3  ;;  %v1403_v31 = vld [vmem:[#allocation7 + $0x13f0] sm:$0xff] }
 0x1d6   : > { %9159 = vst [vmem:[#allocation51_spill] sm:$0xff] %v7599_v60  ;;  %2434 = vmatpush.msrb.mxu0 %v1476_v45  ;;  %2404 = vmatpush.msra.mxu3 %v1116_v0  ;;  %v7607_v45 = vpop.f32.mrf.mxu0  ;;  %v1044_v0 = vld [vmem:[#allocation7 + $0x8b8] sm:$0xff] }
 0x1d7   : > { %2347 = vmatpush.msra.mxu1 %v1091_v17  ;;  %2377 = vmatpush.msra.mxu2 %v1451_v55  ;;  %9160 = vst [vmem:[#allocation52_spill] sm:$0xff] %v7605_v30  ;;  %v1404_v17 = vld [vmem:[#allocation7 + $0x13f8] sm:$0xff]  ;;  %v1019_v55 = vld [vmem:[#allocation7 + $0x7f0] sm:$0xff] }
 0x1d8   : > { %2435 = vmatpush.msrb.mxu0 %v1452_v62  ;;  %2277 = vmatmul.f32.gmra.mxu2 %v7400_v6  ;;  %9161 = vst [vmem:[#allocation53_spill] sm:$0xff] %v7607_v45  ;;  %v1379_v62 = vld [vmem:[#allocation7 + $0x1330] sm:$0xff]  ;;  %v996_v60 = vld [vmem:[#allocation7 + $0x738] sm:$0xff] }
 0x1d9   : > { %2335 = vmatmul.f32.gmra.mxu0 %v7400_v6  ;;  %2405 = vmatpush.msra.mxu3 %v1092_v48  ;;  %v1020_v48 = vld [vmem:[#allocation7 + $0x7f8] sm:$0xff]  ;;  %v979_v30 = vld [vmem:[#allocation7 + $0x6b0] sm:$0xff] }
 0x1da   : > { %2348 = vmatpush.msra.mxu1 %v1067_v14  ;;  %2378 = vmatpush.msra.mxu2 %v1427_v16  ;;  %v995_v14 = vld [vmem:[#allocation7 + $0x730] sm:$0xff] }
 0x1db   : > { %2436 = vmatpush.msrb.mxu0 %v1428_v19  ;;  %2406 = vmatpush.msra.mxu3 %v1068_v29  ;;  %v1355_v16 = vld [vmem:[#allocation7 + $0x1270] sm:$0xff]  ;;  %v1356_v19 = vld [vmem:[#allocation7 + $0x1278] sm:$0xff]  ;;  %v7613_v29 = vpop.f32.mrf.mxu2 }
 0x1dc   : > { %2248 = vmatmul.f32.gmra.mxu1 %v7405_v13  ;;  %2306 = vmatmul.f32.gmra.mxu3 %v7405_v13  ;;  %9163 = vst [vmem:[#allocation55_spill] sm:$0xff] %v7613_v29 }
 0x1dd   : > { %2349 = vmatpush.msra.mxu1 %v1043_v22  ;;  %v7611_v5 = vpop.f32.mrf.mxu1  ;;  %2379 = vmatpush.msra.mxu2 %v1403_v31  ;;  %v971_v22 = vld [vmem:[#allocation7 + $0x670] sm:$0xff]  ;;  %v972_v31 = vld [vmem:[#allocation7 + $0x678] sm:$0xff] }
 0x1de   : > { %9162 = vst [vmem:[#allocation54_spill] sm:$0xff] %v7611_v5  ;;  %2437 = vmatpush.msrb.mxu0 %v1404_v17  ;;  %2407 = vmatpush.msra.mxu3 %v1044_v0  ;;  %v7617_v17 = vpop.f32.mrf.mxu3  ;;  %v947_v0 = vld [vmem:[#allocation7 + $0x5b0] sm:$0xff]  ;;  %v977_v5 = vld [vmem:[#allocation7 + $0x6a0] sm:$0xff] }
 0x1df   : > { %2350 = vmatpush.msra.mxu1 %v1019_v55  ;;  %2380 = vmatpush.msra.mxu2 %v1379_v62  ;;  %9164 = vst [vmem:[#allocation56_spill] sm:$0xff] %v7617_v17  ;;  %v1308_v55 = vld [vmem:[#allocation7 + $0x10f8] sm:$0xff] }
 0x1e0   : > { %2438 = vmatpush.msrb.mxu0 %v1380_v23  ;;  %2408 = vmatpush.msra.mxu3 %v1020_v48  ;;  %v1307_v23 = vld [vmem:[#allocation7 + $0x10f0] sm:$0xff]  ;;  %v7621_v48 = vpop.f32.mrf.mxu0 }
 0x1e1   : > { %2351 = vmatpush.msra.mxu1 %v995_v14  ;;  %2381 = vmatpush.msra.mxu2 %v1355_v16  ;;  %9166 = vst [vmem:[#allocation58_spill] sm:$0xff] %v7621_v48  ;;  %v948_v14 = vld [vmem:[#allocation7 + $0x5b8] sm:$0xff]  ;;  %v923_v16 = vld [vmem:[#allocation7 + $0x4f0] sm:$0xff]  ;;  %v973_v48 = vld [vmem:[#allocation7 + $0x680] sm:$0xff] }
 0x1e2   : > { %2439 = vmatpush.msrb.mxu0 %v1356_v19  ;;  %2280 = vmatmul.f32.gmra.mxu2 %v7410_v26  ;;  %v1283_v19 = vld [vmem:[#allocation7 + $0x1030] sm:$0xff] }
 0x1e3   : > { %2338 = vmatmul.f32.gmra.mxu0 %v7410_v26  ;;  %2409 = vmatpush.msra.mxu3 %v996_v60  ;;  %v1284_v60 = vld [vmem:[#allocation7 + $0x1038] sm:$0xff]  ;;  %v7625_v15 = vpop.f32.mrf.mxu2 }
 0x1e4   : > { %2352 = vmatpush.msra.mxu1 %v971_v22  ;;  %2382 = vmatpush.msra.mxu2 %v1331_v20  ;;  %v924_v20 = vld [vmem:[#allocation7 + $0x4f8] sm:$0xff]  ;;  %v1259_v22 = vld [vmem:[#allocation7 + $0xf70] sm:$0xff]  ;;  %9167 = vst [vmem:[#allocation59_spill] sm:$0xff] %v7625_v15 }
 0x1e5   : > { %2440 = vmatpush.msrb.mxu0 %v1332_v11  ;;  %v7619_v62 = vpop.f32.mrf.mxu1  ;;  %2410 = vmatpush.msra.mxu3 %v972_v31  ;;  %v899_v11 = vld [vmem:[#allocation7 + $0x430] sm:$0xff]  ;;  %v900_v31 = vld [vmem:[#allocation7 + $0x438] sm:$0xff] }
 0x1e6   : > { %9165 = vst [vmem:[#allocation57_spill] sm:$0xff] %v7619_v62  ;;  %2251 = vmatmul.f32.gmra.mxu1 %v7415_v32  ;;  %2309 = vmatmul.f32.gmra.mxu3 %v7415_v32 }
 0x1e7   : > { %2353 = vmatpush.msra.mxu1 %v947_v0  ;;  %2383 = vmatpush.msra.mxu2 %v1307_v23  ;;  %v1235_v0 = vld [vmem:[#allocation7 + $0xeb0] sm:$0xff]  ;;  %v876_v23 = vld [vmem:[#allocation7 + $0x378] sm:$0xff] }
 0x1e8   : > { %2441 = vmatpush.msrb.mxu0 %v1308_v55  ;;  %2411 = vmatpush.msra.mxu3 %v948_v14  ;;  %v7631_v14 = vpop.f32.mrf.mxu3 }
 0x1e9   : > { %2354 = vmatpush.msra.mxu1 %v923_v16  ;;  %2384 = vmatpush.msra.mxu2 %v1283_v19  ;;  %9169 = vst [vmem:[#allocation61_spill] sm:$0xff] %v7631_v14  ;;  %v851_v16 = vld [vmem:[#allocation7 + $0x2b0] sm:$0xff] }
 0x1ea   : > { %2442 = vmatpush.msrb.mxu0 %v1284_v60  ;;  %2412 = vmatpush.msra.mxu3 %v924_v20  ;;  %v1211_v19 = vld [vmem:[#allocation7 + $0xdf0] sm:$0xff]  ;;  %v1212_v60 = vld [vmem:[#allocation7 + $0xdf8] sm:$0xff]  ;;  %v7633_v20 = vpop.f32.mrf.mxu0 }
 0x1eb   : > { %2355 = vmatpush.msra.mxu1 %v899_v11  ;;  %2385 = vmatpush.msra.mxu2 %v1259_v22  ;;  %9170 = vst [vmem:[#allocation62_spill] sm:$0xff] %v7633_v20  ;;  %v827_v11 = vld [vmem:[#allocation7 + $0x1f0] sm:$0xff]  ;;  %v7637_v14 = vpop.f32.mrf.mxu2 }
 0x1ec   : > { %2443 = vmatpush.msrb.mxu0 %v1260_v39  ;;  %2283 = vmatmul.f32.gmra.mxu2 %v7420_v46  ;;  %v852_v39 = vld [vmem:[#allocation7 + $0x2b8] sm:$0xff]  ;;  %v1187_v22 = vld [vmem:[#allocation7 + $0xd30] sm:$0xff]  ;;  %9171 = vst [vmem:[#allocation63_spill] sm:$0xff] %v7637_v14 }
 0x1ed   : > { %2341 = vmatmul.f32.gmra.mxu0 %v7420_v46  ;;  %v7629_v55 = vpop.f32.mrf.mxu1  ;;  %2413 = vmatpush.msra.mxu3 %v900_v31  ;;  %v803_v31 = vld [vmem:[#allocation7 + $0x130] sm:$0xff] }
 0x1ee   : > { %9168 = vst [vmem:[#allocation60_spill] sm:$0xff] %v7629_v55  ;;  %2356 = vmatpush.msra.mxu1 %v875_v61  ;;  %2386 = vmatpush.msra.mxu2 %v1235_v0  ;;  %v1188_v55 = vld [vmem:[#allocation7 + $0xd38] sm:$0xff]  ;;  %v779_v20 = vld [vmem:[#allocation7 + $0x70] sm:$0xff] }
 0x1ef   : > { %2444 = vmatpush.msrb.mxu0 %v1236_v9  ;;  %2414 = vmatpush.msra.mxu3 %v876_v23  ;;  %v828_v61 = vld [vmem:[#allocation7 + $0x1f8] sm:$0xff]  ;;  %v1163_v9 = vld [vmem:[#allocation7 + $0xc70] sm:$0xff] }
 0x1f0   : > { %2254 = vmatmul.f32.gmra.mxu1 %v7425_v35  ;;  %2312 = vmatmul.f32.gmra.mxu3 %v7425_v35  ;;  %v1164_v0 = vld [vmem:[#allocation7 + $0xc78] sm:$0xff] }
 0x1f1   : > { %2357 = vmatpush.msra.mxu1 %v851_v16  ;;  %2387 = vmatpush.msra.mxu2 %v1211_v19  ;;  %v804_v23 = vld [vmem:[#allocation7 + $0x138] sm:$0xff]  ;;  %v1525_v16 = vld [vmem:[#allocation7 + $0x17c0] sm:$0xff]  ;;  %v1526_v19 = vld [vmem:[#allocation7 + $0x17c8] sm:$0xff] }
 0x1f2   : > { %2445 = vmatpush.msrb.mxu0 %v1212_v60  ;;  %2415 = vmatpush.msra.mxu3 %v852_v39  ;;  %v780_v60 = vld [vmem:[#allocation7 + $0x78] sm:$0xff]  ;;  %v7642_v39 = vpop.f32.mrf.mxu3 }
 0x1f3   : > { %2358 = vmatpush.msra.mxu1 %v827_v11  ;;  %2388 = vmatpush.msra.mxu2 %v1187_v22  ;;  %9173 = vst [vmem:[#allocation65_spill] sm:$0xff] %v7642_v39  ;;  %v1501_v11 = vld [vmem:[#allocation7 + $0x1700] sm:$0xff]  ;;  %v1502_v22 = vld [vmem:[#allocation7 + $0x1708] sm:$0xff]  ;;  %v7649_v39 = vpop.f32.mrf.mxu2 }
 0x1f4   : > { %2446 = vmatpush.msrb.mxu0 %v1188_v55  ;;  %2416 = vmatpush.msra.mxu3 %v828_v61  ;;  %v1141_v55 = vld [vmem:[#allocation7 + $0xbc0] sm:$0xff]  ;;  %v7645_v61 = vpop.f32.mrf.mxu0  ;;  %9175 = vst [vmem:[#allocation67_spill] sm:$0xff] %v7649_v39 }
 0x1f5   : > { %2359 = vmatpush.msra.mxu1 %v803_v31  ;;  %v7639_v15 = vpop.f32.mrf.mxu1  ;;  %2389 = vmatpush.msra.mxu2 %v1163_v9  ;;  %9174 = vst [vmem:[#allocation66_spill] sm:$0xff] %v7645_v61  ;;  %v1142_v31 = vld [vmem:[#allocation7 + $0xbc8] sm:$0xff]  ;;  %v1117_v9 = vld [vmem:[#allocation7 + $0xb00] sm:$0xff] }
 0x1f6   : > { %9172 = vst [vmem:[#allocation64_spill] sm:$0xff] %v7639_v15  ;;  %2447 = vmatpush.msrb.mxu0 %v1164_v0  ;;  %2390 = vmatmul.f32.vlgmr.msra.gmra.mxu2 %v7390_v50  ;;  %v1477_v0 = vld [vmem:[#allocation7 + $0x1640] sm:$0xff] }
 0x1f7   : > { %2417 = vmatpush.msra.mxu3 %v804_v23  ;;  %2448 = vmatmul.f32.vlgmr.msrb.gmra.mxu0 %v7390_v50  ;;  %v1478_v23 = vld [vmem:[#allocation7 + $0x1648] sm:$0xff]  ;;  %v1093_v15 = vld [vmem:[#allocation7 + $0xa40] sm:$0xff] }
 0x1f8   : > { %2360 = vmatpush.msra.mxu1 %v779_v20  ;;  %2490 = vmatpush.msrb.mxu2 %v1525_v16  ;;  %v1118_v20 = vld [vmem:[#allocation7 + $0xb08] sm:$0xff]  ;;  %v1453_v16 = vld [vmem:[#allocation7 + $0x1580] sm:$0xff] }
 0x1f9   : > { %2548 = vmatpush.msra.mxu0 %v1526_v19  ;;  %2418 = vmatpush.msra.mxu3 %v780_v60  ;;  %v1454_v19 = vld [vmem:[#allocation7 + $0x1588] sm:$0xff]  ;;  %v1069_v61 = vld [vmem:[#allocation7 + $0x980] sm:$0xff] }
 0x1fa   : > { %2361 = vmatmul.f32.vlgmr.msra.gmra.mxu1 %v7395_v58  ;;  %2419 = vmatmul.f32.vlgmr.msra.gmra.mxu3 %v7395_v58  ;;  %v1094_v60 = vld [vmem:[#allocation7 + $0xa48] sm:$0xff] }
 0x1fb   : > { %2461 = vmatpush.msrb.mxu1 %v1141_v55  ;;  %2491 = vmatpush.msrb.mxu2 %v1501_v11  ;;  %v1429_v55 = vld [vmem:[#allocation7 + $0x14c0] sm:$0xff]  ;;  %v1430_v11 = vld [vmem:[#allocation7 + $0x14c8] sm:$0xff]  ;;  %v7661_v62 = vpop.f32.mrf.mxu2 }
 0x1fc   : > { %2549 = vmatpush.msra.mxu0 %v1502_v22  ;;  %2519 = vmatpush.msrb.mxu3 %v1142_v31  ;;  %v1070_v22 = vld [vmem:[#allocation7 + $0x988] sm:$0xff]  ;;  %v7655_v31 = vpop.f32.mrf.mxu3  ;;  %9178 = vst [vmem:[#allocation70_spill] sm:$0xff] %v7661_v62 }
 0x1fd   : > { %2462 = vmatpush.msrb.mxu1 %v1117_v9  ;;  %2492 = vmatpush.msrb.mxu2 %v1477_v0  ;;  %9176 = vst [vmem:[#allocation68_spill] sm:$0xff] %v7655_v31  ;;  %v1045_v9 = vld [vmem:[#allocation7 + $0x8c0] sm:$0xff]  ;;  %v1406_v0 = vld [vmem:[#allocation7 + $0x1408] sm:$0xff] }
 0x1fe   : > { %2550 = vmatpush.msra.mxu0 %v1478_v23  ;;  %2520 = vmatpush.msrb.mxu3 %v1118_v20  ;;  %v7651_v14 = vpop.f32.mrf.mxu1  ;;  %v7657_v23 = vpop.f32.mrf.mxu0  ;;  %v1046_v20 = vld [vmem:[#allocation7 + $0x8c8] sm:$0xff] }
 0x1ff   : > { %2463 = vmatpush.msrb.mxu1 %v1093_v15  ;;  %2493 = vmatpush.msrb.mxu2 %v1453_v16  ;;  %v1405_v15 = vld [vmem:[#allocation7 + $0x1400] sm:$0xff]  ;;  %9177 = vst [vmem:[#allocation69_spill] sm:$0xff] %v7657_v23  ;;  %v1286_v62 = vld [vmem:[#allocation7 + $0x1048] sm:$0xff] }
 0x200   : > { %2551 = vmatpush.msra.mxu0 %v1454_v19  ;;  %2393 = vmatmul.f32.gmra.mxu2 %v7400_v6  ;;  %v1021_v16 = vld [vmem:[#allocation7 + $0x800] sm:$0xff] }
 0x201   : > { %2451 = vmatmul.f32.gmra.mxu0 %v7400_v6  ;;  %2521 = vmatpush.msrb.mxu3 %v1094_v60  ;;  %v1381_v19 = vld [vmem:[#allocation7 + $0x1340] sm:$0xff] }
 0x202   : > { %2464 = vmatpush.msrb.mxu1 %v1069_v61  ;;  %2494 = vmatpush.msrb.mxu2 %v1429_v55  ;;  %v1022_v61 = vld [vmem:[#allocation7 + $0x808] sm:$0xff]  ;;  %v997_v60 = vld [vmem:[#allocation7 + $0x740] sm:$0xff] }
 0x203   : > { %2552 = vmatpush.msra.mxu0 %v1430_v11  ;;  %2522 = vmatpush.msrb.mxu3 %v1070_v22  ;;  %v1357_v55 = vld [vmem:[#allocation7 + $0x1280] sm:$0xff]  ;;  %v1358_v11 = vld [vmem:[#allocation7 + $0x1288] sm:$0xff] }
 0x204   : > { %2364 = vmatmul.f32.gmra.mxu1 %v7405_v13  ;;  %2422 = vmatmul.f32.gmra.mxu3 %v7405_v13  ;;  %v998_v22 = vld [vmem:[#allocation7 + $0x748] sm:$0xff] }
 0x205   : > { %2465 = vmatpush.msrb.mxu1 %v1045_v9  ;;  %2495 = vmatpush.msrb.mxu2 %v1405_v15  ;;  %v1333_v9 = vld [vmem:[#allocation7 + $0x11c0] sm:$0xff]  ;;  %v1334_v15 = vld [vmem:[#allocation7 + $0x11c8] sm:$0xff] }
 0x206   : > { %2553 = vmatpush.msra.mxu0 %v1406_v0  ;;  %2523 = vmatpush.msrb.mxu3 %v1046_v20  ;;  %v974_v0 = vld [vmem:[#allocation7 + $0x688] sm:$0xff]  ;;  %v7667_v20 = vpop.f32.mrf.mxu3 }
 0x207   : > { %2466 = vmatpush.msrb.mxu1 %v1021_v16  ;;  %2496 = vmatpush.msrb.mxu2 %v1381_v19  ;;  %9179 = vst [vmem:[#allocation71_spill] sm:$0xff] %v7667_v20  ;;  %v1309_v16 = vld [vmem:[#allocation7 + $0x1100] sm:$0xff]  ;;  %v1310_v19 = vld [vmem:[#allocation7 + $0x1108] sm:$0xff]  ;;  %v7673_v20 = vpop.f32.mrf.mxu2 }
 0x208   : > { %2554 = vmatpush.msra.mxu0 %v1382_v41  ;;  %2524 = vmatpush.msrb.mxu3 %v1022_v61  ;;  %v949_v41 = vld [vmem:[#allocation7 + $0x5c0] sm:$0xff]  ;;  %v7669_v61 = vpop.f32.mrf.mxu0  ;;  %9181 = vst [vmem:[#allocation73_spill] sm:$0xff] %v7673_v20  ;;  %v1190_v20 = vld [vmem:[#allocation7 + $0xd48] sm:$0xff] }
 0x209   : > { %2467 = vmatpush.msrb.mxu1 %v997_v60  ;;  %v7663_v17 = vpop.f32.mrf.mxu1  ;;  %2497 = vmatpush.msrb.mxu2 %v1357_v55  ;;  %9180 = vst [vmem:[#allocation72_spill] sm:$0xff] %v7669_v61  ;;  %v950_v60 = vld [vmem:[#allocation7 + $0x5c8] sm:$0xff]  ;;  %v925_v55 = vld [vmem:[#allocation7 + $0x500] sm:$0xff] }
 0x20a   : > { %2555 = vmatpush.msra.mxu0 %v1358_v11  ;;  %2396 = vmatmul.f32.gmra.mxu2 %v7410_v26  ;;  %v1285_v11 = vld [vmem:[#allocation7 + $0x1040] sm:$0xff] }
 0x20b   : > { %2454 = vmatmul.f32.gmra.mxu0 %v7410_v26  ;;  %2525 = vmatpush.msrb.mxu3 %v998_v22  ;;  %v901_v22 = vld [vmem:[#allocation7 + $0x440] sm:$0xff] }
 0x20c   : > { %2468 = vmatpush.msrb.mxu1 %v973_v48  ;;  %2498 = vmatpush.msrb.mxu2 %v1333_v9  ;;  %v926_v48 = vld [vmem:[#allocation7 + $0x508] sm:$0xff]  ;;  %v1261_v9 = vld [vmem:[#allocation7 + $0xf80] sm:$0xff] }
 0x20d   : > { %2556 = vmatpush.msra.mxu0 %v1334_v15  ;;  %2526 = vmatpush.msrb.mxu3 %v974_v0  ;;  %v1262_v15 = vld [vmem:[#allocation7 + $0xf88] sm:$0xff]  ;;  %v877_v61 = vld [vmem:[#allocation7 + $0x380] sm:$0xff] }
 0x20e   : > { %2367 = vmatmul.f32.gmra.mxu1 %v7415_v32  ;;  %2425 = vmatmul.f32.gmra.mxu3 %v7415_v32  ;;  %v902_v0 = vld [vmem:[#allocation7 + $0x448] sm:$0xff] }
 0x20f   : > { %2469 = vmatpush.msrb.mxu1 %v949_v41  ;;  %2499 = vmatpush.msrb.mxu2 %v1309_v16  ;;  %v1237_v41 = vld [vmem:[#allocation7 + $0xec0] sm:$0xff]  ;;  %v1238_v16 = vld [vmem:[#allocation7 + $0xec8] sm:$0xff] }
 0x210   : > { %2557 = vmatpush.msra.mxu0 %v1310_v19  ;;  %2527 = vmatpush.msrb.mxu3 %v950_v60  ;;  %v878_v19 = vld [vmem:[#allocation7 + $0x388] sm:$0xff]  ;;  %v7679_v60 = vpop.f32.mrf.mxu3 }
 0x211   : > { %2470 = vmatpush.msrb.mxu1 %v925_v55  ;;  %2500 = vmatpush.msrb.mxu2 %v1285_v11  ;;  %9183 = vst [vmem:[#allocation75_spill] sm:$0xff] %v7679_v60  ;;  %v1213_v55 = vld [vmem:[#allocation7 + $0xe00] sm:$0xff]  ;;  %v1214_v11 = vld [vmem:[#allocation7 + $0xe08] sm:$0xff]  ;;  %v7685_v60 = vpop.f32.mrf.mxu2 }
 0x212   : > { %2558 = vmatpush.msra.mxu0 %v1286_v62  ;;  %2528 = vmatpush.msrb.mxu3 %v926_v48  ;;  %v853_v62 = vld [vmem:[#allocation7 + $0x2c0] sm:$0xff]  ;;  %v7681_v48 = vpop.f32.mrf.mxu0  ;;  %9185 = vst [vmem:[#allocation77_spill] sm:$0xff] %v7685_v60 }
 0x213   : > { %2471 = vmatpush.msrb.mxu1 %v901_v22  ;;  %v7675_v23 = vpop.f32.mrf.mxu1  ;;  %2501 = vmatpush.msrb.mxu2 %v1261_v9  ;;  %9184 = vst [vmem:[#allocation76_spill] sm:$0xff] %v7681_v48  ;;  %v854_v22 = vld [vmem:[#allocation7 + $0x2c8] sm:$0xff]  ;;  %v829_v9 = vld [vmem:[#allocation7 + $0x200] sm:$0xff] }
 0x214   : > { %9182 = vst [vmem:[#allocation74_spill] sm:$0xff] %v7675_v23  ;;  %2559 = vmatpush.msra.mxu0 %v1262_v15  ;;  %2399 = vmatmul.f32.gmra.mxu2 %v7420_v46  ;;  %v1189_v15 = vld [vmem:[#allocation7 + $0xd40] sm:$0xff]  ;;  %v879_v23 = vld [vmem:[#allocation7 + $0x390] sm:$0xff] }
 0x215   : > { %2457 = vmatmul.f32.gmra.mxu0 %v7420_v46  ;;  %2529 = vmatpush.msrb.mxu3 %v902_v0  ;;  %v805_v0 = vld [vmem:[#allocation7 + $0x140] sm:$0xff] }
 0x216   : > { %2472 = vmatpush.msrb.mxu1 %v877_v61  ;;  %2502 = vmatpush.msrb.mxu2 %v1237_v41  ;;  %v830_v61 = vld [vmem:[#allocation7 + $0x208] sm:$0xff]  ;;  %v1165_v41 = vld [vmem:[#allocation7 + $0xc80] sm:$0xff] }
 0x217   : > { %2560 = vmatpush.msra.mxu0 %v1238_v16  ;;  %2530 = vmatpush.msrb.mxu3 %v878_v19  ;;  %v1166_v16 = vld [vmem:[#allocation7 + $0xc88] sm:$0xff]  ;;  %v781_v48 = vld [vmem:[#allocation7 + $0x80] sm:$0xff] }
 0x218   : > { %2370 = vmatmul.f32.gmra.mxu1 %v7425_v35  ;;  %2428 = vmatmul.f32.gmra.mxu3 %v7425_v35  ;;  %v806_v19 = vld [vmem:[#allocation7 + $0x148] sm:$0xff] }
 0x219   : > { %2473 = vmatpush.msrb.mxu1 %v853_v62  ;;  %2503 = vmatpush.msrb.mxu2 %v1213_v55  ;;  %v1527_v62 = vld [vmem:[#allocation7 + $0x17d0] sm:$0xff]  ;;  %v1528_v55 = vld [vmem:[#allocation7 + $0x17d8] sm:$0xff]  ;;  %v7697_v60 = vpop.f32.mrf.mxu2 }
 0x21a   : > { %2561 = vmatpush.msra.mxu0 %v1214_v11  ;;  %2531 = vmatpush.msrb.mxu3 %v854_v22  ;;  %v782_v11 = vld [vmem:[#allocation7 + $0x88] sm:$0xff]  ;;  %v7690_v22 = vpop.f32.mrf.mxu3 }
 0x21b   : > { %2474 = vmatpush.msrb.mxu1 %v829_v9  ;;  %2504 = vmatpush.msrb.mxu2 %v1189_v15  ;;  %9187 = vst [vmem:[#allocation79_spill] sm:$0xff] %v7690_v22  ;;  %v1503_v9 = vld [vmem:[#allocation7 + $0x1710] sm:$0xff]  ;;  %v1504_v15 = vld [vmem:[#allocation7 + $0x1718] sm:$0xff] }
 0x21c   : > { %2562 = vmatpush.msra.mxu0 %v1190_v20  ;;  %2532 = vmatpush.msrb.mxu3 %v830_v61  ;;  %v1143_v20 = vld [vmem:[#allocation7 + $0xbd0] sm:$0xff]  ;;  %v7693_v61 = vpop.f32.mrf.mxu0 }
 0x21d   : > { %2475 = vmatpush.msrb.mxu1 %v805_v0  ;;  %v7687_v31 = vpop.f32.mrf.mxu1  ;;  %2505 = vmatpush.msrb.mxu2 %v1165_v41  ;;  %9188 = vst [vmem:[#allocation80_spill] sm:$0xff] %v7693_v61  ;;  %v1144_v0 = vld [vmem:[#allocation7 + $0xbd8] sm:$0xff]  ;;  %v1119_v41 = vld [vmem:[#allocation7 + $0xb10] sm:$0xff] }
 0x21e   : > { %9186 = vst [vmem:[#allocation78_spill] sm:$0xff] %v7687_v31  ;;  %2563 = vmatpush.msra.mxu0 %v1166_v16  ;;  %2506 = vmatmul.f32.vlgmr.msrb.gmra.mxu2 %v7390_v50  ;;  %v1479_v16 = vld [vmem:[#allocation7 + $0x1650] sm:$0xff] }
 0x21f   : > { %2533 = vmatpush.msrb.mxu3 %v806_v19  ;;  %2564 = vmatmul.f32.vlgmr.msra.gmra.mxu0 %v7390_v50  ;;  %v1480_v19 = vld [vmem:[#allocation7 + $0x1658] sm:$0xff]  ;;  %v1095_v22 = vld [vmem:[#allocation7 + $0xa50] sm:$0xff] }
 0x220   : > { %2476 = vmatpush.msrb.mxu1 %v781_v48  ;;  %2606 = vmatpush.msra.mxu2 %v1527_v62  ;;  %v1120_v48 = vld [vmem:[#allocation7 + $0xb18] sm:$0xff]  ;;  %v1455_v62 = vld [vmem:[#allocation7 + $0x1590] sm:$0xff] }
 0x221   : > { %2664 = vmatpush.msrb.mxu0 %v1528_v55  ;;  %2534 = vmatpush.msrb.mxu3 %v782_v11  ;;  %v1456_v55 = vld [vmem:[#allocation7 + $0x1598] sm:$0xff]  ;;  %v1071_v61 = vld [vmem:[#allocation7 + $0x990] sm:$0xff]  ;;  %v7709_v54 = vpop.f32.mrf.mxu2 }
 0x222   : > { %2477 = vmatmul.f32.vlgmr.msrb.gmra.mxu1 %v7395_v58  ;;  %2535 = vmatmul.f32.vlgmr.msrb.gmra.mxu3 %v7395_v58  ;;  %v1096_v11 = vld [vmem:[#allocation7 + $0xa58] sm:$0xff] }
 0x223   : > { %2577 = vmatpush.msra.mxu1 %v1143_v20  ;;  %2607 = vmatpush.msra.mxu2 %v1503_v9  ;;  %v1431_v20 = vld [vmem:[#allocation7 + $0x14d0] sm:$0xff]  ;;  %v1432_v9 = vld [vmem:[#allocation7 + $0x14d8] sm:$0xff] }
 0x224   : > { %2665 = vmatpush.msrb.mxu0 %v1504_v15  ;;  %2635 = vmatpush.msra.mxu3 %v1144_v0  ;;  %v1072_v15 = vld [vmem:[#allocation7 + $0x998] sm:$0xff]  ;;  %v7703_v0 = vpop.f32.mrf.mxu3 }
 0x225   : > { %2578 = vmatpush.msra.mxu1 %v1119_v41  ;;  %2608 = vmatpush.msra.mxu2 %v1479_v16  ;;  %v1047_v41 = vld [vmem:[#allocation7 + $0x8d0] sm:$0xff]  ;;  %v1408_v16 = vld [vmem:[#allocation7 + $0x1418] sm:$0xff] }
 0x226   : > { %2666 = vmatpush.msrb.mxu0 %v1480_v19  ;;  %2636 = vmatpush.msra.mxu3 %v1120_v48  ;;  %v7705_v19 = vpop.f32.mrf.mxu0  ;;  %v1048_v48 = vld [vmem:[#allocation7 + $0x8d8] sm:$0xff] }
 0x227   : > { %2579 = vmatpush.msra.mxu1 %v1095_v22  ;;  %v7699_v31 = vpop.f32.mrf.mxu1  ;;  %2609 = vmatpush.msra.mxu2 %v1455_v62  ;;  %v1407_v22 = vld [vmem:[#allocation7 + $0x1410] sm:$0xff] }
 0x228   : > { %2667 = vmatpush.msrb.mxu0 %v1456_v55  ;;  %2509 = vmatmul.f32.gmra.mxu2 %v7400_v6  ;;  %v1023_v62 = vld [vmem:[#allocation7 + $0x810] sm:$0xff] }
 0x229   : > { %2567 = vmatmul.f32.gmra.mxu0 %v7400_v6  ;;  %2637 = vmatpush.msra.mxu3 %v1096_v11  ;;  %v1383_v55 = vld [vmem:[#allocation7 + $0x1350] sm:$0xff]  ;;  %v7721_v12 = vpop.f32.mrf.mxu2 }
 0x22a   : > { %2580 = vmatpush.msra.mxu1 %v1071_v61  ;;  %2610 = vmatpush.msra.mxu2 %v1431_v20  ;;  %v1024_v61 = vld [vmem:[#allocation7 + $0x818] sm:$0xff]  ;;  %v999_v11 = vld [vmem:[#allocation7 + $0x750] sm:$0xff]  ;;  %9189 = vst [vmem:[#allocation81_spill] sm:$0xff] %v7721_v12 }
 0x22b   : > { %2668 = vmatpush.msrb.mxu0 %v1432_v9  ;;  %2638 = vmatpush.msra.mxu3 %v1072_v15  ;;  %v1359_v20 = vld [vmem:[#allocation7 + $0x1290] sm:$0xff]  ;;  %v1360_v9 = vld [vmem:[#allocation7 + $0x1298] sm:$0xff] }
 0x22c   : > { %2480 = vmatmul.f32.gmra.mxu1 %v7405_v13  ;;  %2538 = vmatmul.f32.gmra.mxu3 %v7405_v13  ;;  %v1000_v15 = vld [vmem:[#allocation7 + $0x758] sm:$0xff] }
 0x22d   : > { %2581 = vmatpush.msra.mxu1 %v1047_v41  ;;  %2611 = vmatpush.msra.mxu2 %v1407_v22  ;;  %v1335_v41 = vld [vmem:[#allocation7 + $0x11d0] sm:$0xff]  ;;  %v1336_v22 = vld [vmem:[#allocation7 + $0x11d8] sm:$0xff] }
 0x22e   : > { %2669 = vmatpush.msrb.mxu0 %v1408_v16  ;;  %2639 = vmatpush.msra.mxu3 %v1048_v48  ;;  %v976_v16 = vld [vmem:[#allocation7 + $0x698] sm:$0xff]  ;;  %v7715_v48 = vpop.f32.mrf.mxu3 }
 0x22f   : > { %2582 = vmatpush.msra.mxu1 %v1023_v62  ;;  %2612 = vmatpush.msra.mxu2 %v1383_v55  ;;  %v1311_v62 = vld [vmem:[#allocation7 + $0x1110] sm:$0xff]  ;;  %v1312_v55 = vld [vmem:[#allocation7 + $0x1118] sm:$0xff] }
 0x230   : > { %2670 = vmatpush.msrb.mxu0 %v1384_v8  ;;  %2640 = vmatpush.msra.mxu3 %v1024_v61  ;;  %v951_v8 = vld [vmem:[#allocation7 + $0x5d0] sm:$0xff]  ;;  %v7717_v61 = vpop.f32.mrf.mxu0 }
 0x231   : > { %2583 = vmatpush.msra.mxu1 %v999_v11  ;;  %v7711_v40 = vpop.f32.mrf.mxu1  ;;  %2613 = vmatpush.msra.mxu2 %v1359_v20  ;;  %v952_v11 = vld [vmem:[#allocation7 + $0x5d8] sm:$0xff]  ;;  %v927_v20 = vld [vmem:[#allocation7 + $0x510] sm:$0xff]  ;;  %v7733_v12 = vpop.f32.mrf.mxu2 }
 0x232   : > { %2671 = vmatpush.msrb.mxu0 %v1360_v9  ;;  %2512 = vmatmul.f32.gmra.mxu2 %v7410_v26  ;;  %v1287_v9 = vld [vmem:[#allocation7 + $0x1050] sm:$0xff]  ;;  %9193 = vst [vmem:[#allocation85_spill] sm:$0xff] %v7733_v12 }
 0x233   : > { %2570 = vmatmul.f32.gmra.mxu0 %v7410_v26  ;;  %2641 = vmatpush.msra.mxu3 %v1000_v15  ;;  %v903_v15 = vld [vmem:[#allocation7 + $0x450] sm:$0xff] }
 0x234   : > { %2584 = vmatpush.msra.mxu1 %v975_v25  ;;  %2614 = vmatpush.msra.mxu2 %v1335_v41  ;;  %v928_v25 = vld [vmem:[#allocation7 + $0x518] sm:$0xff]  ;;  %v1263_v41 = vld [vmem:[#allocation7 + $0xf90] sm:$0xff] }
 0x235   : > { %2672 = vmatpush.msrb.mxu0 %v1336_v22  ;;  %2642 = vmatpush.msra.mxu3 %v976_v16  ;;  %v1264_v22 = vld [vmem:[#allocation7 + $0xf98] sm:$0xff] }
 0x236   : > { %2483 = vmatmul.f32.gmra.mxu1 %v7415_v32  ;;  %2541 = vmatmul.f32.gmra.mxu3 %v7415_v32  ;;  %v904_v16 = vld [vmem:[#allocation7 + $0x458] sm:$0xff] }
 0x237   : > { %2585 = vmatpush.msra.mxu1 %v951_v8  ;;  %2615 = vmatpush.msra.mxu2 %v1311_v62  ;;  %v1239_v8 = vld [vmem:[#allocation7 + $0xed0] sm:$0xff]  ;;  %v1240_v62 = vld [vmem:[#allocation7 + $0xed8] sm:$0xff] }
 0x238   : > { %2673 = vmatpush.msrb.mxu0 %v1312_v55  ;;  %2643 = vmatpush.msra.mxu3 %v952_v11  ;;  %v880_v55 = vld [vmem:[#allocation7 + $0x398] sm:$0xff]  ;;  %v7727_v11 = vpop.f32.mrf.mxu3 }
 0x239   : > { %2586 = vmatpush.msra.mxu1 %v927_v20  ;;  %2616 = vmatpush.msra.mxu2 %v1287_v9  ;;  %9191 = vst [vmem:[#allocation83_spill] sm:$0xff] %v7727_v11  ;;  %v1215_v20 = vld [vmem:[#allocation7 + $0xe10] sm:$0xff]  ;;  %v1216_v9 = vld [vmem:[#allocation7 + $0xe18] sm:$0xff]  ;;  %v7745_v12 = vpop.f32.mrf.mxu2  ;;  %v1386_v11 = vld [vmem:[#allocation7 + $0x1368] sm:$0xff] }
 0x23a   : > { %2674 = vmatpush.msrb.mxu0 %v1288_v18  ;;  %2644 = vmatpush.msra.mxu3 %v928_v25  ;;  %v855_v18 = vld [vmem:[#allocation7 + $0x2d0] sm:$0xff]  ;;  %v7729_v25 = vpop.f32.mrf.mxu0 }
 0x23b   : > { %2587 = vmatpush.msra.mxu1 %v903_v15  ;;  %v7723_v29 = vpop.f32.mrf.mxu1  ;;  %2617 = vmatpush.msra.mxu2 %v1263_v41  ;;  %9192 = vst [vmem:[#allocation84_spill] sm:$0xff] %v7729_v25  ;;  %v856_v15 = vld [vmem:[#allocation7 + $0x2d8] sm:$0xff]  ;;  %v831_v41 = vld [vmem:[#allocation7 + $0x210] sm:$0xff] }
 0x23c   : > { %9190 = vst [vmem:[#allocation82_spill] sm:$0xff] %v7723_v29  ;;  %2675 = vmatpush.msrb.mxu0 %v1264_v22  ;;  %2515 = vmatmul.f32.gmra.mxu2 %v7420_v46  ;;  %v1191_v22 = vld [vmem:[#allocation7 + $0xd50] sm:$0xff]  ;;  %v1192_v29 = vld [vmem:[#allocation7 + $0xd58] sm:$0xff] }
 0x23d   : > { %2573 = vmatmul.f32.gmra.mxu0 %v7420_v46  ;;  %2645 = vmatpush.msra.mxu3 %v904_v16  ;;  %v807_v16 = vld [vmem:[#allocation7 + $0x150] sm:$0xff] }
 0x23e   : > { %2588 = vmatpush.msra.mxu1 %v879_v23  ;;  %2618 = vmatpush.msra.mxu2 %v1239_v8  ;;  %v832_v23 = vld [vmem:[#allocation7 + $0x218] sm:$0xff]  ;;  %v1167_v8 = vld [vmem:[#allocation7 + $0xc90] sm:$0xff] }
 0x23f   : > { %2676 = vmatpush.msrb.mxu0 %v1240_v62  ;;  %2646 = vmatpush.msra.mxu3 %v880_v55  ;;  %v1168_v62 = vld [vmem:[#allocation7 + $0xc98] sm:$0xff] }
 0x240   : > { %2486 = vmatmul.f32.gmra.mxu1 %v7425_v35  ;;  %2544 = vmatmul.f32.gmra.mxu3 %v7425_v35  ;;  %v808_v55 = vld [vmem:[#allocation7 + $0x158] sm:$0xff] }
 0x241   : > { %2589 = vmatpush.msra.mxu1 %v855_v18  ;;  %2619 = vmatpush.msra.mxu2 %v1215_v20  ;;  %v1529_v18 = vld [vmem:[#allocation7 + $0x17e0] sm:$0xff]  ;;  %v1530_v20 = vld [vmem:[#allocation7 + $0x17e8] sm:$0xff]  ;;  %v7757_v39 = vpop.f32.mrf.mxu2 }
 0x242   : > { %2677 = vmatpush.msrb.mxu0 %v1216_v9  ;;  %2647 = vmatpush.msra.mxu3 %v856_v15  ;;  %v784_v9 = vld [vmem:[#allocation7 + $0x98] sm:$0xff]  ;;  %v7738_v15 = vpop.f32.mrf.mxu3 }
 0x243   : > { %2590 = vmatpush.msra.mxu1 %v831_v41  ;;  %2620 = vmatpush.msra.mxu2 %v1191_v22  ;;  %9195 = vst [vmem:[#allocation87_spill] sm:$0xff] %v7738_v15  ;;  %v1505_v41 = vld [vmem:[#allocation7 + $0x1720] sm:$0xff]  ;;  %v1506_v22 = vld [vmem:[#allocation7 + $0x1728] sm:$0xff] }
 0x244   : > { %2678 = vmatpush.msrb.mxu0 %v1192_v29  ;;  %2648 = vmatpush.msra.mxu3 %v832_v23  ;;  %v1145_v29 = vld [vmem:[#allocation7 + $0xbe0] sm:$0xff]  ;;  %v7741_v23 = vpop.f32.mrf.mxu0 }
 0x245   : > { %2591 = vmatpush.msra.mxu1 %v807_v16  ;;  %v7735_v25 = vpop.f32.mrf.mxu1  ;;  %2621 = vmatpush.msra.mxu2 %v1167_v8  ;;  %9196 = vst [vmem:[#allocation88_spill] sm:$0xff] %v7741_v23  ;;  %v1146_v16 = vld [vmem:[#allocation7 + $0xbe8] sm:$0xff]  ;;  %v1121_v8 = vld [vmem:[#allocation7 + $0xb20] sm:$0xff] }
 0x246   : > { %9194 = vst [vmem:[#allocation86_spill] sm:$0xff] %v7735_v25  ;;  %2679 = vmatpush.msrb.mxu0 %v1168_v62  ;;  %2622 = vmatmul.f32.vlgmr.msra.gmra.mxu2 %v7390_v50  ;;  %v1481_v62 = vld [vmem:[#allocation7 + $0x1660] sm:$0xff] }
 0x247   : > { %2649 = vmatpush.msra.mxu3 %v808_v55  ;;  %2680 = vmatmul.f32.vlgmr.msrb.gmra.mxu0 %v7390_v50  ;;  %v1482_v55 = vld [vmem:[#allocation7 + $0x1668] sm:$0xff]  ;;  %v1097_v25 = vld [vmem:[#allocation7 + $0xa60] sm:$0xff] }
 0x248   : > { %2592 = vmatpush.msra.mxu1 %v783_v53  ;;  %2722 = vmatpush.msrb.mxu2 %v1529_v18  ;;  %v1122_v53 = vld [vmem:[#allocation7 + $0xb28] sm:$0xff]  ;;  %v1457_v18 = vld [vmem:[#allocation7 + $0x15a0] sm:$0xff] }
 0x249   : > { %2780 = vmatpush.msra.mxu0 %v1530_v20  ;;  %2650 = vmatpush.msra.mxu3 %v784_v9  ;;  %v1458_v20 = vld [vmem:[#allocation7 + $0x15a8] sm:$0xff]  ;;  %v1073_v23 = vld [vmem:[#allocation7 + $0x9a0] sm:$0xff]  ;;  %v7769_v49 = vpop.f32.mrf.mxu2 }
 0x24a   : > { %2593 = vmatmul.f32.vlgmr.msra.gmra.mxu1 %v7395_v58  ;;  %2651 = vmatmul.f32.vlgmr.msra.gmra.mxu3 %v7395_v58  ;;  %v1098_v9 = vld [vmem:[#allocation7 + $0xa68] sm:$0xff]  ;;  %9200 = vst [vmem:[#allocation92_spill] sm:$0xff] %v7769_v49 }
 0x24b   : > { %2693 = vmatpush.msrb.mxu1 %v1145_v29  ;;  %2723 = vmatpush.msrb.mxu2 %v1505_v41  ;;  %v1433_v29 = vld [vmem:[#allocation7 + $0x14e0] sm:$0xff]  ;;  %v1434_v41 = vld [vmem:[#allocation7 + $0x14e8] sm:$0xff] }
 0x24c   : > { %2781 = vmatpush.msra.mxu0 %v1506_v22  ;;  %2751 = vmatpush.msrb.mxu3 %v1146_v16  ;;  %v1074_v22 = vld [vmem:[#allocation7 + $0x9a8] sm:$0xff]  ;;  %v7751_v16 = vpop.f32.mrf.mxu3 }
 0x24d   : > { %2694 = vmatpush.msrb.mxu1 %v1121_v8  ;;  %2724 = vmatpush.msrb.mxu2 %v1481_v62  ;;  %v1049_v8 = vld [vmem:[#allocation7 + $0x8e0] sm:$0xff]  ;;  %v1410_v62 = vld [vmem:[#allocation7 + $0x1428] sm:$0xff] }
 0x24e   : > { %2782 = vmatpush.msra.mxu0 %v1482_v55  ;;  %2752 = vmatpush.msrb.mxu3 %v1122_v53  ;;  %v7753_v55 = vpop.f32.mrf.mxu0  ;;  %v1050_v53 = vld [vmem:[#allocation7 + $0x8e8] sm:$0xff] }
 0x24f   : > { %2695 = vmatpush.msrb.mxu1 %v1097_v25  ;;  %v7747_v15 = vpop.f32.mrf.mxu1  ;;  %2725 = vmatpush.msrb.mxu2 %v1457_v18  ;;  %v1409_v25 = vld [vmem:[#allocation7 + $0x1420] sm:$0xff] }
 0x250   : > { %2783 = vmatpush.msra.mxu0 %v1458_v20  ;;  %2625 = vmatmul.f32.gmra.mxu2 %v7400_v6  ;;  %v1025_v18 = vld [vmem:[#allocation7 + $0x820] sm:$0xff] }
 0x251   : > { %2683 = vmatmul.f32.gmra.mxu0 %v7400_v6  ;;  %2753 = vmatpush.msrb.mxu3 %v1098_v9  ;;  %v1385_v20 = vld [vmem:[#allocation7 + $0x1360] sm:$0xff] }
 0x252   : > { %2696 = vmatpush.msrb.mxu1 %v1073_v23  ;;  %2726 = vmatpush.msrb.mxu2 %v1433_v29  ;;  %v1026_v23 = vld [vmem:[#allocation7 + $0x828] sm:$0xff]  ;;  %v1001_v9 = vld [vmem:[#allocation7 + $0x760] sm:$0xff] }
 0x253   : > { %2784 = vmatpush.msra.mxu0 %v1434_v41  ;;  %2754 = vmatpush.msrb.mxu3 %v1074_v22  ;;  %v1361_v29 = vld [vmem:[#allocation7 + $0x12a0] sm:$0xff]  ;;  %v1362_v41 = vld [vmem:[#allocation7 + $0x12a8] sm:$0xff] }
 0x254   : > { %2596 = vmatmul.f32.gmra.mxu1 %v7405_v13  ;;  %2654 = vmatmul.f32.gmra.mxu3 %v7405_v13  ;;  %v1002_v22 = vld [vmem:[#allocation7 + $0x768] sm:$0xff] }
 0x255   : > { %2697 = vmatpush.msrb.mxu1 %v1049_v8  ;;  %2727 = vmatpush.msrb.mxu2 %v1409_v25  ;;  %v1337_v8 = vld [vmem:[#allocation7 + $0x11e0] sm:$0xff]  ;;  %v1338_v25 = vld [vmem:[#allocation7 + $0x11e8] sm:$0xff] }
 0x256   : > { %2785 = vmatpush.msra.mxu0 %v1410_v62  ;;  %2755 = vmatpush.msrb.mxu3 %v1050_v53  ;;  %v978_v62 = vld [vmem:[#allocation7 + $0x6a8] sm:$0xff]  ;;  %v7763_v53 = vpop.f32.mrf.mxu3 }
 0x257   : > { %2698 = vmatpush.msrb.mxu1 %v1025_v18  ;;  %2728 = vmatpush.msrb.mxu2 %v1385_v20  ;;  %9198 = vst [vmem:[#allocation90_spill] sm:$0xff] %v7763_v53  ;;  %v1313_v18 = vld [vmem:[#allocation7 + $0x1120] sm:$0xff]  ;;  %v1314_v20 = vld [vmem:[#allocation7 + $0x1128] sm:$0xff] }
 0x258   : > { %2786 = vmatpush.msra.mxu0 %v1386_v11  ;;  %2756 = vmatpush.msrb.mxu3 %v1026_v23  ;;  %v953_v11 = vld [vmem:[#allocation7 + $0x5e0] sm:$0xff]  ;;  %v7765_v23 = vpop.f32.mrf.mxu0 }
 0x259   : > { %2699 = vmatpush.msrb.mxu1 %v1001_v9  ;;  %v7759_v43 = vpop.f32.mrf.mxu1  ;;  %2729 = vmatpush.msrb.mxu2 %v1361_v29  ;;  %9199 = vst [vmem:[#allocation91_spill] sm:$0xff] %v7765_v23  ;;  %v954_v9 = vld [vmem:[#allocation7 + $0x5e8] sm:$0xff]  ;;  %v929_v29 = vld [vmem:[#allocation7 + $0x520] sm:$0xff] }
 0x25a   : > { %9197 = vst [vmem:[#allocation89_spill] sm:$0xff] %v7759_v43  ;;  %2787 = vmatpush.msra.mxu0 %v1362_v41  ;;  %2628 = vmatmul.f32.gmra.mxu2 %v7410_v26  ;;  %v1289_v41 = vld [vmem:[#allocation7 + $0x1060] sm:$0xff]  ;;  %v1290_v43 = vld [vmem:[#allocation7 + $0x1068] sm:$0xff] }
 0x25b   : > { %2686 = vmatmul.f32.gmra.mxu0 %v7410_v26  ;;  %2757 = vmatpush.msrb.mxu3 %v1002_v22  ;;  %v905_v22 = vld [vmem:[#allocation7 + $0x460] sm:$0xff] }
 0x25c   : > { %2700 = vmatpush.msrb.mxu1 %v977_v5  ;;  %2730 = vmatpush.msrb.mxu2 %v1337_v8  ;;  %v930_v5 = vld [vmem:[#allocation7 + $0x528] sm:$0xff]  ;;  %v1265_v8 = vld [vmem:[#allocation7 + $0xfa0] sm:$0xff] }
 0x25d   : > { %2788 = vmatpush.msra.mxu0 %v1338_v25  ;;  %2758 = vmatpush.msrb.mxu3 %v978_v62  ;;  %v1266_v25 = vld [vmem:[#allocation7 + $0xfa8] sm:$0xff]  ;;  %v881_v23 = vld [vmem:[#allocation7 + $0x3a0] sm:$0xff] }
 0x25e   : > { %2599 = vmatmul.f32.gmra.mxu1 %v7415_v32  ;;  %2657 = vmatmul.f32.gmra.mxu3 %v7415_v32  ;;  %v906_v62 = vld [vmem:[#allocation7 + $0x468] sm:$0xff] }
 0x25f   : > { %2701 = vmatpush.msrb.mxu1 %v953_v11  ;;  %2731 = vmatpush.msrb.mxu2 %v1313_v18  ;;  %v1241_v11 = vld [vmem:[#allocation7 + $0xee0] sm:$0xff]  ;;  %v1242_v18 = vld [vmem:[#allocation7 + $0xee8] sm:$0xff] }
 0x260   : > { %2789 = vmatpush.msra.mxu0 %v1314_v20  ;;  %2759 = vmatpush.msrb.mxu3 %v954_v9  ;;  %v882_v20 = vld [vmem:[#allocation7 + $0x3a8] sm:$0xff]  ;;  %v7775_v9 = vpop.f32.mrf.mxu3 }
 0x261   : > { %2702 = vmatpush.msrb.mxu1 %v929_v29  ;;  %2732 = vmatpush.msrb.mxu2 %v1289_v41  ;;  %9202 = vst [vmem:[#allocation94_spill] sm:$0xff] %v7775_v9  ;;  %v1217_v29 = vld [vmem:[#allocation7 + $0xe20] sm:$0xff]  ;;  %v1218_v41 = vld [vmem:[#allocation7 + $0xe28] sm:$0xff]  ;;  %v7781_v9 = vpop.f32.mrf.mxu2 }
 0x262   : > { %2790 = vmatpush.msra.mxu0 %v1290_v43  ;;  %2760 = vmatpush.msrb.mxu3 %v930_v5  ;;  %v857_v43 = vld [vmem:[#allocation7 + $0x2e0] sm:$0xff]  ;;  %v7777_v5 = vpop.f32.mrf.mxu0  ;;  %9204 = vst [vmem:[#allocation96_spill] sm:$0xff] %v7781_v9 }
 0x263   : > { %2703 = vmatpush.msrb.mxu1 %v905_v22  ;;  %v7771_v53 = vpop.f32.mrf.mxu1  ;;  %2733 = vmatpush.msrb.mxu2 %v1265_v8  ;;  %9203 = vst [vmem:[#allocation95_spill] sm:$0xff] %v7777_v5  ;;  %v858_v22 = vld [vmem:[#allocation7 + $0x2e8] sm:$0xff]  ;;  %v833_v8 = vld [vmem:[#allocation7 + $0x220] sm:$0xff] }
 0x264   : > { %9201 = vst [vmem:[#allocation93_spill] sm:$0xff] %v7771_v53  ;;  %2791 = vmatpush.msra.mxu0 %v1266_v25  ;;  %2631 = vmatmul.f32.gmra.mxu2 %v7420_v46  ;;  %v1193_v25 = vld [vmem:[#allocation7 + $0xd60] sm:$0xff]  ;;  %v1194_v53 = vld [vmem:[#allocation7 + $0xd68] sm:$0xff] }
 0x265   : > { %2689 = vmatmul.f32.gmra.mxu0 %v7420_v46  ;;  %2761 = vmatpush.msrb.mxu3 %v906_v62  ;;  %v809_v62 = vld [vmem:[#allocation7 + $0x160] sm:$0xff] }
 0x266   : > { %2704 = vmatpush.msrb.mxu1 %v881_v23  ;;  %2734 = vmatpush.msrb.mxu2 %v1241_v11  ;;  %v834_v23 = vld [vmem:[#allocation7 + $0x228] sm:$0xff]  ;;  %v1169_v11 = vld [vmem:[#allocation7 + $0xca0] sm:$0xff] }
 0x267   : > { %2792 = vmatpush.msra.mxu0 %v1242_v18  ;;  %2762 = vmatpush.msrb.mxu3 %v882_v20  ;;  %v1170_v18 = vld [vmem:[#allocation7 + $0xca8] sm:$0xff]  ;;  %v785_v5 = vld [vmem:[#allocation7 + $0xa0] sm:$0xff] }
 0x268   : > { %2602 = vmatmul.f32.gmra.mxu1 %v7425_v35  ;;  %2660 = vmatmul.f32.gmra.mxu3 %v7425_v35  ;;  %v810_v20 = vld [vmem:[#allocation7 + $0x168] sm:$0xff] }
 0x269   : > { %2705 = vmatpush.msrb.mxu1 %v857_v43  ;;  %2735 = vmatpush.msrb.mxu2 %v1217_v29  ;;  %v1531_v43 = vld [vmem:[#allocation7 + $0x17f0] sm:$0xff]  ;;  %v1532_v29 = vld [vmem:[#allocation7 + $0x17f8] sm:$0xff] }
 0x26a   : > { %2793 = vmatpush.msra.mxu0 %v1218_v41  ;;  %2763 = vmatpush.msrb.mxu3 %v858_v22  ;;  %v786_v41 = vld [vmem:[#allocation7 + $0xa8] sm:$0xff]  ;;  %v7786_v22 = vpop.f32.mrf.mxu3 }
 0x26b   : > { %2706 = vmatpush.msrb.mxu1 %v833_v8  ;;  %2736 = vmatpush.msrb.mxu2 %v1193_v25  ;;  %9206 = vst [vmem:[#allocation98_spill] sm:$0xff] %v7786_v22  ;;  %v1507_v8 = vld [vmem:[#allocation7 + $0x1730] sm:$0xff]  ;;  %v1508_v25 = vld [vmem:[#allocation7 + $0x1738] sm:$0xff]  ;;  %v7793_v22 = vpop.f32.mrf.mxu2 }
 0x26c   : > { %2794 = vmatpush.msra.mxu0 %v1194_v53  ;;  %2764 = vmatpush.msrb.mxu3 %v834_v23  ;;  %v1147_v53 = vld [vmem:[#allocation7 + $0xbf0] sm:$0xff]  ;;  %v7789_v23 = vpop.f32.mrf.mxu0 }
 0x26d   : > { %2707 = vmatpush.msrb.mxu1 %v809_v62  ;;  %v7783_v49 = vpop.f32.mrf.mxu1  ;;  %2737 = vmatpush.msrb.mxu2 %v1169_v11  ;;  %9207 = vst [vmem:[#allocation99_spill] sm:$0xff] %v7789_v23  ;;  %v1148_v62 = vld [vmem:[#allocation7 + $0xbf8] sm:$0xff]  ;;  %v1123_v11 = vld [vmem:[#allocation7 + $0xb30] sm:$0xff] }
 0x26e   : > { %9205 = vst [vmem:[#allocation97_spill] sm:$0xff] %v7783_v49  ;;  %2795 = vmatpush.msra.mxu0 %v1170_v18  ;;  %2738 = vmatmul.f32.vlgmr.msrb.gmra.mxu2 %v7390_v50  ;;  %v1483_v18 = vld [vmem:[#allocation7 + $0x1670] sm:$0xff] }
 0x26f   : > { %2765 = vmatpush.msrb.mxu3 %v810_v20  ;;  %2796 = vmatmul.f32.vlgmr.msra.gmra.mxu0 %v7390_v50  ;;  %v1484_v20 = vld [vmem:[#allocation7 + $0x1678] sm:$0xff]  ;;  %v1099_v49 = vld [vmem:[#allocation7 + $0xa70] sm:$0xff] }
 0x270   : > { %2708 = vmatpush.msrb.mxu1 %v785_v5  ;;  %2838 = vmatpush.msra.mxu2 %v1531_v43  ;;  %v1124_v5 = vld [vmem:[#allocation7 + $0xb38] sm:$0xff]  ;;  %v1459_v43 = vld [vmem:[#allocation7 + $0x15b0] sm:$0xff] }
 0x271   : > { %2896 = vmatpush.msrb.mxu0 %v1532_v29  ;;  %2766 = vmatpush.msrb.mxu3 %v786_v41  ;;  %v1460_v29 = vld [vmem:[#allocation7 + $0x15b8] sm:$0xff]  ;;  %v1075_v23 = vld [vmem:[#allocation7 + $0x9b0] sm:$0xff] }
 0x272   : > { %2709 = vmatmul.f32.vlgmr.msrb.gmra.mxu1 %v7395_v58  ;;  %2767 = vmatmul.f32.vlgmr.msrb.gmra.mxu3 %v7395_v58  ;;  %v1100_v41 = vld [vmem:[#allocation7 + $0xa78] sm:$0xff] }
 0x273   : > { %2809 = vmatpush.msra.mxu1 %v1147_v53  ;;  %2839 = vmatpush.msra.mxu2 %v1507_v8  ;;  %v1435_v53 = vld [vmem:[#allocation7 + $0x14f0] sm:$0xff]  ;;  %v1436_v8 = vld [vmem:[#allocation7 + $0x14f8] sm:$0xff]  ;;  %v7805_v45 = vpop.f32.mrf.mxu2 }
 0x274   : > { %2897 = vmatpush.msrb.mxu0 %v1508_v25  ;;  %2867 = vmatpush.msra.mxu3 %v1148_v62  ;;  %v1076_v25 = vld [vmem:[#allocation7 + $0x9b8] sm:$0xff]  ;;  %v7799_v62 = vpop.f32.mrf.mxu3 }
 0x275   : > { %2810 = vmatpush.msra.mxu1 %v1123_v11  ;;  %2840 = vmatpush.msra.mxu2 %v1483_v18  ;;  %v1051_v11 = vld [vmem:[#allocation7 + $0x8f0] sm:$0xff]  ;;  %v1412_v18 = vld [vmem:[#allocation7 + $0x1438] sm:$0xff] }
 0x276   : > { %2898 = vmatpush.msrb.mxu0 %v1484_v20  ;;  %2868 = vmatpush.msra.mxu3 %v1124_v5  ;;  %v7801_v20 = vpop.f32.mrf.mxu0  ;;  %v1052_v5 = vld [vmem:[#allocation7 + $0x8f8] sm:$0xff] }
 0x277   : > { %2811 = vmatpush.msra.mxu1 %v1099_v49  ;;  %v7795_v9 = vpop.f32.mrf.mxu1  ;;  %2841 = vmatpush.msra.mxu2 %v1459_v43  ;;  %v1411_v49 = vld [vmem:[#allocation7 + $0x1430] sm:$0xff] }
 0x278   : > { %9208 = vst [vmem:[#allocation100_spill] sm:$0xff] %v7795_v9  ;;  %2899 = vmatpush.msrb.mxu0 %v1460_v29  ;;  %2741 = vmatmul.f32.gmra.mxu2 %v7400_v6  ;;  %v1027_v43 = vld [vmem:[#allocation7 + $0x830] sm:$0xff]  ;;  %v1388_v9 = vld [vmem:[#allocation7 + $0x1378] sm:$0xff] }
 0x279   : > { %2799 = vmatmul.f32.gmra.mxu0 %v7400_v6  ;;  %2869 = vmatpush.msra.mxu3 %v1100_v41  ;;  %v1387_v29 = vld [vmem:[#allocation7 + $0x1370] sm:$0xff] }
 0x27a   : > { %2812 = vmatpush.msra.mxu1 %v1075_v23  ;;  %2842 = vmatpush.msra.mxu2 %v1435_v53  ;;  %v1028_v23 = vld [vmem:[#allocation7 + $0x838] sm:$0xff]  ;;  %v1003_v41 = vld [vmem:[#allocation7 + $0x770] sm:$0xff] }
 0x27b   : > { %2900 = vmatpush.msrb.mxu0 %v1436_v8  ;;  %2870 = vmatpush.msra.mxu3 %v1076_v25  ;;  %v1363_v53 = vld [vmem:[#allocation7 + $0x12b0] sm:$0xff]  ;;  %v1364_v8 = vld [vmem:[#allocation7 + $0x12b8] sm:$0xff] }
 0x27c   : > { %2712 = vmatmul.f32.gmra.mxu1 %v7405_v13  ;;  %2770 = vmatmul.f32.gmra.mxu3 %v7405_v13  ;;  %v1004_v25 = vld [vmem:[#allocation7 + $0x778] sm:$0xff] }
 0x27d   : > { %2813 = vmatpush.msra.mxu1 %v1051_v11  ;;  %2843 = vmatpush.msra.mxu2 %v1411_v49  ;;  %v1339_v11 = vld [vmem:[#allocation7 + $0x11f0] sm:$0xff]  ;;  %v1340_v49 = vld [vmem:[#allocation7 + $0x11f8] sm:$0xff] }
 0x27e   : > { %2901 = vmatpush.msrb.mxu0 %v1412_v18  ;;  %2871 = vmatpush.msra.mxu3 %v1052_v5  ;;  %v980_v18 = vld [vmem:[#allocation7 + $0x6b8] sm:$0xff]  ;;  %v7811_v5 = vpop.f32.mrf.mxu3 }
 0x27f   : > { %2814 = vmatpush.msra.mxu1 %v1027_v43  ;;  %2844 = vmatpush.msra.mxu2 %v1387_v29  ;;  %9210 = vst [vmem:[#allocation102_spill] sm:$0xff] %v7811_v5  ;;  %v1315_v43 = vld [vmem:[#allocation7 + $0x1130] sm:$0xff]  ;;  %v1316_v29 = vld [vmem:[#allocation7 + $0x1138] sm:$0xff]  ;;  %v7817_v5 = vpop.f32.mrf.mxu2 }
 0x280   : > { %2902 = vmatpush.msrb.mxu0 %v1388_v9  ;;  %2872 = vmatpush.msra.mxu3 %v1028_v23  ;;  %v955_v9 = vld [vmem:[#allocation7 + $0x5f0] sm:$0xff]  ;;  %v7813_v23 = vpop.f32.mrf.mxu0 }
 0x281   : > { %2815 = vmatpush.msra.mxu1 %v1003_v41  ;;  %v7807_v44 = vpop.f32.mrf.mxu1  ;;  %2845 = vmatpush.msra.mxu2 %v1363_v53  ;;  %9211 = vst [vmem:[#allocation103_spill] sm:$0xff] %v7813_v23  ;;  %v956_v41 = vld [vmem:[#allocation7 + $0x5f8] sm:$0xff]  ;;  %v931_v53 = vld [vmem:[#allocation7 + $0x530] sm:$0xff] }
 0x282   : > { %9209 = vst [vmem:[#allocation101_spill] sm:$0xff] %v7807_v44  ;;  %2903 = vmatpush.msrb.mxu0 %v1364_v8  ;;  %2744 = vmatmul.f32.gmra.mxu2 %v7410_v26  ;;  %v1291_v8 = vld [vmem:[#allocation7 + $0x1070] sm:$0xff]  ;;  %v1292_v44 = vld [vmem:[#allocation7 + $0x1078] sm:$0xff] }
 0x283   : > { %2802 = vmatmul.f32.gmra.mxu0 %v7410_v26  ;;  %2873 = vmatpush.msra.mxu3 %v1004_v25  ;;  %v907_v25 = vld [vmem:[#allocation7 + $0x470] sm:$0xff] }
 0x284   : > { %2816 = vmatpush.msra.mxu1 %v979_v30  ;;  %2846 = vmatpush.msra.mxu2 %v1339_v11  ;;  %v932_v30 = vld [vmem:[#allocation7 + $0x538] sm:$0xff]  ;;  %v1267_v11 = vld [vmem:[#allocation7 + $0xfb0] sm:$0xff] }
 0x285   : > { %2904 = vmatpush.msrb.mxu0 %v1340_v49  ;;  %2874 = vmatpush.msra.mxu3 %v980_v18  ;;  %v1268_v49 = vld [vmem:[#allocation7 + $0xfb8] sm:$0xff]  ;;  %v883_v23 = vld [vmem:[#allocation7 + $0x3b0] sm:$0xff] }
 0x286   : > { %2715 = vmatmul.f32.gmra.mxu1 %v7415_v32  ;;  %2773 = vmatmul.f32.gmra.mxu3 %v7415_v32  ;;  %v908_v18 = vld [vmem:[#allocation7 + $0x478] sm:$0xff] }
 0x287   : > { %2817 = vmatpush.msra.mxu1 %v955_v9  ;;  %2847 = vmatpush.msra.mxu2 %v1315_v43  ;;  %v1243_v9 = vld [vmem:[#allocation7 + $0xef0] sm:$0xff]  ;;  %v1244_v43 = vld [vmem:[#allocation7 + $0xef8] sm:$0xff] }
 0x288   : > { %2905 = vmatpush.msrb.mxu0 %v1316_v29  ;;  %2875 = vmatpush.msra.mxu3 %v956_v41  ;;  %v884_v29 = vld [vmem:[#allocation7 + $0x3b8] sm:$0xff]  ;;  %v7823_v41 = vpop.f32.mrf.mxu3 }
 0x289   : > { %2818 = vmatpush.msra.mxu1 %v931_v53  ;;  %2848 = vmatpush.msra.mxu2 %v1291_v8  ;;  %9213 = vst [vmem:[#allocation105_spill] sm:$0xff] %v7823_v41  ;;  %v1219_v53 = vld [vmem:[#allocation7 + $0xe30] sm:$0xff]  ;;  %v1220_v8 = vld [vmem:[#allocation7 + $0xe38] sm:$0xff]  ;;  %v7829_v41 = vpop.f32.mrf.mxu2 }
 0x28a   : > { %2906 = vmatpush.msrb.mxu0 %v1292_v44  ;;  %2876 = vmatpush.msra.mxu3 %v932_v30  ;;  %v859_v44 = vld [vmem:[#allocation7 + $0x2f0] sm:$0xff]  ;;  %v7825_v30 = vpop.f32.mrf.mxu0 }
 0x28b   : > { %2819 = vmatpush.msra.mxu1 %v907_v25  ;;  %v7819_v32 = vpop.f32.mrf.mxu1  ;;  %2849 = vmatpush.msra.mxu2 %v1267_v11  ;;  %9214 = vst [vmem:[#allocation106_spill] sm:$0xff] %v7825_v30  ;;  %v860_v25 = vld [vmem:[#allocation7 + $0x2f8] sm:$0xff]  ;;  %v835_v11 = vld [vmem:[#allocation7 + $0x230] sm:$0xff] }
 0x28c   : > { %9212 = vst [vmem:[#allocation104_spill] sm:$0xff] %v7819_v32  ;;  %2907 = vmatpush.msrb.mxu0 %v1268_v49  ;;  %2747 = vmatmul.f32.gmra.mxu2 %v7420_v46  ;;  %v1195_v49 = vld [vmem:[#allocation7 + $0xd70] sm:$0xff]  ;;  %v1196_v32 = vld [vmem:[#allocation7 + $0xd78] sm:$0xff] }
 0x28d   : > { %2805 = vmatmul.f32.gmra.mxu0 %v7420_v46  ;;  %2877 = vmatpush.msra.mxu3 %v908_v18  ;;  %v811_v18 = vld [vmem:[#allocation7 + $0x170] sm:$0xff] }
 0x28e   : > { %2820 = vmatpush.msra.mxu1 %v883_v23  ;;  %2850 = vmatpush.msra.mxu2 %v1243_v9  ;;  %v836_v23 = vld [vmem:[#allocation7 + $0x238] sm:$0xff]  ;;  %v1171_v9 = vld [vmem:[#allocation7 + $0xcb0] sm:$0xff] }
 0x28f   : > { %2908 = vmatpush.msrb.mxu0 %v1244_v43  ;;  %2878 = vmatpush.msra.mxu3 %v884_v29  ;;  %v1172_v43 = vld [vmem:[#allocation7 + $0xcb8] sm:$0xff]  ;;  %v787_v30 = vld [vmem:[#allocation7 + $0xb0] sm:$0xff] }
 0x290   : > { %2718 = vmatmul.f32.gmra.mxu1 %v7425_v35  ;;  %2776 = vmatmul.f32.gmra.mxu3 %v7425_v35  ;;  %v812_v29 = vld [vmem:[#allocation7 + $0x178] sm:$0xff] }
 0x291   : > { %2821 = vmatpush.msra.mxu1 %v859_v44  ;;  %2851 = vmatpush.msra.mxu2 %v1219_v53  ;;  %v788_v44 = vld [vmem:[#allocation7 + $0xb8] sm:$0xff] }
 0x292   : > { %2909 = vmatpush.msrb.mxu0 %v1220_v8  ;;  %2879 = vmatpush.msra.mxu3 %v860_v25  ;;  %v3004_v53 = vld [vmem:[#allocation11 + $0x1e0] sm:$0xff]  ;;  %v7834_v8 = vpop.f32.mrf.mxu3 }
 0x293   : > { %2822 = vmatpush.msra.mxu1 %v835_v11  ;;  %2852 = vmatpush.msra.mxu2 %v1195_v49  ;;  %v3003_v25 = vld [vmem:[#allocation11 + $0x1c0] sm:$0xff]  ;;  %v7840_v11 = vpop.f32.mrf.mxu0  ;;  %v1638_v49 = vadd.f32 %v7507_v42, %v7505_v37  ;;  %v2218_v42 = vadd.f32 %v7753_v55, %v7751_v16  ;;  %v646_v55 = vmul.f32 %v7459_v47, %v7377_v36 }
 0x294   : > { %2910 = vmatpush.msrb.mxu0 %v1196_v32  ;;  %2880 = vmatpush.msra.mxu3 %v836_v23  ;;  %v2102_v32 = vadd.f32 %v7705_v19, %v7703_v0  ;;  %v2044_v23 = vadd.f32 %v7697_v60, %v7651_v14  ;;  %v1580_v0 = vadd.f32 %v7501_v24, %v7493_v2 }
 0x295   : > { %2823 = vmatpush.msra.mxu1 %v811_v18  ;;  %v7831_v35 = vpop.f32.mrf.mxu1  ;;  %2853 = vmatpush.msra.mxu2 %v1171_v9  ;;  %v1696_v19 = vadd.f32 %v7551_v34, %v7529_v33  ;;  %v2391_v9 = vpop.f32.mrf.mxu2  ;;  %v1754_v2 = vadd.f32 %v7557_v63, %v7555_v56  ;;  %v2105_v33 = vadd.f32 %v7717_v61, %v7715_v48 }
 0x296   : > { %2911 = vmatpush.msrb.mxu0 %v1172_v43  ;;  %2854 = vmatmul.f32.vlgmr.msra.gmra.mxu2 %v7390_v50  ;;  %v2926_v18 = vmul.f32 %v2102_v32, %v1638_v49  ;;  %v2925_v43 = vmul.f32 %v2044_v23, %v1580_v0  ;;  %v2276_v34 = vadd.f32 %v7793_v22, %v7747_v15  ;;  %v2998_v15 = vld [vmem:[#allocation11 + $0x120] sm:$0xff] }
 0x297   : > { %2881 = vmatpush.msra.mxu3 %v812_v29  ;;  %2912 = vmatmul.f32.vlgmr.msrb.gmra.mxu0 %v7390_v50  ;;  %v2160_v50 = vadd.f32 %v7745_v12, %v7699_v31  ;;  %v3000_v12 = vld [vmem:[#allocation11 + $0x160] sm:$0xff]  ;;  %v1641_v60 = vadd.f32 %v7521_v10, %v7517_v1  ;;  %v1812_v56 = vadd.f32 %v7601_v7, %v7569_v59 }
 0x298   : > { %2824 = vmatpush.msra.mxu1 %v787_v30  ;;  %v3002_v30 = vld [vmem:[#allocation11 + $0x1a0] sm:$0xff]  ;;  %v2957_v24 = vadd.f32 %v2926_v18, %v2925_v43  ;;  %v2928_v48 = vmul.f32 %v2218_v42, %v1754_v2  ;;  %v2163_v61 = vadd.f32 %v7757_v39, %v7711_v40  ;;  %v7879_v1 = vmul.f32 %v7469_v3, %v7379_v52  ;;  %v9217_v39 = vld [vmem:[#allocation53_spill] sm:$0xff] }
 0x299   : > { %2882 = vmatpush.msra.mxu3 %v788_v44  ;;  %2825 = vmatmul.f32.vlgmr.msra.gmra.mxu1 %v7395_v58  ;;  %v2927_v37 = vmul.f32 %v2160_v50, %v1696_v19  ;;  %v2999_v31 = vld [vmem:[#allocation11 + $0x140] sm:$0xff]  ;;  %v1699_v59 = vadd.f32 %v7563_v28, %v7539_v4  ;;  %v2929_v7 = vmul.f32 %v2276_v34, %v1812_v56  ;;  %v9218_v4 = vld [vmem:[#allocation90_spill] sm:$0xff]  ;;  %v6552_v2 = vadd.f32 -1.0, %v646_v55 }
 0x29a   : > { %2883 = vmatmul.f32.vlgmr.msra.gmra.mxu3 %v7395_v58  ;;  %3005 = vmatpush.msrb.mxu1 %v3004_v53  ;;  %v3001_v58 = vld [vmem:[#allocation11 + $0x180] sm:$0xff]  ;;  %v2420_v16 = vpop.f32.mrf.mxu3  ;;  %v2334_v40 = vadd.f32 %v7801_v20, %v7799_v62  ;;  %v1586_v36 = vadd.f32 %v7525_v21, %v7511_v51  ;;  %v9221_v20 = vld [vmem:[#allocation41_spill] sm:$0xff]  ;;  %v9222_v51 = vld [vmem:[#allocation42_spill] sm:$0xff] }
 0x29b   : > { %v2961_v63 = vadd.f32 %v2957_v24, %v2927_v37  ;;  %v2449_v10 = vpop.f32.mrf.mxu0  ;;  %v9215_v52 = vld [vmem:[#allocation35_spill] sm:$0xff]  ;;  %v9216_v3 = vld [vmem:[#allocation52_spill] sm:$0xff]  ;;  %v2935_v29 = vmul.f32 %v2163_v61, %v1699_v59  ;;  %v1757_v21 = vadd.f32 %v9222_v51, %v9221_v20  ;;  %v9228_v37 = vld [vmem:[#allocation26_spill] sm:$0xff] }
 0x29c   : > { %3006 = vmatpush.msrb.mxu1 %v3003_v25  ;;  %v1644_v47 = vadd.f32 %v9215_v52, %v7531_v38  ;;  %v9219_v28 = vld [vmem:[#allocation91_spill] sm:$0xff]  ;;  %v9220_v53 = vld [vmem:[#allocation100_spill] sm:$0xff]  ;;  %v9223_v25 = vld [vmem:[#allocation54_spill] sm:$0xff] }
 0x29d   : > { %v2965_v22 = vadd.f32 %v2961_v63, %v2928_v48  ;;  %v2221_v44 = vadd.f32 %v9219_v28, %v9218_v4  ;;  %v2392_v32 = vadd.f32 %v2391_v9, %v9220_v53  ;;  %v2996_v62 = vld [vmem:[#allocation11 + $0xe0] sm:$0xff]  ;;  %v2394_v0 = vpop.f32.mrf.mxu2  ;;  %v9227_v9 = vld [vmem:[#allocation89_spill] sm:$0xff]  ;;  %v9243_v53 = vld [vmem:[#allocation102_spill] sm:$0xff] }
 0x29e   : > { %3007 = vmatpush.msrb.mxu1 %v3002_v30  ;;  %2857 = vmatmul.f32.gmra.mxu2 %v7400_v6  ;;  %v9224_v38 = vld [vmem:[#allocation67_spill] sm:$0xff]  ;;  %v9226_v50 = vld [vmem:[#allocation84_spill] sm:$0xff]  ;;  %v2279_v43 = vadd.f32 %v7805_v45, %v9227_v9  ;;  %v9235_v59 = vld [vmem:[#allocation37_spill] sm:$0xff] }
 0x29f   : > { %v7856_v14 = vpop.f32.mrf.mxu1  ;;  %2915 = vmatmul.f32.gmra.mxu0 %v7400_v6  ;;  %v2047_v6 = vadd.f32 %v7709_v54, %v7663_v17  ;;  %v2934_v54 = vmul.f32 %v2105_v33, %v1641_v60  ;;  %v2997_v17 = vld [vmem:[#allocation11 + $0x100] sm:$0xff]  ;;  %v1928_v49 = vadd.f32 %v9224_v38, %v9223_v25  ;;  %v2969_v18 = vadd.f32 %v2965_v22, %v2929_v7  ;;  %v9232_v60 = vld [vmem:[#allocation81_spill] sm:$0xff]  ;;  %v9246_v20 = vld [vmem:[#allocation58_spill] sm:$0xff] }
 0x2a0   : > { %3008 = vmatpush.msrb.mxu1 %v3001_v58  ;;  %v9225_v23 = vld [vmem:[#allocation83_spill] sm:$0xff]  ;;  %v9229_v24 = vld [vmem:[#allocation44_spill] sm:$0xff]  ;;  %v2936_v45 = vmul.f32 %v2221_v44, %v1757_v21  ;;  %v9239_v52 = vld [vmem:[#allocation45_spill] sm:$0xff] }
 0x2a1   : > { %2828 = vmatmul.f32.gmra.mxu1 %v7405_v13  ;;  %v2108_v30 = vadd.f32 %v9226_v50, %v9225_v23  ;;  %v2995_v42 = vld [vmem:[#allocation11 + $0xc0] sm:$0xff]  ;;  %v2931_v61 = vmul.f32 %v2392_v32, %v1928_v49  ;;  %v9242_v4 = vld [vmem:[#allocation69_spill] sm:$0xff]  ;;  %v9247_v38 = vld [vmem:[#allocation94_spill] sm:$0xff] }
 0x2a2   : > { %2886 = vmatmul.f32.gmra.mxu3 %v7405_v13  ;;  %3009 = vmatpush.msrb.mxu1 %v3000_v12  ;;  %v1583_v13 = vadd.f32 %v7513_v57, %v7499_v27  ;;  %v1870_v27 = vadd.f32 %v9217_v39, %v9216_v3  ;;  %v9230_v33 = vld [vmem:[#allocation55_spill] sm:$0xff]  ;;  %v9234_v56 = vld [vmem:[#allocation92_spill] sm:$0xff]  ;;  %v9240_v3 = vld [vmem:[#allocation46_spill] sm:$0xff] }
 0x2a3   : > { %v1815_v34 = vadd.f32 %v9230_v33, %v9229_v24  ;;  %v9237_v7 = vld [vmem:[#allocation39_spill] sm:$0xff]  ;;  %v1760_v39 = vadd.f32 %v9240_v3, %v9239_v52  ;;  %v9241_v22 = vld [vmem:[#allocation68_spill] sm:$0xff]  ;;  %v9249_v9 = vld [vmem:[#allocation101_spill] sm:$0xff] }
 0x2a4   : > { %3010 = vmatpush.msrb.mxu1 %v2999_v31  ;;  %v2933_v57 = vmul.f32 %v2047_v6, %v1583_v13  ;;  %v2930_v58 = vmul.f32 %v2334_v40, %v1870_v27  ;;  %v9231_v31 = vld [vmem:[#allocation74_spill] sm:$0xff]  ;;  %v2994_v13 = vld [vmem:[#allocation11 + $0xa0] sm:$0xff]  ;;  %v2942_v27 = vmul.f32 %v2108_v30, %v1644_v47  ;;  %v1986_v28 = vadd.f32 %v9242_v4, %v9241_v22  ;;  %v2452_v47 = vpop.f32.mrf.mxu0 }
 0x2a5   : > { %v2050_v6 = vadd.f32 %v9232_v60, %v9231_v31  ;;  %v9238_v40 = vld [vmem:[#allocation43_spill] sm:$0xff]  ;;  %v2937_v44 = vmul.f32 %v2279_v43, %v1815_v34  ;;  %v9250_v43 = vld [vmem:[#allocation57_spill] sm:$0xff]  ;;  %v9254_v31 = vld [vmem:[#allocation78_spill] sm:$0xff] }
 0x2a6   : > { %3011 = vmatpush.msrb.mxu1 %v2998_v15  ;;  %2860 = vmatmul.f32.gmra.mxu2 %v7410_v26  ;;  %v2958_v19 = vadd.f32 %v2934_v54, %v2933_v57  ;;  %v2450_v15 = vadd.f32 %v2449_v10, %v2420_v16  ;;  %v9236_v54 = vld [vmem:[#allocation38_spill] sm:$0xff]  ;;  %v2423_v57 = vpop.f32.mrf.mxu3  ;;  %v9244_v16 = vld [vmem:[#allocation103_spill] sm:$0xff]  ;;  %v9255_v60 = vld [vmem:[#allocation85_spill] sm:$0xff] }
 0x2a7   : > { %2918 = vmatmul.f32.gmra.mxu0 %v7410_v26  ;;  %v9233_v26 = vld [vmem:[#allocation82_spill] sm:$0xff]  ;;  %v1647_v55 = vadd.f32 %v9236_v54, %v9235_v59  ;;  %v2337_v10 = vadd.f32 %v9244_v16, %v9243_v53  ;;  %v2993_v32 = vld [vmem:[#allocation11 + $0x80] sm:$0xff]  ;;  %v2941_v21 = vmul.f32 %v2050_v6, %v1586_v36  ;;  %v2053_v6 = vadd.f32 %v9255_v60, %v9254_v31  ;;  %v9266_v16 = vld [vmem:[#allocation61_spill] sm:$0xff] }
 0x2a8   : > { %3012 = vmatpush.msrb.mxu1 %v2997_v17  ;;  %v2166_v63 = vadd.f32 %v9234_v56, %v9233_v26  ;;  %v2962_v48 = vadd.f32 %v2958_v19, %v2935_v29  ;;  %v1702_v17 = vadd.f32 %v9238_v40, %v9237_v7  ;;  %v2973_v29 = vadd.f32 %v2969_v18, %v2930_v58  ;;  %v9248_v49 = vld [vmem:[#allocation95_spill] sm:$0xff]  ;;  %v9253_v36 = vld [vmem:[#allocation88_spill] sm:$0xff]  ;;  %v9258_v59 = vld [vmem:[#allocation86_spill] sm:$0xff]  ;;  %v2397_v40 = vpop.f32.mrf.mxu2 }
 0x2a9   : > { %2831 = vmatmul.f32.gmra.mxu1 %v9228_v37  ;;  %v7907_v12 = vpop.f32.mrf.mxu1  ;;  %v2224_v23 = vadd.f32 %v9248_v49, %v9247_v38  ;;  %v2932_v19 = vmul.f32 %v2450_v15, %v1986_v28  ;;  %v2395_v18 = vadd.f32 %v2394_v0, %v9249_v9  ;;  %v2992_v58 = vld [vmem:[#allocation11 + $0x60] sm:$0xff]  ;;  %v2959_v24 = vadd.f32 %v2942_v27, %v2941_v21  ;;  %v9262_v28 = vld [vmem:[#allocation34_spill] sm:$0xff] }
 0x2aa   : > { %2889 = vmatmul.f32.gmra.mxu3 %v9228_v37  ;;  %3013 = vmatpush.msrb.mxu1 %v2996_v62  ;;  %v9245_v62 = vld [vmem:[#allocation56_spill] sm:$0xff]  ;;  %v2943_v25 = vmul.f32 %v2166_v63, %v1702_v17  ;;  %v2966_v50 = vadd.f32 %v2962_v48, %v2936_v45  ;;  %v2977_v30 = vadd.f32 %v2973_v29, %v2931_v61  ;;  %v9251_v37 = vld [vmem:[#allocation70_spill] sm:$0xff]  ;;  %v9252_v33 = vld [vmem:[#allocation87_spill] sm:$0xff]  ;;  %v654_v61 = vmul.f32 1e+30, %v6552_v2 }
 0x2ab   : > { %v1873_v51 = vadd.f32 %v9246_v20, %v9245_v62  ;;  %v2111_v34 = vadd.f32 %v9253_v36, %v9252_v33  ;;  %v9256_v63 = vld [vmem:[#allocation93_spill] sm:$0xff]  ;;  %v9257_v48 = vld [vmem:[#allocation27_spill] sm:$0xff]  ;;  %v9259_v54 = vld [vmem:[#allocation96_spill] sm:$0xff]  ;;  %v2453_v22 = vadd.f32 %v2452_v47, %v2423_v57  ;;  %v6553_v36 = vadd.f32 -1.0, %v7879_v1 }
 0x2ac   : > { %3014 = vmatpush.msrb.mxu1 %v2995_v42  ;;  %v1931_v42 = vadd.f32 %v9251_v37, %v9250_v43  ;;  %v2970_v26 = vadd.f32 %v2966_v50, %v2937_v44  ;;  %v2282_v0 = vadd.f32 %v7817_v5, %v9256_v63  ;;  %v2991_v45 = vld [vmem:[#allocation11 + $0x40] sm:$0xff]  ;;  %v2963_v15 = vadd.f32 %v2959_v24, %v2943_v25  ;;  %v9270_v57 = vld [vmem:[#allocation105_spill] sm:$0xff]  ;;  %v9271_v49 = vld [vmem:[#allocation106_spill] sm:$0xff] }
 0x2ad   : > { %v2938_v56 = vmul.f32 %v2337_v10, %v1873_v51  ;;  %v2169_v7 = vadd.f32 %v9259_v54, %v9258_v59  ;;  %v9261_v17 = vld [vmem:[#allocation59_spill] sm:$0xff]  ;;  %v2981_v3 = vadd.f32 %v2977_v30, %v2932_v19  ;;  %v9263_v2 = vld [vmem:[#allocation36_spill] sm:$0xff]  ;;  %v9267_v10 = vld [vmem:[#allocation62_spill] sm:$0xff]  ;;  %v2950_v62 = vmul.f32 %v2111_v34, %v1647_v55 }
 0x2ae   : > { %3015 = vmatpush.msrb.mxu1 %v2994_v13  ;;  %2863 = vmatmul.f32.gmra.mxu2 %v7420_v46  ;;  %v2944_v13 = vmul.f32 %v2224_v23, %v1760_v39  ;;  %v2939_v27 = vmul.f32 %v2395_v18, %v1931_v42  ;;  %v2990_v5 = vld [vmem:[#allocation11 + $0x20] sm:$0xff]  ;;  %v1589_v29 = vadd.f32 %v9263_v2, %v9262_v28  ;;  %v9272_v9 = vld [vmem:[#allocation98_spill] sm:$0xff]  ;;  %v2426_v43 = vpop.f32.mrf.mxu3  ;;  %v9275_v34 = vld [vmem:[#allocation49_spill] sm:$0xff] }
 0x2af   : > { %2921 = vmatmul.f32.gmra.mxu0 %v7420_v46  ;;  %v9260_v46 = vld [vmem:[#allocation48_spill] sm:$0xff]  ;;  %v9265_v44 = vld [vmem:[#allocation47_spill] sm:$0xff]  ;;  %v2974_v25 = vadd.f32 %v2970_v26, %v2938_v56  ;;  %v2340_v23 = vadd.f32 %v9271_v49, %v9270_v57  ;;  %v7961_v37 = vadd.f32 %v2981_v3, %v654_v61  ;;  %v9276_v31 = vld [vmem:[#allocation50_spill] sm:$0xff] }
 0x2b0   : > { %3016 = vmatpush.msrb.mxu1 %v2993_v32  ;;  %v1818_v52 = vadd.f32 %v9261_v17, %v9260_v46  ;;  %v9264_v39 = vld [vmem:[#allocation40_spill] sm:$0xff]  ;;  %v1876_v32 = vadd.f32 %v9267_v10, %v9266_v16  ;;  %v9268_v20 = vld [vmem:[#allocation71_spill] sm:$0xff]  ;;  %v2949_v50 = vmul.f32 %v2053_v6, %v1589_v29  ;;  %v2967_v30 = vadd.f32 %v2963_v15, %v2944_v13  ;;  %v2455_v6 = vpop.f32.mrf.mxu0  ;;  %v9278_v63 = vld [vmem:[#allocation73_spill] sm:$0xff] }
 0x2b1   : > { %2834 = vmatmul.f32.gmra.mxu1 %v9257_v48  ;;  %v1705_v53 = vadd.f32 %v9265_v44, %v9264_v39  ;;  %v9269_v51 = vld [vmem:[#allocation72_spill] sm:$0xff]  ;;  %v9273_v18 = vld [vmem:[#allocation99_spill] sm:$0xff]  ;;  %v2978_v55 = vadd.f32 %v2974_v25, %v2939_v27  ;;  %v1763_v60 = vadd.f32 %v9276_v31, %v9275_v34  ;;  %v9279_v15 = vld [vmem:[#allocation97_spill] sm:$0xff]  ;;  %v2456_v17 = vadd.f32 %v2455_v6, %v2426_v43 }
 0x2b2   : > { %2892 = vmatmul.f32.gmra.mxu3 %v9257_v48  ;;  %3017 = vmatpush.msrb.mxu1 %v2992_v58  ;;  %v1989_v21 = vadd.f32 %v9269_v51, %v9268_v20  ;;  %v2945_v38 = vmul.f32 %v2282_v0, %v1818_v52  ;;  %v2989_v47 = vld [vmem:[#allocation11] sm:$0xff]  ;;  %v2227_v58 = vadd.f32 %v9273_v18, %v9272_v9  ;;  %v655_v52 = vmul.f32 1e+30, %v6553_v36  ;;  %v9283_v27 = vld [vmem:[#allocation30_spill] sm:$0xff]  ;;  %v9286_v16 = vld [vmem:[#allocation65_spill] sm:$0xff] }
 0x2b3   : > { %v7947_v4 = vpop.f32.mrf.mxu1  ;;  %v2951_v19 = vmul.f32 %v2169_v7, %v1705_v53  ;;  %v9274_v24 = vld [vmem:[#allocation104_spill] sm:$0xff]  ;;  %v2960_v26 = vadd.f32 %v2950_v62, %v2949_v50  ;;  %v2285_v61 = vadd.f32 %v7829_v41, %v9279_v15  ;;  %v9280_v54 = vld [vmem:[#allocation51_spill] sm:$0xff]  ;;  %v2343_v44 = vadd.f32 %v7840_v11, %v7834_v8  ;;  %v9287_v10 = vld [vmem:[#allocation66_spill] sm:$0xff] }
 0x2b4   : > { %3018 = vmatpush.msrb.mxu1 %v2991_v45  ;;  %v2940_v42 = vmul.f32 %v2453_v22, %v1989_v21  ;;  %v2398_v33 = vadd.f32 %v2397_v40, %v9274_v24  ;;  %v9277_v56 = vld [vmem:[#allocation60_spill] sm:$0xff]  ;;  %v2971_v48 = vadd.f32 %v2967_v30, %v2945_v38  ;;  %v2946_v45 = vmul.f32 %v2340_v23, %v1876_v32  ;;  %v9281_v1 = vld [vmem:[#allocation63_spill] sm:$0xff]  ;;  %v9289_v23 = vld [vmem:[#allocation77_spill] sm:$0xff] }
 0x2b5   : > { %v1934_v0 = vadd.f32 %v9278_v63, %v9277_v56  ;;  %v2964_v13 = vadd.f32 %v2960_v26, %v2951_v19  ;;  %v2952_v59 = vmul.f32 %v2227_v58, %v1763_v60  ;;  %v1821_v7 = vadd.f32 %v9281_v1, %v9280_v54  ;;  %v9282_v3 = vld [vmem:[#allocation24_spill] sm:$0xff]  ;;  %v9284_v28 = vld [vmem:[#allocation75_spill] sm:$0xff]  ;;  %v9290_v58 = vld [vmem:[#allocation25_spill] sm:$0xff] }
 0x2b6   : > { %3019 = vmatpush.msrb.mxu1 %v2990_v5  ;;  %v2982_v40 = vadd.f32 %v2978_v55, %v2940_v42  ;;  %v648_v22 = vmul.f32 %v9283_v27, %v9282_v3  ;;  %v2400_v5 = vpop.f32.mrf.mxu2  ;;  %v9285_v2 = vld [vmem:[#allocation76_spill] sm:$0xff]  ;;  %v2975_v39 = vadd.f32 %v2971_v48, %v2946_v45  ;;  %v1879_v32 = vadd.f32 %v9287_v10, %v9286_v16  ;;  %v2429_v38 = vpop.f32.mrf.mxu3 }
 0x2b7   : > { %v2947_v46 = vmul.f32 %v2398_v33, %v1934_v0  ;;  %v1992_v29 = vadd.f32 %v9285_v2, %v9284_v28  ;;  %v2953_v41 = vmul.f32 %v2285_v61, %v1821_v7  ;;  %v2968_v62 = vadd.f32 %v2964_v13, %v2952_v59  ;;  %v9288_v49 = vld [vmem:[#allocation64_spill] sm:$0xff] }
 0x2b8   : > { %3020 = vmatpush.msrb.mxu1 %v2989_v47  ;;  %v2401_v21 = vadd.f32 %v2400_v5, %v7831_v35  ;;  %v7985_v25 = vadd.f32 %v2982_v40, %v655_v52  ;;  %v6554_v57 = vadd.f32 -1.0, %v648_v22  ;;  %v1937_v47 = vadd.f32 %v9289_v23, %v9288_v49  ;;  %v2458_v8 = vpop.f32.mrf.mxu0  ;;  %v9291_v43 = vld [vmem:[#allocation32_spill] sm:$0xff]  ;;  %v9292_v35 = vld [vmem:[#allocation79_spill] sm:$0xff]  ;;  %v3099_v49 = vld [vmem:[#allocation11 + $0x190] sm:$0xff] }
 0x2b9   : > { %3021 = vmatmul.f32.vlgmr.msrb.gmra.mxu1 %v7961_v37  ;;  %v2979_v20 = vadd.f32 %v2975_v39, %v2947_v46  ;;  %v2948_v51 = vmul.f32 %v2456_v17, %v1992_v29  ;;  %v2972_v50 = vadd.f32 %v2968_v62, %v2953_v41  ;;  %v2954_v30 = vmul.f32 %v2343_v44, %v1879_v32  ;;  %v9293_v42 = vld [vmem:[#allocation80_spill] sm:$0xff] }
 0x2ba   : > { %v2955_v19 = vmul.f32 %v2401_v21, %v1937_v47  ;;  %v2459_v9 = vadd.f32 %v2458_v8, %v2429_v38  ;;  %v656_v18 = vmul.f32 1e+30, %v6554_v57  ;;  %v649_v55 = vmul.f32 %v9291_v43, %v9290_v58  ;;  %v3053_v13 = vld [vmem:[#allocation11 + $0x1e8] sm:$0xff]  ;;  %v3101_v21 = vld [vmem:[#allocation11 + $0x1d0] sm:$0xff] }
 0x2bb   : > { %v2983_v11 = vadd.f32 %v2979_v20, %v2948_v51  ;;  %v1995_v24 = vadd.f32 %v9293_v42, %v9292_v35  ;;  %v2976_v33 = vadd.f32 %v2972_v50, %v2954_v30  ;;  %3054 = vmatpush.msrb.mxu2 %v3053_v13  ;;  %v3052_v59 = vld [vmem:[#allocation11 + $0x1c8] sm:$0xff]  ;;  %v3102_v51 = vld [vmem:[#allocation11 + $0x1f0] sm:$0xff] }
 0x2bc   : > { %v6555_v26 = vadd.f32 -1.0, %v649_v55  ;;  %v3051_v54 = vld [vmem:[#allocation11 + $0x1a8] sm:$0xff]  ;;  %3103 = vmatpush.msrb.mxu3 %v3102_v51  ;;  %v3100_v57 = vld [vmem:[#allocation11 + $0x1b0] sm:$0xff] }
 0x2bd   : > { %v7980_v53 = vpop.f32.mrf.mxu1  ;;  %v2980_v36 = vadd.f32 %v2976_v33, %v2955_v19  ;;  %v2956_v34 = vmul.f32 %v2459_v9, %v1995_v24  ;;  %v7994_v31 = vadd.f32 %v2983_v11, %v656_v18  ;;  %3055 = vmatpush.msrb.mxu2 %v3052_v59  ;;  %v3050_v1 = vld [vmem:[#allocation11 + $0x188] sm:$0xff]  ;;  %v3098_v50 = vld [vmem:[#allocation11 + $0x170] sm:$0xff] }
 0x2be   : > { %v657_v56 = vmul.f32 1e+30, %v6555_v26  ;;  %v3049_v40 = vld [vmem:[#allocation11 + $0x168] sm:$0xff]  ;;  %v8018_v16 = vpop.f32.mrf.mxu2  ;;  %3104 = vmatpush.msrb.mxu3 %v3101_v21  ;;  %v3097_v30 = vld [vmem:[#allocation11 + $0x150] sm:$0xff]  ;;  %v3161_v21 = vld [vmem:[#allocation11 + $0x1b8] sm:$0xff] }
 0x2bf   : > { %v2984_v6 = vadd.f32 %v2980_v36, %v2956_v34  ;;  %3056 = vmatpush.msrb.mxu2 %v3051_v54  ;;  %v3048_v46 = vld [vmem:[#allocation11 + $0x148] sm:$0xff]  ;;  %v3096_v8 = vld [vmem:[#allocation11 + $0x130] sm:$0xff] }
 0x2c0   : > { %v3047_v17 = vld [vmem:[#allocation11 + $0x128] sm:$0xff]  ;;  %3105 = vmatpush.msrb.mxu3 %v3100_v57  ;;  %v3095_v19 = vld [vmem:[#allocation11 + $0x110] sm:$0xff]  ;;  %v3160_v57 = vld [vmem:[#allocation11 + $0x198] sm:$0xff] }
 0x2c1   : > { %3024 = vmatmul.f32.gmra.mxu1 %v7985_v25  ;;  %v7999_v63 = vadd.f32 %v2984_v6, %v657_v56  ;;  %3057 = vmatpush.msrb.mxu2 %v3050_v1  ;;  %v3046_v52 = vld [vmem:[#allocation11 + $0x108] sm:$0xff]  ;;  %v3094_v58 = vld [vmem:[#allocation11 + $0xf0] sm:$0xff] }
 0x2c2   : > { %v3045_v3 = vld [vmem:[#allocation11 + $0xe8] sm:$0xff]  ;;  %3106 = vmatpush.msrb.mxu3 %v3099_v49  ;;  %v3093_v43 = vld [vmem:[#allocation11 + $0xd0] sm:$0xff] }
 0x2c3   : > { %3058 = vmatpush.msrb.mxu2 %v3049_v40  ;;  %v3044_v22 = vld [vmem:[#allocation11 + $0xc8] sm:$0xff]  ;;  %v3092_v55 = vld [vmem:[#allocation11 + $0xb0] sm:$0xff] }
 0x2c4   : > { %v3043_v5 = vld [vmem:[#allocation11 + $0xa8] sm:$0xff]  ;;  %3107 = vmatpush.msrb.mxu3 %v3098_v50  ;;  %v3091_v35 = vld [vmem:[#allocation11 + $0x90] sm:$0xff]  ;;  %v3159_v50 = vld [vmem:[#allocation11 + $0x178] sm:$0xff] }
 0x2c5   : > { %3059 = vmatpush.msrb.mxu2 %v3048_v46  ;;  %v3042_v28 = vld [vmem:[#allocation11 + $0x88] sm:$0xff]  ;;  %v3090_v36 = vld [vmem:[#allocation11 + $0x70] sm:$0xff] }
 0x2c6   : > { %v3041_v2 = vld [vmem:[#allocation11 + $0x68] sm:$0xff]  ;;  %v8024_v62 = vpop.f32.mrf.mxu2  ;;  %3108 = vmatpush.msrb.mxu3 %v3097_v30  ;;  %v3089_v34 = vld [vmem:[#allocation11 + $0x50] sm:$0xff]  ;;  %v3158_v30 = vld [vmem:[#allocation11 + $0x158] sm:$0xff] }
 0x2c7   : > { %v7996_v60 = vpop.f32.mrf.mxu1  ;;  %3060 = vmatpush.msrb.mxu2 %v3047_v17  ;;  %v3040_v29 = vld [vmem:[#allocation11 + $0x48] sm:$0xff]  ;;  %v3088_v26 = vld [vmem:[#allocation11 + $0x30] sm:$0xff] }
 0x2c8   : > { %v3039_v41 = vld [vmem:[#allocation11 + $0x28] sm:$0xff]  ;;  %3109 = vmatpush.msrb.mxu3 %v3096_v8  ;;  %v3157_v8 = vld [vmem:[#allocation11 + $0x138] sm:$0xff] }
 0x2c9   : > { %3027 = vmatmul.f32.gmra.mxu1 %v7994_v31  ;;  %3061 = vmatpush.msrb.mxu2 %v3046_v52  ;;  %v3038_v44 = vld [vmem:[#allocation11 + $0x8] sm:$0xff] }
 0x2ca   : > { %3110 = vmatpush.msrb.mxu3 %v3095_v19 }
 0x2cb   : > { %3062 = vmatpush.msrb.mxu2 %v3045_v3  ;;  %v3087_v3 = vld [vmem:[#allocation11 + $0x10] sm:$0xff] }
 0x2cc   : > { %3111 = vmatpush.msrb.mxu3 %v3094_v58 }
 0x2cd   : > { %3063 = vmatpush.msrb.mxu2 %v3044_v22 }
 0x2ce   : > { %v8028_v38 = vpop.f32.mrf.mxu2  ;;  %3112 = vmatpush.msrb.mxu3 %v3093_v43 }
 0x2cf   : > { %3064 = vmatpush.msrb.mxu2 %v3043_v5  ;;  %v8056_v5 = vpop.f32.mrf.mxu3 }
 0x2d0   : > { %3113 = vmatpush.msrb.mxu3 %v3092_v55  ;;  %v3155_v55 = vld [vmem:[#allocation11 + $0xf8] sm:$0xff] }
 0x2d1   : > { %3030 = vmatmul.f32.gmra.mxu1 %v7999_v63  ;;  %v8002_v0 = vpop.f32.mrf.mxu1  ;;  %3065 = vmatpush.msrb.mxu2 %v3042_v28 }
 0x2d2   : > { %3114 = vmatpush.msrb.mxu3 %v3091_v35 }
 0x2d3   : > { %3066 = vmatpush.msrb.mxu2 %v3041_v2 }
 0x2d4   : > { %3115 = vmatpush.msrb.mxu3 %v3090_v36 }
 0x2d5   : > { %3067 = vmatpush.msrb.mxu2 %v3040_v29 }
 0x2d6   : > { %v8031_v11 = vpop.f32.mrf.mxu2  ;;  %3116 = vmatpush.msrb.mxu3 %v3089_v34 }
 0x2d7   : > { %3068 = vmatpush.msrb.mxu2 %v3039_v41  ;;  %v8060_v2 = vpop.f32.mrf.mxu3  ;;  %v3163_v41 = vld [vmem:[#allocation11 + $0x1f8] sm:$0xff] }
 0x2d8   : > { %3117 = vmatpush.msrb.mxu3 %v3088_v26  ;;  %3164 = vmatpush.msra.mxu0 %v3163_v41 }
 0x2d9   : > { %3069 = vmatpush.msrb.mxu2 %v3038_v44  ;;  %v3162_v44 = vld [vmem:[#allocation11 + $0x1d8] sm:$0xff] }
 0x2da   : > { %3118 = vmatpush.msrb.mxu3 %v3087_v3  ;;  %3165 = vmatpush.msra.mxu0 %v3162_v44 }
 0x2db   : > { %v8004_v48 = vpop.f32.mrf.mxu1 }
 0x2dc   : > { %3166 = vmatpush.msra.mxu0 %v3161_v21 }
 0x2de   : > { %v8034_v42 = vpop.f32.mrf.mxu2  ;;  %3167 = vmatpush.msra.mxu0 %v3160_v57 }
 0x2df   : > { %v8064_v51 = vpop.f32.mrf.mxu3 }
 0x2e0   : > { %3168 = vmatpush.msra.mxu0 %v3159_v50  ;;  %v3152_v50 = vld [vmem:[#allocation11 + $0x98] sm:$0xff] }
 0x2e2   : > { %3169 = vmatpush.msra.mxu0 %v3158_v30  ;;  %v3151_v30 = vld [vmem:[#allocation11 + $0x78] sm:$0xff] }
 0x2e4   : > { %3170 = vmatpush.msra.mxu0 %v3157_v8  ;;  %v3150_v8 = vld [vmem:[#allocation11 + $0x58] sm:$0xff] }
 0x2e5   : > { %v8006_v45 = vpop.f32.mrf.mxu1 }
 0x2e6   : > { %v8038_v13 = vpop.f32.mrf.mxu2 }
 0x2e7   : > { %v8066_v19 = vpop.f32.mrf.mxu3 }
 0x2ee   : > { %v8040_v59 = vpop.f32.mrf.mxu2 }
 0x2ef   : > { %v8008_v15 = vpop.f32.mrf.mxu1 }
 0x2f6   : > { %v8042_v54 = vpop.f32.mrf.mxu2 }
 0x2f9   : > { %v8010_v61 = vpop.f32.mrf.mxu1 }
 0x2fa   : > { %9294 = vst [vmem:[#allocation35_spill] sm:$0xff] %v8010_v61 }
 0x2fe   : > { %v8044_v1 = vpop.f32.mrf.mxu2 }
 0x303   : > { %v8012_v7 = vpop.f32.mrf.mxu1 }
 0x304   : > { %9295 = vst [vmem:[#allocation52_spill] sm:$0xff] %v8012_v7  ;;  %v3301_v7 = vld [vmem:[#allocation13 + $0x600] sm:$0xff] }
 0x306   : > { %v8046_v40 = vpop.f32.mrf.mxu2 }
 0x307   : > { %9301 = vst [vmem:[#allocation42_spill] sm:$0xff] %v8046_v40  ;;  %v3273_v40 = vld [vmem:[#allocation13 + $0x220] sm:$0xff] }
 0x30d   : > { %v8014_v27 = vpop.f32.mrf.mxu1 }
 0x30e   : > { %9296 = vst [vmem:[#allocation53_spill] sm:$0xff] %v8014_v27  ;;  %v8048_v46 = vpop.f32.mrf.mxu2  ;;  %v3366_v27 = vld [vmem:[#allocation13 + $0xe08] sm:$0xff] }
 0x30f   : > { %9302 = vst [vmem:[#allocation54_spill] sm:$0xff] %v8048_v46  ;;  %v3311_v46 = vld [vmem:[#allocation13 + $0x710] sm:$0xff] }
 0x316   : > { %v8016_v39 = vpop.f32.mrf.mxu1  ;;  %v8050_v17 = vpop.f32.mrf.mxu2 }
 0x317   : > { %9297 = vst [vmem:[#allocation90_spill] sm:$0xff] %v8016_v39 }
 0x318   : > { %9303 = vst [vmem:[#allocation67_spill] sm:$0xff] %v8050_v17  ;;  %v3375_v17 = vld [vmem:[#allocation13 + $0xf10] sm:$0xff] }
 0x319   : > { %3439 = vmatpush.msra.mxu3 %v3375_v17  ;;  %v3351_v17 = vld [vmem:[#allocation13 + $0xc10] sm:$0xff] }
 0x31e   : > { %v8020_v10 = vpop.f32.mrf.mxu1  ;;  %v8052_v52 = vpop.f32.mrf.mxu2 }
 0x31f   : > { %9298 = vst [vmem:[#allocation91_spill] sm:$0xff] %v8020_v10  ;;  %v3299_v10 = vld [vmem:[#allocation13 + $0x530] sm:$0xff] }
 0x320   : > { %9304 = vst [vmem:[#allocation83_spill] sm:$0xff] %v8052_v52 }
 0x326   : > { %v8022_v32 = vpop.f32.mrf.mxu1  ;;  %v8054_v22 = vpop.f32.mrf.mxu2 }
 0x327   : > { %9299 = vst [vmem:[#allocation100_spill] sm:$0xff] %v8022_v32  ;;  %v3368_v32 = vld [vmem:[#allocation13 + $0xe18] sm:$0xff] }
 0x328   : > { %9305 = vst [vmem:[#allocation84_spill] sm:$0xff] %v8054_v22 }
 0x32e   : > { %v8026_v20 = vpop.f32.mrf.mxu1  ;;  %v8058_v28 = vpop.f32.mrf.mxu2 }
 0x32f   : > { %9300 = vst [vmem:[#allocation41_spill] sm:$0xff] %v8026_v20 }
 0x330   : > { %9306 = vst [vmem:[#allocation89_spill] sm:$0xff] %v8058_v28 }
 0x336   : > { %v3022_v23 = vpop.f32.mrf.mxu1  ;;  %v8062_v29 = vpop.f32.mrf.mxu2 }
 0x337   : > { %v3034_v47 = vmax.f32 %v7961_v37, %v3022_v23  ;;  %9307 = vst [vmem:[#allocation26_spill] sm:$0xff] %v8062_v29 }
 0x339   : > { %3070 = vmatmul.f32.vlgmr.msrb.gmra.mxu2 %v3034_v47 }
 0x33e   : > { %v3025_v9 = vpop.f32.mrf.mxu1 }
 0x33f   : > { %v3035_v18 = vmax.f32 %v7985_v25, %v3025_v9  ;;  %v3156_v9 = vld [vmem:[#allocation11 + $0x118] sm:$0xff] }
 0x340   : > { %3171 = vmatpush.msra.mxu0 %v3156_v9  ;;  %v3149_v9 = vld [vmem:[#allocation11 + $0x38] sm:$0xff] }
 0x341   : > { %3073 = vmatmul.f32.gmra.mxu2 %v3035_v18 }
 0x342   : > { %3172 = vmatpush.msra.mxu0 %v3155_v55 }
 0x346   : > { %v3028_v24 = vpop.f32.mrf.mxu1 }
 0x347   : > { %v3036_v33 = vmax.f32 %v7994_v31, %v3028_v24 }
 0x349   : > { %3076 = vmatmul.f32.gmra.mxu2 %v3036_v33 }
 0x34e   : > { %v3031_v6 = vpop.f32.mrf.mxu1 }
 0x34f   : > { %v3037_v56 = vmax.f32 %v7999_v63, %v3031_v6 }
 0x351   : > { %3079 = vmatmul.f32.gmra.mxu2 %v3037_v56 }
 0x3bc   : > { %v3071_v49 = vpop.f32.mrf.mxu2 }
 0x3bd   : > { %v3083_v23 = vmax.f32 %v3034_v47, %v3071_v49  ;;  %v8071_v47 = vpop.f32.mrf.mxu3  ;;  %v3153_v49 = vld [vmem:[#allocation11 + $0xb8] sm:$0xff] }
 0x3bf   : > { %3119 = vmatmul.f32.vlgmr.msrb.gmra.mxu3 %v3083_v23 }
 0x3c4   : > { %v3074_v58 = vpop.f32.mrf.mxu2 }
 0x3c5   : > { %v8068_v43 = vmax.f32 %v3035_v18, %v3074_v58  ;;  %v8078_v26 = vpop.f32.mrf.mxu3  ;;  %v8097_v58 = vpop.f32.mrf.mxu0 }
 0x3c7   : > { %3122 = vmatmul.f32.gmra.mxu3 %v8068_v43 }
 0x3cc   : > { %v3077_v35 = vpop.f32.mrf.mxu2 }
 0x3cd   : > { %v8073_v24 = vmax.f32 %v3036_v33, %v3077_v35  ;;  %v8081_v18 = vpop.f32.mrf.mxu3  ;;  %v3148_v35 = vld [vmem:[#allocation11 + $0x18] sm:$0xff] }
 0x3cf   : > { %3125 = vmatmul.f32.gmra.mxu3 %v8073_v24 }
 0x3d4   : > { %v3080_v36 = vpop.f32.mrf.mxu2 }
 0x3d5   : > { %v8076_v34 = vmax.f32 %v3037_v56, %v3080_v36  ;;  %v8083_v6 = vpop.f32.mrf.mxu3  ;;  %v3154_v56 = vld [vmem:[#allocation11 + $0xd8] sm:$0xff]  ;;  %v8101_v36 = vpop.f32.mrf.mxu0 }
 0x3d6   : > { %3173 = vmatpush.msra.mxu0 %v3154_v56 }
 0x3d7   : > { %3128 = vmatmul.f32.gmra.mxu3 %v8076_v34 }
 0x3d8   : > { %3174 = vmatpush.msra.mxu0 %v3153_v49 }
 0x3da   : > { %3175 = vmatpush.msra.mxu0 %v3152_v50 }
 0x3dc   : > { %3176 = vmatpush.msra.mxu0 %v3151_v30 }
 0x3dd   : > { %v8085_v3 = vpop.f32.mrf.mxu3  ;;  %v8105_v49 = vpop.f32.mrf.mxu0 }
 0x3de   : > { %3177 = vmatpush.msra.mxu0 %v3150_v8  ;;  %v3374_v8 = vld [vmem:[#allocation13 + $0xf08] sm:$0xff] }
 0x3df   : > { %3410 = vmatpush.msra.mxu2 %v3374_v8 }
 0x3e0   : > { %3178 = vmatpush.msra.mxu0 %v3149_v9  ;;  %v3376_v9 = vld [vmem:[#allocation13 + $0xf18] sm:$0xff] }
 0x3e1   : > { %3411 = vmatpush.msra.mxu2 %v3366_v27 }
 0x3e2   : > { %3179 = vmatpush.msra.mxu0 %v3148_v35  ;;  %v3365_v35 = vld [vmem:[#allocation13 + $0xe00] sm:$0xff] }
 0x3e4   : > { %3468 = vmatpush.msrb.mxu0 %v3376_v9  ;;  %v3352_v9 = vld [vmem:[#allocation13 + $0xc18] sm:$0xff] }
 0x3e5   : > { %v8087_v41 = vpop.f32.mrf.mxu3 }
 0x3e6   : > { %9308 = vst [vmem:[#allocation44_spill] sm:$0xff] %v8087_v41  ;;  %3469 = vmatpush.msrb.mxu0 %v3368_v32  ;;  %v3343_v32 = vld [vmem:[#allocation13 + $0xb10] sm:$0xff]  ;;  %v3289_v41 = vld [vmem:[#allocation13 + $0x420] sm:$0xff] }
 0x3ed   : > { %v8089_v44 = vpop.f32.mrf.mxu3 }
 0x3ee   : > { %9309 = vst [vmem:[#allocation55_spill] sm:$0xff] %v8089_v44  ;;  %v3358_v44 = vld [vmem:[#allocation13 + $0xd08] sm:$0xff] }
 0x3ef   : > { %3412 = vmatpush.msra.mxu2 %v3358_v44  ;;  %v3335_v44 = vld [vmem:[#allocation13 + $0xa10] sm:$0xff] }
 0x3f5   : > { %v8091_v33 = vpop.f32.mrf.mxu3 }
 0x3f6   : > { %9310 = vst [vmem:[#allocation74_spill] sm:$0xff] %v8091_v33  ;;  %v3373_v33 = vld [vmem:[#allocation13 + $0xf00] sm:$0xff] }
 0x3f7   : > { %3381 = vmatpush.msra.mxu1 %v3373_v33  ;;  %v3349_v33 = vld [vmem:[#allocation13 + $0xc00] sm:$0xff] }
 0x3f9   : > { %3382 = vmatpush.msra.mxu1 %v3365_v35  ;;  %v3344_v35 = vld [vmem:[#allocation13 + $0xb18] sm:$0xff] }
 0x3fd   : > { %v8093_v21 = vpop.f32.mrf.mxu3 }
 0x405   : > { %v8095_v57 = vpop.f32.mrf.mxu3 }
 0x406   : > { %9311 = vst [vmem:[#allocation81_spill] sm:$0xff] %v8095_v57  ;;  %v3283_v57 = vld [vmem:[#allocation13 + $0x330] sm:$0xff] }
 0x40d   : > { %v8099_v55 = vpop.f32.mrf.mxu3 }
 0x40e   : > { %9312 = vst [vmem:[#allocation82_spill] sm:$0xff] %v8099_v55  ;;  %v3334_v55 = vld [vmem:[#allocation13 + $0xa08] sm:$0xff] }
 0x415   : > { %v8103_v56 = vpop.f32.mrf.mxu3 }
 0x416   : > { %9313 = vst [vmem:[#allocation92_spill] sm:$0xff] %v8103_v56  ;;  %v3367_v56 = vld [vmem:[#allocation13 + $0xe10] sm:$0xff] }
 0x417   : > { %3440 = vmatpush.msra.mxu3 %v3367_v56  ;;  %v3341_v56 = vld [vmem:[#allocation13 + $0xb00] sm:$0xff] }
 0x442   : > { %v3120_v29 = vpop.f32.mrf.mxu3 }
 0x443   : > { %v3132_v50 = vmax.f32 %v3083_v23, %v3120_v29  ;;  %v3359_v23 = vld [vmem:[#allocation13 + $0xd10] sm:$0xff] }
 0x444   : > { %3441 = vmatpush.msra.mxu3 %v3359_v23 }
 0x445   : > { %v3136_v30 = vsub.f32 %v7961_v37, %v3132_v50  ;;  %v3357_v37 = vld [vmem:[#allocation13 + $0xd00] sm:$0xff]  ;;  %v3360_v50 = vld [vmem:[#allocation13 + $0xd18] sm:$0xff] }
 0x446   : > { %3383 = vmatpush.msra.mxu1 %v3357_v37  ;;  %3470 = vmatpush.msrb.mxu0 %v3360_v50  ;;  %v3336_v37 = vld [vmem:[#allocation13 + $0xa18] sm:$0xff] }
 0x447   : > { %v3140_v20 = vmul.f32 1.442695, %v3136_v30  ;;  %v8109_v30 = vpop.f32.mrf.mxu0  ;;  %3442 = vmatpush.msra.mxu3 %v3351_v17 }
 0x448   : > { %3384 = vmatpush.msra.mxu1 %v3349_v33  ;;  %3471 = vmatpush.msrb.mxu0 %v3352_v9 }
 0x449   : > { %6719 = vpow2.f32 %v3140_v20  ;;  %v3350_v20 = vld [vmem:[#allocation13 + $0xc08] sm:$0xff]  ;;  %3443 = vmatpush.msra.mxu3 %v3343_v32 }
 0x44a   : > { %v3123_v28 = vpop.f32.mrf.mxu3  ;;  %3413 = vmatpush.msra.mxu2 %v3350_v20  ;;  %3385 = vmatpush.msra.mxu1 %v3341_v56 }
 0x44b   : > { %v3133_v29 = vmax.f32 %v8068_v43, %v3123_v28  ;;  %v3342_v28 = vld [vmem:[#allocation13 + $0xb08] sm:$0xff]  ;;  %3472 = vmatpush.msrb.mxu0 %v3344_v35  ;;  %3444 = vmatpush.msra.mxu3 %v3335_v44 }
 0x44c   : > { %3414 = vmatpush.msra.mxu2 %v3342_v28 }
 0x44d   : > { %v3137_v8 = vsub.f32 %v7985_v25, %v3133_v29  ;;  %v3333_v25 = vld [vmem:[#allocation13 + $0xa00] sm:$0xff]  ;;  %3473 = vmatpush.msrb.mxu0 %v3336_v37 }
 0x44e   : > { %3415 = vmatpush.msra.mxu2 %v3334_v55  ;;  %3386 = vmatpush.msra.mxu1 %v3333_v25  ;;  %v3325_v37 = vld [vmem:[#allocation13 + $0x900] sm:$0xff] }
 0x44f   : > { %v8112_v27 = vpop.eup %6719  ;;  %v3142_v43 = vmul.f32 1.442695, %v3137_v8  ;;  %v8119_v33 = vpop.f32.mrf.mxu0 }
 0x450   : > { %3180 = vmatmul.f32.vlgmr.msra.gmra.mxu0 %v8112_v27  ;;  %3387 = vmatpush.msra.mxu1 %v3325_v37  ;;  %v3302_v37 = vld [vmem:[#allocation13 + $0x608] sm:$0xff] }
 0x451   : > { %6721 = vpow2.f32 %v3142_v43 }
 0x452   : > { %v3126_v29 = vpop.f32.mrf.mxu3 }
 0x453   : > { %v3134_v23 = vmax.f32 %v8073_v24, %v3126_v29  ;;  %v3326_v29 = vld [vmem:[#allocation13 + $0x908] sm:$0xff] }
 0x454   : > { %3416 = vmatpush.msra.mxu2 %v3326_v29  ;;  %v3312_v29 = vld [vmem:[#allocation13 + $0x718] sm:$0xff] }
 0x455   : > { %v3138_v50 = vsub.f32 %v7994_v31, %v3134_v23  ;;  %v3327_v23 = vld [vmem:[#allocation13 + $0x910] sm:$0xff] }
 0x456   : > { %3445 = vmatpush.msra.mxu3 %v3327_v23  ;;  %v3303_v23 = vld [vmem:[#allocation13 + $0x610] sm:$0xff] }
 0x457   : > { %v8117_v20 = vpop.eup %6721  ;;  %v3144_v8 = vmul.f32 1.442695, %v3138_v50  ;;  %v8127_v31 = vpop.f32.mrf.mxu0  ;;  %v3328_v50 = vld [vmem:[#allocation13 + $0x918] sm:$0xff] }
 0x458   : > { %3183 = vmatmul.f32.gmra.mxu0 %v8117_v20 }
 0x459   : > { %6723 = vpow2.f32 %v3144_v8  ;;  %3474 = vmatpush.msrb.mxu0 %v3328_v50  ;;  %v3304_v50 = vld [vmem:[#allocation13 + $0x618] sm:$0xff] }
 0x45a   : > { %v3129_v17 = vpop.f32.mrf.mxu3 }
 0x45b   : > { %v3135_v9 = vmax.f32 %v8076_v34, %v3129_v17  ;;  %v3318_v17 = vld [vmem:[#allocation13 + $0x808] sm:$0xff] }
 0x45c   : > { %3417 = vmatpush.msra.mxu2 %v3318_v17  ;;  %v3294_v17 = vld [vmem:[#allocation13 + $0x508] sm:$0xff] }
 0x45d   : > { %v3139_v24 = vsub.f32 %v7999_v63, %v3135_v9  ;;  %v3317_v9 = vld [vmem:[#allocation13 + $0x800] sm:$0xff] }
 0x45e   : > { %3388 = vmatpush.msra.mxu1 %v3317_v9  ;;  %v3293_v9 = vld [vmem:[#allocation13 + $0x500] sm:$0xff] }
 0x45f   : > { %v8124_v28 = vpop.eup %6723  ;;  %v3146_v55 = vmul.f32 1.442695, %v3139_v24  ;;  %v8132_v56 = vpop.f32.mrf.mxu0  ;;  %v3319_v24 = vld [vmem:[#allocation13 + $0x810] sm:$0xff] }
 0x460   : > { %3186 = vmatmul.f32.gmra.mxu0 %v8124_v28  ;;  %3446 = vmatpush.msra.mxu3 %v3319_v24  ;;  %v3295_v24 = vld [vmem:[#allocation13 + $0x510] sm:$0xff] }
 0x461   : > { %6725 = vpow2.f32 %v3146_v55  ;;  %v3320_v55 = vld [vmem:[#allocation13 + $0x818] sm:$0xff] }
 0x462   : > { %3475 = vmatpush.msrb.mxu0 %v3320_v55  ;;  %3447 = vmatpush.msra.mxu3 %v3311_v46  ;;  %v3296_v55 = vld [vmem:[#allocation13 + $0x518] sm:$0xff]  ;;  %v3287_v46 = vld [vmem:[#allocation13 + $0x410] sm:$0xff] }
 0x464   : > { %3476 = vmatpush.msrb.mxu0 %v3312_v29  ;;  %3448 = vmatpush.msra.mxu3 %v3303_v23  ;;  %v3288_v29 = vld [vmem:[#allocation13 + $0x418] sm:$0xff]  ;;  %v3279_v23 = vld [vmem:[#allocation13 + $0x310] sm:$0xff] }
 0x466   : > { %3477 = vmatpush.msrb.mxu0 %v3304_v50  ;;  %3449 = vmatpush.msra.mxu3 %v3295_v24  ;;  %v3280_v50 = vld [vmem:[#allocation13 + $0x318] sm:$0xff]  ;;  %v3271_v24 = vld [vmem:[#allocation13 + $0x210] sm:$0xff] }
 0x467   : > { %v8129_v43 = vpop.eup %6725  ;;  %v8134_v32 = vpop.f32.mrf.mxu0 }
 0x468   : > { %3189 = vmatmul.f32.gmra.mxu0 %v8129_v43  ;;  %3450 = vmatpush.msra.mxu3 %v3287_v46  ;;  %v3263_v46 = vld [vmem:[#allocation13 + $0x110] sm:$0xff] }
 0x469   : > { %3478 = vmatpush.msrb.mxu0 %v3296_v55  ;;  %v3272_v55 = vld [vmem:[#allocation13 + $0x218] sm:$0xff] }
 0x46a   : > { %3451 = vmatpush.msra.mxu3 %v3279_v23  ;;  %v3255_v23 = vld [vmem:[#allocation13 + $0x10] sm:$0xff] }
 0x46b   : > { %3479 = vmatpush.msrb.mxu0 %v3288_v29  ;;  %v3264_v29 = vld [vmem:[#allocation13 + $0x118] sm:$0xff] }
 0x46c   : > { %3452 = vmatpush.msra.mxu3 %v3271_v24  ;;  %v3379_v24 = vld [vmem:[#allocation13 + $0xf30] sm:$0xff] }
 0x46d   : > { %3480 = vmatpush.msrb.mxu0 %v3280_v50  ;;  %v3256_v50 = vld [vmem:[#allocation13 + $0x18] sm:$0xff] }
 0x46e   : > { %3453 = vmatpush.msra.mxu3 %v3263_v46  ;;  %v3371_v46 = vld [vmem:[#allocation13 + $0xe30] sm:$0xff] }
 0x46f   : > { %v8136_v35 = vpop.f32.mrf.mxu0  ;;  %3481 = vmatpush.msrb.mxu0 %v3272_v55  ;;  %v3380_v55 = vld [vmem:[#allocation13 + $0xf38] sm:$0xff] }
 0x470   : > { %3454 = vmatpush.msra.mxu3 %v3255_v23  ;;  %v3363_v23 = vld [vmem:[#allocation13 + $0xd30] sm:$0xff] }
 0x471   : > { %3482 = vmatpush.msrb.mxu0 %v3264_v29  ;;  %v3372_v29 = vld [vmem:[#allocation13 + $0xe38] sm:$0xff] }
 0x472   : > { %3555 = vmatpush.msrb.mxu3 %v3379_v24  ;;  %v3355_v24 = vld [vmem:[#allocation13 + $0xc30] sm:$0xff] }
 0x473   : > { %3483 = vmatpush.msrb.mxu0 %v3256_v50  ;;  %v3364_v50 = vld [vmem:[#allocation13 + $0xd38] sm:$0xff] }
 0x474   : > { %3556 = vmatpush.msrb.mxu3 %v3371_v46  ;;  %v3347_v46 = vld [vmem:[#allocation13 + $0xb30] sm:$0xff] }
 0x475   : > { %3584 = vmatpush.msra.mxu0 %v3380_v55  ;;  %v3356_v55 = vld [vmem:[#allocation13 + $0xc38] sm:$0xff] }
 0x476   : > { %3557 = vmatpush.msrb.mxu3 %v3363_v23  ;;  %v3339_v23 = vld [vmem:[#allocation13 + $0xa30] sm:$0xff] }
 0x477   : > { %v8138_v34 = vpop.f32.mrf.mxu0  ;;  %3585 = vmatpush.msra.mxu0 %v3372_v29  ;;  %v3348_v29 = vld [vmem:[#allocation13 + $0xb38] sm:$0xff] }
 0x478   : > { %9314 = vst [vmem:[#allocation37_spill] sm:$0xff] %v8138_v34  ;;  %3558 = vmatpush.msrb.mxu3 %v3355_v24  ;;  %v3331_v24 = vld [vmem:[#allocation13 + $0x930] sm:$0xff] }
 0x479   : > { %3586 = vmatpush.msra.mxu0 %v3364_v50  ;;  %v3340_v50 = vld [vmem:[#allocation13 + $0xa38] sm:$0xff] }
 0x47a   : > { %3559 = vmatpush.msrb.mxu3 %v3347_v46  ;;  %v3323_v46 = vld [vmem:[#allocation13 + $0x830] sm:$0xff] }
 0x47b   : > { %3587 = vmatpush.msra.mxu0 %v3356_v55  ;;  %v3332_v55 = vld [vmem:[#allocation13 + $0x938] sm:$0xff] }
 0x47c   : > { %3560 = vmatpush.msrb.mxu3 %v3339_v23  ;;  %v3315_v23 = vld [vmem:[#allocation13 + $0x730] sm:$0xff] }
 0x47d   : > { %3588 = vmatpush.msra.mxu0 %v3348_v29  ;;  %v3324_v29 = vld [vmem:[#allocation13 + $0x838] sm:$0xff] }
 0x47e   : > { %3561 = vmatpush.msrb.mxu3 %v3331_v24 }
 0x47f   : > { %v8140_v63 = vpop.f32.mrf.mxu0  ;;  %3589 = vmatpush.msra.mxu0 %v3340_v50 }
 0x480   : > { %9315 = vst [vmem:[#allocation38_spill] sm:$0xff] %v8140_v63  ;;  %v3309_v63 = vld [vmem:[#allocation13 + $0x700] sm:$0xff]  ;;  %3562 = vmatpush.msrb.mxu3 %v3323_v46  ;;  %v3308_v46 = vld [vmem:[#allocation13 + $0x638] sm:$0xff] }
 0x481   : > { %3389 = vmatpush.msra.mxu1 %v3309_v63  ;;  %v3286_v63 = vld [vmem:[#allocation13 + $0x408] sm:$0xff]  ;;  %3590 = vmatpush.msra.mxu0 %v3332_v55 }
 0x482   : > { %3563 = vmatpush.msrb.mxu3 %v3315_v23  ;;  %v3306_v55 = vld [vmem:[#allocation13 + $0x628] sm:$0xff]  ;;  %v3300_v23 = vld [vmem:[#allocation13 + $0x538] sm:$0xff] }
 0x483   : > { %3390 = vmatpush.msra.mxu1 %v3301_v7  ;;  %v3278_v7 = vld [vmem:[#allocation13 + $0x308] sm:$0xff]  ;;  %3591 = vmatpush.msra.mxu0 %v3324_v29 }
 0x485   : > { %3391 = vmatpush.msra.mxu1 %v3293_v9  ;;  %v3269_v9 = vld [vmem:[#allocation13 + $0x200] sm:$0xff] }
 0x487   : > { %v8142_v25 = vpop.f32.mrf.mxu0 }
 0x488   : > { %9316 = vst [vmem:[#allocation39_spill] sm:$0xff] %v8142_v25  ;;  %v3310_v25 = vld [vmem:[#allocation13 + $0x708] sm:$0xff] }
 0x489   : > { %3418 = vmatpush.msra.mxu2 %v3310_v25  ;;  %v3285_v25 = vld [vmem:[#allocation13 + $0x400] sm:$0xff] }
 0x48a   : > { %3392 = vmatpush.msra.mxu1 %v3285_v25  ;;  %v3261_v25 = vld [vmem:[#allocation13 + $0x100] sm:$0xff] }
 0x48b   : > { %3419 = vmatpush.msra.mxu2 %v3302_v37  ;;  %v3277_v37 = vld [vmem:[#allocation13 + $0x300] sm:$0xff] }
 0x48c   : > { %3393 = vmatpush.msra.mxu1 %v3277_v37  ;;  %v3253_v37 = vld [vmem:[#allocation13] sm:$0xff] }
 0x48d   : > { %3420 = vmatpush.msra.mxu2 %v3294_v17  ;;  %v3270_v17 = vld [vmem:[#allocation13 + $0x208] sm:$0xff] }
 0x48e   : > { %3394 = vmatpush.msra.mxu1 %v3269_v9  ;;  %v3377_v9 = vld [vmem:[#allocation13 + $0xf20] sm:$0xff] }
 0x48f   : > { %v8144_v44 = vpop.f32.mrf.mxu0  ;;  %3421 = vmatpush.msra.mxu2 %v3286_v63  ;;  %v3262_v63 = vld [vmem:[#allocation13 + $0x108] sm:$0xff] }
 0x490   : > { %3395 = vmatpush.msra.mxu1 %v3261_v25  ;;  %v3369_v25 = vld [vmem:[#allocation13 + $0xe20] sm:$0xff] }
 0x491   : > { %3422 = vmatpush.msra.mxu2 %v3278_v7  ;;  %v3254_v7 = vld [vmem:[#allocation13 + $0x8] sm:$0xff] }
 0x492   : > { %3396 = vmatpush.msra.mxu1 %v3253_v37  ;;  %v3361_v37 = vld [vmem:[#allocation13 + $0xd20] sm:$0xff] }
 0x493   : > { %3423 = vmatpush.msra.mxu2 %v3270_v17  ;;  %v3378_v17 = vld [vmem:[#allocation13 + $0xf28] sm:$0xff] }
 0x494   : > { %3497 = vmatpush.msrb.mxu1 %v3377_v9  ;;  %v3353_v9 = vld [vmem:[#allocation13 + $0xc20] sm:$0xff] }
 0x495   : > { %3424 = vmatpush.msra.mxu2 %v3262_v63  ;;  %v3370_v63 = vld [vmem:[#allocation13 + $0xe28] sm:$0xff] }
 0x496   : > { %3498 = vmatpush.msrb.mxu1 %v3369_v25  ;;  %v3345_v25 = vld [vmem:[#allocation13 + $0xb20] sm:$0xff] }
 0x497   : > { %v8146_v8 = vpop.f32.mrf.mxu0  ;;  %3425 = vmatpush.msra.mxu2 %v3254_v7  ;;  %v3362_v7 = vld [vmem:[#allocation13 + $0xd28] sm:$0xff] }
 0x498   : > { %9317 = vst [vmem:[#allocation43_spill] sm:$0xff] %v8146_v8  ;;  %3499 = vmatpush.msrb.mxu1 %v3361_v37  ;;  %v3337_v37 = vld [vmem:[#allocation13 + $0xa20] sm:$0xff] }
 0x499   : > { %3526 = vmatpush.msrb.mxu2 %v3378_v17  ;;  %v3354_v17 = vld [vmem:[#allocation13 + $0xc28] sm:$0xff] }
 0x49a   : > { %3500 = vmatpush.msrb.mxu1 %v3353_v9  ;;  %v3329_v9 = vld [vmem:[#allocation13 + $0x920] sm:$0xff] }
 0x49b   : > { %3527 = vmatpush.msrb.mxu2 %v3370_v63  ;;  %v3346_v63 = vld [vmem:[#allocation13 + $0xb28] sm:$0xff] }
 0x49c   : > { %3501 = vmatpush.msrb.mxu1 %v3345_v25  ;;  %v3321_v25 = vld [vmem:[#allocation13 + $0x820] sm:$0xff] }
 0x49d   : > { %3528 = vmatpush.msrb.mxu2 %v3362_v7  ;;  %v3338_v7 = vld [vmem:[#allocation13 + $0xa28] sm:$0xff] }
 0x49e   : > { %3502 = vmatpush.msrb.mxu1 %v3337_v37  ;;  %v3313_v37 = vld [vmem:[#allocation13 + $0x720] sm:$0xff] }
 0x49f   : > { %v8148_v22 = vpop.f32.mrf.mxu0  ;;  %3529 = vmatpush.msrb.mxu2 %v3354_v17  ;;  %v3330_v17 = vld [vmem:[#allocation13 + $0x928] sm:$0xff] }
 0x4a0   : > { %9318 = vst [vmem:[#allocation45_spill] sm:$0xff] %v8148_v22  ;;  %3503 = vmatpush.msrb.mxu1 %v3329_v9 }
 0x4a1   : > { %3530 = vmatpush.msrb.mxu2 %v3346_v63  ;;  %v3322_v63 = vld [vmem:[#allocation13 + $0x828] sm:$0xff] }
 0x4a2   : > { %3504 = vmatpush.msrb.mxu1 %v3321_v25  ;;  %v3307_v25 = vld [vmem:[#allocation13 + $0x630] sm:$0xff] }
 0x4a3   : > { %3531 = vmatpush.msrb.mxu2 %v3338_v7  ;;  %v3314_v7 = vld [vmem:[#allocation13 + $0x728] sm:$0xff]  ;;  %3564 = vmatpush.msrb.mxu3 %v3307_v25 }
 0x4a4   : > { %3505 = vmatpush.msrb.mxu1 %v3313_v37  ;;  %v3297_v37 = vld [vmem:[#allocation13 + $0x520] sm:$0xff]  ;;  %v3282_v25 = vld [vmem:[#allocation13 + $0x328] sm:$0xff] }
 0x4a5   : > { %3532 = vmatpush.msrb.mxu2 %v3330_v17  ;;  %v3316_v17 = vld [vmem:[#allocation13 + $0x738] sm:$0xff]  ;;  %3565 = vmatpush.msrb.mxu3 %v3299_v10 }
 0x4a6   : > { %3592 = vmatpush.msra.mxu0 %v3316_v17  ;;  %v3290_v17 = vld [vmem:[#allocation13 + $0x428] sm:$0xff] }
 0x4a7   : > { %v8150_v22 = vpop.f32.mrf.mxu0  ;;  %3533 = vmatpush.msrb.mxu2 %v3322_v63  ;;  %v3305_v63 = vld [vmem:[#allocation13 + $0x620] sm:$0xff] }
 0x4a8   : > { %9319 = vst [vmem:[#allocation46_spill] sm:$0xff] %v8150_v22  ;;  %3506 = vmatpush.msrb.mxu1 %v3305_v63  ;;  %3593 = vmatpush.msra.mxu0 %v3308_v46  ;;  %v3292_v63 = vld [vmem:[#allocation13 + $0x438] sm:$0xff]  ;;  %v3281_v46 = vld [vmem:[#allocation13 + $0x320] sm:$0xff] }
 0x4a9   : > { %3534 = vmatpush.msrb.mxu2 %v3314_v7  ;;  %v3298_v7 = vld [vmem:[#allocation13 + $0x528] sm:$0xff] }
 0x4aa   : > { %3507 = vmatpush.msrb.mxu1 %v3297_v37  ;;  %3594 = vmatpush.msra.mxu0 %v3300_v23  ;;  %v3274_v37 = vld [vmem:[#allocation13 + $0x228] sm:$0xff]  ;;  %v3276_v23 = vld [vmem:[#allocation13 + $0x238] sm:$0xff] }
 0x4ab   : > { %3535 = vmatpush.msrb.mxu2 %v3306_v55 }
 0x4ac   : > { %3508 = vmatpush.msrb.mxu1 %v3289_v41  ;;  %3595 = vmatpush.msra.mxu0 %v3292_v63  ;;  %v3275_v41 = vld [vmem:[#allocation13 + $0x230] sm:$0xff]  ;;  %v3265_v63 = vld [vmem:[#allocation13 + $0x120] sm:$0xff] }
 0x4ad   : > { %3536 = vmatpush.msrb.mxu2 %v3298_v7 }
 0x4ae   : > { %3509 = vmatpush.msrb.mxu1 %v3281_v46 }
 0x4af   : > { %3537 = vmatpush.msrb.mxu2 %v3290_v17 }
 0x4b0   : > { %3510 = vmatpush.msrb.mxu1 %v3273_v40  ;;  %v3258_v40 = vld [vmem:[#allocation13 + $0x28] sm:$0xff] }
 0x4b1   : > { %3538 = vmatpush.msrb.mxu2 %v3282_v25 }
 0x4b2   : > { %3511 = vmatpush.msrb.mxu1 %v3265_v63 }
 0x4b3   : > { %3539 = vmatpush.msrb.mxu2 %v3274_v37 }
 0x4cd   : > { %v8152_v22 = vpop.f32.mrf.mxu0 }
 0x4ce   : > { %6727 = vrcp.f32 %v8152_v22  ;;  %v3204_v34 = vand.u32 2147483648, %v8152_v22  ;;  %v3202_v55 = vand.u32 2147483647, %v8152_v22  ;;  %vm3198_vm2 = vweird.f32 %v8152_v22 }
 0x4d0   : > { %v3205_v10 = vor.u32 1.1754944e-38, %v3204_v34  ;;  %vm3203_vm4 = vcmp.eq.f32.partialorder %v3202_v55, 8.507059e+37  ;;  %v3267_v55 = vld [vmem:[#allocation13 + $0x130] sm:$0xff] }
 0x4d4   : > { %v8155_v50 = vpop.eup %6727 }
 0x4d5   : > { %v3194_v9 = vmul.f32 %v8155_v50, %v8152_v22  ;;  %v8159_v24 = vpop.f32.mrf.mxu0  ;;  %vm3199_vm1 = vweird.f32 %v8155_v50 }
 0x4d6   : > { %6729 = vrcp.f32 %v8159_v24  ;;  %vm3200_vm3 = vmor %vm3198_vm2, %vm3199_vm1  ;;  %vm3212_vm6 = vweird.f32 %v8159_v24 }
 0x4d7   : > { %v3195_v29 = vsub.f32 1.0, %v3194_v9  ;;  %v3291_v9 = vld [vmem:[#allocation13 + $0x430] sm:$0xff] }
 0x4d8   : > { %3566 = vmatpush.msrb.mxu3 %v3291_v9  ;;  %v3266_v9 = vld [vmem:[#allocation13 + $0x128] sm:$0xff] }
 0x4d9   : > { %v3196_v8 = vmul.f32 %v8155_v50, %v3195_v29  ;;  %v3284_v29 = vld [vmem:[#allocation13 + $0x338] sm:$0xff]  ;;  %3540 = vmatpush.msrb.mxu2 %v3266_v9 }
 0x4da   : > { %3567 = vmatpush.msrb.mxu3 %v3283_v57  ;;  %3596 = vmatpush.msra.mxu0 %v3284_v29  ;;  %v3268_v57 = vld [vmem:[#allocation13 + $0x138] sm:$0xff] }
 0x4db   : > { %v3197_v7 = vadd.f32 %v8155_v50, %v3196_v8  ;;  %v3260_v29 = vld [vmem:[#allocation13 + $0x38] sm:$0xff]  ;;  %3541 = vmatpush.msrb.mxu2 %v3258_v40 }
 0x4dc   : > { %v6730_v61 = vpop.eup %6729  ;;  %3568 = vmatpush.msrb.mxu3 %v3275_v41  ;;  %3597 = vmatpush.msra.mxu0 %v3276_v23  ;;  %v3893_v41 = vld [vmem:[#allocation13 + $0xf40] sm:$0xff]  ;;  %v3896_v9 = vld [vmem:[#allocation13 + $0xf58] sm:$0xff] }
 0x4dd   : > { %v3201_v17 = vsel %vm3200_vm3, %v8155_v50, %v3197_v7  ;;  %v3208_v8 = vmul.f32 %v6730_v61, %v8159_v24  ;;  %v8172_v22 = vpop.f32.mrf.mxu0  ;;  %v3218_v50 = vand.u32 2147483648, %v8159_v24  ;;  %vm3213_vm5 = vweird.f32 %v6730_v61  ;;  %v3888_v40 = vld [vmem:[#allocation13 + $0xe58] sm:$0xff] }
 0x4de   : > { %v3206_v52 = vsel %vm3203_vm4, %v3205_v10, %v3201_v17  ;;  %6731 = vrcp.f32 %v8172_v22  ;;  %v3216_v7 = vand.u32 2147483647, %v8159_v24  ;;  %3569 = vmatpush.msrb.mxu3 %v3267_v55  ;;  %3598 = vmatpush.msra.mxu0 %v3268_v57  ;;  %v3894_v10 = vld [vmem:[#allocation13 + $0xf48] sm:$0xff]  ;;  %vm3214_vm7 = vmor %vm3212_vm6, %vm3213_vm5  ;;  %v3885_v55 = vld [vmem:[#allocation13 + $0xe40] sm:$0xff]  ;;  %vm3226_vm10 = vweird.f32 %v8172_v22 }
 0x4df   : > { %v8176_v34 = vmul.f32 %v8112_v27, %v3206_v52  ;;  %v3209_v25 = vsub.f32 1.0, %v3208_v8  ;;  %v3257_v52 = vld [vmem:[#allocation13 + $0x20] sm:$0xff]  ;;  %v3259_v27 = vld [vmem:[#allocation13 + $0x30] sm:$0xff]  ;;  %v3219_v17 = vor.u32 1.1754944e-38, %v3218_v50  ;;  %v3886_v24 = vld [vmem:[#allocation13 + $0xe48] sm:$0xff] }
 0x4e0   : > { %3512 = vmatpush.msrb.mxu1 %v3257_v52  ;;  %v3895_v8 = vld [vmem:[#allocation13 + $0xf50] sm:$0xff]  ;;  %vm3217_vm8 = vcmp.eq.f32.partialorder %v3216_v7, 8.507059e+37  ;;  %3570 = vmatpush.msrb.mxu3 %v3259_v27  ;;  %v3230_v27 = vand.u32 2147483647, %v8172_v22 }
 0x4e1   : > { %9320 = vst [vmem:[#allocation68_spill] sm:$0xff] %v8176_v34  ;;  %v3210_v46 = vmul.f32 %v6730_v61, %v3209_v25  ;;  %3397 = vmatmul.f32.vlgmr.msra.gmra.mxu1 %v8176_v34  ;;  %3426 = vmatmul.f32.vlgmr.msra.gmra.mxu2 %v8176_v34  ;;  %v3887_v7 = vld [vmem:[#allocation13 + $0xe50] sm:$0xff] }
 0x4e2   : > { %3455 = vmatmul.f32.vlgmr.msra.gmra.mxu3 %v8176_v34  ;;  %3484 = vmatmul.f32.vlgmr.msrb.gmra.mxu0 %v8176_v34  ;;  %vm3231_vm12 = vcmp.eq.f32.partialorder %v3230_v27, 8.507059e+37  ;;  %v3864_v27 = vld [vmem:[#allocation13 + $0xb58] sm:$0xff] }
 0x4e3   : > { %v3211_v37 = vadd.f32 %v6730_v61, %v3210_v46  ;;  %3599 = vmatpush.msra.mxu0 %v3260_v29  ;;  %3930 = vmatpush.msra.mxu2 %v3894_v10  ;;  %v3878_v29 = vld [vmem:[#allocation13 + $0xd48] sm:$0xff]  ;;  %v3880_v10 = vld [vmem:[#allocation13 + $0xd58] sm:$0xff] }
 0x4e4   : > { %v6732_v23 = vpop.eup %6731  ;;  %3901 = vmatpush.msra.mxu1 %v3893_v41  ;;  %3959 = vmatpush.msra.mxu3 %v3895_v8  ;;  %v3869_v8 = vld [vmem:[#allocation13 + $0xc40] sm:$0xff] }
 0x4e5   : > { %v3215_v63 = vsel %vm3214_vm7, %v6730_v61, %v3211_v37  ;;  %v3222_v25 = vmul.f32 %v6732_v23, %v8172_v22  ;;  %v8187_v39 = vpop.f32.mrf.mxu0  ;;  %3988 = vmatpush.msrb.mxu0 %v3896_v9  ;;  %v3232_v61 = vand.u32 2147483648, %v8172_v22  ;;  %3931 = vmatpush.msra.mxu2 %v3886_v24  ;;  %vm3227_vm9 = vweird.f32 %v6732_v23  ;;  %v3879_v37 = vld [vmem:[#allocation13 + $0xd50] sm:$0xff]  ;;  %v3872_v24 = vld [vmem:[#allocation13 + $0xc58] sm:$0xff]  ;;  %v3861_v22 = vld [vmem:[#allocation13 + $0xb40] sm:$0xff] }
 0x4e6   : > { %v3220_v57 = vsel %vm3217_vm8, %v3219_v17, %v3215_v63  ;;  %6733 = vrcp.f32 %v8187_v39  ;;  %3902 = vmatpush.msra.mxu1 %v3885_v55  ;;  %3960 = vmatpush.msra.mxu3 %v3887_v7  ;;  %v3870_v17 = vld [vmem:[#allocation13 + $0xc48] sm:$0xff]  ;;  %vm3228_vm11 = vmor %vm3226_vm10, %vm3227_vm9  ;;  %vm3240_vm14 = vweird.f32 %v8187_v39 }
 0x4e7   : > { %v8191_v50 = vmul.f32 %v8117_v20, %v3220_v57  ;;  %v3223_v46 = vsub.f32 1.0, %v3222_v25  ;;  %v3877_v20 = vld [vmem:[#allocation13 + $0xd40] sm:$0xff]  ;;  %3989 = vmatpush.msrb.mxu0 %v3888_v40  ;;  %v3233_v63 = vor.u32 1.1754944e-38, %v3232_v61  ;;  %3932 = vmatpush.msra.mxu2 %v3878_v29  ;;  %v3871_v25 = vld [vmem:[#allocation13 + $0xc50] sm:$0xff]  ;;  %v3246_v61 = vand.u32 2147483648, %v8187_v39 }
 0x4e8   : > { %3903 = vmatpush.msra.mxu1 %v3877_v20  ;;  %3961 = vmatpush.msra.mxu3 %v3879_v37  ;;  %v3244_v20 = vand.u32 2147483647, %v8187_v39  ;;  %v3854_v37 = vld [vmem:[#allocation13 + $0xa48] sm:$0xff] }
 0x4e9   : > { %9321 = vst [vmem:[#allocation69_spill] sm:$0xff] %v8191_v50  ;;  %v3224_v52 = vmul.f32 %v6732_v23, %v3223_v46  ;;  %3400 = vmatmul.f32.gmra.mxu1 %v8191_v50  ;;  %3429 = vmatmul.f32.gmra.mxu2 %v8191_v50  ;;  %v3862_v46 = vld [vmem:[#allocation13 + $0xb48] sm:$0xff] }
 0x4ea   : > { %3458 = vmatmul.f32.gmra.mxu3 %v8191_v50  ;;  %3487 = vmatmul.f32.gmra.mxu0 %v8191_v50  ;;  %vm3245_vm0 = vcmp.eq.f32.partialorder %v3244_v20, 8.507059e+37  ;;  %v3821_v20 = vld [vmem:[#allocation13 + $0x640] sm:$0xff] }
 0x4eb   : > { %v3225_v41 = vadd.f32 %v6732_v23, %v3224_v52  ;;  %3990 = vmatpush.msrb.mxu0 %v3880_v10  ;;  %3933 = vmatpush.msra.mxu2 %v3870_v17  ;;  %v3855_v10 = vld [vmem:[#allocation13 + $0xa50] sm:$0xff] }
 0x4ec   : > { %v6734_v9 = vpop.eup %6733  ;;  %3904 = vmatpush.msra.mxu1 %v3869_v8  ;;  %3962 = vmatpush.msra.mxu3 %v3871_v25  ;;  %v3846_v8 = vld [vmem:[#allocation13 + $0x948] sm:$0xff]  ;;  %v3247_v25 = vor.u32 1.1754944e-38, %v3246_v61  ;;  %v3840_v61 = vld [vmem:[#allocation13 + $0x858] sm:$0xff] }
 0x4ed   : > { %v3229_v55 = vsel %vm3228_vm11, %v6732_v23, %v3225_v41  ;;  %v3236_v57 = vmul.f32 %v6734_v9, %v8187_v39  ;;  %3991 = vmatpush.msrb.mxu0 %v3872_v24  ;;  %3934 = vmatpush.msra.mxu2 %v3862_v46  ;;  %v3863_v23 = vld [vmem:[#allocation13 + $0xb50] sm:$0xff]  ;;  %vm3241_vm13 = vweird.f32 %v6734_v9  ;;  %v3856_v41 = vld [vmem:[#allocation13 + $0xa58] sm:$0xff]  ;;  %v3838_v46 = vld [vmem:[#allocation13 + $0x848] sm:$0xff] }
 0x4ee   : > { %v3234_v7 = vsel %vm3231_vm12, %v3233_v63, %v3229_v55  ;;  %3905 = vmatpush.msra.mxu1 %v3861_v22  ;;  %3963 = vmatpush.msra.mxu3 %v3863_v23  ;;  %v3845_v63 = vld [vmem:[#allocation13 + $0x940] sm:$0xff]  ;;  %vm3242_vm15 = vmor %vm3240_vm14, %vm3241_vm13  ;;  %v3847_v24 = vld [vmem:[#allocation13 + $0x950] sm:$0xff] }
 0x4ef   : > { %v8203_v40 = vmul.f32 %v8124_v28, %v3234_v7  ;;  %v3237_v52 = vsub.f32 1.0, %v3236_v57  ;;  %v3853_v28 = vld [vmem:[#allocation13 + $0xa40] sm:$0xff]  ;;  %3992 = vmatpush.msrb.mxu0 %v3864_v27  ;;  %3935 = vmatpush.msra.mxu2 %v3854_v37  ;;  %v3848_v55 = vld [vmem:[#allocation13 + $0x958] sm:$0xff]  ;;  %v3831_v27 = vld [vmem:[#allocation13 + $0x750] sm:$0xff] }
 0x4f0   : > { %3906 = vmatpush.msra.mxu1 %v3853_v28  ;;  %3964 = vmatpush.msra.mxu3 %v3855_v10  ;;  %v3837_v22 = vld [vmem:[#allocation13 + $0x840] sm:$0xff]  ;;  %v3823_v37 = vld [vmem:[#allocation13 + $0x650] sm:$0xff]  ;;  %v3824_v28 = vld [vmem:[#allocation13 + $0x658] sm:$0xff] }
 0x4f1   : > { %9322 = vst [vmem:[#allocation102_spill] sm:$0xff] %v8203_v40  ;;  %v3238_v29 = vmul.f32 %v6734_v9, %v3237_v52  ;;  %3403 = vmatmul.f32.gmra.mxu1 %v8203_v40  ;;  %3432 = vmatmul.f32.gmra.mxu2 %v8203_v40  ;;  %v3839_v52 = vld [vmem:[#allocation13 + $0x850] sm:$0xff]  ;;  %v3829_v23 = vld [vmem:[#allocation13 + $0x740] sm:$0xff]  ;;  %v3814_v10 = vld [vmem:[#allocation13 + $0x548] sm:$0xff] }
 0x4f2   : > { %3461 = vmatmul.f32.gmra.mxu3 %v8203_v40  ;;  %3490 = vmatmul.f32.gmra.mxu0 %v8203_v40 }
 0x4f3   : > { %v3239_v17 = vadd.f32 %v6734_v9, %v3238_v29  ;;  %3993 = vmatpush.msrb.mxu0 %v3856_v41  ;;  %3936 = vmatpush.msra.mxu2 %v3846_v8  ;;  %v3832_v29 = vld [vmem:[#allocation13 + $0x758] sm:$0xff]  ;;  %v3813_v41 = vld [vmem:[#allocation13 + $0x540] sm:$0xff] }
 0x4f4   : > { %3907 = vmatpush.msra.mxu1 %v3845_v63  ;;  %3965 = vmatpush.msra.mxu3 %v3847_v24  ;;  %v3816_v8 = vld [vmem:[#allocation13 + $0x558] sm:$0xff]  ;;  %v3806_v63 = vld [vmem:[#allocation13 + $0x448] sm:$0xff]  ;;  %v3807_v24 = vld [vmem:[#allocation13 + $0x450] sm:$0xff] }
 0x4f5   : > { %v3243_v57 = vsel %vm3242_vm15, %v6734_v9, %v3239_v17  ;;  %3994 = vmatpush.msrb.mxu0 %v3848_v55  ;;  %3937 = vmatpush.msra.mxu2 %v3838_v46  ;;  %v3830_v9 = vld [vmem:[#allocation13 + $0x748] sm:$0xff]  ;;  %v3815_v17 = vld [vmem:[#allocation13 + $0x550] sm:$0xff]  ;;  %v3808_v55 = vld [vmem:[#allocation13 + $0x458] sm:$0xff] }
 0x4f6   : > { %v3248_v7 = vsel %vm3245_vm0, %v3247_v25, %v3243_v57  ;;  %3908 = vmatpush.msra.mxu1 %v3837_v22  ;;  %3966 = vmatpush.msra.mxu3 %v3839_v52  ;;  %v3805_v25 = vld [vmem:[#allocation13 + $0x440] sm:$0xff]  ;;  %v3798_v57 = vld [vmem:[#allocation13 + $0x348] sm:$0xff]  ;;  %v3799_v22 = vld [vmem:[#allocation13 + $0x350] sm:$0xff] }
 0x4f7   : > { %v8214_v39 = vmul.f32 %v8129_v43, %v3248_v7  ;;  %3995 = vmatpush.msrb.mxu0 %v3840_v61  ;;  %v3822_v43 = vld [vmem:[#allocation13 + $0x648] sm:$0xff]  ;;  %3938 = vmatpush.msra.mxu2 %v3830_v9  ;;  %v3797_v46 = vld [vmem:[#allocation13 + $0x340] sm:$0xff]  ;;  %v3800_v7 = vld [vmem:[#allocation13 + $0x358] sm:$0xff] }
 0x4f8   : > { %3909 = vmatpush.msra.mxu1 %v3829_v23  ;;  %3967 = vmatpush.msra.mxu3 %v3831_v27  ;;  %v3790_v52 = vld [vmem:[#allocation13 + $0x248] sm:$0xff]  ;;  %v3789_v61 = vld [vmem:[#allocation13 + $0x240] sm:$0xff]  ;;  %v3791_v9 = vld [vmem:[#allocation13 + $0x250] sm:$0xff] }
 0x4f9   : > { %9323 = vst [vmem:[#allocation103_spill] sm:$0xff] %v8214_v39  ;;  %3406 = vmatmul.f32.gmra.mxu1 %v8214_v39  ;;  %3435 = vmatmul.f32.gmra.mxu2 %v8214_v39  ;;  %v3792_v23 = vld [vmem:[#allocation13 + $0x258] sm:$0xff]  ;;  %v3782_v27 = vld [vmem:[#allocation13 + $0x148] sm:$0xff] }
 0x4fa   : > { %3464 = vmatmul.f32.gmra.mxu3 %v8214_v39  ;;  %3493 = vmatmul.f32.gmra.mxu0 %v8214_v39 }
 0x4fb   : > { %3996 = vmatpush.msrb.mxu0 %v3832_v29  ;;  %3939 = vmatpush.msra.mxu2 %v3822_v43  ;;  %v3781_v29 = vld [vmem:[#allocation13 + $0x140] sm:$0xff]  ;;  %v3783_v43 = vld [vmem:[#allocation13 + $0x150] sm:$0xff] }
 0x4fc   : > { %3910 = vmatpush.msra.mxu1 %v3821_v20  ;;  %3968 = vmatpush.msra.mxu3 %v3823_v37  ;;  %v3784_v20 = vld [vmem:[#allocation13 + $0x158] sm:$0xff]  ;;  %v3774_v37 = vld [vmem:[#allocation13 + $0x48] sm:$0xff] }
 0x4fd   : > { %3997 = vmatpush.msrb.mxu0 %v3824_v28  ;;  %3940 = vmatpush.msra.mxu2 %v3814_v10  ;;  %v3773_v28 = vld [vmem:[#allocation13 + $0x40] sm:$0xff]  ;;  %v3775_v10 = vld [vmem:[#allocation13 + $0x50] sm:$0xff] }
 0x4fe   : > { %3911 = vmatpush.msra.mxu1 %v3813_v41  ;;  %3969 = vmatpush.msra.mxu3 %v3815_v17  ;;  %v3776_v41 = vld [vmem:[#allocation13 + $0x58] sm:$0xff]  ;;  %v3898_v17 = vld [vmem:[#allocation13 + $0xf68] sm:$0xff] }
 0x4ff   : > { %3998 = vmatpush.msrb.mxu0 %v3816_v8  ;;  %3941 = vmatpush.msra.mxu2 %v3806_v63  ;;  %v3897_v8 = vld [vmem:[#allocation13 + $0xf60] sm:$0xff]  ;;  %v3899_v63 = vld [vmem:[#allocation13 + $0xf70] sm:$0xff] }
 0x500   : > { %3912 = vmatpush.msra.mxu1 %v3805_v25  ;;  %3970 = vmatpush.msra.mxu3 %v3807_v24  ;;  %v3900_v25 = vld [vmem:[#allocation13 + $0xf78] sm:$0xff]  ;;  %v3890_v24 = vld [vmem:[#allocation13 + $0xe68] sm:$0xff] }
 0x501   : > { %3513 = vmatmul.f32.vlgmr.msrb.gmra.mxu1 %v8176_v34  ;;  %3542 = vmatmul.f32.vlgmr.msrb.gmra.mxu2 %v8176_v34 }
 0x502   : > { %3571 = vmatmul.f32.vlgmr.msrb.gmra.mxu3 %v8176_v34  ;;  %3600 = vmatmul.f32.vlgmr.msra.gmra.mxu0 %v8176_v34 }
 0x503   : > { %3999 = vmatpush.msrb.mxu0 %v3808_v55  ;;  %3942 = vmatpush.msra.mxu2 %v3798_v57  ;;  %v3889_v55 = vld [vmem:[#allocation13 + $0xe60] sm:$0xff]  ;;  %v3891_v57 = vld [vmem:[#allocation13 + $0xe70] sm:$0xff] }
 0x504   : > { %3913 = vmatpush.msra.mxu1 %v3797_v46  ;;  %3971 = vmatpush.msra.mxu3 %v3799_v22  ;;  %v3892_v46 = vld [vmem:[#allocation13 + $0xe78] sm:$0xff]  ;;  %v3882_v22 = vld [vmem:[#allocation13 + $0xd68] sm:$0xff] }
 0x505   : > { %4000 = vmatpush.msrb.mxu0 %v3800_v7  ;;  %3943 = vmatpush.msra.mxu2 %v3790_v52  ;;  %v3881_v7 = vld [vmem:[#allocation13 + $0xd60] sm:$0xff]  ;;  %v3883_v52 = vld [vmem:[#allocation13 + $0xd70] sm:$0xff] }
 0x506   : > { %3914 = vmatpush.msra.mxu1 %v3789_v61  ;;  %3972 = vmatpush.msra.mxu3 %v3791_v9  ;;  %v3884_v61 = vld [vmem:[#allocation13 + $0xd78] sm:$0xff]  ;;  %v3874_v9 = vld [vmem:[#allocation13 + $0xc68] sm:$0xff] }
 0x507   : > { %4001 = vmatpush.msrb.mxu0 %v3792_v23  ;;  %3944 = vmatpush.msra.mxu2 %v3782_v27  ;;  %v3873_v23 = vld [vmem:[#allocation13 + $0xc60] sm:$0xff]  ;;  %v3875_v27 = vld [vmem:[#allocation13 + $0xc70] sm:$0xff] }
 0x508   : > { %3915 = vmatpush.msra.mxu1 %v3781_v29  ;;  %3973 = vmatpush.msra.mxu3 %v3783_v43  ;;  %v3876_v29 = vld [vmem:[#allocation13 + $0xc78] sm:$0xff]  ;;  %v3866_v43 = vld [vmem:[#allocation13 + $0xb68] sm:$0xff] }
 0x509   : > { %3516 = vmatmul.f32.gmra.mxu1 %v8191_v50  ;;  %3545 = vmatmul.f32.gmra.mxu2 %v8191_v50 }
 0x50a   : > { %3574 = vmatmul.f32.gmra.mxu3 %v8191_v50  ;;  %3603 = vmatmul.f32.gmra.mxu0 %v8191_v50 }
 0x50b   : > { %4002 = vmatpush.msrb.mxu0 %v3784_v20  ;;  %3945 = vmatpush.msra.mxu2 %v3774_v37  ;;  %v3865_v20 = vld [vmem:[#allocation13 + $0xb60] sm:$0xff]  ;;  %v3867_v37 = vld [vmem:[#allocation13 + $0xb70] sm:$0xff] }
 0x50c   : > { %3916 = vmatpush.msra.mxu1 %v3773_v28  ;;  %3974 = vmatpush.msra.mxu3 %v3775_v10  ;;  %v3868_v28 = vld [vmem:[#allocation13 + $0xb78] sm:$0xff]  ;;  %v3858_v10 = vld [vmem:[#allocation13 + $0xa68] sm:$0xff] }
 0x50d   : > { %4003 = vmatpush.msrb.mxu0 %v3776_v41  ;;  %4046 = vmatpush.msrb.mxu2 %v3898_v17  ;;  %v3857_v41 = vld [vmem:[#allocation13 + $0xa60] sm:$0xff]  ;;  %v3859_v17 = vld [vmem:[#allocation13 + $0xa70] sm:$0xff] }
 0x50e   : > { %4017 = vmatpush.msrb.mxu1 %v3897_v8  ;;  %4075 = vmatpush.msrb.mxu3 %v3899_v63  ;;  %v3860_v8 = vld [vmem:[#allocation13 + $0xa78] sm:$0xff]  ;;  %v3850_v63 = vld [vmem:[#allocation13 + $0x968] sm:$0xff] }
 0x50f   : > { %4104 = vmatpush.msra.mxu0 %v3900_v25  ;;  %4047 = vmatpush.msrb.mxu2 %v3890_v24  ;;  %v3849_v25 = vld [vmem:[#allocation13 + $0x960] sm:$0xff]  ;;  %v3851_v24 = vld [vmem:[#allocation13 + $0x970] sm:$0xff] }
 0x510   : > { %4018 = vmatpush.msrb.mxu1 %v3889_v55  ;;  %4076 = vmatpush.msrb.mxu3 %v3891_v57  ;;  %v3852_v55 = vld [vmem:[#allocation13 + $0x978] sm:$0xff]  ;;  %v3842_v57 = vld [vmem:[#allocation13 + $0x868] sm:$0xff] }
 0x511   : > { %3519 = vmatmul.f32.gmra.mxu1 %v8203_v40  ;;  %3548 = vmatmul.f32.gmra.mxu2 %v8203_v40 }
 0x512   : > { %3577 = vmatmul.f32.gmra.mxu3 %v8203_v40  ;;  %3606 = vmatmul.f32.gmra.mxu0 %v8203_v40 }
 0x513   : > { %4105 = vmatpush.msra.mxu0 %v3892_v46  ;;  %4048 = vmatpush.msrb.mxu2 %v3882_v22  ;;  %v3841_v46 = vld [vmem:[#allocation13 + $0x860] sm:$0xff]  ;;  %v3843_v22 = vld [vmem:[#allocation13 + $0x870] sm:$0xff] }
 0x514   : > { %4019 = vmatpush.msrb.mxu1 %v3881_v7  ;;  %4077 = vmatpush.msrb.mxu3 %v3883_v52  ;;  %v3844_v7 = vld [vmem:[#allocation13 + $0x878] sm:$0xff]  ;;  %v3834_v52 = vld [vmem:[#allocation13 + $0x768] sm:$0xff] }
 0x515   : > { %4106 = vmatpush.msra.mxu0 %v3884_v61  ;;  %4049 = vmatpush.msrb.mxu2 %v3874_v9  ;;  %v3833_v61 = vld [vmem:[#allocation13 + $0x760] sm:$0xff]  ;;  %v3835_v9 = vld [vmem:[#allocation13 + $0x770] sm:$0xff] }
 0x516   : > { %4020 = vmatpush.msrb.mxu1 %v3873_v23  ;;  %4078 = vmatpush.msrb.mxu3 %v3875_v27  ;;  %v3836_v23 = vld [vmem:[#allocation13 + $0x778] sm:$0xff]  ;;  %v3826_v27 = vld [vmem:[#allocation13 + $0x668] sm:$0xff] }
 0x517   : > { %4107 = vmatpush.msra.mxu0 %v3876_v29  ;;  %4050 = vmatpush.msrb.mxu2 %v3866_v43  ;;  %v3825_v29 = vld [vmem:[#allocation13 + $0x660] sm:$0xff]  ;;  %v3827_v43 = vld [vmem:[#allocation13 + $0x670] sm:$0xff] }
 0x518   : > { %4021 = vmatpush.msrb.mxu1 %v3865_v20  ;;  %4079 = vmatpush.msrb.mxu3 %v3867_v37  ;;  %v3828_v20 = vld [vmem:[#allocation13 + $0x678] sm:$0xff]  ;;  %v3818_v37 = vld [vmem:[#allocation13 + $0x568] sm:$0xff] }
 0x519   : > { %3522 = vmatmul.f32.gmra.mxu1 %v8214_v39  ;;  %3551 = vmatmul.f32.gmra.mxu2 %v8214_v39 }
 0x51a   : > { %3580 = vmatmul.f32.gmra.mxu3 %v8214_v39  ;;  %3609 = vmatmul.f32.gmra.mxu0 %v8214_v39 }
 0x51b   : > { %4108 = vmatpush.msra.mxu0 %v3868_v28  ;;  %4051 = vmatpush.msrb.mxu2 %v3858_v10  ;;  %v3817_v28 = vld [vmem:[#allocation13 + $0x560] sm:$0xff]  ;;  %v3819_v10 = vld [vmem:[#allocation13 + $0x570] sm:$0xff] }
 0x51c   : > { %4022 = vmatpush.msrb.mxu1 %v3857_v41  ;;  %4080 = vmatpush.msrb.mxu3 %v3859_v17  ;;  %v3820_v41 = vld [vmem:[#allocation13 + $0x578] sm:$0xff]  ;;  %v3810_v17 = vld [vmem:[#allocation13 + $0x468] sm:$0xff] }
 0x51d   : > { %4109 = vmatpush.msra.mxu0 %v3860_v8  ;;  %4052 = vmatpush.msrb.mxu2 %v3850_v63  ;;  %v3809_v8 = vld [vmem:[#allocation13 + $0x460] sm:$0xff]  ;;  %v3811_v63 = vld [vmem:[#allocation13 + $0x470] sm:$0xff] }
 0x51e   : > { %4023 = vmatpush.msrb.mxu1 %v3849_v25  ;;  %4081 = vmatpush.msrb.mxu3 %v3851_v24  ;;  %v3812_v25 = vld [vmem:[#allocation13 + $0x478] sm:$0xff]  ;;  %v3802_v24 = vld [vmem:[#allocation13 + $0x368] sm:$0xff] }
 0x51f   : > { %4110 = vmatpush.msra.mxu0 %v3852_v55  ;;  %4053 = vmatpush.msrb.mxu2 %v3842_v57  ;;  %v3801_v55 = vld [vmem:[#allocation13 + $0x360] sm:$0xff]  ;;  %v3803_v57 = vld [vmem:[#allocation13 + $0x370] sm:$0xff] }
 0x520   : > { %4024 = vmatpush.msrb.mxu1 %v3841_v46  ;;  %4082 = vmatpush.msrb.mxu3 %v3843_v22  ;;  %v3804_v46 = vld [vmem:[#allocation13 + $0x378] sm:$0xff]  ;;  %v3794_v22 = vld [vmem:[#allocation13 + $0x268] sm:$0xff] }
 0x521   : > { %3917 = vmatmul.f32.vlgmr.msra.gmra.mxu1 %v8176_v34  ;;  %3946 = vmatmul.f32.vlgmr.msra.gmra.mxu2 %v8176_v34 }
 0x522   : > { %3975 = vmatmul.f32.vlgmr.msra.gmra.mxu3 %v8176_v34  ;;  %4004 = vmatmul.f32.vlgmr.msrb.gmra.mxu0 %v8176_v34 }
 0x523   : > { %4111 = vmatpush.msra.mxu0 %v3844_v7  ;;  %4054 = vmatpush.msrb.mxu2 %v3834_v52  ;;  %v3793_v7 = vld [vmem:[#allocation13 + $0x260] sm:$0xff]  ;;  %v3795_v52 = vld [vmem:[#allocation13 + $0x270] sm:$0xff] }
 0x524   : > { %4025 = vmatpush.msrb.mxu1 %v3833_v61  ;;  %4083 = vmatpush.msrb.mxu3 %v3835_v9  ;;  %v3796_v61 = vld [vmem:[#allocation13 + $0x278] sm:$0xff]  ;;  %v3786_v9 = vld [vmem:[#allocation13 + $0x168] sm:$0xff] }
 0x525   : > { %4112 = vmatpush.msra.mxu0 %v3836_v23  ;;  %4055 = vmatpush.msrb.mxu2 %v3826_v27  ;;  %v3785_v23 = vld [vmem:[#allocation13 + $0x160] sm:$0xff]  ;;  %v3787_v27 = vld [vmem:[#allocation13 + $0x170] sm:$0xff] }
 0x526   : > { %4026 = vmatpush.msrb.mxu1 %v3825_v29  ;;  %4084 = vmatpush.msrb.mxu3 %v3827_v43  ;;  %v3788_v29 = vld [vmem:[#allocation13 + $0x178] sm:$0xff]  ;;  %v3778_v43 = vld [vmem:[#allocation13 + $0x68] sm:$0xff] }
 0x527   : > { %4113 = vmatpush.msra.mxu0 %v3828_v20  ;;  %4056 = vmatpush.msrb.mxu2 %v3818_v37  ;;  %v3777_v20 = vld [vmem:[#allocation13 + $0x60] sm:$0xff]  ;;  %v3779_v37 = vld [vmem:[#allocation13 + $0x70] sm:$0xff] }
 0x528   : > { %4027 = vmatpush.msrb.mxu1 %v3817_v28  ;;  %4085 = vmatpush.msrb.mxu3 %v3819_v10  ;;  %v3780_v28 = vld [vmem:[#allocation13 + $0x78] sm:$0xff] }
 0x529   : > { %3920 = vmatmul.f32.gmra.mxu1 %v8191_v50  ;;  %3949 = vmatmul.f32.gmra.mxu2 %v8191_v50 }
 0x52a   : > { %3978 = vmatmul.f32.gmra.mxu3 %v8191_v50  ;;  %4007 = vmatmul.f32.gmra.mxu0 %v8191_v50 }
 0x52b   : > { %4114 = vmatpush.msra.mxu0 %v3820_v41  ;;  %4057 = vmatpush.msrb.mxu2 %v3810_v17  ;;  %v4180_v17 = vld [vmem:[#allocation14 + $0x1e8] sm:$0xff] }
 0x52c   : > { %4028 = vmatpush.msrb.mxu1 %v3809_v8  ;;  %4086 = vmatpush.msrb.mxu3 %v3811_v63  ;;  %v4228_v8 = vld [vmem:[#allocation14 + $0x7e8] sm:$0xff] }
 0x52d   : > { %4115 = vmatpush.msra.mxu0 %v3812_v25  ;;  %4058 = vmatpush.msrb.mxu2 %v3802_v24  ;;  %v4179_v24 = vld [vmem:[#allocation14 + $0x1c8] sm:$0xff] }
 0x52e   : > { %4029 = vmatpush.msrb.mxu1 %v3801_v55  ;;  %4087 = vmatpush.msrb.mxu3 %v3803_v57  ;;  %v4227_v55 = vld [vmem:[#allocation14 + $0x7c8] sm:$0xff] }
 0x52f   : > { %4116 = vmatpush.msra.mxu0 %v3804_v46  ;;  %4059 = vmatpush.msrb.mxu2 %v3794_v22  ;;  %v4178_v22 = vld [vmem:[#allocation14 + $0x1a8] sm:$0xff] }
 0x530   : > { %4030 = vmatpush.msrb.mxu1 %v3793_v7  ;;  %4088 = vmatpush.msrb.mxu3 %v3795_v52  ;;  %v4226_v7 = vld [vmem:[#allocation14 + $0x7a8] sm:$0xff] }
 0x531   : > { %3923 = vmatmul.f32.gmra.mxu1 %v8203_v40  ;;  %3952 = vmatmul.f32.gmra.mxu2 %v8203_v40  ;;  %v4196_v52 = vld [vmem:[#allocation14 + $0x3e8] sm:$0xff] }
 0x532   : > { %3981 = vmatmul.f32.gmra.mxu3 %v8203_v40  ;;  %4010 = vmatmul.f32.gmra.mxu0 %v8203_v40 }
 0x533   : > { %4117 = vmatpush.msra.mxu0 %v3796_v61  ;;  %4060 = vmatpush.msrb.mxu2 %v3786_v9  ;;  %v4177_v61 = vld [vmem:[#allocation14 + $0x188] sm:$0xff] }
 0x534   : > { %4031 = vmatpush.msrb.mxu1 %v3785_v23  ;;  %4089 = vmatpush.msrb.mxu3 %v3787_v27  ;;  %v4212_v9 = vld [vmem:[#allocation14 + $0x5e8] sm:$0xff] }
 0x535   : > { %4118 = vmatpush.msra.mxu0 %v3788_v29  ;;  %4061 = vmatpush.msrb.mxu2 %v3778_v43  ;;  %v4225_v23 = vld [vmem:[#allocation14 + $0x788] sm:$0xff] }
 0x536   : > { %4032 = vmatpush.msrb.mxu1 %v3777_v20  ;;  %4090 = vmatpush.msrb.mxu3 %v3779_v37  ;;  %v4195_v27 = vld [vmem:[#allocation14 + $0x3c8] sm:$0xff] }
 0x537   : > { %4119 = vmatpush.msra.mxu0 %v3780_v28  ;;  %4322 = vmatpush.msra.mxu2 %v4196_v52  ;;  %v4176_v29 = vld [vmem:[#allocation14 + $0x168] sm:$0xff] }
 0x538   : > { %4293 = vmatpush.msra.mxu1 %v4180_v17  ;;  %4351 = vmatpush.msra.mxu3 %v4212_v9  ;;  %v4211_v43 = vld [vmem:[#allocation14 + $0x5c8] sm:$0xff] }
 0x539   : > { %3926 = vmatmul.f32.gmra.mxu1 %v8214_v39  ;;  %3955 = vmatmul.f32.gmra.mxu2 %v8214_v39  ;;  %v4224_v20 = vld [vmem:[#allocation14 + $0x768] sm:$0xff] }
 0x53a   : > { %3984 = vmatmul.f32.gmra.mxu3 %v8214_v39  ;;  %4013 = vmatmul.f32.gmra.mxu0 %v8214_v39  ;;  %v4194_v37 = vld [vmem:[#allocation14 + $0x3a8] sm:$0xff] }
 0x53b   : > { %4380 = vmatpush.msrb.mxu0 %v4228_v8  ;;  %4294 = vmatpush.msra.mxu1 %v4179_v24  ;;  %v4175_v8 = vld [vmem:[#allocation14 + $0x148] sm:$0xff] }
 0x53c   : > { %4323 = vmatpush.msra.mxu2 %v4195_v27  ;;  %4352 = vmatpush.msra.mxu3 %v4211_v43  ;;  %v4210_v24 = vld [vmem:[#allocation14 + $0x5a8] sm:$0xff] }
 0x53d   : > { %4381 = vmatpush.msrb.mxu0 %v4227_v55  ;;  %4295 = vmatpush.msra.mxu1 %v4178_v22  ;;  %v4223_v55 = vld [vmem:[#allocation14 + $0x748] sm:$0xff] }
 0x53e   : > { %4324 = vmatpush.msra.mxu2 %v4194_v37  ;;  %4353 = vmatpush.msra.mxu3 %v4210_v24  ;;  %v4209_v9 = vld [vmem:[#allocation14 + $0x588] sm:$0xff] }
 0x53f   : > { %4382 = vmatpush.msrb.mxu0 %v4226_v7  ;;  %4296 = vmatpush.msra.mxu1 %v4177_v61  ;;  %v4193_v7 = vld [vmem:[#allocation14 + $0x388] sm:$0xff] }
 0x540   : > { %4325 = vmatpush.msra.mxu2 %v4193_v7  ;;  %v4174_v61 = vld [vmem:[#allocation14 + $0x128] sm:$0xff]  ;;  %4354 = vmatpush.msra.mxu3 %v4209_v9 }
 0x541   : > { %4033 = vmatmul.f32.vlgmr.msrb.gmra.mxu1 %v8176_v34  ;;  %4062 = vmatmul.f32.vlgmr.msrb.gmra.mxu2 %v8176_v34  ;;  %v4192_v27 = vld [vmem:[#allocation14 + $0x368] sm:$0xff] }
 0x542   : > { %4091 = vmatmul.f32.vlgmr.msrb.gmra.mxu3 %v8176_v34  ;;  %4120 = vmatmul.f32.vlgmr.msra.gmra.mxu0 %v8176_v34  ;;  %v4208_v43 = vld [vmem:[#allocation14 + $0x568] sm:$0xff] }
 0x543   : > { %4383 = vmatpush.msrb.mxu0 %v4225_v23  ;;  %4297 = vmatpush.msra.mxu1 %v4176_v29  ;;  %v4222_v23 = vld [vmem:[#allocation14 + $0x728] sm:$0xff] }
 0x544   : > { %v4173_v29 = vld [vmem:[#allocation14 + $0x108] sm:$0xff]  ;;  %4326 = vmatpush.msra.mxu2 %v4192_v27  ;;  %4355 = vmatpush.msra.mxu3 %v4208_v43 }
 0x545   : > { %4384 = vmatpush.msrb.mxu0 %v4224_v20  ;;  %4298 = vmatpush.msra.mxu1 %v4175_v8  ;;  %v4221_v20 = vld [vmem:[#allocation14 + $0x708] sm:$0xff] }
 0x546   : > { %v4191_v37 = vld [vmem:[#allocation14 + $0x348] sm:$0xff] }
 0x547   : > { %4385 = vmatpush.msrb.mxu0 %v4223_v55  ;;  %4299 = vmatpush.msra.mxu1 %v4174_v61  ;;  %v4207_v8 = vld [vmem:[#allocation14 + $0x548] sm:$0xff] }
 0x548   : > { %v4220_v24 = vld [vmem:[#allocation14 + $0x6e8] sm:$0xff]  ;;  %4327 = vmatpush.msra.mxu2 %v4191_v37  ;;  %4356 = vmatpush.msra.mxu3 %v4207_v8 }
 0x549   : > { %4036 = vmatmul.f32.gmra.mxu1 %v8191_v50  ;;  %4065 = vmatmul.f32.gmra.mxu2 %v8191_v50  ;;  %v4171_v61 = vld [vmem:[#allocation14 + $0xc8] sm:$0xff] }
 0x54a   : > { %4094 = vmatmul.f32.gmra.mxu3 %v8191_v50  ;;  %4123 = vmatmul.f32.gmra.mxu0 %v8191_v50  ;;  %v4206_v9 = vld [vmem:[#allocation14 + $0x528] sm:$0xff] }
 0x54b   : > { %4386 = vmatpush.msrb.mxu0 %v4222_v23  ;;  %4300 = vmatpush.msra.mxu1 %v4173_v29  ;;  %v4219_v23 = vld [vmem:[#allocation14 + $0x6c8] sm:$0xff] }
 0x54c   : > { %4357 = vmatpush.msra.mxu3 %v4206_v9  ;;  %v4189_v29 = vld [vmem:[#allocation14 + $0x308] sm:$0xff] }
 0x54d   : > { %4387 = vmatpush.msrb.mxu0 %v4221_v20  ;;  %v4170_v20 = vld [vmem:[#allocation14 + $0xa8] sm:$0xff] }
 0x54e   : > { %v4205_v37 = vld [vmem:[#allocation14 + $0x508] sm:$0xff] }
 0x54f   : > { %4388 = vmatpush.msrb.mxu0 %v4220_v24  ;;  %4358 = vmatpush.msra.mxu3 %v4205_v37  ;;  %v4188_v8 = vld [vmem:[#allocation14 + $0x2e8] sm:$0xff] }
 0x550   : > { %v4169_v24 = vld [vmem:[#allocation14 + $0x88] sm:$0xff] }
 0x551   : > { %4039 = vmatmul.f32.gmra.mxu1 %v8203_v40  ;;  %4068 = vmatmul.f32.gmra.mxu2 %v8203_v40  ;;  %v4217_v50 = vld [vmem:[#allocation14 + $0x688] sm:$0xff] }
 0x552   : > { %4097 = vmatmul.f32.gmra.mxu3 %v8203_v40  ;;  %4126 = vmatmul.f32.gmra.mxu0 %v8203_v40  ;;  %v4190_v40 = vld [vmem:[#allocation14 + $0x328] sm:$0xff] }
 0x553   : > { %4328 = vmatpush.msra.mxu2 %v4190_v40  ;;  %4389 = vmatpush.msrb.mxu0 %v4219_v23  ;;  %v4204_v40 = vld [vmem:[#allocation14 + $0x4e8] sm:$0xff] }
 0x554   : > { %v4187_v34 = vld [vmem:[#allocation14 + $0x2c8] sm:$0xff]  ;;  %4359 = vmatpush.msra.mxu3 %v4204_v40 }
 0x555   : > { %4329 = vmatpush.msra.mxu2 %v4189_v29  ;;  %v4216_v9 = vld [vmem:[#allocation14 + $0x668] sm:$0xff] }
 0x556   : > { %v4202_v37 = vld [vmem:[#allocation14 + $0x4a8] sm:$0xff] }
 0x557   : > { %4330 = vmatpush.msra.mxu2 %v4188_v8 }
 0x559   : > { %4042 = vmatmul.f32.gmra.mxu1 %v8214_v39  ;;  %4071 = vmatmul.f32.gmra.mxu2 %v8214_v39 }
 0x55a   : > { %4100 = vmatmul.f32.gmra.mxu3 %v8214_v39  ;;  %4129 = vmatmul.f32.gmra.mxu0 %v8214_v39  ;;  %v4172_v39 = vld [vmem:[#allocation14 + $0xe8] sm:$0xff] }
 0x55b   : > { %4301 = vmatpush.msra.mxu1 %v4172_v39  ;;  %v4218_v39 = vld [vmem:[#allocation14 + $0x6a8] sm:$0xff]  ;;  %4331 = vmatpush.msra.mxu2 %v4187_v34 }
 0x55c   : > { %4390 = vmatpush.msrb.mxu0 %v4218_v39  ;;  %v4215_v39 = vld [vmem:[#allocation14 + $0x648] sm:$0xff] }
 0x55d   : > { %4302 = vmatpush.msra.mxu1 %v4171_v61  ;;  %v4203_v61 = vld [vmem:[#allocation14 + $0x4c8] sm:$0xff] }
 0x55e   : > { %v8268_v10 = vpop.f32.mrf.mxu1  ;;  %4391 = vmatpush.msrb.mxu0 %v4217_v50  ;;  %4360 = vmatpush.msra.mxu3 %v4203_v61  ;;  %v4166_v34 = vld [vmem:[#allocation14 + $0x28] sm:$0xff] }
 0x55f   : > { %v8270_v41 = vpop.f32.mrf.mxu0  ;;  %4303 = vmatpush.msra.mxu1 %v4170_v20  ;;  %v4167_v20 = vld [vmem:[#allocation14 + $0x48] sm:$0xff] }
 0x560   : > { %4392 = vmatpush.msrb.mxu0 %v4216_v9  ;;  %4361 = vmatpush.msra.mxu3 %v4202_v37  ;;  %v4201_v50 = vld [vmem:[#allocation14 + $0x488] sm:$0xff] }
 0x561   : > { %4304 = vmatpush.msra.mxu1 %v4169_v24  ;;  %v4185_v24 = vld [vmem:[#allocation14 + $0x288] sm:$0xff] }
 0x562   : > { %4393 = vmatpush.msrb.mxu0 %v4215_v39  ;;  %4362 = vmatpush.msra.mxu3 %v4201_v50  ;;  %v4184_v61 = vld [vmem:[#allocation14 + $0x268] sm:$0xff] }
 0x563   : > { %v4165_v9 = vld [vmem:[#allocation14 + $0x8] sm:$0xff] }
 0x564   : > { %v8272_v63 = vpop.f32.mrf.mxu2  ;;  %v4244_v37 = vld [vmem:[#allocation14 + $0x9e8] sm:$0xff] }
 0x565   : > { %v8274_v25 = vpop.f32.mrf.mxu3  ;;  %v4182_v39 = vld [vmem:[#allocation14 + $0x228] sm:$0xff] }
 0x566   : > { %v8276_v57 = vpop.f32.mrf.mxu1  ;;  %v4198_v50 = vld [vmem:[#allocation14 + $0x428] sm:$0xff] }
 0x567   : > { %v8278_v46 = vpop.f32.mrf.mxu0 }
 0x56c   : > { %v8280_v28 = vpop.f32.mrf.mxu2 }
 0x56d   : > { %v8282_v17 = vpop.f32.mrf.mxu3 }
 0x56e   : > { %v8284_v22 = vpop.f32.mrf.mxu1 }
 0x56f   : > { %v8286_v52 = vpop.f32.mrf.mxu0 }
 0x574   : > { %v8288_v55 = vpop.f32.mrf.mxu2 }
 0x575   : > { %v8290_v7 = vpop.f32.mrf.mxu3 }
 0x576   : > { %v8292_v27 = vpop.f32.mrf.mxu1 }
 0x577   : > { %9324 = vst [vmem:[#allocation56_spill] sm:$0xff] %v8292_v27  ;;  %v8294_v43 = vpop.f32.mrf.mxu0  ;;  %v4168_v27 = vld [vmem:[#allocation14 + $0x68] sm:$0xff] }
 0x578   : > { %9325 = vst [vmem:[#allocation58_spill] sm:$0xff] %v8294_v43  ;;  %v4186_v43 = vld [vmem:[#allocation14 + $0x2a8] sm:$0xff]  ;;  %4305 = vmatpush.msra.mxu1 %v4168_v27 }
 0x579   : > { %4332 = vmatpush.msra.mxu2 %v4186_v43  ;;  %v4214_v27 = vld [vmem:[#allocation14 + $0x628] sm:$0xff] }
 0x57a   : > { %4306 = vmatpush.msra.mxu1 %v4167_v20  ;;  %v4200_v43 = vld [vmem:[#allocation14 + $0x468] sm:$0xff]  ;;  %4394 = vmatpush.msrb.mxu0 %v4214_v27 }
 0x57b   : > { %4333 = vmatpush.msra.mxu2 %v4185_v24  ;;  %4363 = vmatpush.msra.mxu3 %v4200_v43  ;;  %v4199_v20 = vld [vmem:[#allocation14 + $0x448] sm:$0xff] }
 0x57c   : > { %v8296_v23 = vpop.f32.mrf.mxu2  ;;  %4307 = vmatpush.msra.mxu1 %v4166_v34  ;;  %v4243_v27 = vld [vmem:[#allocation14 + $0x9c8] sm:$0xff] }
 0x57d   : > { %9326 = vst [vmem:[#allocation94_spill] sm:$0xff] %v8296_v23  ;;  %v8298_v29 = vpop.f32.mrf.mxu3  ;;  %4334 = vmatpush.msra.mxu2 %v4184_v61  ;;  %v4183_v23 = vld [vmem:[#allocation14 + $0x248] sm:$0xff]  ;;  %4364 = vmatpush.msra.mxu3 %v4199_v20 }
 0x57e   : > { %9327 = vst [vmem:[#allocation95_spill] sm:$0xff] %v8298_v29  ;;  %v8300_v8 = vpop.f32.mrf.mxu1  ;;  %v4213_v29 = vld [vmem:[#allocation14 + $0x608] sm:$0xff]  ;;  %4308 = vmatpush.msra.mxu1 %v4165_v9 }
 0x57f   : > { %9328 = vst [vmem:[#allocation101_spill] sm:$0xff] %v8300_v8  ;;  %v8302_v40 = vpop.f32.mrf.mxu0  ;;  %v4292_v8 = vld [vmem:[#allocation14 + $0xfe8] sm:$0xff]  ;;  %4395 = vmatpush.msrb.mxu0 %v4213_v29  ;;  %4335 = vmatpush.msra.mxu2 %v4183_v23 }
 0x580   : > { %9329 = vst [vmem:[#allocation57_spill] sm:$0xff] %v8302_v40  ;;  %4409 = vmatpush.msrb.mxu1 %v4244_v37  ;;  %v4291_v61 = vld [vmem:[#allocation14 + $0xfc8] sm:$0xff]  ;;  %4365 = vmatpush.msra.mxu3 %v4198_v50 }
 0x581   : > { %4496 = vmatpush.msra.mxu0 %v4292_v8  ;;  %4336 = vmatpush.msra.mxu2 %v4182_v39  ;;  %v4181_v9 = vld [vmem:[#allocation14 + $0x208] sm:$0xff] }
 0x582   : > { %4410 = vmatpush.msrb.mxu1 %v4243_v27  ;;  %v4197_v23 = vld [vmem:[#allocation14 + $0x408] sm:$0xff] }
 0x583   : > { %4497 = vmatpush.msra.mxu0 %v4291_v61  ;;  %4337 = vmatpush.msra.mxu2 %v4181_v9  ;;  %v4242_v29 = vld [vmem:[#allocation14 + $0x9a8] sm:$0xff] }
 0x584   : > { %v8304_v24 = vpop.f32.mrf.mxu2  ;;  %v4290_v20 = vld [vmem:[#allocation14 + $0xfa8] sm:$0xff]  ;;  %4366 = vmatpush.msra.mxu3 %v4197_v23  ;;  %4411 = vmatpush.msrb.mxu1 %v4242_v29 }
 0x585   : > { %v8306_v34 = vpop.f32.mrf.mxu3  ;;  %v4260_v37 = vld [vmem:[#allocation14 + $0xbe8] sm:$0xff]  ;;  %4498 = vmatpush.msra.mxu0 %v4290_v20 }
 0x586   : > { %9330 = vst [vmem:[#allocation70_spill] sm:$0xff] %v8306_v34  ;;  %v8308_v40 = vpop.f32.mrf.mxu1  ;;  %v4241_v8 = vld [vmem:[#allocation14 + $0x988] sm:$0xff]  ;;  %4438 = vmatpush.msrb.mxu2 %v4260_v37 }
 0x587   : > { %9331 = vst [vmem:[#allocation87_spill] sm:$0xff] %v8308_v40  ;;  %v8310_v43 = vpop.f32.mrf.mxu0  ;;  %v4276_v39 = vld [vmem:[#allocation14 + $0xde8] sm:$0xff]  ;;  %4412 = vmatpush.msrb.mxu1 %v4241_v8 }
 0x588   : > { %9332 = vst [vmem:[#allocation88_spill] sm:$0xff] %v8310_v43  ;;  %v4289_v34 = vld [vmem:[#allocation14 + $0xf88] sm:$0xff]  ;;  %4467 = vmatpush.msrb.mxu3 %v4276_v39 }
 0x589   : > { %v4259_v50 = vld [vmem:[#allocation14 + $0xbc8] sm:$0xff]  ;;  %4499 = vmatpush.msra.mxu0 %v4289_v34 }
 0x58a   : > { %v4240_v27 = vld [vmem:[#allocation14 + $0x968] sm:$0xff]  ;;  %4439 = vmatpush.msrb.mxu2 %v4259_v50 }
 0x58b   : > { %v4275_v40 = vld [vmem:[#allocation14 + $0xdc8] sm:$0xff]  ;;  %4413 = vmatpush.msrb.mxu1 %v4240_v27 }
 0x58c   : > { %v4288_v61 = vld [vmem:[#allocation14 + $0xf68] sm:$0xff]  ;;  %v8312_v43 = vpop.f32.mrf.mxu2  ;;  %4468 = vmatpush.msrb.mxu3 %v4275_v40 }
 0x58d   : > { %v4258_v9 = vld [vmem:[#allocation14 + $0xba8] sm:$0xff]  ;;  %9333 = vst [vmem:[#allocation78_spill] sm:$0xff] %v8312_v43  ;;  %v8314_v23 = vpop.f32.mrf.mxu3  ;;  %4500 = vmatpush.msra.mxu0 %v4288_v61 }
 0x58e   : > { %9334 = vst [vmem:[#allocation85_spill] sm:$0xff] %v8314_v23  ;;  %4440 = vmatpush.msrb.mxu2 %v4258_v9  ;;  %v4239_v29 = vld [vmem:[#allocation14 + $0x948] sm:$0xff]  ;;  %v8316_v8 = vpop.f32.mrf.mxu1 }
 0x58f   : > { %v4274_v20 = vld [vmem:[#allocation14 + $0xda8] sm:$0xff]  ;;  %9335 = vst [vmem:[#allocation93_spill] sm:$0xff] %v8316_v8  ;;  %4414 = vmatpush.msrb.mxu1 %v4239_v29  ;;  %v8318_v34 = vpop.f32.mrf.mxu0 }
 0x590   : > { %v4287_v37 = vld [vmem:[#allocation14 + $0xf48] sm:$0xff]  ;;  %4469 = vmatpush.msrb.mxu3 %v4274_v20  ;;  %9336 = vst [vmem:[#allocation27_spill] sm:$0xff] %v8318_v34 }
 0x591   : > { %v4257_v39 = vld [vmem:[#allocation14 + $0xb88] sm:$0xff]  ;;  %4501 = vmatpush.msra.mxu0 %v4287_v37 }
 0x592   : > { %4441 = vmatpush.msrb.mxu2 %v4257_v39  ;;  %v4238_v50 = vld [vmem:[#allocation14 + $0x928] sm:$0xff] }
 0x593   : > { %v4273_v43 = vld [vmem:[#allocation14 + $0xd88] sm:$0xff]  ;;  %4415 = vmatpush.msrb.mxu1 %v4238_v50 }
 0x594   : > { %v4286_v27 = vld [vmem:[#allocation14 + $0xf28] sm:$0xff]  ;;  %4470 = vmatpush.msrb.mxu3 %v4273_v43  ;;  %v8320_v34 = vpop.f32.mrf.mxu2 }
 0x595   : > { %v4256_v40 = vld [vmem:[#allocation14 + $0xb68] sm:$0xff]  ;;  %4502 = vmatpush.msra.mxu0 %v4286_v27  ;;  %9337 = vst [vmem:[#allocation86_spill] sm:$0xff] %v8320_v34  ;;  %v8322_v43 = vpop.f32.mrf.mxu3 }
 0x596   : > { %v4237_v61 = vld [vmem:[#allocation14 + $0x908] sm:$0xff]  ;;  %4442 = vmatpush.msrb.mxu2 %v4256_v40  ;;  %9338 = vst [vmem:[#allocation96_spill] sm:$0xff] %v8322_v43 }
 0x597   : > { %v4272_v9 = vld [vmem:[#allocation14 + $0xd68] sm:$0xff]  ;;  %4416 = vmatpush.msrb.mxu1 %v4237_v61  ;;  %v8324_v61 = vpop.f32.mrf.mxu1 }
 0x598   : > { %v4285_v23 = vld [vmem:[#allocation14 + $0xf08] sm:$0xff]  ;;  %4471 = vmatpush.msrb.mxu3 %v4272_v9  ;;  %9339 = vst [vmem:[#allocation48_spill] sm:$0xff] %v8324_v61 }
 0x599   : > { %v4255_v29 = vld [vmem:[#allocation14 + $0xb48] sm:$0xff]  ;;  %4503 = vmatpush.msra.mxu0 %v4285_v23  ;;  %v8326_v23 = vpop.f32.mrf.mxu0 }
 0x59a   : > { %v4236_v20 = vld [vmem:[#allocation14 + $0x8e8] sm:$0xff]  ;;  %4443 = vmatpush.msrb.mxu2 %v4255_v29  ;;  %9340 = vst [vmem:[#allocation59_spill] sm:$0xff] %v8326_v23 }
 0x59b   : > { %v4271_v8 = vld [vmem:[#allocation14 + $0xd48] sm:$0xff]  ;;  %4417 = vmatpush.msrb.mxu1 %v4236_v20 }
 0x59c   : > { %v4284_v37 = vld [vmem:[#allocation14 + $0xee8] sm:$0xff]  ;;  %4472 = vmatpush.msrb.mxu3 %v4271_v8  ;;  %v8328_v23 = vpop.f32.mrf.mxu2 }
 0x59d   : > { %v4254_v39 = vld [vmem:[#allocation14 + $0xb28] sm:$0xff]  ;;  %4504 = vmatpush.msra.mxu0 %v4284_v37  ;;  %9341 = vst [vmem:[#allocation34_spill] sm:$0xff] %v8328_v23 }
 0x59e   : > { %4444 = vmatpush.msrb.mxu2 %v4254_v39  ;;  %v4235_v50 = vld [vmem:[#allocation14 + $0x8c8] sm:$0xff] }
 0x59f   : > { %v4270_v27 = vld [vmem:[#allocation14 + $0xd28] sm:$0xff]  ;;  %4418 = vmatpush.msrb.mxu1 %v4235_v50 }
 0x5a0   : > { %v4283_v40 = vld [vmem:[#allocation14 + $0xec8] sm:$0xff]  ;;  %4473 = vmatpush.msrb.mxu3 %v4270_v27 }
 0x5a1   : > { %v4253_v9 = vld [vmem:[#allocation14 + $0xb08] sm:$0xff]  ;;  %4505 = vmatpush.msra.mxu0 %v4283_v40 }
 0x5a2   : > { %4445 = vmatpush.msrb.mxu2 %v4253_v9  ;;  %v4234_v29 = vld [vmem:[#allocation14 + $0x8a8] sm:$0xff] }
 0x5a3   : > { %v4269_v34 = vld [vmem:[#allocation14 + $0xd08] sm:$0xff]  ;;  %4419 = vmatpush.msrb.mxu1 %v4234_v29  ;;  %v8334_v29 = vpop.f32.mrf.mxu3 }
 0x5a4   : > { %v4282_v20 = vld [vmem:[#allocation14 + $0xea8] sm:$0xff]  ;;  %4474 = vmatpush.msrb.mxu3 %v4269_v34  ;;  %v8332_v34 = vadd.f32 %v8018_v16, %v7856_v14  ;;  %9342 = vst [vmem:[#allocation36_spill] sm:$0xff] %v8334_v29 }
 0x5a5   : > { %v4252_v8 = vld [vmem:[#allocation14 + $0xae8] sm:$0xff]  ;;  %4506 = vmatpush.msra.mxu0 %v4282_v20 }
 0x5a6   : > { %v4233_v37 = vld [vmem:[#allocation14 + $0x888] sm:$0xff]  ;;  %4446 = vmatpush.msrb.mxu2 %v4252_v8 }
 0x5a7   : > { %v4268_v39 = vld [vmem:[#allocation14 + $0xce8] sm:$0xff]  ;;  %4420 = vmatpush.msrb.mxu1 %v4233_v37 }
 0x5a8   : > { %v4281_v43 = vld [vmem:[#allocation14 + $0xe88] sm:$0xff]  ;;  %4475 = vmatpush.msrb.mxu3 %v4268_v39  ;;  %v3918_v39 = vpop.f32.mrf.mxu1 }
 0x5a9   : > { %v4251_v50 = vld [vmem:[#allocation14 + $0xac8] sm:$0xff]  ;;  %4507 = vmatpush.msra.mxu0 %v4281_v43  ;;  %v8338_v43 = vadd.f32 %v8119_v33, %v8071_v47 }
 0x5aa   : > { %v4232_v27 = vld [vmem:[#allocation14 + $0x868] sm:$0xff]  ;;  %4447 = vmatpush.msrb.mxu2 %v4251_v50 }
 0x5ab   : > { %v4267_v61 = vld [vmem:[#allocation14 + $0xcc8] sm:$0xff]  ;;  %4421 = vmatpush.msrb.mxu1 %v4232_v27  ;;  %v4005_v27 = vpop.f32.mrf.mxu0 }
 0x5ac   : > { %v4280_v40 = vld [vmem:[#allocation14 + $0xe68] sm:$0xff]  ;;  %4476 = vmatpush.msrb.mxu3 %v4267_v61  ;;  %v4133_v61 = vmul.f32 %v3918_v39, %v8332_v34  ;;  %v3660_v39 = vld [vmem:[#allocation14 + $0x1e0] sm:$0xff] }
 0x5ad   : > { %v4250_v9 = vld [vmem:[#allocation14 + $0xaa8] sm:$0xff]  ;;  %4508 = vmatpush.msra.mxu0 %v4280_v40 }
 0x5ae   : > { %4448 = vmatpush.msrb.mxu2 %v4250_v9  ;;  %v4231_v20 = vld [vmem:[#allocation14 + $0x848] sm:$0xff]  ;;  %v4136_v9 = vmul.f32 %v4005_v27, %v8338_v43  ;;  %4309 = vmatmul.f32.vlgmr.msra.gmra.mxu1 %v4133_v61  ;;  %v3947_v61 = vpop.f32.mrf.mxu2 }
 0x5af   : > { %v4266_v8 = vld [vmem:[#allocation14 + $0xca8] sm:$0xff]  ;;  %4422 = vmatpush.msrb.mxu1 %v4231_v20 }
 0x5b0   : > { %v4279_v37 = vld [vmem:[#allocation14 + $0xe48] sm:$0xff]  ;;  %4477 = vmatpush.msrb.mxu3 %v4266_v8  ;;  %4396 = vmatmul.f32.vlgmr.msrb.gmra.mxu0 %v4136_v9  ;;  %v3707_v9 = vld [vmem:[#allocation14 + $0x7c0] sm:$0xff] }
 0x5b1   : > { %v4249_v50 = vld [vmem:[#allocation14 + $0xa88] sm:$0xff]  ;;  %4509 = vmatpush.msra.mxu0 %v4279_v37  ;;  %v8344_v37 = vadd.f32 %v8097_v58, %v8056_v5  ;;  %v3659_v58 = vld [vmem:[#allocation14 + $0x1c0] sm:$0xff] }
 0x5b2   : > { %4449 = vmatpush.msrb.mxu2 %v4249_v50  ;;  %v4230_v14 = vld [vmem:[#allocation14 + $0x828] sm:$0xff]  ;;  %v3708_v50 = vld [vmem:[#allocation14 + $0x7e0] sm:$0xff] }
 0x5b3   : > { %v4265_v16 = vld [vmem:[#allocation14 + $0xc88] sm:$0xff]  ;;  %4423 = vmatpush.msrb.mxu1 %v4230_v14  ;;  %v8348_v14 = vadd.f32 %v8034_v42, %v7996_v60  ;;  %v3921_v42 = vpop.f32.mrf.mxu1 }
 0x5b4   : > { %v4278_v40 = vld [vmem:[#allocation14 + $0xe28] sm:$0xff]  ;;  %4478 = vmatpush.msrb.mxu3 %v4265_v16  ;;  %v4134_v16 = vmul.f32 %v3947_v61, %v8344_v37  ;;  %v3705_v61 = vld [vmem:[#allocation14 + $0x780] sm:$0xff] }
 0x5b5   : > { %v4248_v29 = vld [vmem:[#allocation14 + $0xa68] sm:$0xff]  ;;  %4510 = vmatpush.msra.mxu0 %v4278_v40  ;;  %v3976_v40 = vpop.f32.mrf.mxu3 }
 0x5b6   : > { %v4229_v23 = vld [vmem:[#allocation14 + $0x808] sm:$0xff]  ;;  %4450 = vmatpush.msrb.mxu2 %v4248_v29  ;;  %v8352_v29 = vadd.f32 %v8024_v62, %v7907_v12  ;;  %v4135_v60 = vmul.f32 %v3976_v40, %v8348_v14  ;;  %v4008_v62 = vpop.f32.mrf.mxu0  ;;  %v8368_v40 = vadd.f32 %v8038_v13, %v8002_v0 }
 0x5b7   : > { %v4264_v47 = vld [vmem:[#allocation14 + $0xc68] sm:$0xff]  ;;  %4424 = vmatpush.msrb.mxu1 %v4229_v23  ;;  %v8357_v23 = vadd.f32 %v8127_v31, %v8078_v26  ;;  %4338 = vmatmul.f32.vlgmr.msra.gmra.mxu2 %v4134_v16  ;;  %v3706_v26 = vld [vmem:[#allocation14 + $0x7a0] sm:$0xff] }
 0x5b8   : > { %v4277_v33 = vld [vmem:[#allocation14 + $0xe08] sm:$0xff]  ;;  %4479 = vmatpush.msrb.mxu3 %v4264_v47  ;;  %v4141_v12 = vmul.f32 %v3921_v42, %v8352_v29  ;;  %v3676_v31 = vld [vmem:[#allocation14 + $0x3e0] sm:$0xff] }
 0x5b9   : > { %v4247_v20 = vld [vmem:[#allocation14 + $0xa48] sm:$0xff]  ;;  %4511 = vmatpush.msra.mxu0 %v4277_v33  ;;  %4525 = vmatpush.msra.mxu1 %v3660_v39  ;;  %v4144_v33 = vmul.f32 %v4008_v62, %v8357_v23  ;;  %v3657_v39 = vld [vmem:[#allocation14 + $0x180] sm:$0xff] }
 0x5ba   : > { %v4263_v8 = vld [vmem:[#allocation14 + $0xc48] sm:$0xff]  ;;  %4451 = vmatpush.msrb.mxu2 %v4247_v20  ;;  %4367 = vmatmul.f32.vlgmr.msra.gmra.mxu3 %v4135_v60  ;;  %v3675_v16 = vld [vmem:[#allocation14 + $0x3c0] sm:$0xff]  ;;  %v8372_v60 = vadd.f32 %v8028_v38, %v7947_v4 }
 0x5bb   : > { %v4246_v27 = vld [vmem:[#allocation14 + $0xa28] sm:$0xff]  ;;  %4480 = vmatpush.msrb.mxu3 %v4263_v8  ;;  %4612 = vmatpush.msrb.mxu0 %v3708_v50  ;;  %v3658_v8 = vld [vmem:[#allocation14 + $0x1a0] sm:$0xff]  ;;  %v3924_v13 = vpop.f32.mrf.mxu1 }
 0x5bc   : > { %v4262_v5 = vld [vmem:[#allocation14 + $0xc28] sm:$0xff]  ;;  %4452 = vmatpush.msrb.mxu2 %v4246_v27  ;;  %4526 = vmatpush.msra.mxu1 %v3659_v58  ;;  %v3692_v50 = vld [vmem:[#allocation14 + $0x5e0] sm:$0xff]  ;;  %v8364_v27 = vadd.f32 %v8101_v36, %v8060_v2  ;;  %v4149_v62 = vmul.f32 %v3924_v13, %v8372_v60 }
 0x5bd   : > { %4481 = vmatpush.msrb.mxu3 %v4262_v5  ;;  %v4245_v47 = vld [vmem:[#allocation14 + $0xa08] sm:$0xff]  ;;  %4312 = vmatmul.f32.gmra.mxu1 %v4141_v12  ;;  %v3950_v5 = vpop.f32.mrf.mxu2  ;;  %v3656_v58 = vld [vmem:[#allocation14 + $0x160] sm:$0xff]  ;;  %v3979_v2 = vpop.f32.mrf.mxu3 }
 0x5be   : > { %v4261_v20 = vld [vmem:[#allocation14 + $0xc08] sm:$0xff]  ;;  %4613 = vmatpush.msrb.mxu0 %v3707_v9  ;;  %4453 = vmatpush.msrb.mxu2 %v4245_v47  ;;  %v4142_v42 = vmul.f32 %v3950_v5, %v8364_v27  ;;  %v3704_v36 = vld [vmem:[#allocation14 + $0x760] sm:$0xff]  ;;  %v8377_v9 = vadd.f32 %v8132_v56, %v8081_v18  ;;  %v4143_v0 = vmul.f32 %v3979_v2, %v8368_v40  ;;  %v4011_v4 = vpop.f32.mrf.mxu0 }
 0x5bf   : > { %4399 = vmatmul.f32.gmra.mxu0 %v4144_v33  ;;  %4482 = vmatpush.msrb.mxu3 %v4261_v20  ;;  %v3691_v12 = vld [vmem:[#allocation14 + $0x5c0] sm:$0xff]  ;;  %v8397_v2 = vadd.f32 %v8134_v32, %v8083_v6 }
 0x5c0   : > { %4527 = vmatpush.msra.mxu1 %v3658_v8  ;;  %4614 = vmatpush.msrb.mxu0 %v3706_v26  ;;  %v3674_v38 = vld [vmem:[#allocation14 + $0x3a0] sm:$0xff]  ;;  %v4152_v47 = vmul.f32 %v4011_v4, %v8377_v9 }
 0x5c1   : > { %4554 = vmatpush.msra.mxu2 %v3676_v31  ;;  %4583 = vmatpush.msra.mxu3 %v3692_v50  ;;  %v3655_v33 = vld [vmem:[#allocation14 + $0x140] sm:$0xff]  ;;  %v8384_v31 = vadd.f32 %v8105_v49, %v8064_v51 }
 0x5c2   : > { %4528 = vmatpush.msra.mxu1 %v3657_v39  ;;  %4615 = vmatpush.msrb.mxu0 %v3705_v61  ;;  %v3690_v20 = vld [vmem:[#allocation14 + $0x5a0] sm:$0xff]  ;;  %v8388_v61 = vadd.f32 %v8040_v59, %v8004_v48 }
 0x5c3   : > { %4555 = vmatpush.msra.mxu2 %v3675_v16  ;;  %4370 = vmatmul.f32.gmra.mxu3 %v4143_v0  ;;  %v3703_v18 = vld [vmem:[#allocation14 + $0x740] sm:$0xff]  ;;  %v3927_v59 = vpop.f32.mrf.mxu1 }
 0x5c4   : > { %4341 = vmatmul.f32.gmra.mxu2 %v4142_v42  ;;  %4529 = vmatpush.msra.mxu1 %v3656_v58  ;;  %v3673_v56 = vld [vmem:[#allocation14 + $0x380] sm:$0xff]  ;;  %v8392_v58 = vadd.f32 %v8031_v11, %v7980_v53 }
 0x5c5   : > { %4616 = vmatpush.msrb.mxu0 %v3704_v36  ;;  %4315 = vmatmul.f32.gmra.mxu1 %v4149_v62  ;;  %v3654_v8 = vld [vmem:[#allocation14 + $0x120] sm:$0xff]  ;;  %v3953_v16 = vpop.f32.mrf.mxu2  ;;  %v3982_v51 = vpop.f32.mrf.mxu3 }
 0x5c6   : > { %4584 = vmatpush.msra.mxu3 %v3691_v12  ;;  %4556 = vmatpush.msra.mxu2 %v3674_v38  ;;  %v3689_v26 = vld [vmem:[#allocation14 + $0x580] sm:$0xff]  ;;  %v4150_v42 = vmul.f32 %v3953_v16, %v8384_v31  ;;  %v4151_v48 = vmul.f32 %v3982_v51, %v8388_v61  ;;  %v4157_v0 = vmul.f32 %v3927_v59, %v8392_v58  ;;  %v4014_v53 = vpop.f32.mrf.mxu0 }
 0x5c7   : > { %4402 = vmatmul.f32.gmra.mxu0 %v4152_v47  ;;  %4530 = vmatpush.msra.mxu1 %v3655_v33  ;;  %v3702_v39 = vld [vmem:[#allocation14 + $0x720] sm:$0xff]  ;;  %v4160_v13 = vmul.f32 %v4014_v53, %v8397_v2  ;;  %v8404_v47 = vadd.f32 %v8109_v30, %v8066_v19 }
 0x5c8   : > { %4585 = vmatpush.msra.mxu3 %v3690_v20  ;;  %v3672_v50 = vld [vmem:[#allocation14 + $0x360] sm:$0xff]  ;;  %4617 = vmatpush.msrb.mxu0 %v3703_v18  ;;  %v8408_v18 = vadd.f32 %v8042_v54, %v8006_v45 }
 0x5c9   : > { %4557 = vmatpush.msra.mxu2 %v3673_v56  ;;  %v3653_v5 = vld [vmem:[#allocation14 + $0x100] sm:$0xff]  ;;  %4531 = vmatpush.msra.mxu1 %v3654_v8 }
 0x5ca   : > { %4586 = vmatpush.msra.mxu3 %v3689_v26  ;;  %v3701_v49 = vld [vmem:[#allocation14 + $0x700] sm:$0xff]  ;;  %4618 = vmatpush.msrb.mxu0 %v3702_v39  ;;  %v8412_v26 = vadd.f32 %v8044_v1, %v8008_v15 }
 0x5cb   : > { %4558 = vmatpush.msra.mxu2 %v3672_v50  ;;  %v3688_v36 = vld [vmem:[#allocation14 + $0x560] sm:$0xff]  ;;  %4532 = vmatpush.msra.mxu1 %v3653_v5  ;;  %v8417_v50 = vadd.f32 %v8144_v44, %v8093_v21  ;;  %v4034_v54 = vpop.f32.mrf.mxu1 }
 0x5cc   : > { %4344 = vmatmul.f32.gmra.mxu2 %v4150_v42  ;;  %v3671_v11 = vld [vmem:[#allocation14 + $0x340] sm:$0xff]  ;;  %4373 = vmatmul.f32.gmra.mxu3 %v4151_v48  ;;  %v4137_v5 = vmul.f32 %v4034_v54, %v8412_v26 }
 0x5cd   : > { %4619 = vmatpush.msrb.mxu0 %v3701_v49  ;;  %v3652_v12 = vld [vmem:[#allocation14 + $0xe0] sm:$0xff]  ;;  %4318 = vmatmul.f32.gmra.mxu1 %v4157_v0  ;;  %v3956_v56 = vpop.f32.mrf.mxu2  ;;  %v3985_v19 = vpop.f32.mrf.mxu3 }
 0x5ce   : > { %v3687_v62 = vld [vmem:[#allocation14 + $0x540] sm:$0xff]  ;;  %4587 = vmatpush.msra.mxu3 %v3688_v36  ;;  %4559 = vmatpush.msra.mxu2 %v3671_v11  ;;  %v4158_v39 = vmul.f32 %v3956_v56, %v8404_v47  ;;  %v4159_v45 = vmul.f32 %v3985_v19, %v8408_v18  ;;  %v4121_v15 = vpop.f32.mrf.mxu0  ;;  %v8424_v36 = vadd.f32 %v8136_v35, %v8085_v3  ;;  %v9343_v11 = vld [vmem:[#allocation90_spill] sm:$0xff] }
 0x5cf   : > { %v3700_v6 = vld [vmem:[#allocation14 + $0x6e0] sm:$0xff]  ;;  %4405 = vmatmul.f32.gmra.mxu0 %v4160_v13  ;;  %4533 = vmatpush.msra.mxu1 %v3652_v12  ;;  %v4140_v42 = vmul.f32 %v4121_v15, %v8417_v50 }
 0x5d0   : > { %v3670_v32 = vld [vmem:[#allocation14 + $0x320] sm:$0xff]  ;;  %4588 = vmatpush.msra.mxu3 %v3687_v62  ;;  %4620 = vmatpush.msrb.mxu0 %v3700_v6 }
 0x5d1   : > { %v3651_v4 = vld [vmem:[#allocation14 + $0xc0] sm:$0xff]  ;;  %4560 = vmatpush.msra.mxu2 %v3670_v32 }
 0x5d2   : > { %v3686_v38 = vld [vmem:[#allocation14 + $0x520] sm:$0xff]  ;;  %4534 = vmatpush.msra.mxu1 %v3651_v4  ;;  %v9346_v4 = vld [vmem:[#allocation42_spill] sm:$0xff] }
 0x5d3   : > { %v3699_v33 = vld [vmem:[#allocation14 + $0x6c0] sm:$0xff]  ;;  %4589 = vmatpush.msra.mxu3 %v3686_v38  ;;  %v4037_v19 = vpop.f32.mrf.mxu1 }
 0x5d4   : > { %v3669_v20 = vld [vmem:[#allocation14 + $0x300] sm:$0xff]  ;;  %4621 = vmatpush.msrb.mxu0 %v3699_v33  ;;  %4347 = vmatmul.f32.gmra.mxu2 %v4158_v39 }
 0x5d5   : > { %v3650_v8 = vld [vmem:[#allocation14 + $0xa0] sm:$0xff]  ;;  %4561 = vmatpush.msra.mxu2 %v3669_v20  ;;  %4376 = vmatmul.f32.gmra.mxu3 %v4159_v45  ;;  %v4063_v62 = vpop.f32.mrf.mxu2  ;;  %v4092_v3 = vpop.f32.mrf.mxu3  ;;  %v9347_v20 = vld [vmem:[#allocation81_spill] sm:$0xff] }
 0x5d6   : > { %v3698_v30 = vld [vmem:[#allocation14 + $0x6a0] sm:$0xff]  ;;  %4535 = vmatpush.msra.mxu1 %v3650_v8  ;;  %v4138_v33 = vmul.f32 %v4063_v62, %v8424_v36  ;;  %v4124_v54 = vpop.f32.mrf.mxu0 }
 0x5d7   : > { %v3685_v16 = vld [vmem:[#allocation14 + $0x500] sm:$0xff]  ;;  %4622 = vmatpush.msrb.mxu0 %v3698_v30  ;;  %4425 = vmatmul.f32.vlgmr.msrb.gmra.mxu1 %v4137_v5 }
 0x5d8   : > { %v3668_v1 = vld [vmem:[#allocation14 + $0x2e0] sm:$0xff]  ;;  %4590 = vmatpush.msra.mxu3 %v3685_v16  ;;  %4512 = vmatmul.f32.vlgmr.msra.gmra.mxu0 %v4140_v42 }
 0x5d9   : > { %v3649_v51 = vld [vmem:[#allocation14 + $0x80] sm:$0xff]  ;;  %4562 = vmatpush.msra.mxu2 %v3668_v1 }
 0x5da   : > { %v3684_v49 = vld [vmem:[#allocation14 + $0x4e0] sm:$0xff]  ;;  %4536 = vmatpush.msra.mxu1 %v3649_v51 }
 0x5db   : > { %v3697_v21 = vld [vmem:[#allocation14 + $0x680] sm:$0xff]  ;;  %4591 = vmatpush.msra.mxu3 %v3684_v49 }
 0x5dc   : > { %v3667_v44 = vld [vmem:[#allocation14 + $0x2c0] sm:$0xff]  ;;  %4623 = vmatpush.msrb.mxu0 %v3697_v21  ;;  %4454 = vmatmul.f32.vlgmr.msrb.gmra.mxu2 %v4138_v33  ;;  %v9354_v33 = vld [vmem:[#allocation54_spill] sm:$0xff] }
 0x5dd   : > { %v3648_v48 = vld [vmem:[#allocation14 + $0x60] sm:$0xff]  ;;  %4563 = vmatpush.msra.mxu2 %v3667_v44 }
 0x5de   : > { %v3683_v59 = vld [vmem:[#allocation14 + $0x4c0] sm:$0xff]  ;;  %4537 = vmatpush.msra.mxu1 %v3648_v48  ;;  %v9350_v48 = vld [vmem:[#allocation37_spill] sm:$0xff] }
 0x5df   : > { %v3696_v0 = vld [vmem:[#allocation14 + $0x660] sm:$0xff]  ;;  %4592 = vmatpush.msra.mxu3 %v3683_v59 }
 0x5e0   : > { %v3666_v53 = vld [vmem:[#allocation14 + $0x2a0] sm:$0xff]  ;;  %4624 = vmatpush.msrb.mxu0 %v3696_v0 }
 0x5e1   : > { %v9344_v13 = vld [vmem:[#allocation83_spill] sm:$0xff]  ;;  %4564 = vmatpush.msra.mxu2 %v3666_v53  ;;  %v9349_v44 = vld [vmem:[#allocation44_spill] sm:$0xff] }
 0x5e2   : > { %v8428_v12 = vadd.f32 %v9344_v13, %v9343_v11  ;;  %v3647_v6 = vld [vmem:[#allocation14 + $0x40] sm:$0xff]  ;;  %v8444_v59 = vadd.f32 %v9350_v48, %v9349_v44 }
 0x5e3   : > { %v9345_v32 = vld [vmem:[#allocation35_spill] sm:$0xff]  ;;  %4538 = vmatpush.msra.mxu1 %v3647_v6  ;;  %v9352_v13 = vld [vmem:[#allocation84_spill] sm:$0xff]  ;;  %v4066_v6 = vpop.f32.mrf.mxu2 }
 0x5e4   : > { %v8432_v38 = vadd.f32 %v9346_v4, %v9345_v32  ;;  %v3695_v35 = vld [vmem:[#allocation14 + $0x640] sm:$0xff]  ;;  %v4139_v39 = vmul.f32 %v4092_v3, %v8428_v12 }
 0x5e5   : > { %v9348_v56 = vld [vmem:[#allocation43_spill] sm:$0xff]  ;;  %4625 = vmatpush.msrb.mxu0 %v3695_v35  ;;  %v9353_v4 = vld [vmem:[#allocation52_spill] sm:$0xff]  ;;  %v4146_v35 = vmul.f32 %v4066_v6, %v8444_v59 }
 0x5e6   : > { %v8437_v8 = vadd.f32 %v9348_v56, %v9347_v20  ;;  %v3682_v30 = vld [vmem:[#allocation14 + $0x4a0] sm:$0xff]  ;;  %v4145_v45 = vmul.f32 %v4037_v19, %v8432_v38  ;;  %4483 = vmatmul.f32.vlgmr.msrb.gmra.mxu3 %v4139_v39  ;;  %v8452_v3 = vadd.f32 %v9354_v33, %v9353_v4  ;;  %v4095_v20 = vpop.f32.mrf.mxu3  ;;  %v9355_v39 = vld [vmem:[#allocation82_spill] sm:$0xff]  ;;  %v9356_v19 = vld [vmem:[#allocation45_spill] sm:$0xff] }
 0x5e7   : > { %v3665_v16 = vld [vmem:[#allocation14 + $0x280] sm:$0xff]  ;;  %4593 = vmatpush.msra.mxu3 %v3682_v30  ;;  %v8457_v30 = vadd.f32 %v9356_v19, %v9355_v39  ;;  %4457 = vmatmul.f32.gmra.mxu2 %v4146_v35  ;;  %v9360_v33 = vld [vmem:[#allocation89_spill] sm:$0xff] }
 0x5e8   : > { %v4148_v5 = vmul.f32 %v4124_v54, %v8437_v8  ;;  %v3646_v15 = vld [vmem:[#allocation14 + $0x20] sm:$0xff]  ;;  %4428 = vmatmul.f32.gmra.mxu1 %v4145_v45  ;;  %4565 = vmatpush.msra.mxu2 %v3665_v16  ;;  %v4040_v54 = vpop.f32.mrf.mxu1  ;;  %v9361_v39 = vld [vmem:[#allocation53_spill] sm:$0xff] }
 0x5e9   : > { %v3681_v1 = vld [vmem:[#allocation14 + $0x480] sm:$0xff]  ;;  %4539 = vmatpush.msra.mxu1 %v3646_v15  ;;  %v4127_v15 = vpop.f32.mrf.mxu0 }
 0x5ea   : > { %v3694_v42 = vld [vmem:[#allocation14 + $0x620] sm:$0xff]  ;;  %4515 = vmatmul.f32.gmra.mxu0 %v4148_v5  ;;  %4594 = vmatpush.msra.mxu3 %v3681_v1  ;;  %v4153_v5 = vmul.f32 %v4040_v54, %v8452_v3 }
 0x5eb   : > { %v3664_v51 = vld [vmem:[#allocation14 + $0x260] sm:$0xff]  ;;  %4626 = vmatpush.msrb.mxu0 %v3694_v42  ;;  %v4156_v42 = vmul.f32 %v4127_v15, %v8457_v30 }
 0x5ec   : > { %v3645_v49 = vld [vmem:[#allocation14] sm:$0xff]  ;;  %4566 = vmatpush.msra.mxu2 %v3664_v51 }
 0x5ed   : > { %v3680_v21 = vld [vmem:[#allocation14 + $0x460] sm:$0xff]  ;;  %4540 = vmatpush.msra.mxu1 %v3645_v49 }
 0x5ee   : > { %v3693_v0 = vld [vmem:[#allocation14 + $0x600] sm:$0xff]  ;;  %4595 = vmatpush.msra.mxu3 %v3680_v21 }
 0x5ef   : > { %v3663_v53 = vld [vmem:[#allocation14 + $0x240] sm:$0xff]  ;;  %4627 = vmatpush.msrb.mxu0 %v3693_v0 }
 0x5f0   : > { %v9351_v11 = vld [vmem:[#allocation91_spill] sm:$0xff]  ;;  %4567 = vmatpush.msra.mxu2 %v3663_v53  ;;  %4431 = vmatmul.f32.gmra.mxu1 %v4153_v5  ;;  %v9359_v4 = vld [vmem:[#allocation100_spill] sm:$0xff] }
 0x5f1   : > { %v8448_v62 = vadd.f32 %v9352_v13, %v9351_v11  ;;  %v3679_v32 = vld [vmem:[#allocation14 + $0x440] sm:$0xff]  ;;  %v9358_v11 = vld [vmem:[#allocation38_spill] sm:$0xff]  ;;  %v8468_v35 = vadd.f32 %v9360_v33, %v9359_v4 }
 0x5f2   : > { %v3724_v56 = vld [vmem:[#allocation14 + $0x9e0] sm:$0xff]  ;;  %4596 = vmatpush.msra.mxu3 %v3679_v32  ;;  %4518 = vmatmul.f32.gmra.mxu0 %v4156_v42 }
 0x5f3   : > { %v4147_v45 = vmul.f32 %v4095_v20, %v8448_v62  ;;  %v3772_v16 = vld [vmem:[#allocation14 + $0xfe0] sm:$0xff]  ;;  %4641 = vmatpush.msrb.mxu1 %v3724_v56  ;;  %v4069_v20 = vpop.f32.mrf.mxu2 }
 0x5f4   : > { %v3662_v1 = vld [vmem:[#allocation14 + $0x220] sm:$0xff]  ;;  %4728 = vmatpush.msra.mxu0 %v3772_v16  ;;  %v4098_v16 = vpop.f32.mrf.mxu3 }
 0x5f5   : > { %4486 = vmatmul.f32.gmra.mxu3 %v4147_v45  ;;  %v3678_v51 = vld [vmem:[#allocation14 + $0x420] sm:$0xff]  ;;  %4568 = vmatpush.msra.mxu2 %v3662_v1  ;;  %v9364_v1 = vld [vmem:[#allocation46_spill] sm:$0xff] }
 0x5f6   : > { %v3723_v49 = vld [vmem:[#allocation14 + $0x9c0] sm:$0xff]  ;;  %4597 = vmatpush.msra.mxu3 %v3678_v51  ;;  %v4155_v51 = vmul.f32 %v4098_v16, %v8468_v35 }
 0x5f7   : > { %v3771_v21 = vld [vmem:[#allocation14 + $0xfc0] sm:$0xff]  ;;  %4642 = vmatpush.msrb.mxu1 %v3723_v49  ;;  %v4043_v49 = vpop.f32.mrf.mxu1 }
 0x5f8   : > { %v3661_v44 = vld [vmem:[#allocation14 + $0x200] sm:$0xff]  ;;  %4729 = vmatpush.msra.mxu0 %v3771_v21 }
 0x5f9   : > { %v3677_v48 = vld [vmem:[#allocation14 + $0x400] sm:$0xff]  ;;  %4569 = vmatpush.msra.mxu2 %v3661_v44 }
 0x5fa   : > { %v3722_v0 = vld [vmem:[#allocation14 + $0x9a0] sm:$0xff]  ;;  %4598 = vmatpush.msra.mxu3 %v3677_v48 }
 0x5fb   : > { %v9357_v53 = vld [vmem:[#allocation55_spill] sm:$0xff]  ;;  %4643 = vmatpush.msrb.mxu1 %v3722_v0  ;;  %v9363_v15 = vld [vmem:[#allocation92_spill] sm:$0xff] }
 0x5fc   : > { %v8464_v13 = vadd.f32 %v9358_v11, %v9357_v53  ;;  %v3770_v6 = vld [vmem:[#allocation14 + $0xfa0] sm:$0xff]  ;;  %v8477_v42 = vadd.f32 %v9364_v1, %v9363_v15  ;;  %v4130_v53 = vpop.f32.mrf.mxu0  ;;  %v9368_v15 = vld [vmem:[#allocation41_spill] sm:$0xff] }
 0x5fd   : > { %v3740_v32 = vld [vmem:[#allocation14 + $0xbe0] sm:$0xff]  ;;  %4730 = vmatpush.msra.mxu0 %v3770_v6  ;;  %4489 = vmatmul.f32.gmra.mxu3 %v4155_v51  ;;  %v4072_v51 = vpop.f32.mrf.mxu2 }
 0x5fe   : > { %v3721_v56 = vld [vmem:[#allocation14 + $0x980] sm:$0xff]  ;;  %v4154_v54 = vmul.f32 %v4069_v20, %v8464_v13  ;;  %9365 = vst [vmem:[#allocation40_spill] sm:$0xff] %v8477_v42  ;;  %4670 = vmatpush.msrb.mxu2 %v3740_v32  ;;  %v4164_v48 = vmul.f32 %v4130_v53, %v8477_v42 }
 0x5ff   : > { %v9362_v19 = vld [vmem:[#allocation67_spill] sm:$0xff]  ;;  %4644 = vmatpush.msrb.mxu1 %v3721_v56 }
 0x600   : > { %v8472_v45 = vadd.f32 %v9362_v19, %v9361_v39  ;;  %v3769_v5 = vld [vmem:[#allocation14 + $0xf80] sm:$0xff]  ;;  %4460 = vmatmul.f32.gmra.mxu2 %v4154_v54  ;;  %4521 = vmatmul.f32.gmra.mxu0 %v4164_v48  ;;  %v9366_v39 = vld [vmem:[#allocation74_spill] sm:$0xff] }
 0x601   : > { %v3756_v21 = vld [vmem:[#allocation14 + $0xde0] sm:$0xff]  ;;  %4731 = vmatpush.msra.mxu0 %v3769_v5  ;;  %v9369_v5 = vld [vmem:[#allocation26_spill] sm:$0xff] }
 0x602   : > { %v4161_v44 = vmul.f32 %v4043_v49, %v8472_v45  ;;  %v3739_v11 = vld [vmem:[#allocation14 + $0xbc0] sm:$0xff]  ;;  %4699 = vmatpush.msrb.mxu3 %v3756_v21  ;;  %v8488_v1 = vadd.f32 %v9369_v5, %v9368_v15 }
 0x603   : > { %v3720_v0 = vld [vmem:[#allocation14 + $0x960] sm:$0xff]  ;;  %4671 = vmatpush.msrb.mxu2 %v3739_v11 }
 0x604   : > { %v3755_v4 = vld [vmem:[#allocation14 + $0xdc0] sm:$0xff]  ;;  %4434 = vmatmul.f32.gmra.mxu1 %v4161_v44  ;;  %v4101_v44 = vpop.f32.mrf.mxu3 }
 0x605   : > { %v3768_v33 = vld [vmem:[#allocation14 + $0xf60] sm:$0xff]  ;;  %4645 = vmatpush.msrb.mxu1 %v3720_v0  ;;  %4700 = vmatpush.msrb.mxu3 %v3755_v4  ;;  %v4163_v11 = vmul.f32 %v4101_v44, %v8488_v1  ;;  %v3613_v0 = vmul.f32 %v8268_v10, %v8332_v34 }
 0x606   : > { %v3738_v20 = vld [vmem:[#allocation14 + $0xba0] sm:$0xff]  ;;  %4732 = vmatpush.msra.mxu0 %v3768_v33  ;;  %v3616_v33 = vmul.f32 %v8270_v41, %v8338_v43  ;;  %v3614_v41 = vmul.f32 %v8272_v63, %v8344_v37 }
 0x607   : > { %v3719_v6 = vld [vmem:[#allocation14 + $0x940] sm:$0xff]  ;;  %4672 = vmatpush.msrb.mxu2 %v3738_v20  ;;  %4492 = vmatmul.f32.gmra.mxu3 %v4163_v11 }
 0x608   : > { %v3754_v32 = vld [vmem:[#allocation14 + $0xda0] sm:$0xff]  ;;  %4646 = vmatpush.msrb.mxu1 %v3719_v6  ;;  %4628 = vmatmul.f32.vlgmr.msrb.gmra.mxu0 %v3616_v33 }
 0x609   : > { %v9367_v19 = vld [vmem:[#allocation39_spill] sm:$0xff]  ;;  %4701 = vmatpush.msrb.mxu3 %v3754_v32 }
 0x60a   : > { %v8484_v16 = vadd.f32 %v9367_v19, %v9366_v39  ;;  %v3767_v56 = vld [vmem:[#allocation14 + $0xf40] sm:$0xff] }
 0x60b   : > { %v3737_v54 = vld [vmem:[#allocation14 + $0xb80] sm:$0xff]  ;;  %4733 = vmatpush.msra.mxu0 %v3767_v56 }
 0x60c   : > { %v3718_v49 = vld [vmem:[#allocation14 + $0x920] sm:$0xff]  ;;  %v4162_v21 = vmul.f32 %v4072_v51, %v8484_v16  ;;  %4673 = vmatpush.msrb.mxu2 %v3737_v54  ;;  %4541 = vmatmul.f32.vlgmr.msra.gmra.mxu1 %v3613_v0  ;;  %v3615_v51 = vmul.f32 %v8274_v25, %v8348_v14 }
 0x60d   : > { %v3766_v53 = vld [vmem:[#allocation14 + $0xf20] sm:$0xff]  ;;  %4647 = vmatpush.msrb.mxu1 %v3718_v49 }
 0x60e   : > { %v3753_v48 = vld [vmem:[#allocation14 + $0xd80] sm:$0xff]  ;;  %4463 = vmatmul.f32.gmra.mxu2 %v4162_v21  ;;  %4734 = vmatpush.msra.mxu0 %v3766_v53  ;;  %v3621_v21 = vmul.f32 %v8276_v57, %v8352_v29  ;;  %v3624_v53 = vmul.f32 %v8278_v46, %v8357_v23  ;;  %v3622_v46 = vmul.f32 %v8280_v28, %v8364_v27 }
 0x60f   : > { %v3736_v4 = vld [vmem:[#allocation14 + $0xb60] sm:$0xff]  ;;  %4702 = vmatpush.msrb.mxu3 %v3753_v48 }
 0x610   : > { %v3717_v20 = vld [vmem:[#allocation14 + $0x900] sm:$0xff]  ;;  %4674 = vmatpush.msrb.mxu2 %v3736_v4  ;;  %4599 = vmatmul.f32.vlgmr.msra.gmra.mxu3 %v3615_v51 }
 0x611   : > { %v3752_v6 = vld [vmem:[#allocation14 + $0xd60] sm:$0xff]  ;;  %4648 = vmatpush.msrb.mxu1 %v3717_v20  ;;  %4631 = vmatmul.f32.gmra.mxu0 %v3624_v53 }
 0x612   : > { %v3765_v32 = vld [vmem:[#allocation14 + $0xf00] sm:$0xff]  ;;  %4703 = vmatpush.msrb.mxu3 %v3752_v6 }
 0x613   : > { %v3735_v39 = vld [vmem:[#allocation14 + $0xb40] sm:$0xff]  ;;  %4735 = vmatpush.msra.mxu0 %v3765_v32  ;;  %v3623_v32 = vmul.f32 %v8282_v17, %v8368_v40 }
 0x614   : > { %v3716_v19 = vld [vmem:[#allocation14 + $0x8e0] sm:$0xff]  ;;  %4675 = vmatpush.msrb.mxu2 %v3735_v39  ;;  %4544 = vmatmul.f32.gmra.mxu1 %v3621_v21 }
 0x615   : > { %v3751_v56 = vld [vmem:[#allocation14 + $0xd40] sm:$0xff]  ;;  %4649 = vmatpush.msrb.mxu1 %v3716_v19  ;;  %v3629_v19 = vmul.f32 %v8284_v22, %v8372_v60 }
 0x616   : > { %v3764_v10 = vld [vmem:[#allocation14 + $0xee0] sm:$0xff]  ;;  %4704 = vmatpush.msrb.mxu3 %v3751_v56  ;;  %4570 = vmatmul.f32.vlgmr.msra.gmra.mxu2 %v3614_v41 }
 0x617   : > { %v3734_v54 = vld [vmem:[#allocation14 + $0xb20] sm:$0xff]  ;;  %4736 = vmatpush.msra.mxu0 %v3764_v10  ;;  %v3632_v10 = vmul.f32 %v8286_v52, %v8377_v9  ;;  %v3630_v52 = vmul.f32 %v8288_v55, %v8384_v31 }
 0x618   : > { %v3715_v15 = vld [vmem:[#allocation14 + $0x8c0] sm:$0xff]  ;;  %4676 = vmatpush.msrb.mxu2 %v3734_v54  ;;  %4602 = vmatmul.f32.gmra.mxu3 %v3623_v32 }
 0x619   : > { %v3763_v5 = vld [vmem:[#allocation14 + $0xec0] sm:$0xff]  ;;  %4650 = vmatpush.msrb.mxu1 %v3715_v15  ;;  %4634 = vmatmul.f32.gmra.mxu0 %v3632_v10 }
 0x61a   : > { %v3750_v49 = vld [vmem:[#allocation14 + $0xd20] sm:$0xff]  ;;  %4737 = vmatpush.msra.mxu0 %v3763_v5 }
 0x61b   : > { %v3733_v44 = vld [vmem:[#allocation14 + $0xb00] sm:$0xff]  ;;  %4705 = vmatpush.msrb.mxu3 %v3750_v49 }
 0x61c   : > { %v3714_v63 = vld [vmem:[#allocation14 + $0x8a0] sm:$0xff]  ;;  %4677 = vmatpush.msrb.mxu2 %v3733_v44  ;;  %4547 = vmatmul.f32.gmra.mxu1 %v3629_v19  ;;  %v3631_v44 = vmul.f32 %v8290_v7, %v8388_v61 }
 0x61d   : > { %v3749_v11 = vld [vmem:[#allocation14 + $0xd00] sm:$0xff]  ;;  %4651 = vmatpush.msrb.mxu1 %v3714_v63 }
 0x61e   : > { %v3762_v48 = vld [vmem:[#allocation14 + $0xea0] sm:$0xff]  ;;  %4706 = vmatpush.msrb.mxu3 %v3749_v11  ;;  %4573 = vmatmul.f32.gmra.mxu2 %v3622_v46  ;;  %v4872_v46 = vld [vmem:[#allocation13 + $0xe98] sm:$0xff] }
 0x61f   : > { %v3732_v25 = vld [vmem:[#allocation14 + $0xae0] sm:$0xff]  ;;  %4738 = vmatpush.msra.mxu0 %v3762_v48 }
 0x620   : > { %v3713_v0 = vld [vmem:[#allocation14 + $0x880] sm:$0xff]  ;;  %4678 = vmatpush.msrb.mxu2 %v3732_v25  ;;  %v9371_v25 = vld [vmem:[#allocation58_spill] sm:$0xff]  ;;  %4605 = vmatmul.f32.gmra.mxu3 %v3631_v44 }
 0x621   : > { %v3748_v4 = vld [vmem:[#allocation14 + $0xce0] sm:$0xff]  ;;  %4652 = vmatpush.msrb.mxu1 %v3713_v0  ;;  %v3640_v0 = vmul.f32 %v9371_v25, %v8397_v2  ;;  %v3618_v25 = vmul.f32 %v8304_v24, %v8424_v36 }
 0x622   : > { %v3761_v57 = vld [vmem:[#allocation14 + $0xe80] sm:$0xff]  ;;  %4707 = vmatpush.msrb.mxu3 %v3748_v4 }
 0x623   : > { %v3731_v33 = vld [vmem:[#allocation14 + $0xac0] sm:$0xff]  ;;  %4739 = vmatpush.msra.mxu0 %v3761_v57  ;;  %v4880_v57 = vld [vmem:[#allocation13 + $0xf98] sm:$0xff] }
 0x624   : > { %v3712_v20 = vld [vmem:[#allocation14 + $0x860] sm:$0xff]  ;;  %4679 = vmatpush.msrb.mxu2 %v3731_v33  ;;  %4637 = vmatmul.f32.gmra.mxu0 %v3640_v0  ;;  %v4840_v0 = vld [vmem:[#allocation13 + $0xa98] sm:$0xff] }
 0x625   : > { %v3760_v6 = vld [vmem:[#allocation14 + $0xe60] sm:$0xff]  ;;  %4653 = vmatpush.msrb.mxu1 %v3712_v20 }
 0x626   : > { %v3747_v39 = vld [vmem:[#allocation14 + $0xcc0] sm:$0xff]  ;;  %4740 = vmatpush.msra.mxu0 %v3760_v6  ;;  %4576 = vmatmul.f32.gmra.mxu2 %v3630_v52  ;;  %v4856_v52 = vld [vmem:[#allocation13 + $0xc98] sm:$0xff] }
 0x627   : > { %v3730_v56 = vld [vmem:[#allocation14 + $0xaa0] sm:$0xff]  ;;  %4708 = vmatpush.msrb.mxu3 %v3747_v39  ;;  %v9372_v39 = vld [vmem:[#allocation94_spill] sm:$0xff] }
 0x628   : > { %v3711_v28 = vld [vmem:[#allocation14 + $0x840] sm:$0xff]  ;;  %4680 = vmatpush.msrb.mxu2 %v3730_v56  ;;  %v3638_v19 = vmul.f32 %v9372_v39, %v8404_v47  ;;  %v4832_v39 = vld [vmem:[#allocation13 + $0x998] sm:$0xff] }
 0x629   : > { %v3746_v54 = vld [vmem:[#allocation14 + $0xca0] sm:$0xff]  ;;  %4654 = vmatpush.msrb.mxu1 %v3711_v28 }
 0x62a   : > { %v3759_v15 = vld [vmem:[#allocation14 + $0xe40] sm:$0xff]  ;;  %4709 = vmatpush.msrb.mxu3 %v3746_v54  ;;  %v4864_v54 = vld [vmem:[#allocation13 + $0xd98] sm:$0xff] }
 0x62b   : > { %v3729_v17 = vld [vmem:[#allocation14 + $0xa80] sm:$0xff]  ;;  %4741 = vmatpush.msra.mxu0 %v3759_v15  ;;  %v9374_v15 = vld [vmem:[#allocation101_spill] sm:$0xff] }
 0x62c   : > { %v3710_v41 = vld [vmem:[#allocation14 + $0x820] sm:$0xff]  ;;  %4681 = vmatpush.msrb.mxu2 %v3729_v17  ;;  %v3617_v17 = vmul.f32 %v9374_v15, %v8412_v26 }
 0x62d   : > { %v3745_v5 = vld [vmem:[#allocation14 + $0xc80] sm:$0xff]  ;;  %4655 = vmatpush.msrb.mxu1 %v3710_v41  ;;  %v4878_v41 = vld [vmem:[#allocation13 + $0xf88] sm:$0xff] }
 0x62e   : > { %v3758_v22 = vld [vmem:[#allocation14 + $0xe20] sm:$0xff]  ;;  %4710 = vmatpush.msrb.mxu3 %v3745_v5  ;;  %4579 = vmatmul.f32.gmra.mxu2 %v3638_v19  ;;  %v9375_v5 = vld [vmem:[#allocation57_spill] sm:$0xff] }
 0x62f   : > { %v3728_v51 = vld [vmem:[#allocation14 + $0xa60] sm:$0xff]  ;;  %4742 = vmatpush.msra.mxu0 %v3758_v22  ;;  %v3620_v22 = vmul.f32 %v9375_v5, %v8417_v50  ;;  %v4846_v19 = vld [vmem:[#allocation13 + $0xb88] sm:$0xff]  ;;  %v4816_v5 = vld [vmem:[#allocation13 + $0x798] sm:$0xff] }
 0x630   : > { %v3709_v49 = vld [vmem:[#allocation14 + $0x800] sm:$0xff]  ;;  %4682 = vmatpush.msrb.mxu2 %v3728_v51 }
 0x631   : > { %v3757_v21 = vld [vmem:[#allocation14 + $0xe00] sm:$0xff]  ;;  %4656 = vmatpush.msrb.mxu1 %v3709_v49  ;;  %v4879_v49 = vld [vmem:[#allocation13 + $0xf90] sm:$0xff] }
 0x632   : > { %v3744_v53 = vld [vmem:[#allocation14 + $0xc60] sm:$0xff]  ;;  %4743 = vmatpush.msra.mxu0 %v3757_v21  ;;  %v4870_v21 = vld [vmem:[#allocation13 + $0xe88] sm:$0xff] }
 0x633   : > { %v9370_v63 = vld [vmem:[#allocation56_spill] sm:$0xff]  ;;  %4711 = vmatpush.msrb.mxu3 %v3744_v53  ;;  %v9373_v10 = vld [vmem:[#allocation95_spill] sm:$0xff]  ;;  %4744 = vmatmul.f32.vlgmr.msra.gmra.mxu0 %v3620_v22  ;;  %v4871_v53 = vld [vmem:[#allocation13 + $0xe90] sm:$0xff] }
 0x634   : > { %v3637_v11 = vmul.f32 %v9370_v63, %v8392_v58  ;;  %v3727_v48 = vld [vmem:[#allocation14 + $0xa40] sm:$0xff]  ;;  %4972 = vmatpush.msrb.mxu0 %v4880_v57  ;;  %v3639_v28 = vmul.f32 %v9373_v10, %v8408_v18  ;;  %v4848_v63 = vld [vmem:[#allocation13 + $0xb98] sm:$0xff]  ;;  %v4863_v57 = vld [vmem:[#allocation13 + $0xd90] sm:$0xff] }
 0x635   : > { %v3743_v55 = vld [vmem:[#allocation14 + $0xc40] sm:$0xff]  ;;  %4683 = vmatpush.msrb.mxu2 %v3727_v48  ;;  %v4847_v10 = vld [vmem:[#allocation13 + $0xb90] sm:$0xff] }
 0x636   : > { %v4877_v4 = vld [vmem:[#allocation13 + $0xf80] sm:$0xff]  ;;  %4550 = vmatmul.f32.gmra.mxu1 %v3637_v11  ;;  %4712 = vmatpush.msrb.mxu3 %v3743_v55  ;;  %v4862_v11 = vld [vmem:[#allocation13 + $0xd88] sm:$0xff]  ;;  %v9376_v55 = vld [vmem:[#allocation70_spill] sm:$0xff] }
 0x637   : > { %v3726_v7 = vld [vmem:[#allocation14 + $0xa20] sm:$0xff]  ;;  %4885 = vmatpush.msra.mxu1 %v4877_v4  ;;  %4973 = vmatpush.msrb.mxu0 %v4872_v46  ;;  %v3619_v4 = vmul.f32 %v9376_v55, %v8428_v12  ;;  %v9380_v22 = vld [vmem:[#allocation85_spill] sm:$0xff] }
 0x638   : > { %v3742_v33 = vld [vmem:[#allocation14 + $0xc20] sm:$0xff]  ;;  %4684 = vmatpush.msrb.mxu2 %v3726_v7  ;;  %4608 = vmatmul.f32.gmra.mxu3 %v3639_v28  ;;  %v4824_v28 = vld [vmem:[#allocation13 + $0x898] sm:$0xff] }
 0x639   : > { %v4869_v20 = vld [vmem:[#allocation13 + $0xe80] sm:$0xff]  ;;  %4713 = vmatpush.msrb.mxu3 %v3742_v33  ;;  %4974 = vmatpush.msrb.mxu0 %v4864_v54  ;;  %v4838_v54 = vld [vmem:[#allocation13 + $0xa88] sm:$0xff] }
 0x63a   : > { %v3725_v6 = vld [vmem:[#allocation14 + $0xa00] sm:$0xff]  ;;  %4886 = vmatpush.msra.mxu1 %v4869_v20  ;;  %v4854_v20 = vld [vmem:[#allocation13 + $0xc88] sm:$0xff] }
 0x63b   : > { %v3741_v32 = vld [vmem:[#allocation14 + $0xc00] sm:$0xff]  ;;  %4685 = vmatpush.msrb.mxu2 %v3725_v6  ;;  %4975 = vmatpush.msrb.mxu0 %v4856_v52  ;;  %v9381_v52 = vld [vmem:[#allocation93_spill] sm:$0xff] }
 0x63c   : > { %v4861_v56 = vld [vmem:[#allocation13 + $0xd80] sm:$0xff]  ;;  %4714 = vmatpush.msrb.mxu3 %v3741_v32  ;;  %4686 = vmatmul.f32.vlgmr.msrb.gmra.mxu2 %v3618_v25  ;;  %v4855_v32 = vld [vmem:[#allocation13 + $0xc90] sm:$0xff]  ;;  %v4808_v25 = vld [vmem:[#allocation13 + $0x698] sm:$0xff] }
 0x63d   : > { %4887 = vmatpush.msra.mxu1 %v4861_v56  ;;  %v4853_v51 = vld [vmem:[#allocation13 + $0xc80] sm:$0xff]  ;;  %4914 = vmatpush.msra.mxu2 %v4878_v41 }
 0x63e   : > { %4657 = vmatmul.f32.vlgmr.msrb.gmra.mxu1 %v3617_v17  ;;  %v4845_v44 = vld [vmem:[#allocation13 + $0xb80] sm:$0xff]  ;;  %4943 = vmatpush.msra.mxu3 %v4879_v49  ;;  %v9379_v17 = vld [vmem:[#allocation78_spill] sm:$0xff] }
 0x63f   : > { %4888 = vmatpush.msra.mxu1 %v4853_v51  ;;  %4915 = vmatpush.msra.mxu2 %v4870_v21  ;;  %v4837_v48 = vld [vmem:[#allocation13 + $0xa80] sm:$0xff]  ;;  %v3626_v41 = vmul.f32 %v9379_v17, %v8444_v59  ;;  %v3627_v51 = vmul.f32 %v9380_v22, %v8448_v62  ;;  %v4839_v49 = vld [vmem:[#allocation13 + $0xa90] sm:$0xff]  ;;  %v3633_v21 = vmul.f32 %v9381_v52, %v8452_v3  ;;  %v4790_v52 = vld [vmem:[#allocation13 + $0x488] sm:$0xff] }
 0x640   : > { %4944 = vmatpush.msra.mxu3 %v4871_v53  ;;  %4976 = vmatpush.msrb.mxu0 %v4848_v63  ;;  %v9377_v7 = vld [vmem:[#allocation87_spill] sm:$0xff]  ;;  %v9378_v46 = vld [vmem:[#allocation88_spill] sm:$0xff]  ;;  %v4807_v17 = vld [vmem:[#allocation13 + $0x690] sm:$0xff] }
 0x641   : > { %4889 = vmatpush.msra.mxu1 %v4845_v44  ;;  %4916 = vmatpush.msra.mxu2 %v4862_v11  ;;  %v3625_v33 = vmul.f32 %v9377_v7, %v8432_v38  ;;  %v3628_v6 = vmul.f32 %v9378_v46, %v8437_v8  ;;  %v4829_v24 = vld [vmem:[#allocation13 + $0x980] sm:$0xff]  ;;  %v4830_v44 = vld [vmem:[#allocation13 + $0x988] sm:$0xff] }
 0x642   : > { %4715 = vmatmul.f32.vlgmr.msrb.gmra.mxu3 %v3619_v4  ;;  %4977 = vmatpush.msrb.mxu0 %v4840_v0  ;;  %v4821_v56 = vld [vmem:[#allocation13 + $0x880] sm:$0xff]  ;;  %v4822_v0 = vld [vmem:[#allocation13 + $0x888] sm:$0xff]  ;;  %v4823_v4 = vld [vmem:[#allocation13 + $0x890] sm:$0xff] }
 0x643   : > { %4890 = vmatpush.msra.mxu1 %v4837_v48  ;;  %4945 = vmatpush.msra.mxu3 %v4863_v57  ;;  %v4813_v15 = vld [vmem:[#allocation13 + $0x780] sm:$0xff]  ;;  %v4831_v48 = vld [vmem:[#allocation13 + $0x990] sm:$0xff]  ;;  %v4800_v57 = vld [vmem:[#allocation13 + $0x598] sm:$0xff] }
 0x644   : > { %4747 = vmatmul.f32.gmra.mxu0 %v3628_v6  ;;  %4917 = vmatpush.msra.mxu2 %v4854_v20  ;;  %v9382_v53 = vld [vmem:[#allocation27_spill] sm:$0xff]  ;;  %v4814_v7 = vld [vmem:[#allocation13 + $0x788] sm:$0xff]  ;;  %v9383_v20 = vld [vmem:[#allocation86_spill] sm:$0xff] }
 0x645   : > { %4891 = vmatpush.msra.mxu1 %v4829_v24  ;;  %4946 = vmatpush.msra.mxu3 %v4855_v32  ;;  %v3636_v63 = vmul.f32 %v9382_v53, %v8457_v30  ;;  %v4805_v11 = vld [vmem:[#allocation13 + $0x680] sm:$0xff]  ;;  %v3634_v46 = vmul.f32 %v9383_v20, %v8464_v13  ;;  %v4792_v6 = vld [vmem:[#allocation13 + $0x498] sm:$0xff]  ;;  %v4774_v20 = vld [vmem:[#allocation13 + $0x288] sm:$0xff] }
 0x646   : > { %4660 = vmatmul.f32.gmra.mxu1 %v3625_v33  ;;  %4978 = vmatpush.msrb.mxu0 %v4832_v39  ;;  %v4797_v55 = vld [vmem:[#allocation13 + $0x580] sm:$0xff]  ;;  %v4815_v39 = vld [vmem:[#allocation13 + $0x790] sm:$0xff]  ;;  %v4768_v53 = vld [vmem:[#allocation13 + $0x198] sm:$0xff] }
 0x647   : > { %4918 = vmatpush.msra.mxu2 %v4846_v19  ;;  %4892 = vmatpush.msra.mxu1 %v4821_v56  ;;  %v4789_v33 = vld [vmem:[#allocation13 + $0x480] sm:$0xff] }
 0x648   : > { %4947 = vmatpush.msra.mxu3 %v4847_v10  ;;  %4979 = vmatpush.msrb.mxu0 %v4824_v28  ;;  %v9384_v24 = vld [vmem:[#allocation96_spill] sm:$0xff]  ;;  %v9386_v28 = vld [vmem:[#allocation59_spill] sm:$0xff] }
 0x649   : > { %4919 = vmatpush.msra.mxu2 %v4838_v54  ;;  %4893 = vmatpush.msra.mxu1 %v4813_v15  ;;  %v3635_v32 = vmul.f32 %v9384_v24, %v8468_v35  ;;  %v9385_v19 = vld [vmem:[#allocation48_spill] sm:$0xff]  ;;  %v3644_v54 = vmul.f32 %v9386_v28, %v8477_v42 }
 0x64a   : > { %4689 = vmatmul.f32.gmra.mxu2 %v3626_v41  ;;  %4718 = vmatmul.f32.gmra.mxu3 %v3627_v51  ;;  %v3641_v56 = vmul.f32 %v9385_v19, %v8472_v45  ;;  %v4806_v10 = vld [vmem:[#allocation13 + $0x688] sm:$0xff]  ;;  %v4781_v15 = vld [vmem:[#allocation13 + $0x380] sm:$0xff]  ;;  %v4784_v41 = vld [vmem:[#allocation13 + $0x398] sm:$0xff] }
 0x64b   : > { %4980 = vmatpush.msrb.mxu0 %v4816_v5  ;;  %4948 = vmatpush.msra.mxu3 %v4839_v49  ;;  %v4798_v5 = vld [vmem:[#allocation13 + $0x588] sm:$0xff]  ;;  %v4773_v22 = vld [vmem:[#allocation13 + $0x280] sm:$0xff]  ;;  %v4799_v51 = vld [vmem:[#allocation13 + $0x590] sm:$0xff] }
 0x64c   : > { %4750 = vmatmul.f32.gmra.mxu0 %v3636_v63  ;;  %4920 = vmatpush.msra.mxu2 %v4830_v44  ;;  %v4776_v49 = vld [vmem:[#allocation13 + $0x298] sm:$0xff]  ;;  %v4791_v44 = vld [vmem:[#allocation13 + $0x490] sm:$0xff]  ;;  %v9391_v24 = vld [vmem:[#allocation68_spill] sm:$0xff] }
 0x64d   : > { %4894 = vmatpush.msra.mxu1 %v4805_v11  ;;  %4949 = vmatpush.msra.mxu3 %v4831_v48  ;;  %v9387_v63 = vld [vmem:[#allocation34_spill] sm:$0xff]  ;;  %v8554_v48 = vpop.f32.mrf.mxu1  ;;  %v4758_v28 = vld [vmem:[#allocation13 + $0x88] sm:$0xff] }
 0x64e   : > { %4663 = vmatmul.f32.gmra.mxu1 %v3633_v21  ;;  %4981 = vmatpush.msrb.mxu0 %v4808_v25  ;;  %v4765_v21 = vld [vmem:[#allocation13 + $0x180] sm:$0xff]  ;;  %v3642_v11 = vmul.f32 %v9387_v63, %v8484_v16  ;;  %9388 = vst [vmem:[#allocation47_spill] sm:$0xff] %v8554_v48  ;;  %v4782_v25 = vld [vmem:[#allocation13 + $0x388] sm:$0xff]  ;;  %v4767_v19 = vld [vmem:[#allocation13 + $0x190] sm:$0xff] }
 0x64f   : > { %4921 = vmatpush.msra.mxu2 %v4822_v0  ;;  %4895 = vmatpush.msra.mxu1 %v4797_v55  ;;  %v9389_v0 = vld [vmem:[#allocation36_spill] sm:$0xff] }
 0x650   : > { %4950 = vmatpush.msra.mxu3 %v4823_v4  ;;  %4982 = vmatpush.msrb.mxu0 %v4800_v57  ;;  %v3643_v55 = vmul.f32 %v9389_v0, %v8488_v1  ;;  %v8558_v4 = vpop.f32.mrf.mxu0  ;;  %v4757_v57 = vld [vmem:[#allocation13 + $0x80] sm:$0xff]  ;;  %v4852_v0 = vld [vmem:[#allocation13 + $0xbb8] sm:$0xff] }
 0x651   : > { %4922 = vmatpush.msra.mxu2 %v4814_v7  ;;  %4896 = vmatpush.msra.mxu1 %v4789_v33  ;;  %9390 = vst [vmem:[#allocation61_spill] sm:$0xff] %v8558_v4  ;;  %v4783_v7 = vld [vmem:[#allocation13 + $0x390] sm:$0xff]  ;;  %v4760_v33 = vld [vmem:[#allocation13 + $0x98] sm:$0xff]  ;;  %v4849_v63 = vld [vmem:[#allocation13 + $0xba0] sm:$0xff] }
 0x652   : > { %4692 = vmatmul.f32.gmra.mxu2 %v3634_v46  ;;  %4721 = vmatmul.f32.gmra.mxu3 %v3635_v32  ;;  %v4775_v46 = vld [vmem:[#allocation13 + $0x290] sm:$0xff]  ;;  %v4884_v32 = vld [vmem:[#allocation13 + $0xfb8] sm:$0xff] }
 0x653   : > { %4983 = vmatpush.msrb.mxu0 %v4792_v6  ;;  %4951 = vmatpush.msra.mxu3 %v4815_v39  ;;  %v4881_v6 = vld [vmem:[#allocation13 + $0xfa0] sm:$0xff]  ;;  %v4766_v39 = vld [vmem:[#allocation13 + $0x188] sm:$0xff]  ;;  %v8858_v4 = vld [vmem:[#allocation14 + $0xe98] sm:$0xff] }
 0x654   : > { %4753 = vmatmul.f32.gmra.mxu0 %v3644_v54  ;;  %4923 = vmatpush.msra.mxu2 %v4806_v10  ;;  %v4876_v10 = vld [vmem:[#allocation13 + $0xeb8] sm:$0xff] }
 0x655   : > { %4897 = vmatpush.msra.mxu1 %v4781_v15  ;;  %4952 = vmatpush.msra.mxu3 %v4807_v17  ;;  %v8562_v54 = vpop.f32.mrf.mxu1  ;;  %v4759_v15 = vld [vmem:[#allocation13 + $0x90] sm:$0xff]  ;;  %v4865_v17 = vld [vmem:[#allocation13 + $0xda0] sm:$0xff] }
 0x656   : > { %4666 = vmatmul.f32.gmra.mxu1 %v3641_v56  ;;  %4984 = vmatpush.msrb.mxu0 %v4784_v41  ;;  %v4873_v56 = vld [vmem:[#allocation13 + $0xea0] sm:$0xff]  ;;  %9392 = vst [vmem:[#allocation62_spill] sm:$0xff] %v8562_v54  ;;  %v5946_v54 = vld [vmem:[#allocation14 + $0x538] sm:$0xff] }
 0x657   : > { %4924 = vmatpush.msra.mxu2 %v4798_v5  ;;  %4898 = vmatpush.msra.mxu1 %v4773_v22  ;;  %v4868_v5 = vld [vmem:[#allocation13 + $0xdb8] sm:$0xff]  ;;  %v4882_v22 = vld [vmem:[#allocation13 + $0xfa8] sm:$0xff] }
 0x658   : > { %4953 = vmatpush.msra.mxu3 %v4799_v51  ;;  %4985 = vmatpush.msrb.mxu0 %v4776_v49  ;;  %v8564_v41 = vpop.f32.mrf.mxu0  ;;  %v4857_v51 = vld [vmem:[#allocation13 + $0xca0] sm:$0xff]  ;;  %v4883_v49 = vld [vmem:[#allocation13 + $0xfb0] sm:$0xff] }
 0x659   : > { %4925 = vmatpush.msra.mxu2 %v4790_v52  ;;  %4899 = vmatpush.msra.mxu1 %v4765_v21  ;;  %9393 = vst [vmem:[#allocation71_spill] sm:$0xff] %v8564_v41  ;;  %v4860_v52 = vld [vmem:[#allocation13 + $0xcb8] sm:$0xff]  ;;  %v8567_v21 = vpop.f32.mrf.mxu2  ;;  %v5180_v41 = vld [vmem:[#allocation14 + $0x3f0] sm:$0xff] }
 0x65a   : > { %4954 = vmatpush.msra.mxu3 %v4791_v44  ;;  %4986 = vmatpush.msrb.mxu0 %v4768_v53  ;;  %9394 = vst [vmem:[#allocation72_spill] sm:$0xff] %v8567_v21  ;;  %v4874_v44 = vld [vmem:[#allocation13 + $0xea8] sm:$0xff]  ;;  %v8570_v53 = vpop.f32.mrf.mxu3 }
 0x65b   : > { %4695 = vmatmul.f32.gmra.mxu2 %v3642_v11  ;;  %4724 = vmatmul.f32.gmra.mxu3 %v3643_v55  ;;  %9395 = vst [vmem:[#allocation105_spill] sm:$0xff] %v8570_v53  ;;  %v4875_v11 = vld [vmem:[#allocation13 + $0xeb0] sm:$0xff]  ;;  %v4866_v55 = vld [vmem:[#allocation13 + $0xda8] sm:$0xff]  ;;  %v5995_v53 = vld [vmem:[#allocation14 + $0xb58] sm:$0xff] }
 0x65c   : > { %4926 = vmatpush.msra.mxu2 %v4782_v25  ;;  %4900 = vmatpush.msra.mxu1 %v4757_v57  ;;  %v9396_v25 = vld [vmem:[#allocation69_spill] sm:$0xff]  ;;  %v4841_v57 = vld [vmem:[#allocation13 + $0xaa0] sm:$0xff] }
 0x65d   : > { %4955 = vmatpush.msra.mxu3 %v4783_v7  ;;  %4987 = vmatpush.msrb.mxu0 %v4760_v33  ;;  %v4867_v7 = vld [vmem:[#allocation13 + $0xdb0] sm:$0xff]  ;;  %v8574_v33 = vpop.f32.mrf.mxu1 }
 0x65e   : > { %4901 = vmatmul.f32.vlgmr.msra.gmra.mxu1 %v9391_v24  ;;  %4927 = vmatpush.msra.mxu2 %v4774_v20  ;;  %9397 = vst [vmem:[#allocation106_spill] sm:$0xff] %v8574_v33  ;;  %v4844_v20 = vld [vmem:[#allocation13 + $0xab8] sm:$0xff]  ;;  %v5206_v33 = vld [vmem:[#allocation14 + $0x730] sm:$0xff] }
 0x65f   : > { %4988 = vmatmul.f32.vlgmr.msrb.gmra.mxu0 %v9391_v24  ;;  %4956 = vmatpush.msra.mxu3 %v4775_v46  ;;  %v4858_v46 = vld [vmem:[#allocation13 + $0xca8] sm:$0xff] }
 0x660   : > { %5001 = vmatpush.msrb.mxu1 %v4881_v6  ;;  %5088 = vmatpush.msra.mxu0 %v4884_v32  ;;  %v8576_v6 = vpop.f32.mrf.mxu0  ;;  %v4833_v32 = vld [vmem:[#allocation13 + $0x9a0] sm:$0xff] }
 0x661   : > { %4928 = vmatpush.msra.mxu2 %v4766_v39  ;;  %4957 = vmatpush.msra.mxu3 %v4767_v19  ;;  %9398 = vst [vmem:[#allocation98_spill] sm:$0xff] %v8576_v6  ;;  %v4859_v39 = vld [vmem:[#allocation13 + $0xcb0] sm:$0xff]  ;;  %v4836_v19 = vld [vmem:[#allocation13 + $0x9b8] sm:$0xff] }
 0x662   : > { %5002 = vmatpush.msrb.mxu1 %v4873_v56  ;;  %5089 = vmatpush.msra.mxu0 %v4876_v10  ;;  %v4850_v56 = vld [vmem:[#allocation13 + $0xba8] sm:$0xff]  ;;  %v8578_v10 = vpop.f32.mrf.mxu2  ;;  %v4772_v6 = vld [vmem:[#allocation13 + $0x1b8] sm:$0xff] }
 0x663   : > { %4929 = vmatpush.msra.mxu2 %v4758_v28  ;;  %4958 = vmatpush.msra.mxu3 %v4759_v15  ;;  %9399 = vst [vmem:[#allocation99_spill] sm:$0xff] %v8578_v10  ;;  %v4825_v28 = vld [vmem:[#allocation13 + $0x8a0] sm:$0xff]  ;;  %v4851_v15 = vld [vmem:[#allocation13 + $0xbb0] sm:$0xff] }
 0x664   : > { %5003 = vmatpush.msrb.mxu1 %v4865_v17  ;;  %5090 = vmatpush.msra.mxu0 %v4868_v5  ;;  %v8580_v17 = vpop.f32.mrf.mxu3  ;;  %v4828_v5 = vld [vmem:[#allocation13 + $0x8b8] sm:$0xff] }
 0x665   : > { %4930 = vmatmul.f32.vlgmr.msra.gmra.mxu2 %v9391_v24  ;;  %4959 = vmatmul.f32.vlgmr.msra.gmra.mxu3 %v9391_v24  ;;  %9400 = vst [vmem:[#allocation104_spill] sm:$0xff] %v8580_v17 }
 0x666   : > { %5030 = vmatpush.msrb.mxu2 %v4882_v22  ;;  %5004 = vmatpush.msrb.mxu1 %v4857_v51  ;;  %v4842_v22 = vld [vmem:[#allocation13 + $0xaa8] sm:$0xff]  ;;  %v4817_v51 = vld [vmem:[#allocation13 + $0x7a0] sm:$0xff] }
 0x667   : > { %5059 = vmatpush.msrb.mxu3 %v4883_v49  ;;  %5091 = vmatpush.msra.mxu0 %v4860_v52  ;;  %v4843_v49 = vld [vmem:[#allocation13 + $0xab0] sm:$0xff]  ;;  %v8584_v52 = vpop.f32.mrf.mxu1 }
 0x668   : > { %4904 = vmatmul.f32.gmra.mxu1 %v9396_v25  ;;  %4991 = vmatmul.f32.gmra.mxu0 %v9396_v25  ;;  %9401 = vst [vmem:[#allocation49_spill] sm:$0xff] %v8584_v52 }
 0x669   : > { %5031 = vmatpush.msrb.mxu2 %v4874_v44  ;;  %5005 = vmatpush.msrb.mxu1 %v4849_v63  ;;  %v9402_v44 = vld [vmem:[#allocation102_spill] sm:$0xff] }
 0x66a   : > { %5060 = vmatpush.msrb.mxu3 %v4875_v11  ;;  %5092 = vmatpush.msra.mxu0 %v4852_v0  ;;  %v4820_v63 = vld [vmem:[#allocation13 + $0x7b8] sm:$0xff]  ;;  %v4834_v11 = vld [vmem:[#allocation13 + $0x9a8] sm:$0xff]  ;;  %v8587_v0 = vpop.f32.mrf.mxu0 }
 0x66b   : > { %5032 = vmatpush.msrb.mxu2 %v4866_v55  ;;  %5006 = vmatpush.msrb.mxu1 %v4841_v57  ;;  %9403 = vst [vmem:[#allocation50_spill] sm:$0xff] %v8587_v0  ;;  %v4809_v55 = vld [vmem:[#allocation13 + $0x6a0] sm:$0xff]  ;;  %v4835_v57 = vld [vmem:[#allocation13 + $0x9b0] sm:$0xff]  ;;  %v4794_v0 = vld [vmem:[#allocation13 + $0x4a8] sm:$0xff] }
 0x66c   : > { %5061 = vmatpush.msrb.mxu3 %v4867_v7  ;;  %5093 = vmatpush.msra.mxu0 %v4844_v20  ;;  %v4812_v7 = vld [vmem:[#allocation13 + $0x6b8] sm:$0xff]  ;;  %v4826_v20 = vld [vmem:[#allocation13 + $0x8a8] sm:$0xff] }
 0x66d   : > { %5033 = vmatpush.msrb.mxu2 %v4858_v46  ;;  %5007 = vmatpush.msrb.mxu1 %v4833_v32  ;;  %v4801_v46 = vld [vmem:[#allocation13 + $0x5a0] sm:$0xff]  ;;  %v4827_v32 = vld [vmem:[#allocation13 + $0x8b0] sm:$0xff] }
 0x66e   : > { %5062 = vmatpush.msrb.mxu3 %v4859_v39  ;;  %5094 = vmatpush.msra.mxu0 %v4836_v19  ;;  %v8590_v39 = vpop.f32.mrf.mxu2  ;;  %v4804_v19 = vld [vmem:[#allocation13 + $0x5b8] sm:$0xff] }
 0x66f   : > { %4933 = vmatmul.f32.gmra.mxu2 %v9396_v25  ;;  %4962 = vmatmul.f32.gmra.mxu3 %v9396_v25  ;;  %9404 = vst [vmem:[#allocation60_spill] sm:$0xff] %v8590_v39  ;;  %v5158_v39 = vld [vmem:[#allocation14 + $0x130] sm:$0xff] }
 0x670   : > { %5034 = vmatpush.msrb.mxu2 %v4850_v56  ;;  %5008 = vmatpush.msrb.mxu1 %v4825_v28  ;;  %v8592_v56 = vpop.f32.mrf.mxu3  ;;  %v4818_v28 = vld [vmem:[#allocation13 + $0x7a8] sm:$0xff] }
 0x671   : > { %5063 = vmatpush.msrb.mxu3 %v4851_v15  ;;  %5095 = vmatpush.msra.mxu0 %v4828_v5  ;;  %9405 = vst [vmem:[#allocation73_spill] sm:$0xff] %v8592_v56  ;;  %v4793_v15 = vld [vmem:[#allocation13 + $0x4a0] sm:$0xff]  ;;  %v4819_v5 = vld [vmem:[#allocation13 + $0x7b0] sm:$0xff] }
 0x672   : > { %4907 = vmatmul.f32.gmra.mxu1 %v9402_v44  ;;  %4994 = vmatmul.f32.gmra.mxu0 %v9402_v44  ;;  %v5209_v56 = vld [vmem:[#allocation14 + $0x790] sm:$0xff] }
 0x673   : > { %5035 = vmatpush.msrb.mxu2 %v4842_v22  ;;  %5009 = vmatpush.msrb.mxu1 %v4817_v51  ;;  %v4796_v22 = vld [vmem:[#allocation13 + $0x4b8] sm:$0xff]  ;;  %v8595_v51 = vpop.f32.mrf.mxu1 }
 0x674   : > { %5064 = vmatpush.msrb.mxu3 %v4843_v49  ;;  %5096 = vmatpush.msra.mxu0 %v4820_v63  ;;  %9406 = vst [vmem:[#allocation97_spill] sm:$0xff] %v8595_v51  ;;  %v4810_v49 = vld [vmem:[#allocation13 + $0x6a8] sm:$0xff]  ;;  %v8598_v63 = vpop.f32.mrf.mxu0 }
 0x675   : > { %5036 = vmatpush.msrb.mxu2 %v4834_v11  ;;  %5010 = vmatpush.msrb.mxu1 %v4809_v55  ;;  %9407 = vst [vmem:[#allocation51_spill] sm:$0xff] %v8598_v63  ;;  %v4785_v11 = vld [vmem:[#allocation13 + $0x3a0] sm:$0xff]  ;;  %v4811_v55 = vld [vmem:[#allocation13 + $0x6b0] sm:$0xff] }
 0x676   : > { %5065 = vmatpush.msrb.mxu3 %v4835_v57  ;;  %5097 = vmatpush.msra.mxu0 %v4812_v7  ;;  %v9408_v57 = vld [vmem:[#allocation103_spill] sm:$0xff] }
 0x677   : > { %5037 = vmatpush.msrb.mxu2 %v4826_v20  ;;  %5011 = vmatpush.msrb.mxu1 %v4801_v46  ;;  %v4788_v7 = vld [vmem:[#allocation13 + $0x3b8] sm:$0xff]  ;;  %v4802_v20 = vld [vmem:[#allocation13 + $0x5a8] sm:$0xff]  ;;  %v4777_v46 = vld [vmem:[#allocation13 + $0x2a0] sm:$0xff] }
 0x678   : > { %5066 = vmatpush.msrb.mxu3 %v4827_v32  ;;  %5098 = vmatpush.msra.mxu0 %v4804_v19  ;;  %v4803_v32 = vld [vmem:[#allocation13 + $0x5b0] sm:$0xff]  ;;  %v8602_v19 = vpop.f32.mrf.mxu2 }
 0x679   : > { %4936 = vmatmul.f32.gmra.mxu2 %v9402_v44  ;;  %4965 = vmatmul.f32.gmra.mxu3 %v9402_v44  ;;  %9409 = vst [vmem:[#allocation63_spill] sm:$0xff] %v8602_v19 }
 0x67a   : > { %5038 = vmatpush.msrb.mxu2 %v4818_v28  ;;  %5012 = vmatpush.msrb.mxu1 %v4793_v15  ;;  %v4780_v28 = vld [vmem:[#allocation13 + $0x2b8] sm:$0xff]  ;;  %v8604_v15 = vpop.f32.mrf.mxu3 }
 0x67b   : > { %5067 = vmatpush.msrb.mxu3 %v4819_v5  ;;  %5099 = vmatpush.msra.mxu0 %v4796_v22  ;;  %9410 = vst [vmem:[#allocation24_spill] sm:$0xff] %v8604_v15  ;;  %v4769_v5 = vld [vmem:[#allocation13 + $0x1a0] sm:$0xff]  ;;  %v4795_v22 = vld [vmem:[#allocation13 + $0x4b0] sm:$0xff]  ;;  %v8606_v52 = vpop.f32.mrf.mxu1 }
 0x67c   : > { %4910 = vmatmul.f32.gmra.mxu1 %v9408_v57  ;;  %4997 = vmatmul.f32.gmra.mxu0 %v9408_v57  ;;  %9411 = vst [vmem:[#allocation30_spill] sm:$0xff] %v8606_v52  ;;  %v8608_v19 = vpop.f32.mrf.mxu0  ;;  %v5211_v15 = vld [vmem:[#allocation14 + $0x7d0] sm:$0xff] }
 0x67d   : > { %5039 = vmatpush.msrb.mxu2 %v4810_v49  ;;  %5013 = vmatpush.msrb.mxu1 %v4785_v11  ;;  %v4786_v49 = vld [vmem:[#allocation13 + $0x3a8] sm:$0xff]  ;;  %v4761_v11 = vld [vmem:[#allocation13 + $0xa0] sm:$0xff]  ;;  %9412 = vst [vmem:[#allocation75_spill] sm:$0xff] %v8608_v19  ;;  %v5163_v19 = vld [vmem:[#allocation14 + $0x1d0] sm:$0xff] }
 0x67e   : > { %5068 = vmatpush.msrb.mxu3 %v4811_v55  ;;  %5100 = vmatpush.msra.mxu0 %v4788_v7  ;;  %v4787_v55 = vld [vmem:[#allocation13 + $0x3b0] sm:$0xff]  ;;  %v4764_v7 = vld [vmem:[#allocation13 + $0xb8] sm:$0xff] }
 0x67f   : > { %5040 = vmatpush.msrb.mxu2 %v4802_v20  ;;  %5014 = vmatpush.msrb.mxu1 %v4777_v46  ;;  %v4778_v20 = vld [vmem:[#allocation13 + $0x2a8] sm:$0xff] }
 0x680   : > { %5069 = vmatpush.msrb.mxu3 %v4803_v32  ;;  %5101 = vmatpush.msra.mxu0 %v4780_v28  ;;  %v8612_v46 = vpop.f32.mrf.mxu2  ;;  %v4770_v32 = vld [vmem:[#allocation13 + $0x1a8] sm:$0xff] }
 0x681   : > { %5041 = vmatpush.msrb.mxu2 %v4794_v0  ;;  %5015 = vmatpush.msrb.mxu1 %v4769_v5  ;;  %v4779_v0 = vld [vmem:[#allocation13 + $0x2b0] sm:$0xff]  ;;  %9413 = vst [vmem:[#allocation76_spill] sm:$0xff] %v8612_v46  ;;  %v4762_v5 = vld [vmem:[#allocation13 + $0xa8] sm:$0xff]  ;;  %v5999_v46 = vld [vmem:[#allocation14 + $0xbd8] sm:$0xff] }
 0x682   : > { %5070 = vmatpush.msrb.mxu3 %v4795_v22  ;;  %5102 = vmatpush.msra.mxu0 %v4772_v6  ;;  %v8615_v28 = vpop.f32.mrf.mxu3  ;;  %v4771_v6 = vld [vmem:[#allocation13 + $0x1b0] sm:$0xff] }
 0x683   : > { %4939 = vmatmul.f32.gmra.mxu2 %v9408_v57  ;;  %4968 = vmatmul.f32.gmra.mxu3 %v9408_v57  ;;  %9414 = vst [vmem:[#allocation65_spill] sm:$0xff] %v8615_v28  ;;  %v4763_v22 = vld [vmem:[#allocation13 + $0xb0] sm:$0xff]  ;;  %v8838_v28 = vld [vmem:[#allocation14 + $0xf18] sm:$0xff] }
 0x684   : > { %5042 = vmatpush.msrb.mxu2 %v4786_v49  ;;  %5016 = vmatpush.msrb.mxu1 %v4761_v11  ;;  %v8618_v49 = vpop.f32.mrf.mxu1  ;;  %v8620_v11 = vpop.f32.mrf.mxu0 }
 0x685   : > { %5071 = vmatpush.msrb.mxu3 %v4787_v55  ;;  %5103 = vmatpush.msra.mxu0 %v4764_v7  ;;  %9415 = vst [vmem:[#allocation66_spill] sm:$0xff] %v8618_v49 }
 0x686   : > { %5017 = vmatmul.f32.vlgmr.msrb.gmra.mxu1 %v9391_v24  ;;  %5043 = vmatpush.msrb.mxu2 %v4778_v20  ;;  %9416 = vst [vmem:[#allocation64_spill] sm:$0xff] %v8620_v11 }
 0x687   : > { %5104 = vmatmul.f32.vlgmr.msra.gmra.mxu0 %v9391_v24  ;;  %5072 = vmatpush.msrb.mxu3 %v4779_v0 }
 0x688   : > { %5044 = vmatpush.msrb.mxu2 %v4770_v32  ;;  %v8624_v55 = vpop.f32.mrf.mxu2 }
 0x689   : > { %5073 = vmatpush.msrb.mxu3 %v4771_v6  ;;  %9417 = vst [vmem:[#allocation77_spill] sm:$0xff] %v8624_v55  ;;  %v5161_v55 = vld [vmem:[#allocation14 + $0x190] sm:$0xff] }
 0x68a   : > { %5045 = vmatpush.msrb.mxu2 %v4762_v5  ;;  %v8627_v7 = vpop.f32.mrf.mxu3 }
 0x68b   : > { %5074 = vmatpush.msrb.mxu3 %v4763_v22  ;;  %5046 = vmatmul.f32.vlgmr.msrb.gmra.mxu2 %v9391_v24  ;;  %9418 = vst [vmem:[#allocation25_spill] sm:$0xff] %v8627_v7  ;;  %v5162_v7 = vld [vmem:[#allocation14 + $0x1b0] sm:$0xff] }
 0x68c   : > { %5075 = vmatmul.f32.vlgmr.msrb.gmra.mxu3 %v9391_v24  ;;  %v8630_v20 = vpop.f32.mrf.mxu1  ;;  %v8632_v0 = vpop.f32.mrf.mxu0  ;;  %5306 = vmatpush.msra.mxu2 %v5180_v41 }
 0x68d   : > { %9419 = vst [vmem:[#allocation32_spill] sm:$0xff] %v8630_v20  ;;  %v5164_v20 = vld [vmem:[#allocation14 + $0x1f0] sm:$0xff] }
 0x68e   : > { %5020 = vmatmul.f32.gmra.mxu1 %v9396_v25  ;;  %9420 = vst [vmem:[#allocation79_spill] sm:$0xff] %v8632_v0 }
 0x68f   : > { %5107 = vmatmul.f32.gmra.mxu0 %v9396_v25  ;;  %5277 = vmatpush.msra.mxu1 %v5164_v20 }
 0x690   : > { %v8636_v32 = vpop.f32.mrf.mxu2 }
 0x691   : > { %9421 = vst [vmem:[#allocation80_spill] sm:$0xff] %v8636_v32  ;;  %5278 = vmatpush.msra.mxu1 %v5163_v19  ;;  %v5160_v19 = vld [vmem:[#allocation14 + $0x170] sm:$0xff] }
 0x692   : > { %v8639_v6 = vpop.f32.mrf.mxu3 }
 0x693   : > { %5049 = vmatmul.f32.gmra.mxu2 %v9396_v25  ;;  %9422 = vst [vmem:[#allocation90_spill] sm:$0xff] %v8639_v6  ;;  %v5212_v6 = vld [vmem:[#allocation14 + $0x7f0] sm:$0xff]  ;;  %5279 = vmatpush.msra.mxu1 %v5162_v7 }
 0x694   : > { %5078 = vmatmul.f32.gmra.mxu3 %v9396_v25  ;;  %v8642_v5 = vpop.f32.mrf.mxu1  ;;  %v8644_v22 = vpop.f32.mrf.mxu0  ;;  %5364 = vmatpush.msrb.mxu0 %v5212_v6  ;;  %v5196_v7 = vld [vmem:[#allocation14 + $0x5f0] sm:$0xff] }
 0x695   : > { %9423 = vst [vmem:[#allocation83_spill] sm:$0xff] %v8642_v5  ;;  %5280 = vmatpush.msra.mxu1 %v5161_v55  ;;  %5335 = vmatpush.msra.mxu3 %v5196_v7  ;;  %v5177_v7 = vld [vmem:[#allocation14 + $0x390] sm:$0xff] }
 0x696   : > { %5023 = vmatmul.f32.gmra.mxu1 %v9402_v44  ;;  %9424 = vst [vmem:[#allocation35_spill] sm:$0xff] %v8644_v22  ;;  %5365 = vmatpush.msrb.mxu0 %v5211_v15  ;;  %v5208_v15 = vld [vmem:[#allocation14 + $0x770] sm:$0xff] }
 0x697   : > { %5110 = vmatmul.f32.gmra.mxu0 %v9402_v44  ;;  %5281 = vmatpush.msra.mxu1 %v5160_v19  ;;  %v5179_v22 = vld [vmem:[#allocation14 + $0x3d0] sm:$0xff] }
 0x698   : > { %v8648_v0 = vpop.f32.mrf.mxu2  ;;  %5307 = vmatpush.msra.mxu2 %v5179_v22  ;;  %v5178_v19 = vld [vmem:[#allocation14 + $0x3b0] sm:$0xff] }
 0x699   : > { %9425 = vst [vmem:[#allocation42_spill] sm:$0xff] %v8648_v0  ;;  %v5210_v0 = vld [vmem:[#allocation14 + $0x7b0] sm:$0xff] }
 0x69a   : > { %v8651_v11 = vpop.f32.mrf.mxu3  ;;  %5366 = vmatpush.msrb.mxu0 %v5210_v0  ;;  %v5157_v0 = vld [vmem:[#allocation14 + $0x110] sm:$0xff]  ;;  %5308 = vmatpush.msra.mxu2 %v5178_v19 }
 0x69b   : > { %5052 = vmatmul.f32.gmra.mxu2 %v9402_v44  ;;  %9426 = vst [vmem:[#allocation81_spill] sm:$0xff] %v8651_v11  ;;  %v5155_v22 = vld [vmem:[#allocation14 + $0xd0] sm:$0xff] }
 0x69c   : > { %5081 = vmatmul.f32.gmra.mxu3 %v9402_v44  ;;  %v8654_v32 = vpop.f32.mrf.mxu1  ;;  %v8656_v49 = vpop.f32.mrf.mxu0  ;;  %5367 = vmatpush.msrb.mxu0 %v5209_v56  ;;  %v5195_v56 = vld [vmem:[#allocation14 + $0x5d0] sm:$0xff] }
 0x69d   : > { %9427 = vst [vmem:[#allocation43_spill] sm:$0xff] %v8654_v32  ;;  %v5207_v32 = vld [vmem:[#allocation14 + $0x750] sm:$0xff]  ;;  %5336 = vmatpush.msra.mxu3 %v5195_v56  ;;  %5309 = vmatpush.msra.mxu2 %v5177_v7 }
 0x69e   : > { %5026 = vmatmul.f32.gmra.mxu1 %v9408_v57  ;;  %9428 = vst [vmem:[#allocation44_spill] sm:$0xff] %v8656_v49  ;;  %v5159_v49 = vld [vmem:[#allocation14 + $0x150] sm:$0xff]  ;;  %5368 = vmatpush.msrb.mxu0 %v5208_v15 }
 0x69f   : > { %5113 = vmatmul.f32.gmra.mxu0 %v9408_v57  ;;  %5282 = vmatpush.msra.mxu1 %v5159_v49  ;;  %v5156_v49 = vld [vmem:[#allocation14 + $0xf0] sm:$0xff] }
 0x6a0   : > { %v8660_v11 = vpop.f32.mrf.mxu2  ;;  %5369 = vmatpush.msrb.mxu0 %v5207_v32  ;;  %v5194_v32 = vld [vmem:[#allocation14 + $0x5b0] sm:$0xff] }
 0x6a1   : > { %9429 = vst [vmem:[#allocation37_spill] sm:$0xff] %v8660_v11  ;;  %5283 = vmatpush.msra.mxu1 %v5158_v39  ;;  %5337 = vmatpush.msra.mxu3 %v5194_v32  ;;  %v5203_v39 = vld [vmem:[#allocation14 + $0x6d0] sm:$0xff]  ;;  %v8829_v11 = vld [vmem:[#allocation14 + $0xf38] sm:$0xff] }
 0x6a2   : > { %v8662_v52 = vpop.f32.mrf.mxu3  ;;  %5370 = vmatpush.msrb.mxu0 %v5206_v33  ;;  %v5176_v33 = vld [vmem:[#allocation14 + $0x370] sm:$0xff] }
 0x6a3   : > { %5055 = vmatmul.f32.gmra.mxu2 %v9408_v57  ;;  %9430 = vst [vmem:[#allocation91_spill] sm:$0xff] %v8662_v52  ;;  %5284 = vmatpush.msra.mxu1 %v5157_v0  ;;  %v5154_v56 = vld [vmem:[#allocation14 + $0xb0] sm:$0xff] }
 0x6a4   : > { %5084 = vmatmul.f32.gmra.mxu3 %v9408_v57  ;;  %v8664_v20 = vpop.f32.mrf.mxu1  ;;  %v8666_v6 = vpop.f32.mrf.mxu0  ;;  %v5202_v0 = vld [vmem:[#allocation14 + $0x6b0] sm:$0xff]  ;;  %5310 = vmatpush.msra.mxu2 %v5176_v33 }
 0x6a5   : > { %9431 = vst [vmem:[#allocation84_spill] sm:$0xff] %v8664_v20  ;;  %v5204_v20 = vld [vmem:[#allocation14 + $0x6f0] sm:$0xff]  ;;  %5285 = vmatpush.msra.mxu1 %v5156_v49 }
 0x6a6   : > { %9432 = vst [vmem:[#allocation52_spill] sm:$0xff] %v8666_v6  ;;  %v5205_v6 = vld [vmem:[#allocation14 + $0x710] sm:$0xff] }
 0x6a7   : > { %5371 = vmatpush.msrb.mxu0 %v5205_v6  ;;  %5286 = vmatpush.msra.mxu1 %v5155_v22  ;;  %v5192_v6 = vld [vmem:[#allocation14 + $0x570] sm:$0xff] }
 0x6a8   : > { %v8668_v17 = vpop.f32.mrf.mxu2  ;;  %v5153_v49 = vld [vmem:[#allocation14 + $0x90] sm:$0xff] }
 0x6a9   : > { %9433 = vst [vmem:[#allocation54_spill] sm:$0xff] %v8668_v17  ;;  %5372 = vmatpush.msrb.mxu0 %v5204_v20  ;;  %v5191_v32 = vld [vmem:[#allocation14 + $0x550] sm:$0xff]  ;;  %5287 = vmatpush.msra.mxu1 %v5154_v56 }
 0x6aa   : > { %v8670_v55 = vpop.f32.mrf.mxu3  ;;  %v5201_v20 = vld [vmem:[#allocation14 + $0x690] sm:$0xff] }
 0x6ab   : > { %9434 = vst [vmem:[#allocation82_spill] sm:$0xff] %v8670_v55  ;;  %v5193_v55 = vld [vmem:[#allocation14 + $0x590] sm:$0xff]  ;;  %5373 = vmatpush.msrb.mxu0 %v5203_v39  ;;  %5288 = vmatpush.msra.mxu1 %v5153_v49 }
 0x6ac   : > { %v8674_v15 = vpop.f32.mrf.mxu0  ;;  %5338 = vmatpush.msra.mxu3 %v5193_v55  ;;  %v5174_v7 = vld [vmem:[#allocation14 + $0x330] sm:$0xff] }
 0x6ad   : > { %9436 = vst [vmem:[#allocation55_spill] sm:$0xff] %v8674_v15  ;;  %v5175_v15 = vld [vmem:[#allocation14 + $0x350] sm:$0xff]  ;;  %5374 = vmatpush.msrb.mxu0 %v5202_v0 }
 0x6ae   : > { %5339 = vmatpush.msra.mxu3 %v5192_v6  ;;  %5311 = vmatpush.msra.mxu2 %v5175_v15  ;;  %v5152_v22 = vld [vmem:[#allocation14 + $0x70] sm:$0xff] }
 0x6af   : > { %5375 = vmatpush.msrb.mxu0 %v5201_v20  ;;  %v5200_v39 = vld [vmem:[#allocation14 + $0x670] sm:$0xff]  ;;  %5289 = vmatpush.msra.mxu1 %v5152_v22 }
 0x6b0   : > { %v8676_v19 = vpop.f32.mrf.mxu2  ;;  %5340 = vmatpush.msra.mxu3 %v5191_v32  ;;  %5312 = vmatpush.msra.mxu2 %v5174_v7  ;;  %v5173_v33 = vld [vmem:[#allocation14 + $0x310] sm:$0xff] }
 0x6b1   : > { %9437 = vst [vmem:[#allocation38_spill] sm:$0xff] %v8676_v19  ;;  %v5151_v56 = vld [vmem:[#allocation14 + $0x50] sm:$0xff]  ;;  %5376 = vmatpush.msrb.mxu0 %v5200_v39 }
 0x6b2   : > { %v5189_v6 = vld [vmem:[#allocation14 + $0x510] sm:$0xff]  ;;  %5313 = vmatpush.msra.mxu2 %v5173_v33  ;;  %5290 = vmatpush.msra.mxu1 %v5151_v56 }
 0x6b3   : > { %v8672_v41 = vpop.f32.mrf.mxu1  ;;  %v5199_v0 = vld [vmem:[#allocation14 + $0x650] sm:$0xff] }
 0x6b4   : > { %9435 = vst [vmem:[#allocation45_spill] sm:$0xff] %v8672_v41  ;;  %v8678_v41 = vpop.f32.mrf.mxu3  ;;  %v8682_v55 = vpop.f32.mrf.mxu0  ;;  %v5172_v15 = vld [vmem:[#allocation14 + $0x2f0] sm:$0xff]  ;;  %5377 = vmatpush.msrb.mxu0 %v5199_v0 }
 0x6b5   : > { %9438 = vst [vmem:[#allocation100_spill] sm:$0xff] %v8678_v41  ;;  %v5190_v41 = vld [vmem:[#allocation14 + $0x530] sm:$0xff]  ;;  %5314 = vmatpush.msra.mxu2 %v5172_v15 }
 0x6b6   : > { %9440 = vst [vmem:[#allocation53_spill] sm:$0xff] %v8682_v55  ;;  %5341 = vmatpush.msra.mxu3 %v5190_v41  ;;  %v5150_v49 = vld [vmem:[#allocation14 + $0x30] sm:$0xff] }
 0x6b7   : > { %v5188_v32 = vld [vmem:[#allocation14 + $0x4f0] sm:$0xff]  ;;  %5291 = vmatpush.msra.mxu1 %v5150_v49 }
 0x6b8   : > { %v8684_v19 = vpop.f32.mrf.mxu2  ;;  %5342 = vmatpush.msra.mxu3 %v5189_v6  ;;  %v5198_v20 = vld [vmem:[#allocation14 + $0x630] sm:$0xff] }
 0x6b9   : > { %9441 = vst [vmem:[#allocation67_spill] sm:$0xff] %v8684_v19  ;;  %v5171_v22 = vld [vmem:[#allocation14 + $0x2d0] sm:$0xff]  ;;  %5378 = vmatpush.msrb.mxu0 %v5198_v20 }
 0x6ba   : > { %v5149_v41 = vld [vmem:[#allocation14 + $0x10] sm:$0xff]  ;;  %5343 = vmatpush.msra.mxu3 %v5188_v32  ;;  %5315 = vmatpush.msra.mxu2 %v5171_v22 }
 0x6bb   : > { %v8680_v17 = vpop.f32.mrf.mxu1  ;;  %v5187_v55 = vld [vmem:[#allocation14 + $0x4d0] sm:$0xff]  ;;  %5292 = vmatpush.msra.mxu1 %v5149_v41 }
 0x6bc   : > { %9439 = vst [vmem:[#allocation89_spill] sm:$0xff] %v8680_v17  ;;  %v8686_v7 = vpop.f32.mrf.mxu3  ;;  %v5197_v39 = vld [vmem:[#allocation14 + $0x610] sm:$0xff]  ;;  %5344 = vmatpush.msra.mxu3 %v5187_v55 }
 0x6bd   : > { %9442 = vst [vmem:[#allocation92_spill] sm:$0xff] %v8686_v7  ;;  %v5170_v33 = vld [vmem:[#allocation14 + $0x2b0] sm:$0xff]  ;;  %5379 = vmatpush.msrb.mxu0 %v5197_v39 }
 0x6be   : > { %5316 = vmatpush.msra.mxu2 %v5170_v33  ;;  %v5186_v6 = vld [vmem:[#allocation14 + $0x4b0] sm:$0xff] }
 0x6bf   : > { %v5228_v0 = vld [vmem:[#allocation14 + $0x9f0] sm:$0xff]  ;;  %5345 = vmatpush.msra.mxu3 %v5186_v6 }
 0x6c0   : > { %v5276_v15 = vld [vmem:[#allocation14 + $0xff0] sm:$0xff]  ;;  %5393 = vmatpush.msrb.mxu1 %v5228_v0  ;;  %v8692_v19 = vpop.f32.mrf.mxu2 }
 0x6c1   : > { %v8690_v56 = vpop.f32.mrf.mxu0  ;;  %v5169_v7 = vld [vmem:[#allocation14 + $0x290] sm:$0xff]  ;;  %9445 = vst [vmem:[#allocation39_spill] sm:$0xff] %v8692_v19  ;;  %5480 = vmatpush.msra.mxu0 %v5276_v15 }
 0x6c2   : > { %9444 = vst [vmem:[#allocation74_spill] sm:$0xff] %v8690_v56  ;;  %v5185_v49 = vld [vmem:[#allocation14 + $0x490] sm:$0xff]  ;;  %5317 = vmatpush.msra.mxu2 %v5169_v7 }
 0x6c3   : > { %v8688_v17 = vpop.f32.mrf.mxu1  ;;  %v5227_v32 = vld [vmem:[#allocation14 + $0x9d0] sm:$0xff]  ;;  %5346 = vmatpush.msra.mxu3 %v5185_v49 }
 0x6c4   : > { %9443 = vst [vmem:[#allocation46_spill] sm:$0xff] %v8688_v17  ;;  %v5275_v20 = vld [vmem:[#allocation14 + $0xfd0] sm:$0xff]  ;;  %5394 = vmatpush.msrb.mxu1 %v5227_v32 }
 0x6c5   : > { %v5168_v22 = vld [vmem:[#allocation14 + $0x270] sm:$0xff]  ;;  %v8694_v41 = vpop.f32.mrf.mxu3  ;;  %5481 = vmatpush.msra.mxu0 %v5275_v20 }
 0x6c6   : > { %9446 = vst [vmem:[#allocation41_spill] sm:$0xff] %v8694_v41  ;;  %5318 = vmatpush.msra.mxu2 %v5168_v22  ;;  %v5184_v55 = vld [vmem:[#allocation14 + $0x470] sm:$0xff] }
 0x6c7   : > { %v5226_v39 = vld [vmem:[#allocation14 + $0x9b0] sm:$0xff]  ;;  %5347 = vmatpush.msra.mxu3 %v5184_v55 }
 0x6c8   : > { %v5274_v33 = vld [vmem:[#allocation14 + $0xfb0] sm:$0xff]  ;;  %5395 = vmatpush.msrb.mxu1 %v5226_v39 }
 0x6c9   : > { %v5167_v6 = vld [vmem:[#allocation14 + $0x250] sm:$0xff]  ;;  %5482 = vmatpush.msra.mxu0 %v5274_v33  ;;  %v8698_v19 = vpop.f32.mrf.mxu0 }
 0x6ca   : > { %v5183_v0 = vld [vmem:[#allocation14 + $0x450] sm:$0xff]  ;;  %5319 = vmatpush.msra.mxu2 %v5167_v6  ;;  %9448 = vst [vmem:[#allocation56_spill] sm:$0xff] %v8698_v19 }
 0x6cb   : > { %v5225_v56 = vld [vmem:[#allocation14 + $0x990] sm:$0xff]  ;;  %v8696_v17 = vpop.f32.mrf.mxu1  ;;  %5348 = vmatpush.msra.mxu3 %v5183_v0 }
 0x6cc   : > { %9447 = vst [vmem:[#allocation26_spill] sm:$0xff] %v8696_v17  ;;  %v5273_v7 = vld [vmem:[#allocation14 + $0xf90] sm:$0xff]  ;;  %5396 = vmatpush.msrb.mxu1 %v5225_v56 }
 0x6cd   : > { %v5166_v15 = vld [vmem:[#allocation14 + $0x230] sm:$0xff]  ;;  %5483 = vmatpush.msra.mxu0 %v5273_v7  ;;  %v8700_v33 = vpop.f32.mrf.mxu2  ;;  %v8702_v6 = vpop.f32.mrf.mxu3 }
 0x6ce   : > { %v5182_v49 = vld [vmem:[#allocation14 + $0x430] sm:$0xff]  ;;  %5320 = vmatpush.msra.mxu2 %v5166_v15  ;;  %9449 = vst [vmem:[#allocation58_spill] sm:$0xff] %v8700_v33 }
 0x6cf   : > { %v5224_v32 = vld [vmem:[#allocation14 + $0x970] sm:$0xff]  ;;  %5349 = vmatpush.msra.mxu3 %v5182_v49  ;;  %9450 = vst [vmem:[#allocation94_spill] sm:$0xff] %v8702_v6 }
 0x6d0   : > { %v5272_v20 = vld [vmem:[#allocation14 + $0xf70] sm:$0xff]  ;;  %5397 = vmatpush.msrb.mxu1 %v5224_v32 }
 0x6d1   : > { %v5165_v22 = vld [vmem:[#allocation14 + $0x210] sm:$0xff]  ;;  %5484 = vmatpush.msra.mxu0 %v5272_v20  ;;  %v8706_v19 = vpop.f32.mrf.mxu0 }
 0x6d2   : > { %v5181_v55 = vld [vmem:[#allocation14 + $0x410] sm:$0xff]  ;;  %5321 = vmatpush.msra.mxu2 %v5165_v22  ;;  %9452 = vst [vmem:[#allocation101_spill] sm:$0xff] %v8706_v19 }
 0x6d3   : > { %v5223_v39 = vld [vmem:[#allocation14 + $0x950] sm:$0xff]  ;;  %5350 = vmatpush.msra.mxu3 %v5181_v55  ;;  %v8704_v56 = vpop.f32.mrf.mxu1 }
 0x6d4   : > { %v5271_v41 = vld [vmem:[#allocation14 + $0xf50] sm:$0xff]  ;;  %5398 = vmatpush.msrb.mxu1 %v5223_v39  ;;  %9451 = vst [vmem:[#allocation95_spill] sm:$0xff] %v8704_v56 }
 0x6d5   : > { %v5244_v17 = vld [vmem:[#allocation14 + $0xbf0] sm:$0xff]  ;;  %5485 = vmatpush.msra.mxu0 %v5271_v41  ;;  %v8708_v39 = vpop.f32.mrf.mxu2 }
 0x6d6   : > { %5422 = vmatpush.msrb.mxu2 %v5244_v17  ;;  %v5222_v0 = vld [vmem:[#allocation14 + $0x930] sm:$0xff]  ;;  %9453 = vst [vmem:[#allocation57_spill] sm:$0xff] %v8708_v39 }
 0x6d7   : > { %v5260_v7 = vld [vmem:[#allocation14 + $0xdf0] sm:$0xff]  ;;  %5399 = vmatpush.msrb.mxu1 %v5222_v0 }
 0x6d8   : > { %v5270_v15 = vld [vmem:[#allocation14 + $0xf30] sm:$0xff]  ;;  %5451 = vmatpush.msrb.mxu3 %v5260_v7  ;;  %v8710_v7 = vpop.f32.mrf.mxu3 }
 0x6d9   : > { %v5243_v49 = vld [vmem:[#allocation14 + $0xbd0] sm:$0xff]  ;;  %5486 = vmatpush.msra.mxu0 %v5270_v15  ;;  %9454 = vst [vmem:[#allocation70_spill] sm:$0xff] %v8710_v7 }
 0x6da   : > { %v5221_v32 = vld [vmem:[#allocation14 + $0x910] sm:$0xff]  ;;  %5423 = vmatpush.msrb.mxu2 %v5243_v49 }
 0x6db   : > { %v5259_v33 = vld [vmem:[#allocation14 + $0xdd0] sm:$0xff]  ;;  %5400 = vmatpush.msrb.mxu1 %v5221_v32 }
 0x6dc   : > { %v5269_v20 = vld [vmem:[#allocation14 + $0xf10] sm:$0xff]  ;;  %5452 = vmatpush.msrb.mxu3 %v5259_v33  ;;  %v4902_v33 = vpop.f32.mrf.mxu1  ;;  %v4989_v6 = vpop.f32.mrf.mxu0 }
 0x6dd   : > { %v5242_v22 = vld [vmem:[#allocation14 + $0xbb0] sm:$0xff]  ;;  %5487 = vmatpush.msra.mxu0 %v5269_v20  ;;  %v5120_v52 = vmul.f32 %v4989_v6, %v8338_v43 }
 0x6de   : > { %v5220_v41 = vld [vmem:[#allocation14 + $0x8f0] sm:$0xff]  ;;  %5424 = vmatpush.msrb.mxu2 %v5242_v22  ;;  %v5117_v22 = vmul.f32 %v4902_v33, %v8332_v34 }
 0x6df   : > { %v5258_v17 = vld [vmem:[#allocation14 + $0xdb0] sm:$0xff]  ;;  %5401 = vmatpush.msrb.mxu1 %v5220_v41  ;;  %5380 = vmatmul.f32.vlgmr.msrb.gmra.mxu0 %v5120_v52 }
 0x6e0   : > { %v5268_v55 = vld [vmem:[#allocation14 + $0xef0] sm:$0xff]  ;;  %5453 = vmatpush.msrb.mxu3 %v5258_v17  ;;  %5293 = vmatmul.f32.vlgmr.msra.gmra.mxu1 %v5117_v22 }
 0x6e1   : > { %v5241_v56 = vld [vmem:[#allocation14 + $0xb90] sm:$0xff]  ;;  %5488 = vmatpush.msra.mxu0 %v5268_v55  ;;  %v8714_v55 = vpop.f32.mrf.mxu2 }
 0x6e2   : > { %v5219_v19 = vld [vmem:[#allocation14 + $0x8d0] sm:$0xff]  ;;  %5425 = vmatpush.msrb.mxu2 %v5241_v56  ;;  %9455 = vst [vmem:[#allocation87_spill] sm:$0xff] %v8714_v55 }
 0x6e3   : > { %v5257_v0 = vld [vmem:[#allocation14 + $0xd90] sm:$0xff]  ;;  %5402 = vmatpush.msrb.mxu1 %v5219_v19 }
 0x6e4   : > { %v5267_v15 = vld [vmem:[#allocation14 + $0xed0] sm:$0xff]  ;;  %5454 = vmatpush.msrb.mxu3 %v5257_v0 }
 0x6e5   : > { %v5240_v49 = vld [vmem:[#allocation14 + $0xb70] sm:$0xff]  ;;  %5489 = vmatpush.msra.mxu0 %v5267_v15 }
 0x6e6   : > { %5426 = vmatpush.msrb.mxu2 %v5240_v49  ;;  %v5218_v32 = vld [vmem:[#allocation14 + $0x8b0] sm:$0xff]  ;;  %v8716_v49 = vpop.f32.mrf.mxu3 }
 0x6e7   : > { %v5256_v39 = vld [vmem:[#allocation14 + $0xd70] sm:$0xff]  ;;  %5403 = vmatpush.msrb.mxu1 %v5218_v32  ;;  %9456 = vst [vmem:[#allocation88_spill] sm:$0xff] %v8716_v49 }
 0x6e8   : > { %v5266_v20 = vld [vmem:[#allocation14 + $0xeb0] sm:$0xff]  ;;  %5455 = vmatpush.msrb.mxu3 %v5256_v39 }
 0x6e9   : > { %v5239_v7 = vld [vmem:[#allocation14 + $0xb50] sm:$0xff]  ;;  %5490 = vmatpush.msra.mxu0 %v5266_v20 }
 0x6ea   : > { %v5217_v41 = vld [vmem:[#allocation14 + $0x890] sm:$0xff]  ;;  %5427 = vmatpush.msrb.mxu2 %v5239_v7 }
 0x6eb   : > { %v5255_v17 = vld [vmem:[#allocation14 + $0xd50] sm:$0xff]  ;;  %5404 = vmatpush.msrb.mxu1 %v5217_v41  ;;  %v4905_v41 = vpop.f32.mrf.mxu1 }
 0x6ec   : > { %v5265_v19 = vld [vmem:[#allocation14 + $0xe90] sm:$0xff]  ;;  %5456 = vmatpush.msrb.mxu3 %v5255_v17 }
 0x6ed   : > { %v5238_v56 = vld [vmem:[#allocation14 + $0xb30] sm:$0xff]  ;;  %5491 = vmatpush.msra.mxu0 %v5265_v19 }
 0x6ee   : > { %v5216_v0 = vld [vmem:[#allocation14 + $0x870] sm:$0xff]  ;;  %5428 = vmatpush.msrb.mxu2 %v5238_v56  ;;  %v4960_v55 = vpop.f32.mrf.mxu3 }
 0x6ef   : > { %v5254_v15 = vld [vmem:[#allocation14 + $0xd30] sm:$0xff]  ;;  %5405 = vmatpush.msrb.mxu1 %v5216_v0  ;;  %v5125_v0 = vmul.f32 %v4905_v41, %v8352_v29 }
 0x6f0   : > { %v5264_v39 = vld [vmem:[#allocation14 + $0xe70] sm:$0xff]  ;;  %5457 = vmatpush.msrb.mxu3 %v5254_v15  ;;  %v4992_v15 = vpop.f32.mrf.mxu0 }
 0x6f1   : > { %v5237_v33 = vld [vmem:[#allocation14 + $0xb10] sm:$0xff]  ;;  %5492 = vmatpush.msra.mxu0 %v5264_v39  ;;  %5296 = vmatmul.f32.gmra.mxu1 %v5125_v0 }
 0x6f2   : > { %v5215_v32 = vld [vmem:[#allocation14 + $0x850] sm:$0xff]  ;;  %5429 = vmatpush.msrb.mxu2 %v5237_v33 }
 0x6f3   : > { %v5253_v6 = vld [vmem:[#allocation14 + $0xd10] sm:$0xff]  ;;  %5406 = vmatpush.msrb.mxu1 %v5215_v32  ;;  %v5128_v32 = vmul.f32 %v4992_v15, %v8357_v23  ;;  %v5625_v15 = vld [vmem:[#allocation13 + $0xec0] sm:$0xff] }
 0x6f4   : > { %v5263_v7 = vld [vmem:[#allocation14 + $0xe50] sm:$0xff]  ;;  %5458 = vmatpush.msrb.mxu3 %v5253_v6 }
 0x6f5   : > { %v5236_v20 = vld [vmem:[#allocation14 + $0xaf0] sm:$0xff]  ;;  %5493 = vmatpush.msra.mxu0 %v5263_v7  ;;  %v5633_v7 = vld [vmem:[#allocation13 + $0xfc0] sm:$0xff] }
 0x6f6   : > { %v5214_v22 = vld [vmem:[#allocation14 + $0x830] sm:$0xff]  ;;  %5430 = vmatpush.msrb.mxu2 %v5236_v20  ;;  %v4931_v20 = vpop.f32.mrf.mxu2  ;;  %5383 = vmatmul.f32.gmra.mxu0 %v5128_v32  ;;  %v5620_v32 = vld [vmem:[#allocation13 + $0xdd8] sm:$0xff] }
 0x6f7   : > { %v5252_v17 = vld [vmem:[#allocation14 + $0xcf0] sm:$0xff]  ;;  %5407 = vmatpush.msrb.mxu1 %v5214_v22  ;;  %v5636_v22 = vld [vmem:[#allocation13 + $0xfd8] sm:$0xff] }
 0x6f8   : > { %v5262_v52 = vld [vmem:[#allocation14 + $0xe30] sm:$0xff]  ;;  %5459 = vmatpush.msrb.mxu3 %v5252_v17  ;;  %v5118_v17 = vmul.f32 %v4931_v20, %v8344_v37 }
 0x6f9   : > { %v5235_v19 = vld [vmem:[#allocation14 + $0xad0] sm:$0xff]  ;;  %5494 = vmatpush.msra.mxu0 %v5262_v52  ;;  %v5119_v52 = vmul.f32 %v4960_v55, %v8348_v14  ;;  %v5609_v55 = vld [vmem:[#allocation13 + $0xcc0] sm:$0xff] }
 0x6fa   : > { %v5213_v56 = vld [vmem:[#allocation14 + $0x810] sm:$0xff]  ;;  %5431 = vmatpush.msrb.mxu2 %v5235_v19 }
 0x6fb   : > { %v5251_v49 = vld [vmem:[#allocation14 + $0xcd0] sm:$0xff]  ;;  %5408 = vmatpush.msrb.mxu1 %v5213_v56  ;;  %5322 = vmatmul.f32.vlgmr.msra.gmra.mxu2 %v5118_v17  ;;  %v4995_v17 = vpop.f32.mrf.mxu0 }
 0x6fc   : > { %v5261_v39 = vld [vmem:[#allocation14 + $0xe10] sm:$0xff]  ;;  %5460 = vmatpush.msrb.mxu3 %v5251_v49  ;;  %v5628_v49 = vld [vmem:[#allocation13 + $0xed8] sm:$0xff] }
 0x6fd   : > { %v5234_v33 = vld [vmem:[#allocation14 + $0xab0] sm:$0xff]  ;;  %5495 = vmatpush.msra.mxu0 %v5261_v39  ;;  %5641 = vmatpush.msra.mxu1 %v5633_v7  ;;  %v5617_v39 = vld [vmem:[#allocation13 + $0xdc0] sm:$0xff]  ;;  %v5612_v7 = vld [vmem:[#allocation13 + $0xcd8] sm:$0xff] }
 0x6fe   : > { %v5250_v6 = vld [vmem:[#allocation14 + $0xcb0] sm:$0xff]  ;;  %5432 = vmatpush.msrb.mxu2 %v5234_v33  ;;  %5351 = vmatmul.f32.vlgmr.msra.gmra.mxu3 %v5119_v52  ;;  %v5136_v52 = vmul.f32 %v4995_v17, %v8377_v9  ;;  %v5593_v17 = vld [vmem:[#allocation13 + $0xac0] sm:$0xff] }
 0x6ff   : > { %v5233_v41 = vld [vmem:[#allocation14 + $0xa90] sm:$0xff]  ;;  %5461 = vmatpush.msrb.mxu3 %v5250_v6  ;;  %5728 = vmatpush.msrb.mxu0 %v5636_v22  ;;  %v4908_v6 = vpop.f32.mrf.mxu1 }
 0x700   : > { %v5249_v19 = vld [vmem:[#allocation14 + $0xc90] sm:$0xff]  ;;  %5433 = vmatpush.msrb.mxu2 %v5233_v41  ;;  %5642 = vmatpush.msra.mxu1 %v5625_v15  ;;  %v5133_v22 = vmul.f32 %v4908_v6, %v8372_v60  ;;  %v5601_v15 = vld [vmem:[#allocation13 + $0xbc0] sm:$0xff] }
 0x701   : > { %v5232_v56 = vld [vmem:[#allocation14 + $0xa70] sm:$0xff]  ;;  %5462 = vmatpush.msrb.mxu3 %v5249_v19  ;;  %5729 = vmatpush.msrb.mxu0 %v5628_v49  ;;  %v4934_v49 = vpop.f32.mrf.mxu2 }
 0x702   : > { %v5248_v0 = vld [vmem:[#allocation14 + $0xc70] sm:$0xff]  ;;  %5434 = vmatpush.msrb.mxu2 %v5232_v56  ;;  %5643 = vmatpush.msra.mxu1 %v5617_v39  ;;  %v5604_v56 = vld [vmem:[#allocation13 + $0xbd8] sm:$0xff]  ;;  %v4963_v39 = vpop.f32.mrf.mxu3 }
 0x703   : > { %v5231_v20 = vld [vmem:[#allocation14 + $0xa50] sm:$0xff]  ;;  %5463 = vmatpush.msrb.mxu3 %v5248_v0  ;;  %5730 = vmatpush.msrb.mxu0 %v5620_v32  ;;  %v5126_v0 = vmul.f32 %v4934_v49, %v8364_v27  ;;  %v5127_v32 = vmul.f32 %v4963_v39, %v8368_v40  ;;  %v5626_v49 = vld [vmem:[#allocation13 + $0xec8] sm:$0xff] }
 0x704   : > { %v5247_v33 = vld [vmem:[#allocation14 + $0xc50] sm:$0xff]  ;;  %5435 = vmatpush.msrb.mxu2 %v5231_v20  ;;  %5644 = vmatpush.msra.mxu1 %v5609_v55  ;;  %v5634_v55 = vld [vmem:[#allocation13 + $0xfc8] sm:$0xff] }
 0x705   : > { %v5230_v41 = vld [vmem:[#allocation14 + $0xa30] sm:$0xff]  ;;  %5464 = vmatpush.msrb.mxu3 %v5247_v33  ;;  %5299 = vmatmul.f32.gmra.mxu1 %v5133_v22  ;;  %v5596_v33 = vld [vmem:[#allocation13 + $0xad8] sm:$0xff] }
 0x706   : > { %v5246_v19 = vld [vmem:[#allocation14 + $0xc30] sm:$0xff]  ;;  %5731 = vmatpush.msrb.mxu0 %v5612_v7  ;;  %5436 = vmatpush.msrb.mxu2 %v5230_v41  ;;  %v5585_v7 = vld [vmem:[#allocation13 + $0x9c0] sm:$0xff] }
 0x707   : > { %5386 = vmatmul.f32.gmra.mxu0 %v5136_v52  ;;  %v5229_v6 = vld [vmem:[#allocation14 + $0xa10] sm:$0xff]  ;;  %5465 = vmatpush.msrb.mxu3 %v5246_v19  ;;  %v5588_v52 = vld [vmem:[#allocation13 + $0x9d8] sm:$0xff]  ;;  %v5577_v41 = vld [vmem:[#allocation13 + $0x8c0] sm:$0xff]  ;;  %v4911_v19 = vpop.f32.mrf.mxu1 }
 0x708   : > { %5645 = vmatpush.msra.mxu1 %v5601_v15  ;;  %v5245_v20 = vld [vmem:[#allocation14 + $0xc10] sm:$0xff]  ;;  %5325 = vmatmul.f32.gmra.mxu2 %v5126_v0  ;;  %v5580_v15 = vld [vmem:[#allocation13 + $0x8d8] sm:$0xff]  ;;  %v4998_v0 = vpop.f32.mrf.mxu0 }
 0x709   : > { %5732 = vmatpush.msrb.mxu0 %v5604_v56  ;;  %5354 = vmatmul.f32.gmra.mxu3 %v5127_v32  ;;  %v5635_v22 = vld [vmem:[#allocation13 + $0xfd0] sm:$0xff]  ;;  %v5141_v56 = vmul.f32 %v4911_v19, %v8392_v58  ;;  %v5144_v32 = vmul.f32 %v4998_v0, %v8397_v2  ;;  %v5610_v19 = vld [vmem:[#allocation13 + $0xcc8] sm:$0xff] }
 0x70a   : > { %5437 = vmatpush.msrb.mxu2 %v5229_v6  ;;  %5466 = vmatpush.msrb.mxu3 %v5245_v20  ;;  %v5627_v39 = vld [vmem:[#allocation13 + $0xed0] sm:$0xff]  ;;  %v5618_v6 = vld [vmem:[#allocation13 + $0xdc8] sm:$0xff]  ;;  %v5569_v20 = vld [vmem:[#allocation13 + $0x7c0] sm:$0xff] }
 0x70b   : > { %5646 = vmatpush.msra.mxu1 %v5593_v17  ;;  %5733 = vmatpush.msrb.mxu0 %v5596_v33  ;;  %v5619_v17 = vld [vmem:[#allocation13 + $0xdd0] sm:$0xff]  ;;  %v4937_v33 = vpop.f32.mrf.mxu2 }
 0x70c   : > { %5670 = vmatpush.msra.mxu2 %v5634_v55  ;;  %5699 = vmatpush.msra.mxu3 %v5635_v22  ;;  %v5572_v55 = vld [vmem:[#allocation13 + $0x7d8] sm:$0xff]  ;;  %v4966_v22 = vpop.f32.mrf.mxu3  ;;  %v5611_v0 = vld [vmem:[#allocation13 + $0xcd0] sm:$0xff] }
 0x70d   : > { %5647 = vmatpush.msra.mxu1 %v5585_v7  ;;  %5734 = vmatpush.msrb.mxu0 %v5588_v52  ;;  %v5134_v7 = vmul.f32 %v4937_v33, %v8384_v31  ;;  %v5135_v52 = vmul.f32 %v4966_v22, %v8388_v61  ;;  %v5594_v33 = vld [vmem:[#allocation13 + $0xac8] sm:$0xff]  ;;  %v5595_v22 = vld [vmem:[#allocation13 + $0xad0] sm:$0xff] }
 0x70e   : > { %5671 = vmatpush.msra.mxu2 %v5626_v49  ;;  %5700 = vmatpush.msra.mxu3 %v5627_v39  ;;  %v5561_v49 = vld [vmem:[#allocation13 + $0x6c0] sm:$0xff]  ;;  %v5602_v39 = vld [vmem:[#allocation13 + $0xbc8] sm:$0xff] }
 0x70f   : > { %5648 = vmatpush.msra.mxu1 %v5577_v41  ;;  %5735 = vmatpush.msrb.mxu0 %v5580_v15  ;;  %v5564_v41 = vld [vmem:[#allocation13 + $0x6d8] sm:$0xff]  ;;  %v5553_v15 = vld [vmem:[#allocation13 + $0x5c0] sm:$0xff] }
 0x710   : > { %5302 = vmatmul.f32.gmra.mxu1 %v5141_v56  ;;  %5389 = vmatmul.f32.gmra.mxu0 %v5144_v32  ;;  %v5603_v56 = vld [vmem:[#allocation13 + $0xbd0] sm:$0xff]  ;;  %v5556_v32 = vld [vmem:[#allocation13 + $0x5d8] sm:$0xff] }
 0x711   : > { %5672 = vmatpush.msra.mxu2 %v5618_v6  ;;  %5649 = vmatpush.msra.mxu1 %v5569_v20  ;;  %v5545_v6 = vld [vmem:[#allocation13 + $0x4c0] sm:$0xff]  ;;  %v5018_v20 = vpop.f32.mrf.mxu1 }
 0x712   : > { %5701 = vmatpush.msra.mxu3 %v5619_v17  ;;  %5328 = vmatmul.f32.gmra.mxu2 %v5134_v7  ;;  %v5548_v17 = vld [vmem:[#allocation13 + $0x4d8] sm:$0xff]  ;;  %v5105_v7 = vpop.f32.mrf.mxu0 }
 0x713   : > { %5736 = vmatpush.msrb.mxu0 %v5572_v55  ;;  %5357 = vmatmul.f32.gmra.mxu3 %v5135_v52  ;;  %v5121_v55 = vmul.f32 %v5018_v20, %v8412_v26  ;;  %v5124_v52 = vmul.f32 %v5105_v7, %v8417_v50  ;;  %v5578_v20 = vld [vmem:[#allocation13 + $0x8c8] sm:$0xff]  ;;  %v5579_v7 = vld [vmem:[#allocation13 + $0x8d0] sm:$0xff] }
 0x714   : > { %5673 = vmatpush.msra.mxu2 %v5610_v19  ;;  %5650 = vmatpush.msra.mxu1 %v5561_v49  ;;  %v5586_v19 = vld [vmem:[#allocation13 + $0x9c8] sm:$0xff]  ;;  %v5537_v49 = vld [vmem:[#allocation13 + $0x3c0] sm:$0xff] }
 0x715   : > { %5702 = vmatpush.msra.mxu3 %v5611_v0  ;;  %5737 = vmatpush.msrb.mxu0 %v5564_v41  ;;  %v5587_v0 = vld [vmem:[#allocation13 + $0x9d0] sm:$0xff]  ;;  %v4940_v41 = vpop.f32.mrf.mxu2 }
 0x716   : > { %5674 = vmatpush.msra.mxu2 %v5602_v39  ;;  %5651 = vmatpush.msra.mxu1 %v5553_v15  ;;  %v5540_v39 = vld [vmem:[#allocation13 + $0x3d8] sm:$0xff]  ;;  %v5142_v15 = vmul.f32 %v4940_v41, %v8404_v47 }
 0x717   : > { %5703 = vmatpush.msra.mxu3 %v5603_v56  ;;  %5738 = vmatpush.msrb.mxu0 %v5556_v32  ;;  %v4969_v56 = vpop.f32.mrf.mxu3  ;;  %v5524_v41 = vld [vmem:[#allocation13 + $0x1d8] sm:$0xff] }
 0x718   : > { %5675 = vmatpush.msra.mxu2 %v5594_v33  ;;  %5652 = vmatpush.msra.mxu1 %v5545_v6  ;;  %v5143_v32 = vmul.f32 %v4969_v56, %v8408_v18  ;;  %v5529_v33 = vld [vmem:[#allocation13 + $0x2c0] sm:$0xff]  ;;  %v5532_v6 = vld [vmem:[#allocation13 + $0x2d8] sm:$0xff] }
 0x719   : > { %5704 = vmatpush.msra.mxu3 %v5595_v22  ;;  %5409 = vmatmul.f32.vlgmr.msrb.gmra.mxu1 %v5121_v55  ;;  %v5570_v22 = vld [vmem:[#allocation13 + $0x7c8] sm:$0xff]  ;;  %v5571_v55 = vld [vmem:[#allocation13 + $0x7d0] sm:$0xff]  ;;  %v5516_v56 = vld [vmem:[#allocation13 + $0xd8] sm:$0xff] }
 0x71a   : > { %5739 = vmatpush.msrb.mxu0 %v5548_v17  ;;  %5676 = vmatpush.msra.mxu2 %v5586_v19  ;;  %v5521_v17 = vld [vmem:[#allocation13 + $0x1c0] sm:$0xff]  ;;  %v5108_v10 = vpop.f32.mrf.mxu0 }
 0x71b   : > { %5496 = vmatmul.f32.vlgmr.msra.gmra.mxu0 %v5124_v52  ;;  %5653 = vmatpush.msra.mxu1 %v5537_v49  ;;  %v5021_v52 = vpop.f32.mrf.mxu1  ;;  %v5562_v49 = vld [vmem:[#allocation13 + $0x6c8] sm:$0xff] }
 0x71c   : > { %5705 = vmatpush.msra.mxu3 %v5587_v0  ;;  %5331 = vmatmul.f32.gmra.mxu2 %v5142_v15  ;;  %v5129_v19 = vmul.f32 %v5021_v52, %v8432_v38  ;;  %v5132_v0 = vmul.f32 %v5108_v10, %v8437_v8  ;;  %v5563_v15 = vld [vmem:[#allocation13 + $0x6d0] sm:$0xff] }
 0x71d   : > { %5740 = vmatpush.msrb.mxu0 %v5540_v39  ;;  %5360 = vmatmul.f32.gmra.mxu3 %v5143_v32  ;;  %v5513_v39 = vld [vmem:[#allocation13 + $0xc0] sm:$0xff]  ;;  %v5047_v32 = vpop.f32.mrf.mxu2 }
 0x71e   : > { %5677 = vmatpush.msra.mxu2 %v5578_v20  ;;  %5654 = vmatpush.msra.mxu1 %v5529_v33  ;;  %v5554_v20 = vld [vmem:[#allocation13 + $0x5c8] sm:$0xff]  ;;  %v5555_v33 = vld [vmem:[#allocation13 + $0x5d0] sm:$0xff] }
 0x71f   : > { %5706 = vmatpush.msra.mxu3 %v5579_v7  ;;  %5741 = vmatpush.msrb.mxu0 %v5532_v6  ;;  %v5122_v7 = vmul.f32 %v5047_v32, %v8424_v36  ;;  %v5076_v52 = vpop.f32.mrf.mxu3  ;;  %v5637_v6 = vld [vmem:[#allocation13 + $0xfe0] sm:$0xff] }
 0x720   : > { %5678 = vmatpush.msra.mxu2 %v5570_v22  ;;  %5655 = vmatpush.msra.mxu1 %v5521_v17  ;;  %v5123_v10 = vmul.f32 %v5076_v52, %v8428_v12  ;;  %v5640_v22 = vld [vmem:[#allocation13 + $0xff8] sm:$0xff]  ;;  %v5546_v17 = vld [vmem:[#allocation13 + $0x4c8] sm:$0xff] }
 0x721   : > { %5707 = vmatpush.msra.mxu3 %v5571_v55  ;;  %5412 = vmatmul.f32.gmra.mxu1 %v5129_v19  ;;  %v5547_v55 = vld [vmem:[#allocation13 + $0x4d0] sm:$0xff] }
 0x722   : > { %5742 = vmatpush.msrb.mxu0 %v5524_v41  ;;  %5679 = vmatpush.msra.mxu2 %v5562_v49  ;;  %v5629_v41 = vld [vmem:[#allocation13 + $0xee0] sm:$0xff]  ;;  %v5632_v49 = vld [vmem:[#allocation13 + $0xef8] sm:$0xff]  ;;  %v5111_v32 = vpop.f32.mrf.mxu0 }
 0x723   : > { %5499 = vmatmul.f32.gmra.mxu0 %v5132_v0  ;;  %5656 = vmatpush.msra.mxu1 %v5513_v39  ;;  %v5024_v19 = vpop.f32.mrf.mxu1  ;;  %v5538_v39 = vld [vmem:[#allocation13 + $0x3c8] sm:$0xff] }
 0x724   : > { %5708 = vmatpush.msra.mxu3 %v5563_v15  ;;  %5743 = vmatpush.msrb.mxu0 %v5516_v56  ;;  %v5137_v0 = vmul.f32 %v5024_v19, %v8452_v3  ;;  %v5140_v15 = vmul.f32 %v5111_v32, %v8457_v30  ;;  %v5539_v56 = vld [vmem:[#allocation13 + $0x3d0] sm:$0xff] }
 0x725   : > { %5680 = vmatpush.msra.mxu2 %v5554_v20  ;;  %5467 = vmatmul.f32.vlgmr.msrb.gmra.mxu3 %v5123_v10  ;;  %v5621_v20 = vld [vmem:[#allocation13 + $0xde0] sm:$0xff]  ;;  %v5050_v52 = vpop.f32.mrf.mxu2 }
 0x726   : > { %5438 = vmatmul.f32.vlgmr.msrb.gmra.mxu2 %v5122_v7  ;;  %5709 = vmatpush.msra.mxu3 %v5555_v33  ;;  %v5624_v33 = vld [vmem:[#allocation13 + $0xdf8] sm:$0xff]  ;;  %v5530_v7 = vld [vmem:[#allocation13 + $0x2c8] sm:$0xff]  ;;  %v5130_v10 = vmul.f32 %v5050_v52, %v8444_v59 }
 0x727   : > { %5757 = vmatpush.msrb.mxu1 %v5637_v6  ;;  %5844 = vmatpush.msra.mxu0 %v5640_v22  ;;  %v5531_v6 = vld [vmem:[#allocation13 + $0x2d0] sm:$0xff]  ;;  %v5079_v19 = vpop.f32.mrf.mxu3  ;;  %v5613_v22 = vld [vmem:[#allocation13 + $0xce0] sm:$0xff] }
 0x728   : > { %5681 = vmatpush.msra.mxu2 %v5546_v17  ;;  %5710 = vmatpush.msra.mxu3 %v5547_v55  ;;  %v5131_v17 = vmul.f32 %v5079_v19, %v8448_v62  ;;  %v5616_v55 = vld [vmem:[#allocation13 + $0xcf8] sm:$0xff] }
 0x729   : > { %5758 = vmatpush.msrb.mxu1 %v5629_v41  ;;  %5845 = vmatpush.msra.mxu0 %v5632_v49  ;;  %v5522_v41 = vld [vmem:[#allocation13 + $0x1c8] sm:$0xff]  ;;  %v5523_v49 = vld [vmem:[#allocation13 + $0x1d0] sm:$0xff] }
 0x72a   : > { %5415 = vmatmul.f32.gmra.mxu1 %v5137_v0  ;;  %5682 = vmatpush.msra.mxu2 %v5538_v39  ;;  %v5605_v0 = vld [vmem:[#allocation13 + $0xbe0] sm:$0xff]  ;;  %v5608_v39 = vld [vmem:[#allocation13 + $0xbf8] sm:$0xff]  ;;  %v5114_v52 = vpop.f32.mrf.mxu0 }
 0x72b   : > { %5502 = vmatmul.f32.gmra.mxu0 %v5140_v15  ;;  %5711 = vmatpush.msra.mxu3 %v5539_v56  ;;  %v5027_v32 = vpop.f32.mrf.mxu1  ;;  %v5514_v56 = vld [vmem:[#allocation13 + $0xc8] sm:$0xff] }
 0x72c   : > { %5759 = vmatpush.msrb.mxu1 %v5621_v20  ;;  %5846 = vmatpush.msra.mxu0 %v5624_v33  ;;  %v5145_v15 = vmul.f32 %v5027_v32, %v8472_v45  ;;  %v5148_v20 = vmul.f32 %v5114_v52, %v8477_v42  ;;  %v5515_v33 = vld [vmem:[#allocation13 + $0xd0] sm:$0xff]  ;;  %v8876_v42 = vld [vmem:[#allocation14 + $0xe18] sm:$0xff] }
 0x72d   : > { %5683 = vmatpush.msra.mxu2 %v5530_v7  ;;  %5712 = vmatpush.msra.mxu3 %v5531_v6  ;;  %v5597_v7 = vld [vmem:[#allocation13 + $0xae0] sm:$0xff]  ;;  %v5600_v6 = vld [vmem:[#allocation13 + $0xaf8] sm:$0xff]  ;;  %v5053_v19 = vpop.f32.mrf.mxu2  ;;  %v5631_v52 = vld [vmem:[#allocation13 + $0xef0] sm:$0xff] }
 0x72e   : > { %5441 = vmatmul.f32.gmra.mxu2 %v5130_v10  ;;  %5470 = vmatmul.f32.gmra.mxu3 %v5131_v17  ;;  %v5638_v10 = vld [vmem:[#allocation13 + $0xfe8] sm:$0xff]  ;;  %v5138_v17 = vmul.f32 %v5053_v19, %v8464_v13  ;;  %v5565_v19 = vld [vmem:[#allocation13 + $0x6e0] sm:$0xff] }
 0x72f   : > { %5760 = vmatpush.msrb.mxu1 %v5613_v22  ;;  %5847 = vmatpush.msra.mxu0 %v5616_v55  ;;  %v5589_v22 = vld [vmem:[#allocation13 + $0x9e0] sm:$0xff]  ;;  %v5082_v32 = vpop.f32.mrf.mxu3  ;;  %v5592_v55 = vld [vmem:[#allocation13 + $0x9f8] sm:$0xff] }
 0x730   : > { %5684 = vmatpush.msra.mxu2 %v5522_v41  ;;  %5713 = vmatpush.msra.mxu3 %v5523_v49  ;;  %v5139_v41 = vmul.f32 %v5082_v32, %v8468_v35  ;;  %v5639_v49 = vld [vmem:[#allocation13 + $0xff0] sm:$0xff]  ;;  %v5568_v32 = vld [vmem:[#allocation13 + $0x6f8] sm:$0xff] }
 0x731   : > { %5761 = vmatpush.msrb.mxu1 %v5605_v0  ;;  %5848 = vmatpush.msra.mxu0 %v5608_v39  ;;  %v5630_v0 = vld [vmem:[#allocation13 + $0xee8] sm:$0xff]  ;;  %v5581_v39 = vld [vmem:[#allocation13 + $0x8e0] sm:$0xff] }
 0x732   : > { %5418 = vmatmul.f32.gmra.mxu1 %v5145_v15  ;;  %5685 = vmatpush.msra.mxu2 %v5514_v56  ;;  %v5584_v15 = vld [vmem:[#allocation13 + $0x8f8] sm:$0xff]  ;;  %v5622_v56 = vld [vmem:[#allocation13 + $0xde8] sm:$0xff] }
 0x733   : > { %5505 = vmatmul.f32.gmra.mxu0 %v5148_v20  ;;  %5714 = vmatpush.msra.mxu3 %v5515_v33  ;;  %v5573_v20 = vld [vmem:[#allocation13 + $0x7e0] sm:$0xff]  ;;  %v5623_v33 = vld [vmem:[#allocation13 + $0xdf0] sm:$0xff] }
 0x734   : > { %5762 = vmatpush.msrb.mxu1 %v5597_v7  ;;  %5849 = vmatpush.msra.mxu0 %v5600_v6  ;;  %v5576_v7 = vld [vmem:[#allocation13 + $0x7f8] sm:$0xff]  ;;  %v5614_v6 = vld [vmem:[#allocation13 + $0xce8] sm:$0xff] }
 0x735   : > { %5786 = vmatpush.msrb.mxu2 %v5638_v10  ;;  %5815 = vmatpush.msrb.mxu3 %v5639_v49  ;;  %v5056_v10 = vpop.f32.mrf.mxu2  ;;  %v5606_v49 = vld [vmem:[#allocation13 + $0xbe8] sm:$0xff] }
 0x736   : > { %5444 = vmatmul.f32.gmra.mxu2 %v5138_v17  ;;  %5763 = vmatpush.msrb.mxu1 %v5589_v22  ;;  %v5146_v22 = vmul.f32 %v5056_v10, %v8484_v16  ;;  %v5544_v10 = vld [vmem:[#allocation13 + $0x3f8] sm:$0xff] }
 0x737   : > { %5473 = vmatmul.f32.gmra.mxu3 %v5139_v41  ;;  %5850 = vmatpush.msra.mxu0 %v5592_v55  ;;  %v5085_v17 = vpop.f32.mrf.mxu3  ;;  %v5615_v41 = vld [vmem:[#allocation13 + $0xcf0] sm:$0xff] }
 0x738   : > { %5787 = vmatpush.msrb.mxu2 %v5630_v0  ;;  %5764 = vmatpush.msrb.mxu1 %v5581_v39  ;;  %v5147_v55 = vmul.f32 %v5085_v17, %v8488_v1  ;;  %v5557_v0 = vld [vmem:[#allocation13 + $0x5e0] sm:$0xff]  ;;  %v5560_v39 = vld [vmem:[#allocation13 + $0x5f8] sm:$0xff] }
 0x739   : > { %5851 = vmatpush.msra.mxu0 %v5584_v15  ;;  %5816 = vmatpush.msrb.mxu3 %v5631_v52  ;;  %v5607_v15 = vld [vmem:[#allocation13 + $0xbf0] sm:$0xff]  ;;  %v5598_v52 = vld [vmem:[#allocation13 + $0xae8] sm:$0xff]  ;;  %v5533_v17 = vld [vmem:[#allocation13 + $0x2e0] sm:$0xff] }
 0x73a   : > { %5657 = vmatmul.f32.vlgmr.msra.gmra.mxu1 %v9391_v24  ;;  %5788 = vmatpush.msrb.mxu2 %v5622_v56  ;;  %v5549_v56 = vld [vmem:[#allocation13 + $0x4e0] sm:$0xff] }
 0x73b   : > { %5744 = vmatmul.f32.vlgmr.msrb.gmra.mxu0 %v9391_v24  ;;  %5765 = vmatpush.msrb.mxu1 %v5573_v20  ;;  %v5599_v20 = vld [vmem:[#allocation13 + $0xaf0] sm:$0xff] }
 0x73c   : > { %5817 = vmatpush.msrb.mxu3 %v5623_v33  ;;  %5852 = vmatpush.msra.mxu0 %v5576_v7  ;;  %v5552_v33 = vld [vmem:[#allocation13 + $0x4f8] sm:$0xff]  ;;  %v5590_v7 = vld [vmem:[#allocation13 + $0x9e8] sm:$0xff] }
 0x73d   : > { %5789 = vmatpush.msrb.mxu2 %v5614_v6  ;;  %5766 = vmatpush.msrb.mxu1 %v5565_v19  ;;  %v5541_v6 = vld [vmem:[#allocation13 + $0x3e0] sm:$0xff]  ;;  %v5591_v19 = vld [vmem:[#allocation13 + $0x9f0] sm:$0xff] }
 0x73e   : > { %5447 = vmatmul.f32.gmra.mxu2 %v5146_v22  ;;  %5853 = vmatpush.msra.mxu0 %v5568_v32  ;;  %v5582_v22 = vld [vmem:[#allocation13 + $0x8e8] sm:$0xff]  ;;  %v5536_v32 = vld [vmem:[#allocation13 + $0x2f8] sm:$0xff] }
 0x73f   : > { %5476 = vmatmul.f32.gmra.mxu3 %v5147_v55  ;;  %5790 = vmatpush.msrb.mxu2 %v5606_v49  ;;  %v5583_v55 = vld [vmem:[#allocation13 + $0x8f0] sm:$0xff]  ;;  %v5525_v49 = vld [vmem:[#allocation13 + $0x1e0] sm:$0xff] }
 0x740   : > { %5818 = vmatpush.msrb.mxu3 %v5615_v41  ;;  %5767 = vmatpush.msrb.mxu1 %v5557_v0  ;;  %v5574_v41 = vld [vmem:[#allocation13 + $0x7e8] sm:$0xff]  ;;  %v5575_v0 = vld [vmem:[#allocation13 + $0x7f0] sm:$0xff] }
 0x741   : > { %5854 = vmatpush.msra.mxu0 %v5560_v39  ;;  %5791 = vmatpush.msrb.mxu2 %v5598_v52  ;;  %v5528_v39 = vld [vmem:[#allocation13 + $0x1f8] sm:$0xff]  ;;  %v5517_v52 = vld [vmem:[#allocation13 + $0xe0] sm:$0xff] }
 0x742   : > { %5660 = vmatmul.f32.gmra.mxu1 %v9396_v25  ;;  %5819 = vmatpush.msrb.mxu3 %v5607_v15  ;;  %v5566_v15 = vld [vmem:[#allocation13 + $0x6e8] sm:$0xff] }
 0x743   : > { %5747 = vmatmul.f32.gmra.mxu0 %v9396_v25  ;;  %5768 = vmatpush.msrb.mxu1 %v5549_v56  ;;  %v5520_v56 = vld [vmem:[#allocation13 + $0xf8] sm:$0xff] }
 0x744   : > { %5820 = vmatpush.msrb.mxu3 %v5599_v20  ;;  %5855 = vmatpush.msra.mxu0 %v5552_v33  ;;  %v5567_v20 = vld [vmem:[#allocation13 + $0x6f0] sm:$0xff]  ;;  %v5558_v33 = vld [vmem:[#allocation13 + $0x5e8] sm:$0xff] }
 0x745   : > { %5792 = vmatpush.msrb.mxu2 %v5590_v7  ;;  %5769 = vmatpush.msrb.mxu1 %v5541_v6  ;;  %v5559_v7 = vld [vmem:[#allocation13 + $0x5f0] sm:$0xff]  ;;  %v5550_v6 = vld [vmem:[#allocation13 + $0x4e8] sm:$0xff] }
 0x746   : > { %5686 = vmatmul.f32.vlgmr.msra.gmra.mxu2 %v9391_v24  ;;  %5856 = vmatpush.msra.mxu0 %v5544_v10  ;;  %v5551_v10 = vld [vmem:[#allocation13 + $0x4f0] sm:$0xff] }
 0x747   : > { %5715 = vmatmul.f32.vlgmr.msra.gmra.mxu3 %v9391_v24  ;;  %5793 = vmatpush.msrb.mxu2 %v5582_v22  ;;  %v5543_v22 = vld [vmem:[#allocation13 + $0x3f0] sm:$0xff] }
 0x748   : > { %5821 = vmatpush.msrb.mxu3 %v5591_v19  ;;  %5770 = vmatpush.msrb.mxu1 %v5533_v17  ;;  %v5542_v19 = vld [vmem:[#allocation13 + $0x3e8] sm:$0xff] }
 0x749   : > { %5857 = vmatpush.msra.mxu0 %v5536_v32  ;;  %5794 = vmatpush.msrb.mxu2 %v5574_v41  ;;  %v5534_v17 = vld [vmem:[#allocation13 + $0x2e8] sm:$0xff]  ;;  %v5535_v32 = vld [vmem:[#allocation13 + $0x2f0] sm:$0xff] }
 0x74a   : > { %5663 = vmatmul.f32.gmra.mxu1 %v9402_v44  ;;  %5822 = vmatpush.msrb.mxu3 %v5583_v55  ;;  %v5526_v55 = vld [vmem:[#allocation13 + $0x1e8] sm:$0xff]  ;;  %v5527_v41 = vld [vmem:[#allocation13 + $0x1f0] sm:$0xff] }
 0x74b   : > { %5750 = vmatmul.f32.gmra.mxu0 %v9402_v44  ;;  %5771 = vmatpush.msrb.mxu1 %v5525_v49  ;;  %v5518_v49 = vld [vmem:[#allocation13 + $0xe8] sm:$0xff] }
 0x74c   : > { %5823 = vmatpush.msrb.mxu3 %v5575_v0  ;;  %5858 = vmatpush.msra.mxu0 %v5528_v39  ;;  %v5519_v0 = vld [vmem:[#allocation13 + $0xf0] sm:$0xff] }
 0x74d   : > { %5795 = vmatpush.msrb.mxu2 %v5566_v15  ;;  %5772 = vmatpush.msrb.mxu1 %v5517_v52 }
 0x74e   : > { %5689 = vmatmul.f32.gmra.mxu2 %v9396_v25  ;;  %5859 = vmatpush.msra.mxu0 %v5520_v56  ;;  %v5968_v56 = vld [vmem:[#allocation14 + $0x7f8] sm:$0xff] }
 0x74f   : > { %5718 = vmatmul.f32.gmra.mxu3 %v9396_v25  ;;  %5796 = vmatpush.msrb.mxu2 %v5558_v33 }
 0x750   : > { %5824 = vmatpush.msrb.mxu3 %v5567_v20  ;;  %v5919_v20 = vld [vmem:[#allocation14 + $0x1d8] sm:$0xff]  ;;  %6120 = vmatpush.msrb.mxu0 %v5968_v56 }
 0x751   : > { %5797 = vmatpush.msrb.mxu2 %v5550_v6  ;;  %v5966_v6 = vld [vmem:[#allocation14 + $0x7b8] sm:$0xff] }
 0x752   : > { %5666 = vmatmul.f32.gmra.mxu1 %v9408_v57  ;;  %5825 = vmatpush.msrb.mxu3 %v5559_v7  ;;  %v5967_v7 = vld [vmem:[#allocation14 + $0x7d8] sm:$0xff] }
 0x753   : > { %5753 = vmatmul.f32.gmra.mxu0 %v9408_v57  ;;  %5798 = vmatpush.msrb.mxu2 %v5542_v19 }
 0x754   : > { %5826 = vmatpush.msrb.mxu3 %v5551_v10  ;;  %6121 = vmatpush.msrb.mxu0 %v5967_v7  ;;  %v5965_v10 = vld [vmem:[#allocation14 + $0x798] sm:$0xff] }
 0x755   : > { %5799 = vmatpush.msrb.mxu2 %v5534_v17  ;;  %v5962_v7 = vld [vmem:[#allocation14 + $0x738] sm:$0xff] }
 0x756   : > { %5692 = vmatmul.f32.gmra.mxu2 %v9402_v44  ;;  %5827 = vmatpush.msrb.mxu3 %v5543_v22 }
 0x757   : > { %5721 = vmatmul.f32.gmra.mxu3 %v9402_v44  ;;  %5800 = vmatpush.msrb.mxu2 %v5526_v55  ;;  %v5916_v55 = vld [vmem:[#allocation14 + $0x178] sm:$0xff] }
 0x758   : > { %5828 = vmatpush.msrb.mxu3 %v5535_v32  ;;  %6122 = vmatpush.msrb.mxu0 %v5966_v6  ;;  %v5912_v6 = vld [vmem:[#allocation14 + $0xf8] sm:$0xff] }
 0x759   : > { %5801 = vmatpush.msrb.mxu2 %v5518_v49  ;;  %v5915_v49 = vld [vmem:[#allocation14 + $0x158] sm:$0xff] }
 0x75a   : > { %5773 = vmatmul.f32.vlgmr.msrb.gmra.mxu1 %v9391_v24  ;;  %5829 = vmatpush.msrb.mxu3 %v5527_v41  ;;  %v5964_v41 = vld [vmem:[#allocation14 + $0x778] sm:$0xff] }
 0x75b   : > { %5860 = vmatmul.f32.vlgmr.msra.gmra.mxu0 %v9391_v24 }
 0x75c   : > { %5830 = vmatpush.msrb.mxu3 %v5519_v0  ;;  %v5381_v15 = vpop.f32.mrf.mxu0  ;;  %6123 = vmatpush.msrb.mxu0 %v5965_v10 }
 0x75d   : > { %v5294_v39 = vpop.f32.mrf.mxu1 }
 0x75e   : > { %5695 = vmatmul.f32.gmra.mxu2 %v9408_v57  ;;  %6124 = vmatpush.msrb.mxu0 %v5964_v41  ;;  %v5952_v41 = vld [vmem:[#allocation14 + $0x5f8] sm:$0xff] }
 0x75f   : > { %5724 = vmatmul.f32.gmra.mxu3 %v9408_v57 }
 0x760   : > { %6091 = vmatpush.msra.mxu3 %v5952_v41  ;;  %v5956_v41 = vld [vmem:[#allocation14 + $0x678] sm:$0xff] }
 0x762   : > { %5776 = vmatmul.f32.gmra.mxu1 %v9396_v25 }
 0x763   : > { %5863 = vmatmul.f32.gmra.mxu0 %v9396_v25 }
 0x766   : > { %5802 = vmatmul.f32.vlgmr.msrb.gmra.mxu2 %v9391_v24 }
 0x767   : > { %5831 = vmatmul.f32.vlgmr.msrb.gmra.mxu3 %v9391_v24  ;;  %v5920_v24 = vld [vmem:[#allocation14 + $0x1f8] sm:$0xff] }
 0x768   : > { %6033 = vmatpush.msra.mxu1 %v5920_v24 }
 0x76a   : > { %5779 = vmatmul.f32.gmra.mxu1 %v9402_v44 }
 0x76b   : > { %5866 = vmatmul.f32.gmra.mxu0 %v9402_v44  ;;  %6034 = vmatpush.msra.mxu1 %v5919_v20  ;;  %v5914_v20 = vld [vmem:[#allocation14 + $0x138] sm:$0xff] }
 0x76e   : > { %5805 = vmatmul.f32.gmra.mxu2 %v9396_v25  ;;  %v5297_v52 = vpop.f32.mrf.mxu1 }
 0x76f   : > { %5834 = vmatmul.f32.gmra.mxu3 %v9396_v25  ;;  %v5918_v25 = vld [vmem:[#allocation14 + $0x1b8] sm:$0xff] }
 0x770   : > { %6035 = vmatpush.msra.mxu1 %v5918_v25  ;;  %v5913_v25 = vld [vmem:[#allocation14 + $0x118] sm:$0xff] }
 0x772   : > { %5782 = vmatmul.f32.gmra.mxu1 %v9408_v57 }
 0x773   : > { %5869 = vmatmul.f32.gmra.mxu0 %v9408_v57  ;;  %v8778_v33 = vpop.f32.mrf.mxu0 }
 0x776   : > { %5808 = vmatmul.f32.gmra.mxu2 %v9402_v44 }
 0x777   : > { %5837 = vmatmul.f32.gmra.mxu3 %v9402_v44  ;;  %v5917_v44 = vld [vmem:[#allocation14 + $0x198] sm:$0xff] }
 0x778   : > { %6036 = vmatpush.msra.mxu1 %v5917_v44  ;;  %v5960_v44 = vld [vmem:[#allocation14 + $0x6f8] sm:$0xff] }
 0x77a   : > { %6037 = vmatpush.msra.mxu1 %v5916_v55  ;;  %v5936_v55 = vld [vmem:[#allocation14 + $0x3f8] sm:$0xff] }
 0x77b   : > { %6062 = vmatpush.msra.mxu2 %v5936_v55  ;;  %v5957_v55 = vld [vmem:[#allocation14 + $0x698] sm:$0xff] }
 0x77c   : > { %6038 = vmatpush.msra.mxu1 %v5915_v49 }
 0x77e   : > { %5811 = vmatmul.f32.gmra.mxu2 %v9408_v57  ;;  %v5323_v19 = vpop.f32.mrf.mxu2  ;;  %6039 = vmatpush.msra.mxu1 %v5914_v20  ;;  %v5935_v20 = vld [vmem:[#allocation14 + $0x3d8] sm:$0xff] }
 0x77f   : > { %5840 = vmatmul.f32.gmra.mxu3 %v9408_v57  ;;  %v5324_v17 = vadd.f32 %v5323_v19, %v5294_v39  ;;  %v5963_v57 = vld [vmem:[#allocation14 + $0x758] sm:$0xff]  ;;  %6063 = vmatpush.msra.mxu2 %v5935_v20 }
 0x780   : > { %6125 = vmatpush.msrb.mxu0 %v5963_v57  ;;  %v5961_v39 = vld [vmem:[#allocation14 + $0x718] sm:$0xff]  ;;  %6040 = vmatpush.msra.mxu1 %v5913_v25 }
 0x781   : > { %v5352_v32 = vpop.f32.mrf.mxu3  ;;  %v5959_v57 = vld [vmem:[#allocation14 + $0x6d8] sm:$0xff] }
 0x782   : > { %v8782_v22 = vpop.f32.mrf.mxu1  ;;  %v5353_v24 = vadd.f32 %v5352_v32, %v5324_v17  ;;  %6126 = vmatpush.msrb.mxu0 %v5962_v7  ;;  %6041 = vmatpush.msra.mxu1 %v5912_v6  ;;  %v5910_v7 = vld [vmem:[#allocation14 + $0xb8] sm:$0xff] }
 0x783   : > { %v5951_v25 = vld [vmem:[#allocation14 + $0x5d8] sm:$0xff] }
 0x784   : > { %v8784_v0 = vpop.f32.mrf.mxu0  ;;  %v8786_v56 = vadd.f32 %v5381_v15, %v5353_v24  ;;  %6127 = vmatpush.msrb.mxu0 %v5961_v39  ;;  %v5911_v15 = vld [vmem:[#allocation14 + $0xd8] sm:$0xff]  ;;  %6092 = vmatpush.msra.mxu3 %v5951_v25 }
 0x785   : > { %6042 = vmatpush.msra.mxu1 %v5911_v15  ;;  %v5958_v39 = vld [vmem:[#allocation14 + $0x6b8] sm:$0xff] }
 0x786   : > { %6128 = vmatpush.msrb.mxu0 %v5960_v44  ;;  %v5934_v6 = vld [vmem:[#allocation14 + $0x3b8] sm:$0xff] }
 0x787   : > { %6043 = vmatpush.msra.mxu1 %v5910_v7  ;;  %v5909_v44 = vld [vmem:[#allocation14 + $0x98] sm:$0xff]  ;;  %6064 = vmatpush.msra.mxu2 %v5934_v6 }
 0x788   : > { %6129 = vmatpush.msrb.mxu0 %v5959_v57  ;;  %v5949_v15 = vld [vmem:[#allocation14 + $0x598] sm:$0xff] }
 0x789   : > { %6044 = vmatpush.msra.mxu1 %v5909_v44  ;;  %v5932_v57 = vld [vmem:[#allocation14 + $0x378] sm:$0xff] }
 0x78a   : > { %6130 = vmatpush.msrb.mxu0 %v5958_v39  ;;  %v5955_v7 = vld [vmem:[#allocation14 + $0x658] sm:$0xff] }
 0x78b   : > { %v5326_v10 = vpop.f32.mrf.mxu2  ;;  %v5931_v25 = vld [vmem:[#allocation14 + $0x358] sm:$0xff] }
 0x78c   : > { %v5327_v17 = vadd.f32 %v5326_v10, %v5297_v52  ;;  %v5355_v32 = vpop.f32.mrf.mxu3  ;;  %v5950_v10 = vld [vmem:[#allocation14 + $0x5b8] sm:$0xff]  ;;  %6131 = vmatpush.msrb.mxu0 %v5957_v55 }
 0x78d   : > { %v8788_v19 = vpop.f32.mrf.mxu1  ;;  %v8790_v49 = vpop.f32.mrf.mxu0  ;;  %6093 = vmatpush.msra.mxu3 %v5950_v10  ;;  %v5906_v10 = vld [vmem:[#allocation14 + $0x38] sm:$0xff] }
 0x78e   : > { %v5356_v24 = vadd.f32 %v5355_v32, %v5327_v17  ;;  %v5933_v17 = vld [vmem:[#allocation14 + $0x398] sm:$0xff]  ;;  %6132 = vmatpush.msrb.mxu0 %v5956_v41 }
 0x78f   : > { %v5908_v32 = vld [vmem:[#allocation14 + $0x78] sm:$0xff]  ;;  %6065 = vmatpush.msra.mxu2 %v5933_v17  ;;  %6094 = vmatpush.msra.mxu3 %v5949_v15 }
 0x790   : > { %v8793_v52 = vadd.f32 %v8778_v33, %v5356_v24  ;;  %6045 = vmatpush.msra.mxu1 %v5908_v32  ;;  %v5907_v33 = vld [vmem:[#allocation14 + $0x58] sm:$0xff]  ;;  %6133 = vmatpush.msrb.mxu0 %v5955_v7 }
 0x791   : > { %v5948_v24 = vld [vmem:[#allocation14 + $0x578] sm:$0xff]  ;;  %6066 = vmatpush.msra.mxu2 %v5932_v57 }
 0x792   : > { %6046 = vmatpush.msra.mxu1 %v5907_v33  ;;  %6095 = vmatpush.msra.mxu3 %v5948_v24  ;;  %v5947_v55 = vld [vmem:[#allocation14 + $0x558] sm:$0xff] }
 0x793   : > { %v5954_v17 = vld [vmem:[#allocation14 + $0x638] sm:$0xff]  ;;  %6067 = vmatpush.msra.mxu2 %v5931_v25 }
 0x794   : > { %6047 = vmatpush.msra.mxu1 %v5906_v10  ;;  %6096 = vmatpush.msra.mxu3 %v5947_v55  ;;  %v5930_v57 = vld [vmem:[#allocation14 + $0x338] sm:$0xff] }
 0x795   : > { %v5329_v20 = vpop.f32.mrf.mxu2  ;;  %6134 = vmatpush.msrb.mxu0 %v5954_v17  ;;  %v5905_v33 = vld [vmem:[#allocation14 + $0x18] sm:$0xff]  ;;  %6068 = vmatpush.msra.mxu2 %v5930_v57 }
 0x796   : > { %v5410_v39 = vpop.f32.mrf.mxu1  ;;  %v5330_v6 = vadd.f32 %v5329_v20, %v8782_v22  ;;  %v5358_v44 = vpop.f32.mrf.mxu3  ;;  %6048 = vmatpush.msra.mxu1 %v5905_v33  ;;  %v5953_v22 = vld [vmem:[#allocation14 + $0x618] sm:$0xff]  ;;  %6097 = vmatpush.msra.mxu3 %v5946_v54 }
 0x797   : > { %v8797_v32 = vadd.f32 %v5410_v39, %v8786_v56  ;;  %6135 = vmatpush.msrb.mxu0 %v5953_v22  ;;  %v5929_v56 = vld [vmem:[#allocation14 + $0x318] sm:$0xff] }
 0x798   : > { %v8799_v15 = vpop.f32.mrf.mxu0  ;;  %v5359_v41 = vadd.f32 %v5358_v44, %v5330_v6  ;;  %v5945_v20 = vld [vmem:[#allocation14 + $0x518] sm:$0xff]  ;;  %6069 = vmatpush.msra.mxu2 %v5929_v56 }
 0x799   : > { %v5984_v7 = vld [vmem:[#allocation14 + $0x9f8] sm:$0xff]  ;;  %6098 = vmatpush.msra.mxu3 %v5945_v20 }
 0x79a   : > { %v8802_v24 = vadd.f32 %v8784_v0, %v5359_v41  ;;  %6149 = vmatpush.msrb.mxu1 %v5984_v7  ;;  %v8804_v25 = vld [vmem:[#allocation14 + $0xff8] sm:$0xff] }
 0x79b   : > { %6236 = vmatpush.msra.mxu0 %v8804_v25  ;;  %v5928_v39 = vld [vmem:[#allocation14 + $0x2f8] sm:$0xff] }
 0x79c   : > { %v5944_v6 = vld [vmem:[#allocation14 + $0x4f8] sm:$0xff]  ;;  %6070 = vmatpush.msra.mxu2 %v5928_v39 }
 0x79d   : > { %v5983_v44 = vld [vmem:[#allocation14 + $0x9d8] sm:$0xff]  ;;  %6099 = vmatpush.msra.mxu3 %v5944_v6 }
 0x79e   : > { %6150 = vmatpush.msrb.mxu1 %v5983_v44  ;;  %v8807_v10 = vld [vmem:[#allocation14 + $0xfd8] sm:$0xff]  ;;  %v5413_v54 = vpop.f32.mrf.mxu1 }
 0x79f   : > { %v5927_v0 = vld [vmem:[#allocation14 + $0x2d8] sm:$0xff]  ;;  %6237 = vmatpush.msra.mxu0 %v8807_v10  ;;  %v8813_v57 = vadd.f32 %v5413_v54, %v8793_v52  ;;  %v5332_v22 = vpop.f32.mrf.mxu2 }
 0x7a0   : > { %v5943_v55 = vld [vmem:[#allocation14 + $0x4d8] sm:$0xff]  ;;  %v8815_v33 = vpop.f32.mrf.mxu0  ;;  %6071 = vmatpush.msra.mxu2 %v5927_v0  ;;  %v5333_v56 = vadd.f32 %v5332_v22, %v8788_v19  ;;  %v5361_v20 = vpop.f32.mrf.mxu3 }
 0x7a1   : > { %v5982_v17 = vld [vmem:[#allocation14 + $0x9b8] sm:$0xff]  ;;  %6100 = vmatpush.msra.mxu3 %v5943_v55 }
 0x7a2   : > { %v8810_v41 = vld [vmem:[#allocation14 + $0xfb8] sm:$0xff]  ;;  %6151 = vmatpush.msrb.mxu1 %v5982_v17  ;;  %v5362_v52 = vadd.f32 %v5361_v20, %v5333_v56 }
 0x7a3   : > { %6238 = vmatpush.msra.mxu0 %v8810_v41  ;;  %v5926_v7 = vld [vmem:[#allocation14 + $0x2b8] sm:$0xff] }
 0x7a4   : > { %v5942_v39 = vld [vmem:[#allocation14 + $0x4b8] sm:$0xff]  ;;  %6072 = vmatpush.msra.mxu2 %v5926_v7  ;;  %v5391_v55 = vadd.f32 %v8790_v49, %v5362_v52 }
 0x7a5   : > { %v5981_v6 = vld [vmem:[#allocation14 + $0x998] sm:$0xff]  ;;  %6101 = vmatpush.msra.mxu3 %v5942_v39 }
 0x7a6   : > { %6152 = vmatpush.msrb.mxu1 %v5981_v6  ;;  %v8819_v44 = vld [vmem:[#allocation14 + $0xf98] sm:$0xff] }
 0x7a7   : > { %6239 = vmatpush.msra.mxu0 %v8819_v44  ;;  %v5925_v54 = vld [vmem:[#allocation14 + $0x298] sm:$0xff]  ;;  %v5416_v39 = vpop.f32.mrf.mxu1 }
 0x7a8   : > { %v5941_v0 = vld [vmem:[#allocation14 + $0x498] sm:$0xff]  ;;  %6073 = vmatpush.msra.mxu2 %v5925_v54  ;;  %v8832_v49 = vadd.f32 %v5416_v39, %v8802_v24  ;;  %v8834_v52 = vpop.f32.mrf.mxu0  ;;  %v5468_v63 = vpop.f32.mrf.mxu3 }
 0x7a9   : > { %v5980_v17 = vld [vmem:[#allocation14 + $0x978] sm:$0xff]  ;;  %6102 = vmatpush.msra.mxu3 %v5941_v0  ;;  %v5439_v0 = vpop.f32.mrf.mxu2 }
 0x7aa   : > { %6153 = vmatpush.msrb.mxu1 %v5980_v17  ;;  %v8822_v19 = vld [vmem:[#allocation14 + $0xf78] sm:$0xff]  ;;  %v5440_v5 = vadd.f32 %v5439_v0, %v8797_v32 }
 0x7ab   : > { %6240 = vmatpush.msra.mxu0 %v8822_v19  ;;  %v5924_v22 = vld [vmem:[#allocation14 + $0x278] sm:$0xff] }
 0x7ac   : > { %v5940_v7 = vld [vmem:[#allocation14 + $0x478] sm:$0xff]  ;;  %6074 = vmatpush.msra.mxu2 %v5924_v22 }
 0x7ad   : > { %v5979_v6 = vld [vmem:[#allocation14 + $0x958] sm:$0xff]  ;;  %6103 = vmatpush.msra.mxu3 %v5940_v7 }
 0x7ae   : > { %6154 = vmatpush.msrb.mxu1 %v5979_v6  ;;  %v8826_v56 = vld [vmem:[#allocation14 + $0xf58] sm:$0xff] }
 0x7af   : > { %v5923_v20 = vld [vmem:[#allocation14 + $0x258] sm:$0xff]  ;;  %6241 = vmatpush.msra.mxu0 %v8826_v56  ;;  %v5419_v51 = vpop.f32.mrf.mxu1 }
 0x7b0   : > { %v5939_v54 = vld [vmem:[#allocation14 + $0x458] sm:$0xff]  ;;  %6075 = vmatpush.msra.mxu2 %v5923_v20 }
 0x7b1   : > { %v5978_v17 = vld [vmem:[#allocation14 + $0x938] sm:$0xff]  ;;  %6104 = vmatpush.msra.mxu3 %v5939_v54  ;;  %6242 = vmatpush.msra.mxu0 %v8829_v11 }
 0x7b2   : > { %6155 = vmatpush.msrb.mxu1 %v5978_v17  ;;  %v5922_v22 = vld [vmem:[#allocation14 + $0x238] sm:$0xff]  ;;  %v5469_v17 = vadd.f32 %v5468_v63, %v5440_v5 }
 0x7b3   : > { %v5938_v6 = vld [vmem:[#allocation14 + $0x438] sm:$0xff]  ;;  %6076 = vmatpush.msra.mxu2 %v5922_v22  ;;  %6243 = vmatpush.msra.mxu0 %v8838_v28 }
 0x7b4   : > { %v5977_v7 = vld [vmem:[#allocation14 + $0x918] sm:$0xff]  ;;  %6105 = vmatpush.msra.mxu3 %v5938_v6 }
 0x7b5   : > { %6156 = vmatpush.msrb.mxu1 %v5977_v7  ;;  %v5921_v24 = vld [vmem:[#allocation14 + $0x218] sm:$0xff]  ;;  %v8845_v7 = vadd.f32 %v8799_v15, %v5469_v17  ;;  %v5442_v15 = vpop.f32.mrf.mxu2 }
 0x7b6   : > { %v5937_v20 = vld [vmem:[#allocation14 + $0x418] sm:$0xff]  ;;  %6077 = vmatpush.msra.mxu2 %v5921_v24 }
 0x7b7   : > { %v5976_v39 = vld [vmem:[#allocation14 + $0x8f8] sm:$0xff]  ;;  %6106 = vmatpush.msra.mxu3 %v5937_v20  ;;  %9457 = vst [vmem:[#allocation78_spill] sm:$0xff] %v8845_v7  ;;  %v8852_v20 = vadd.f32 %v5419_v51, %v5391_v55  ;;  %v5471_v7 = vpop.f32.mrf.mxu3  ;;  %v5658_v21 = vpop.f32.mrf.mxu1 }
 0x7b8   : > { %6157 = vmatpush.msrb.mxu1 %v5976_v39  ;;  %v8841_v54 = vld [vmem:[#allocation14 + $0xef8] sm:$0xff]  ;;  %v8854_v39 = vpop.f32.mrf.mxu0 }
 0x7b9   : > { %6244 = vmatpush.msra.mxu0 %v8841_v54  ;;  %v6000_v32 = vld [vmem:[#allocation14 + $0xbf8] sm:$0xff] }
 0x7ba   : > { %v5975_v0 = vld [vmem:[#allocation14 + $0x8d8] sm:$0xff]  ;;  %6178 = vmatpush.msrb.mxu2 %v6000_v32 }
 0x7bb   : > { %v6016_v22 = vld [vmem:[#allocation14 + $0xdf8] sm:$0xff]  ;;  %6158 = vmatpush.msrb.mxu1 %v5975_v0 }
 0x7bc   : > { %v8847_v6 = vld [vmem:[#allocation14 + $0xed8] sm:$0xff]  ;;  %6207 = vmatpush.msrb.mxu3 %v6016_v22  ;;  %6179 = vmatpush.msrb.mxu2 %v5999_v46  ;;  %v5443_v22 = vadd.f32 %v5442_v15, %v8813_v57 }
 0x7bd   : > { %6245 = vmatpush.msra.mxu0 %v8847_v6  ;;  %v5974_v63 = vld [vmem:[#allocation14 + $0x8b8] sm:$0xff] }
 0x7be   : > { %v6015_v5 = vld [vmem:[#allocation14 + $0xdd8] sm:$0xff]  ;;  %6159 = vmatpush.msrb.mxu1 %v5974_v63  ;;  %v5472_v63 = vadd.f32 %v5471_v7, %v5443_v22 }
 0x7bf   : > { %v8850_v24 = vld [vmem:[#allocation14 + $0xeb8] sm:$0xff]  ;;  %6208 = vmatpush.msrb.mxu3 %v6015_v5  ;;  %v5474_v48 = vpop.f32.mrf.mxu3 }
 0x7c0   : > { %6246 = vmatpush.msra.mxu0 %v8850_v24  ;;  %v5998_v17 = vld [vmem:[#allocation14 + $0xbb8] sm:$0xff] }
 0x7c1   : > { %v5973_v32 = vld [vmem:[#allocation14 + $0x898] sm:$0xff]  ;;  %6180 = vmatpush.msrb.mxu2 %v5998_v17 }
 0x7c2   : > { %v6014_v0 = vld [vmem:[#allocation14 + $0xdb8] sm:$0xff]  ;;  %6160 = vmatpush.msrb.mxu1 %v5973_v32  ;;  %6247 = vmatpush.msra.mxu0 %v8858_v4  ;;  %v8865_v32 = vadd.f32 %v8815_v33, %v5472_v63  ;;  %v5445_v63 = vpop.f32.mrf.mxu2 }
 0x7c3   : > { %6209 = vmatpush.msrb.mxu3 %v6014_v0  ;;  %v5997_v51 = vld [vmem:[#allocation14 + $0xb98] sm:$0xff] }
 0x7c4   : > { %v5972_v46 = vld [vmem:[#allocation14 + $0x878] sm:$0xff]  ;;  %6181 = vmatpush.msrb.mxu2 %v5997_v51  ;;  %9458 = vst [vmem:[#allocation85_spill] sm:$0xff] %v8865_v32  ;;  %v5446_v32 = vadd.f32 %v5445_v63, %v8832_v49 }
 0x7c5   : > { %v6013_v55 = vld [vmem:[#allocation14 + $0xd98] sm:$0xff]  ;;  %6161 = vmatpush.msrb.mxu1 %v5972_v46  ;;  %v5873_v46 = vmul.f32 %v5658_v21, %v8332_v34 }
 0x7c6   : > { %v8861_v5 = vld [vmem:[#allocation14 + $0xe78] sm:$0xff]  ;;  %6210 = vmatpush.msrb.mxu3 %v6013_v55  ;;  %v5745_v55 = vpop.f32.mrf.mxu0 }
 0x7c7   : > { %6248 = vmatpush.msra.mxu0 %v8861_v5  ;;  %v5996_v57 = vld [vmem:[#allocation14 + $0xb78] sm:$0xff]  ;;  %v5876_v33 = vmul.f32 %v5745_v55, %v8338_v43  ;;  %6049 = vmatmul.f32.vlgmr.msra.gmra.mxu1 %v5873_v46  ;;  %v5661_v46 = vpop.f32.mrf.mxu1 }
 0x7c8   : > { %v5971_v15 = vld [vmem:[#allocation14 + $0x858] sm:$0xff]  ;;  %6182 = vmatpush.msrb.mxu2 %v5996_v57 }
 0x7c9   : > { %v6012_v17 = vld [vmem:[#allocation14 + $0xd78] sm:$0xff]  ;;  %6162 = vmatpush.msrb.mxu1 %v5971_v15  ;;  %6136 = vmatmul.f32.vlgmr.msrb.gmra.mxu0 %v5876_v33  ;;  %v5881_v33 = vmul.f32 %v5661_v46, %v8352_v29 }
 0x7ca   : > { %v8867_v0 = vld [vmem:[#allocation14 + $0xe58] sm:$0xff]  ;;  %6211 = vmatpush.msrb.mxu3 %v6012_v17  ;;  %6183 = vmatpush.msrb.mxu2 %v5995_v53  ;;  %v5475_v53 = vadd.f32 %v5474_v48, %v5446_v32  ;;  %v5448_v32 = vpop.f32.mrf.mxu2 }
 0x7cb   : > { %6249 = vmatpush.msra.mxu0 %v8867_v0  ;;  %v5970_v7 = vld [vmem:[#allocation14 + $0x838] sm:$0xff] }
 0x7cc   : > { %v6011_v22 = vld [vmem:[#allocation14 + $0xd58] sm:$0xff]  ;;  %6163 = vmatpush.msrb.mxu1 %v5970_v7 }
 0x7cd   : > { %v8870_v51 = vld [vmem:[#allocation14 + $0xe38] sm:$0xff]  ;;  %6212 = vmatpush.msrb.mxu3 %v6011_v22  ;;  %v8880_v22 = vadd.f32 %v8834_v52, %v5475_v53 }
 0x7ce   : > { %6250 = vmatpush.msra.mxu0 %v8870_v51  ;;  %v5994_v57 = vld [vmem:[#allocation14 + $0xb38] sm:$0xff]  ;;  %v5748_v63 = vpop.f32.mrf.mxu0 }
 0x7cf   : > { %v5969_v15 = vld [vmem:[#allocation14 + $0x818] sm:$0xff]  ;;  %6184 = vmatpush.msrb.mxu2 %v5994_v57  ;;  %v5884_v48 = vmul.f32 %v5748_v63, %v8357_v23  ;;  %6052 = vmatmul.f32.gmra.mxu1 %v5881_v33 }
 0x7d0   : > { %v6010_v17 = vld [vmem:[#allocation14 + $0xd38] sm:$0xff]  ;;  %6164 = vmatpush.msrb.mxu1 %v5969_v15  ;;  %6251 = vmatpush.msra.mxu0 %v8876_v42 }
 0x7d1   : > { %v5993_v34 = vld [vmem:[#allocation14 + $0xb18] sm:$0xff]  ;;  %6213 = vmatpush.msrb.mxu3 %v6010_v17  ;;  %v5449_v17 = vadd.f32 %v5448_v32, %v8852_v20  ;;  %6139 = vmatmul.f32.gmra.mxu0 %v5884_v48 }
 0x7d2   : > { %v6009_v21 = vld [vmem:[#allocation14 + $0xd18] sm:$0xff]  ;;  %6185 = vmatpush.msrb.mxu2 %v5993_v34  ;;  %v5477_v34 = vpop.f32.mrf.mxu3  ;;  %v5687_v63 = vpop.f32.mrf.mxu2 }
 0x7d3   : > { %v5992_v43 = vld [vmem:[#allocation14 + $0xaf8] sm:$0xff]  ;;  %6214 = vmatpush.msrb.mxu3 %v6009_v21  ;;  %v5478_v53 = vadd.f32 %v5477_v34, %v5449_v17 }
 0x7d4   : > { %v6008_v7 = vld [vmem:[#allocation14 + $0xcf8] sm:$0xff]  ;;  %6186 = vmatpush.msrb.mxu2 %v5992_v43 }
 0x7d5   : > { %v5991_v49 = vld [vmem:[#allocation14 + $0xad8] sm:$0xff]  ;;  %6215 = vmatpush.msrb.mxu3 %v6008_v7  ;;  %v8886_v23 = vadd.f32 %v8854_v39, %v5478_v53 }
 0x7d6   : > { %v6007_v55 = vld [vmem:[#allocation14 + $0xcd8] sm:$0xff]  ;;  %6187 = vmatpush.msrb.mxu2 %v5991_v49  ;;  %v5664_v49 = vpop.f32.mrf.mxu1 }
 0x7d7   : > { %v5990_v57 = vld [vmem:[#allocation14 + $0xab8] sm:$0xff]  ;;  %6216 = vmatpush.msrb.mxu3 %v6007_v55  ;;  %v5889_v46 = vmul.f32 %v5664_v49, %v8372_v60  ;;  %v5751_v55 = vpop.f32.mrf.mxu0 }
 0x7d8   : > { %v6006_v15 = vld [vmem:[#allocation14 + $0xcb8] sm:$0xff]  ;;  %6188 = vmatpush.msrb.mxu2 %v5990_v57  ;;  %v5892_v33 = vmul.f32 %v5751_v55, %v8377_v9  ;;  %v5874_v57 = vmul.f32 %v5687_v63, %v8344_v37  ;;  %v6293_v63 = vld [vmem:[#allocation8 + $0x68] sm:$0xff] }
 0x7d9   : > { %v5989_v52 = vld [vmem:[#allocation14 + $0xa98] sm:$0xff]  ;;  %6217 = vmatpush.msrb.mxu3 %v6006_v15  ;;  %6055 = vmatmul.f32.gmra.mxu1 %v5889_v46 }
 0x7da   : > { %v6005_v21 = vld [vmem:[#allocation14 + $0xc98] sm:$0xff]  ;;  %6189 = vmatpush.msrb.mxu2 %v5989_v52  ;;  %v5716_v15 = vpop.f32.mrf.mxu3  ;;  %6142 = vmatmul.f32.gmra.mxu0 %v5892_v33  ;;  %v6295_v33 = vld [vmem:[#allocation8 + $0x78] sm:$0xff] }
 0x7db   : > { %v5988_v29 = vld [vmem:[#allocation14 + $0xa78] sm:$0xff]  ;;  %6218 = vmatpush.msrb.mxu3 %v6005_v21  ;;  %v5875_v39 = vmul.f32 %v5716_v15, %v8348_v14  ;;  %6078 = vmatmul.f32.vlgmr.msra.gmra.mxu2 %v5874_v57  ;;  %v5690_v14 = vpop.f32.mrf.mxu2  ;;  %v9461_v57 = vld [vmem:[#allocation72_spill] sm:$0xff] }
 0x7dc   : > { %v6004_v43 = vld [vmem:[#allocation14 + $0xc78] sm:$0xff]  ;;  %6190 = vmatpush.msrb.mxu2 %v5988_v29  ;;  %v5882_v21 = vmul.f32 %v5690_v14, %v8364_v27  ;;  %6299 = vmatpush.msra.mxu1 %v6295_v33  ;;  %v9463_v14 = vld [vmem:[#allocation61_spill] sm:$0xff] }
 0x7dd   : > { %v5987_v7 = vld [vmem:[#allocation14 + $0xa58] sm:$0xff]  ;;  %6219 = vmatpush.msrb.mxu3 %v6004_v43 }
 0x7de   : > { %v6003_v20 = vld [vmem:[#allocation14 + $0xc58] sm:$0xff]  ;;  %6191 = vmatpush.msrb.mxu2 %v5987_v7  ;;  %6107 = vmatmul.f32.vlgmr.msra.gmra.mxu3 %v5875_v39  ;;  %v5667_v60 = vpop.f32.mrf.mxu1  ;;  %v6289_v39 = vld [vmem:[#allocation8 + $0x48] sm:$0xff] }
 0x7df   : > { %v5986_v48 = vld [vmem:[#allocation14 + $0xa38] sm:$0xff]  ;;  %6220 = vmatpush.msrb.mxu3 %v6003_v20  ;;  %v5897_v9 = vmul.f32 %v5667_v60, %v8392_v58  ;;  %v5754_v37 = vpop.f32.mrf.mxu0  ;;  %v6288_v60 = vld [vmem:[#allocation8 + $0x40] sm:$0xff] }
 0x7e0   : > { %v6002_v32 = vld [vmem:[#allocation14 + $0xc38] sm:$0xff]  ;;  %6192 = vmatpush.msrb.mxu2 %v5986_v48  ;;  %v5900_v52 = vmul.f32 %v5754_v37, %v8397_v2  ;;  %v6287_v37 = vld [vmem:[#allocation8 + $0x38] sm:$0xff] }
 0x7e1   : > { %v5985_v17 = vld [vmem:[#allocation14 + $0xa18] sm:$0xff]  ;;  %6221 = vmatpush.msrb.mxu3 %v6002_v32  ;;  %6058 = vmatmul.f32.gmra.mxu1 %v5897_v9  ;;  %v6291_v32 = vld [vmem:[#allocation8 + $0x58] sm:$0xff] }
 0x7e2   : > { %v6001_v34 = vld [vmem:[#allocation14 + $0xc18] sm:$0xff]  ;;  %6193 = vmatpush.msrb.mxu2 %v5985_v17  ;;  %v5719_v53 = vpop.f32.mrf.mxu3  ;;  %6145 = vmatmul.f32.gmra.mxu0 %v5900_v52  ;;  %v9462_v17 = vld [vmem:[#allocation105_spill] sm:$0xff] }
 0x7e3   : > { %6222 = vmatpush.msrb.mxu3 %v6001_v34  ;;  %v5883_v29 = vmul.f32 %v5719_v53, %v8368_v40  ;;  %6081 = vmatmul.f32.gmra.mxu2 %v5882_v21  ;;  %v5693_v27 = vpop.f32.mrf.mxu2 }
 0x7e4   : > { %6563 = vmatpush.msra.mxu2 %v8804_v25 }
 0x7e6   : > { %6564 = vmatpush.msra.mxu2 %v8807_v10  ;;  %6110 = vmatmul.f32.gmra.mxu3 %v5883_v29  ;;  %v5774_v58 = vpop.f32.mrf.mxu1  ;;  %v6286_v29 = vld [vmem:[#allocation8 + $0x30] sm:$0xff] }
 0x7e7   : > { %v5877_v25 = vmul.f32 %v5774_v58, %v8412_v26  ;;  %v5861_v2 = vpop.f32.mrf.mxu0  ;;  %v9464_v58 = vld [vmem:[#allocation97_spill] sm:$0xff] }
 0x7e8   : > { %6565 = vmatpush.msra.mxu2 %v8810_v41  ;;  %v5880_v10 = vmul.f32 %v5861_v2, %v8417_v50  ;;  %v5890_v41 = vmul.f32 %v5693_v27, %v8384_v31  ;;  %v9465_v27 = vld [vmem:[#allocation76_spill] sm:$0xff] }
 0x7e9   : > { %6165 = vmatmul.f32.vlgmr.msrb.gmra.mxu1 %v5877_v25 }
 0x7ea   : > { %6566 = vmatpush.msra.mxu2 %v8819_v44  ;;  %v5722_v43 = vpop.f32.mrf.mxu3  ;;  %6252 = vmatmul.f32.vlgmr.msra.gmra.mxu0 %v5880_v10  ;;  %v6285_v10 = vld [vmem:[#allocation8 + $0x28] sm:$0xff] }
 0x7eb   : > { %v5891_v40 = vmul.f32 %v5722_v43, %v8388_v61  ;;  %6084 = vmatmul.f32.gmra.mxu2 %v5890_v41  ;;  %v5696_v44 = vpop.f32.mrf.mxu2  ;;  %v6284_v43 = vld [vmem:[#allocation8 + $0x20] sm:$0xff] }
 0x7ec   : > { %6567 = vmatpush.msra.mxu2 %v8822_v19  ;;  %v5898_v31 = vmul.f32 %v5696_v44, %v8404_v47 }
 0x7ee   : > { %6568 = vmatpush.msra.mxu2 %v8826_v56  ;;  %6113 = vmatmul.f32.gmra.mxu3 %v5891_v40  ;;  %v5777_v26 = vpop.f32.mrf.mxu1 }
 0x7ef   : > { %v5885_v50 = vmul.f32 %v5777_v26, %v8432_v38  ;;  %v5864_v49 = vpop.f32.mrf.mxu0  ;;  %v6283_v26 = vld [vmem:[#allocation8 + $0x18] sm:$0xff] }
 0x7f0   : > { %6569 = vmatpush.msra.mxu2 %v8829_v11 }
 0x7f1   : > { %6168 = vmatmul.f32.gmra.mxu1 %v5885_v50  ;;  %v9466_v50 = vld [vmem:[#allocation65_spill] sm:$0xff] }
 0x7f2   : > { %6570 = vmatpush.msra.mxu2 %v8838_v28  ;;  %v5725_v19 = vpop.f32.mrf.mxu3 }
 0x7f3   : > { %v5899_v61 = vmul.f32 %v5725_v19, %v8408_v18  ;;  %6087 = vmatmul.f32.gmra.mxu2 %v5898_v31  ;;  %v5803_v11 = vpop.f32.mrf.mxu2 }
 0x7f4   : > { %6571 = vmatpush.msra.mxu2 %v8841_v54  ;;  %v5878_v47 = vmul.f32 %v5803_v11, %v8424_v36  ;;  %v9467_v11 = vld [vmem:[#allocation51_spill] sm:$0xff] }
 0x7f6   : > { %6572 = vmatpush.msra.mxu2 %v8847_v6  ;;  %6116 = vmatmul.f32.gmra.mxu3 %v5899_v61  ;;  %v5780_v28 = vpop.f32.mrf.mxu1  ;;  %v6282_v61 = vld [vmem:[#allocation8 + $0x10] sm:$0xff] }
 0x7f7   : > { %v5893_v38 = vmul.f32 %v5780_v28, %v8452_v3  ;;  %v5867_v20 = vpop.f32.mrf.mxu0 }
 0x7f8   : > { %6573 = vmatpush.msra.mxu2 %v8850_v24 }
 0x7f9   : > { %6171 = vmatmul.f32.gmra.mxu1 %v5893_v38  ;;  %v6281_v38 = vld [vmem:[#allocation8 + $0x8] sm:$0xff] }
 0x7fa   : > { %6574 = vmatpush.msra.mxu2 %v8858_v4  ;;  %v5832_v56 = vpop.f32.mrf.mxu3 }
 0x7fb   : > { %v5879_v18 = vmul.f32 %v5832_v56, %v8428_v12  ;;  %6194 = vmatmul.f32.vlgmr.msrb.gmra.mxu2 %v5878_v47  ;;  %v5806_v6 = vpop.f32.mrf.mxu2  ;;  %v6280_v56 = vld [vmem:[#allocation8] sm:$0xff] }
 0x7fc   : > { %6575 = vmatpush.msra.mxu2 %v8861_v5  ;;  %v5886_v3 = vmul.f32 %v5806_v6, %v8444_v59 }
 0x7fe   : > { %6576 = vmatpush.msra.mxu2 %v8867_v0  ;;  %6223 = vmatmul.f32.vlgmr.msrb.gmra.mxu3 %v5879_v18  ;;  %v5783_v4 = vpop.f32.mrf.mxu1  ;;  %v9468_v18 = vld [vmem:[#allocation83_spill] sm:$0xff] }
 0x7ff   : > { %v5901_v54 = vmul.f32 %v5783_v4, %v8472_v45  ;;  %v5870_v46 = vpop.f32.mrf.mxu0 }
 0x800   : > { %6577 = vmatpush.msra.mxu2 %v8870_v51 }
 0x801   : > { %6174 = vmatmul.f32.gmra.mxu1 %v5901_v54  ;;  %v9469_v54 = vld [vmem:[#allocation37_spill] sm:$0xff] }
 0x802   : > { %6578 = vmatpush.msra.mxu2 %v8876_v42  ;;  %v5835_v24 = vpop.f32.mrf.mxu3 }
 0x803   : > { %v5887_v36 = vmul.f32 %v5835_v24, %v8448_v62  ;;  %6197 = vmatmul.f32.gmra.mxu2 %v5886_v3  ;;  %v5809_v5 = vpop.f32.mrf.mxu2  ;;  %v5888_v62 = vmul.f32 %v5864_v49, %v8437_v8  ;;  %v9460_v8 = vld [vmem:[#allocation47_spill] sm:$0xff]  ;;  %v9473_v49 = vld [vmem:[#allocation104_spill] sm:$0xff] }
 0x804   : > { %v5894_v12 = vmul.f32 %v5809_v5, %v8464_v13  ;;  %v5896_v13 = vmul.f32 %v5867_v20, %v8457_v30  ;;  %v4340_v15 = vadd.f32 %v9461_v57, %v9460_v8  ;;  %v6290_v30 = vld [vmem:[#allocation8 + $0x50] sm:$0xff] }
 0x805   : > { %v9478_v8 = vld [vmem:[#allocation71_spill] sm:$0xff] }
 0x806   : > { %6226 = vmatmul.f32.gmra.mxu3 %v5887_v36  ;;  %v4369_v34 = vadd.f32 %v9462_v17, %v4340_v15  ;;  %v9479_v15 = vld [vmem:[#allocation39_spill] sm:$0xff] }
 0x808   : > { %v4398_v21 = vadd.f32 %v9463_v14, %v4369_v34  ;;  %v9482_v14 = vld [vmem:[#allocation77_spill] sm:$0xff] }
 0x80a   : > { %v5838_v0 = vpop.f32.mrf.mxu3  ;;  %v4427_v25 = vadd.f32 %v9464_v58, %v4398_v21 }
 0x80b   : > { %v5895_v51 = vmul.f32 %v5838_v0, %v8468_v35  ;;  %6200 = vmatmul.f32.gmra.mxu2 %v5894_v12  ;;  %v5812_v42 = vpop.f32.mrf.mxu2  ;;  %v9459_v35 = vld [vmem:[#allocation40_spill] sm:$0xff]  ;;  %v9470_v12 = vld [vmem:[#allocation62_spill] sm:$0xff]  ;;  %v9471_v0 = vld [vmem:[#allocation99_spill] sm:$0xff] }
 0x80c   : > { %v5902_v45 = vmul.f32 %v5812_v42, %v8484_v16  ;;  %v5904_v55 = vmul.f32 %v5870_v46, %v9459_v35  ;;  %v6294_v16 = vld [vmem:[#allocation8 + $0x70] sm:$0xff]  ;;  %v4456_v41 = vadd.f32 %v9465_v27, %v4427_v25  ;;  %v9475_v46 = vld [vmem:[#allocation89_spill] sm:$0xff] }
 0x80d   : > { %6300 = vmatpush.msra.mxu1 %v6294_v16  ;;  %v9472_v42 = vld [vmem:[#allocation91_spill] sm:$0xff]  ;;  %v9476_v16 = vld [vmem:[#allocation106_spill] sm:$0xff] }
 0x80e   : > { %6229 = vmatmul.f32.gmra.mxu3 %v5895_v51  ;;  %v4485_v44 = vadd.f32 %v9466_v50, %v4456_v41  ;;  %v4343_v51 = vadd.f32 %v9471_v0, %v9470_v12  ;;  %v9485_v27 = vld [vmem:[#allocation63_spill] sm:$0xff]  ;;  %v9491_v0 = vld [vmem:[#allocation24_spill] sm:$0xff] }
 0x80f   : > { %6301 = vmatpush.msra.mxu1 %v6293_v63  ;;  %v9477_v63 = vld [vmem:[#allocation60_spill] sm:$0xff]  ;;  %v8987_v12 = vld [vmem:[#allocation16 + $0x2] ss:$0 sm:$0xff] }
 0x810   : > { %v4514_v47 = vadd.f32 %v9467_v11, %v4485_v44  ;;  %v9487_v44 = vld [vmem:[#allocation25_spill] sm:$0xff] }
 0x812   : > { %v5841_v7 = vpop.f32.mrf.mxu3  ;;  %v4543_v4 = vadd.f32 %v9468_v18, %v4514_v47  ;;  %v9489_v47 = vld [vmem:[#allocation66_spill] sm:$0xff] }
 0x813   : > { %v5903_v59 = vmul.f32 %v5841_v7, %v8488_v1  ;;  %6203 = vmatmul.f32.gmra.mxu2 %v5902_v45  ;;  %v6292_v1 = vld [vmem:[#allocation8 + $0x60] sm:$0xff] }
 0x814   : > { %6302 = vmatpush.msra.mxu1 %v6292_v1  ;;  %v4572_v6 = vadd.f32 %v9469_v54, %v4543_v4  ;;  %v4346_v1 = vadd.f32 %v9477_v63, %v9476_v16  ;;  %v9490_v4 = vld [vmem:[#allocation78_spill] sm:$0xff] }
 0x815   : > { %v9496_v63 = vld [vmem:[#allocation90_spill] sm:$0xff] }
 0x816   : > { %6232 = vmatmul.f32.gmra.mxu3 %v5903_v59  ;;  %6303 = vmatpush.msra.mxu1 %v6291_v32  ;;  %v4601_v45 = vadd.f32 %v9472_v42, %v4572_v6  ;;  %v4372_v59 = vadd.f32 %v9473_v49, %v4343_v51  ;;  %v9492_v42 = vld [vmem:[#allocation80_spill] sm:$0xff] }
 0x818   : > { %6304 = vmatpush.msra.mxu1 %v6290_v30  ;;  %v4401_v57 = vadd.f32 %v9478_v8, %v4372_v59  ;;  %v9497_v8 = vld [vmem:[#allocation54_spill] sm:$0xff] }
 0x81a   : > { %6305 = vmatpush.msra.mxu1 %v6289_v39  ;;  %v9480_v39 = vld [vmem:[#allocation30_spill] sm:$0xff] }
 0x81b   : > { %6255 = vmatmul.f32.vlgmr.msra.gmra.mxu2 %v5888_v62  ;;  %v9474_v62 = vld [vmem:[#allocation35_spill] sm:$0xff]  ;;  %v4430_v17 = vadd.f32 %v9480_v39, %v4401_v57 }
 0x81c   : > { %6306 = vmatpush.msra.mxu1 %v6288_v60  ;;  %v4630_v20 = vadd.f32 %v9474_v62, %v4601_v45  ;;  %v9481_v60 = vld [vmem:[#allocation73_spill] sm:$0xff] }
 0x81d   : > { %v4459_v21 = vadd.f32 %v9482_v14, %v4430_v17  ;;  %v9500_v17 = vld [vmem:[#allocation42_spill] sm:$0xff] }
 0x81e   : > { %6307 = vmatpush.msra.mxu1 %v6287_v37  ;;  %v4659_v35 = vadd.f32 %v9475_v46, %v4630_v20  ;;  %v4375_v37 = vadd.f32 %v9481_v60, %v4346_v1  ;;  %v9494_v20 = vld [vmem:[#allocation43_spill] sm:$0xff]  ;;  %v9501_v60 = vld [vmem:[#allocation64_spill] sm:$0xff]  ;;  %v9502_v14 = vld [vmem:[#allocation82_spill] sm:$0xff] }
 0x820   : > { %6308 = vmatpush.msra.mxu1 %v6286_v29 }
 0x822   : > { %6309 = vmatpush.msra.mxu1 %v6285_v10  ;;  %v9484_v10 = vld [vmem:[#allocation49_spill] sm:$0xff] }
 0x823   : > { %6258 = vmatmul.f32.gmra.mxu2 %v5896_v13  ;;  %v4349_v41 = vadd.f32 %v9485_v27, %v9484_v10  ;;  %v9505_v27 = vld [vmem:[#allocation38_spill] sm:$0xff] }
 0x824   : > { %6310 = vmatpush.msra.mxu1 %v6284_v43  ;;  %v9486_v43 = vld [vmem:[#allocation98_spill] sm:$0xff] }
 0x825   : > { %v4378_v51 = vadd.f32 %v9491_v0, %v4349_v41 }
 0x826   : > { %6311 = vmatpush.msra.mxu1 %v6283_v26  ;;  %v4404_v26 = vadd.f32 %v9486_v43, %v4375_v37 }
 0x828   : > { %6312 = vmatpush.msra.mxu1 %v6282_v61  ;;  %v4488_v61 = vadd.f32 %v9487_v44, %v4459_v21 }
 0x82a   : > { %6313 = vmatpush.msra.mxu1 %v6281_v38  ;;  %v9488_v38 = vld [vmem:[#allocation53_spill] sm:$0xff] }
 0x82b   : > { %6261 = vmatmul.f32.gmra.mxu2 %v5904_v55 }
 0x82c   : > { %6314 = vmatpush.msra.mxu1 %v6280_v56  ;;  %v4433_v56 = vadd.f32 %v9489_v47, %v4404_v26  ;;  %v9506_v26 = vld [vmem:[#allocation44_spill] sm:$0xff] }
 0x82d   : > { %v9509_v47 = vld [vmem:[#allocation100_spill] sm:$0xff] }
 0x82e   : > { %v4462_v45 = vadd.f32 %v9492_v42, %v4433_v56  ;;  %v9512_v42 = vld [vmem:[#allocation67_spill] sm:$0xff] }
 0x830   : > { %v4491_v1 = vadd.f32 %v9496_v63, %v4462_v45 }
 0x832   : > { %v4520_v37 = vadd.f32 %v9501_v60, %v4491_v1  ;;  %v9519_v60 = vld [vmem:[#allocation85_spill] sm:$0xff] }
 0x844   : > { %v6050_v48 = vpop.f32.mrf.mxu1 }
 0x846   : > { %v6137_v9 = vpop.f32.mrf.mxu0 }
 0x84c   : > { %v8935_v52 = vpop.f32.mrf.mxu1 }
 0x84e   : > { %v8940_v40 = vpop.f32.mrf.mxu0 }
 0x856   : > { %v8943_v31 = vpop.f32.mrf.mxu1 }
 0x857   : > { %v8952_v3 = vpop.f32.mrf.mxu0 }
 0x85e   : > { %v6079_v53 = vpop.f32.mrf.mxu2  ;;  %v8958_v5 = vpop.f32.mrf.mxu1 }
 0x85f   : > { %v6080_v7 = vadd.f32 %v6079_v53, %v6050_v48  ;;  %v8972_v32 = vpop.f32.mrf.mxu0  ;;  %v4688_v48 = vadd.f32 %v9479_v15, %v4659_v35  ;;  %v9483_v53 = vld [vmem:[#allocation41_spill] sm:$0xff]  ;;  %v9498_v15 = vld [vmem:[#allocation28_spill] sm:$0xff] }
 0x861   : > { %v6108_v2 = vpop.f32.mrf.mxu3  ;;  %v4717_v29 = vadd.f32 %v9483_v53, %v4688_v48 }
 0x862   : > { %v6109_v55 = vadd.f32 %v6108_v2, %v6080_v7  ;;  %v9493_v7 = vld [vmem:[#allocation75_spill] sm:$0xff] }
 0x863   : > { %v4746_v11 = vadd.f32 %v9488_v38, %v4717_v29  ;;  %v4517_v49 = vadd.f32 %v9493_v7, %v4488_v61  ;;  %v9503_v29 = vld [vmem:[#allocation84_spill] sm:$0xff]  ;;  %v9507_v61 = vld [vmem:[#allocation46_spill] sm:$0xff] }
 0x864   : > { %v6138_v34 = vadd.f32 %v6137_v9, %v6109_v55  ;;  %v9495_v55 = vld [vmem:[#allocation50_spill] sm:$0xff] }
 0x865   : > { %v5509_v54 = vadd.f32 %v9490_v4, %v4746_v11  ;;  %v4546_v46 = vadd.f32 %v9494_v20, %v4517_v49  ;;  %v4407_v16 = vadd.f32 %v9495_v55, %v4378_v51  ;;  %v9508_v11 = vld [vmem:[#allocation79_spill] sm:$0xff]  ;;  %v9515_v55 = vld [vmem:[#allocation26_spill] sm:$0xff] }
 0x866   : > { %v8945_v19 = vpop.f32.mrf.mxu2  ;;  %v6166_v30 = vpop.f32.mrf.mxu1 }
 0x867   : > { %v6167_v58 = vadd.f32 %v6166_v30, %v6138_v34  ;;  %v6253_v18 = vpop.f32.mrf.mxu0  ;;  %v4575_v57 = vadd.f32 %v9497_v8, %v4546_v46  ;;  %v9499_v30 = vld [vmem:[#allocation32_spill] sm:$0xff]  ;;  %v6083_v53 = vadd.f32 %v8945_v19, %v8935_v52  ;;  %v9518_v8 = vld [vmem:[#allocation74_spill] sm:$0xff] }
 0x868   : > { %v4436_v39 = vadd.f32 %v9499_v30, %v4407_v16 }
 0x869   : > { %v8947_v28 = vpop.f32.mrf.mxu3  ;;  %v4604_v21 = vadd.f32 %v9502_v14, %v4575_v57 }
 0x86a   : > { %v4465_v34 = vadd.f32 %v9500_v17, %v4436_v39  ;;  %v6112_v44 = vadd.f32 %v8947_v28, %v6083_v53  ;;  %v9513_v28 = vld [vmem:[#allocation52_spill] sm:$0xff] }
 0x86c   : > { %v6141_v4 = vadd.f32 %v8940_v40, %v6112_v44  ;;  %v9517_v40 = vld [vmem:[#allocation57_spill] sm:$0xff] }
 0x86e   : > { %v8954_v24 = vpop.f32.mrf.mxu2  ;;  %v6169_v43 = vpop.f32.mrf.mxu1 }
 0x86f   : > { %v6086_v19 = vadd.f32 %v8954_v24, %v8943_v31  ;;  %v6170_v51 = vadd.f32 %v6169_v43, %v6141_v4  ;;  %v9516_v31 = vld [vmem:[#allocation92_spill] sm:$0xff] }
 0x871   : > { %v8956_v36 = vpop.f32.mrf.mxu3 }
 0x872   : > { %v6115_v46 = vadd.f32 %v8956_v36, %v6086_v19 }
 0x874   : > { %v6144_v30 = vadd.f32 %v8952_v3, %v6115_v46  ;;  %v9523_v3 = vld [vmem:[#allocation56_spill] sm:$0xff]  ;;  %v6718_v46 = vld [vmem:[#allocation16 + $0x3] ss:$0 sm:$0xff] }
 0x876   : > { %v8965_v13 = vpop.f32.mrf.mxu2  ;;  %v6172_v63 = vpop.f32.mrf.mxu1 }
 0x879   : > { %v8968_v33 = vpop.f32.mrf.mxu3 }
 0x87e   : > { %v6195_v25 = vpop.f32.mrf.mxu2  ;;  %v6175_v43 = vpop.f32.mrf.mxu1 }
 0x87f   : > { %v6196_v2 = vadd.f32 %v6195_v25, %v6167_v58  ;;  %v4549_v58 = vadd.f32 %v9503_v29, %v4520_v37  ;;  %v9520_v37 = vld [vmem:[#allocation70_spill] sm:$0xff] }
 0x881   : > { %v6224_v50 = vpop.f32.mrf.mxu3  ;;  %v4578_v41 = vadd.f32 %v9505_v27, %v4549_v58  ;;  %v9522_v27 = vld [vmem:[#allocation95_spill] sm:$0xff] }
 0x882   : > { %v6225_v9 = vadd.f32 %v6224_v50, %v6196_v2  ;;  %v9504_v2 = vld [vmem:[#allocation81_spill] sm:$0xff]  ;;  %v4633_v50 = vadd.f32 %v9506_v26, %v4604_v21  ;;  %v9521_v21 = vld [vmem:[#allocation55_spill] sm:$0xff] }
 0x883   : > { %v4494_v10 = vadd.f32 %v9504_v2, %v4465_v34  ;;  %v4607_v56 = vadd.f32 %v9509_v47, %v4578_v41  ;;  %v6173_v34 = vadd.f32 %v6172_v63, %v6144_v30  ;;  %v9524_v26 = vld [vmem:[#allocation87_spill] sm:$0xff] }
 0x884   : > { %v6254_v6 = vadd.f32 %v6253_v18, %v6225_v9  ;;  %v4662_v38 = vadd.f32 %v9507_v61, %v4633_v50  ;;  %v9510_v18 = vld [vmem:[#allocation58_spill] sm:$0xff] }
 0x885   : > { %v4523_v9 = vadd.f32 %v9508_v11, %v4494_v10  ;;  %v4636_v7 = vadd.f32 %v9513_v28, %v4607_v56  ;;  %v9526_v56 = vld [vmem:[#allocation88_spill] sm:$0xff] }
 0x886   : > { %v6265_v59 = vadd.f32 %v6254_v6, %v5509_v54  ;;  %v6198_v62 = vpop.f32.mrf.mxu2  ;;  %v4691_v52 = vadd.f32 %v9510_v18, %v4662_v38  ;;  %v9511_v54 = vld [vmem:[#allocation45_spill] sm:$0xff] }
 0x887   : > { %v4552_v6 = vadd.f32 %v9511_v54, %v4523_v9  ;;  %v4665_v16 = vadd.f32 %v9515_v55, %v4636_v7  ;;  %v9525_v38 = vld [vmem:[#allocation29_spill] sm:$0xff] }
 0x888   : > { %v6272_v35 = vadd.f32 %v8987_v12, %v6265_v59  ;;  %v9514_v59 = vld [vmem:[#allocation94_spill] sm:$0xff] }
 0x889   : > { %v4581_v45 = vadd.f32 %v9512_v42, %v4552_v6  ;;  %v6227_v49 = vpop.f32.mrf.mxu3  ;;  %v4720_v20 = vadd.f32 %v9514_v59, %v4691_v52  ;;  %v4694_v1 = vadd.f32 %v9517_v40, %v4665_v16  ;;  %v9527_v6 = vld [vmem:[#allocation101_spill] sm:$0xff]  ;;  %v9528_v42 = vld [vmem:[#allocation31_spill] sm:$0xff] }
 0x88a   : > { %v6276_v48 = vmul.f32 %v6272_v35, %v9498_v15  ;;  %v6199_v35 = vadd.f32 %v6198_v62, %v6170_v51 }
 0x88b   : > { %v4610_v24 = vadd.f32 %v9516_v31, %v4581_v45  ;;  %v4749_v57 = vadd.f32 %v9518_v8, %v4720_v20  ;;  %v4723_v14 = vadd.f32 %v9520_v37, %v4694_v1 }
 0x88c   : > { %6315 = vmatmul.f32.vlgmr.msra.gmra.mxu1 %v6276_v48  ;;  %v6089_v48 = vadd.f32 %v8965_v13, %v8958_v5  ;;  %v6228_v39 = vadd.f32 %v6227_v49, %v6199_v35 }
 0x88d   : > { %v5510_v36 = vadd.f32 %v9519_v60, %v4749_v57  ;;  %v4639_v53 = vadd.f32 %v9521_v21, %v4610_v24  ;;  %v4752_v13 = vadd.f32 %v9523_v3, %v4723_v14 }
 0x88e   : > { %v6201_v25 = vpop.f32.mrf.mxu2  ;;  %v6118_v29 = vadd.f32 %v8968_v33, %v6089_v48 }
 0x88f   : > { %v6202_v58 = vadd.f32 %v6201_v25, %v6173_v34  ;;  %v4668_v41 = vadd.f32 %v9522_v27, %v4639_v53  ;;  %v5511_v33 = vadd.f32 %v8880_v22, %v4752_v13 }
 0x890   : > { %v6147_v44 = vadd.f32 %v8972_v32, %v6118_v29 }
 0x891   : > { %v6230_v10 = vpop.f32.mrf.mxu3  ;;  %v4697_v50 = vadd.f32 %v9524_v26, %v4668_v41 }
 0x892   : > { %v6231_v61 = vadd.f32 %v6230_v10, %v6202_v58  ;;  %v6176_v47 = vadd.f32 %v6175_v43, %v6147_v44 }
 0x893   : > { %v4726_v18 = vadd.f32 %v9526_v56, %v4697_v50 }
 0x895   : > { %v4755_v51 = vadd.f32 %v9527_v6, %v4726_v18 }
 0x896   : > { %v6204_v0 = vpop.f32.mrf.mxu2 }
 0x897   : > { %v6205_v52 = vadd.f32 %v6204_v0, %v6176_v47  ;;  %v5512_v7 = vadd.f32 %v8886_v23, %v4755_v51  ;;  %v9529_v0 = vld [vmem:[#allocation33_spill] sm:$0xff] }
 0x899   : > { %v6233_v54 = vpop.f32.mrf.mxu3 }
 0x89a   : > { %v6234_v32 = vadd.f32 %v6233_v54, %v6205_v52 }
 0x89e   : > { %v6256_v17 = vpop.f32.mrf.mxu2 }
 0x89f   : > { %v6257_v62 = vadd.f32 %v6256_v17, %v6228_v39 }
 0x8a1   : > { %v6266_v2 = vadd.f32 %v6257_v62, %v5510_v36 }
 0x8a3   : > { %v6273_v5 = vadd.f32 %v8987_v12, %v6266_v2 }
 0x8a5   : > { %v6277_v11 = vmul.f32 %v6273_v5, %v9525_v38 }
 0x8a6   : > { %v6259_v9 = vpop.f32.mrf.mxu2 }
 0x8a7   : > { %v6260_v25 = vadd.f32 %v6259_v9, %v6231_v61  ;;  %6318 = vmatmul.f32.gmra.mxu1 %v6277_v11 }
 0x8a9   : > { %v6267_v19 = vadd.f32 %v6260_v25, %v5511_v33 }
 0x8ab   : > { %v6274_v4 = vadd.f32 %v8987_v12, %v6267_v19 }
 0x8ad   : > { %v6278_v45 = vmul.f32 %v6274_v4, %v9528_v42 }
 0x8ae   : > { %v6262_v28 = vpop.f32.mrf.mxu2 }
 0x8af   : > { %v6263_v49 = vadd.f32 %v6262_v28, %v6234_v32  ;;  %6321 = vmatmul.f32.gmra.mxu1 %v6278_v45 }
 0x8b1   : > { %v6268_v22 = vadd.f32 %v6263_v49, %v5512_v7 }
 0x8b3   : > { %v6275_v59 = vadd.f32 %v8987_v12, %v6268_v22 }
 0x8b5   : > { %v6279_v20 = vmul.f32 %v6275_v59, %v9529_v0 }
 0x8b7   : > { %6324 = vmatmul.f32.gmra.mxu1 %v6279_v20 }
 0x909   : > { %v6316_v35 = vpop.f32.mrf.mxu1 }
 0x90a   : > { %v6317_v55 = vadd.f32 %v6718_v46, %v6316_v35 }
 0x90c   : > { %v6328_v16 = vmul.f32 %v6317_v55, %v9498_v15 }
 0x90e   : > { %6332 = vst [vmem:[%s523_s28] sm:$0xff] %v6328_v16 }
 0x924   : > { %v6319_v63 = vpop.f32.mrf.mxu1 }
 0x925   : > { %v6320_v31 = vadd.f32 %v6718_v46, %v6319_v63 }
 0x927   : > { %v6329_v23 = vmul.f32 %v6320_v31, %v9525_v38 }
 0x929   : > { %6333 = vst [vmem:[%s523_s28 + $0x8] sm:$0xff] %v6329_v23 }
 0x92c   : > { %v6322_v24 = vpop.f32.mrf.mxu1 }
 0x92d   : > { %v6323_v40 = vadd.f32 %v6718_v46, %v6322_v24 }
 0x92f   : > { %v6330_v12 = vmul.f32 %v6323_v40, %v9528_v42 }
 0x931   : > { %6334 = vst [vmem:[%s523_s28 + $0x10] sm:$0xff] %v6330_v12 }
 0x934   : > { %v6325_v15 = vpop.f32.mrf.mxu1 }
 0x935   : > { %v6326_v1 = vadd.f32 %v6718_v46, %v6325_v15 }
 0x937   : > { %v6331_v8 = vmul.f32 %v6326_v1, %v9529_v0 }
 0x939   : > { %6335 = vst [vmem:[%s523_s28 + $0x18] sm:$0xff] %v6331_v8 }
 0x93a   : > { %7032 = shalt.err (!%p7029_p9)
}
 0x93b   : > { %s7106_s11 = smov 128   ;;  %s7107_s28 = smov 8  }
 0x93c   : > { %6613 = dma.vmem_to_hbm [thread:$0]  (%p7269_p12), %s6350_s30, 512, %s6352_s5, %s6337_s12, %s7106_s11, %s7106_s11, %s7107_s28  }
 0x93d PF: > { %p6665_p10 = scmp.ge.s32.totalorder %s7087_s16, 2  ;;  %s6366_s23 = sand.u32 1, %s7075_s13  }
 0x93e   : > { %s6367_s22 = scalar_lea.sflag [#allocation4], %s6366_s23 }
 0x93f   : > { %p6645_p13 = pnand %p6665_p10, %p7274_p2 }
 0x941   : > { %p6646_p0 = pneg %p6645_p13 }
 0x943   : > { %7070 = dma.done.wait (%p6646_p0), %s6367_s22, 512  }
 0x944   : > { %7072 = vsyncadd (%p6646_p0), %s6367_s22, 4294966784  ;;  %p27_p4 = scmp.ge.s32.totalorder %s7249_s24, 6   ;;  %s9530_s13 = smov %s7079_s14 }
 0x945   : > { %s9531_s14 = smov %s7083_s15  ;;  %s9532_s15 = smov %s7261_s26 }
 0x946   : > { %s9533_s16 = smov %s7249_s24  ;;  %29 = sbr.rel (!%p27_p4) target bundleno = 14 (0xe), region = 140 }
 0x94b   :  { %6373 = vsyncpa [#allocation3], 1 }
 0x94c   :  { %6375 = vsyncpa [#allocation3 + $0x1], 1 }
 0x94d   :  { %6376 = vsyncpa [#allocation6], 1 }
 0x94e   :  { %6377 = vsyncpa [#allocation9], 1 }
 0x94f   :  { %6378 = vsyncpa [#allocation12], 1 }
 0x950   :  { %6379 = vsyncpa [#allocation15], 1 }
 0x951   :  { %6380 = vsyncpa [#allocation4], 1 }
 0x952   :  { %6382 = vsyncpa [#allocation4 + $0x1], 1 }

</bundles_post_ra>
